<compile_context>
chip_gen: v7x
topology: tpu7x:2x2x1
jax: 0.10.0
libtpu: 0.0.40
codegen_flags: <defaults>
</compile_context>

<pallas_src>
import functools

import jax
import jax.numpy as jnp
from jax.experimental import pallas as pl
from jax.experimental.pallas import tpu as pltpu

_MAX_TILE_ROWS = 1024                 # row-tile cap (P axis)
_MIN_TILE_ROWS = 8                    # sublane granularity
_VMEM_LIMIT = 32 * 1024 * 1024        # safe on v5e/v6e (128 MiB) and v7x (64 MiB) physical


def _round_up(n, m):
    return (n + m - 1) // m * m


def _row_tiling(P):
    """Pick (row_tile, padded_rows) for a (P, K) GEMM.

    Tile is a multiple of 8, capped at _MAX_TILE_ROWS; whenever the problem is big enough
    we use >=2 tiles so the 'parallel' grid axis feeds both v7x TensorCores.
    """
    P8 = _round_up(max(P, _MIN_TILE_ROWS), _MIN_TILE_ROWS)
    if P8 <= 2 * _MIN_TILE_ROWS:
        tp = P8
    else:
        n = max(2, -(-P8 // _MAX_TILE_ROWS))
        tp = _round_up(-(-P8 // n), _MIN_TILE_ROWS)
    return tp, _round_up(P8, tp)


# ----------------------------- Pallas kernel -------------------------------------------

def _gemm_kernel(*refs, n_in, relu_start, has_res):
    """Fused multi-input GEMM + bias + (partial) ReLU + optional residual epilogue.

    refs = [x_0..x_{n-1}, w_0..w_{n-1}, bias, (residual), out]
      x_i: (TP, K_i) bf16   w_i: (K_i, Cout) bf16   bias: (1, Cout) f32
      residual: (TP, Cout) bf16 (added AFTER relu)   out: (TP, Cout) bf16/f32
    relu_start: None = no relu; 0 = relu all channels; >0 = relu channels [relu_start, Cout).
    """
    xs = refs[:n_in]
    ws = refs[n_in:2 * n_in]
    b_ref = refs[2 * n_in]
    r_ref = refs[2 * n_in + 1] if has_res else None
    o_ref = refs[-1]

    acc = jnp.dot(xs[0][...], ws[0][...], preferred_element_type=jnp.float32)
    for xr, wr in zip(xs[1:], ws[1:]):
        acc = acc + jnp.dot(xr[...], wr[...], preferred_element_type=jnp.float32)
    acc = acc + b_ref[...]

    if relu_start is not None:
        if relu_start <= 0:
            acc = jnp.maximum(acc, 0.0)
        else:
            col = jax.lax.broadcasted_iota(jnp.int32, acc.shape, 1)
            acc = jnp.where(col >= relu_start, jnp.maximum(acc, 0.0), acc)

    if has_res:
        acc = acc + r_ref[...].astype(jnp.float32)

    o_ref[...] = acc.astype(o_ref.dtype)


def _gemm(taps_list, w_list, b, *, tp, relu_start=None, residual=None,
          out_dtype=jnp.bfloat16):
    """taps_list[i]: (P_pad, K_i) bf16; w_list[i]: (K_i, Cout) bf16; b: (1, Cout) f32."""
    P_pad = taps_list[0].shape[0]
    Cout = w_list[0].shape[1]
    n_in = len(taps_list)
    grid = (P_pad // tp,)

    in_specs, args = [], []
    for t in taps_list:
        in_specs.append(pl.BlockSpec((tp, t.shape[1]), lambda i: (i, 0)))
        args.append(t)
    for w in w_list:
        in_specs.append(pl.BlockSpec((w.shape[0], Cout), lambda i: (0, 0)))  # resident
        args.append(w)
    in_specs.append(pl.BlockSpec((1, Cout), lambda i: (0, 0)))               # resident
    args.append(b)
    has_res = residual is not None
    if has_res:
        in_specs.append(pl.BlockSpec((tp, Cout), lambda i: (i, 0)))
        args.append(residual)

    kernel = functools.partial(_gemm_kernel, n_in=n_in, relu_start=relu_start,
                               has_res=has_res)
    return pl.pallas_call(
        kernel,
        out_shape=jax.ShapeDtypeStruct((P_pad, Cout), out_dtype),
        grid=grid,
        in_specs=in_specs,
        out_specs=pl.BlockSpec((tp, Cout), lambda i: (i, 0)),
        compiler_params=pltpu.CompilerParams(
            dimension_semantics=("parallel",),
            vmem_limit_bytes=_VMEM_LIMIT,
        ),
    )(*args)


# ----------------------------- im2col glue (bf16, single materialization) --------------

def _pad_hw(x, pad, value=None):
    """Spatial pad of an NHWC tensor.  pad = ((top, bottom), (left, right))."""
    (pt, pb), (pleft, pright) = pad
    if pt == pb == pleft == pright == 0:
        return x
    if value is None:
        return jnp.pad(x, ((0, 0), (pt, pb), (pleft, pright), (0, 0)))
    N, H, W, C = x.shape
    v = jnp.asarray(value, x.dtype).reshape(1, 1, 1, C)
    rows = [x]
    if pt:
        rows.insert(0, jnp.broadcast_to(v, (N, pt, W, C)))
    if pb:
        rows.append(jnp.broadcast_to(v, (N, pb, W, C)))
    x = jnp.concatenate(rows, axis=1) if len(rows) > 1 else x
    H2 = H + pt + pb
    cols = [x]
    if pleft:
        cols.insert(0, jnp.broadcast_to(v, (N, H2, pleft, C)))
    if pright:
        cols.append(jnp.broadcast_to(v, (N, H2, pright, C)))
    return jnp.concatenate(cols, axis=2) if len(cols) > 1 else x


def _im2col(xp, KH, KW, stride, OH, OW, P_pad):
    """Merged-K im2col on the (already padded, bf16) NHWC tensor.

    Rows are padded to P_pad on the per-tap slices so the (P_pad, KH*KW*Cin) matrix is
    materialized exactly once by the concat.  Column order = ((kh*KW+kw)*Cin + c).
    """
    N, _, _, Cin = xp.shape
    P = N * OH * OW
    cols = []
    for kh in range(KH):
        for kw in range(KW):
            sl = jax.lax.slice(
                xp,
                (0, kh, kw, 0),
                (N, kh + (OH - 1) * stride + 1, kw + (OW - 1) * stride + 1, Cin),
                (1, stride, stride, 1),
            ).reshape(P, Cin)
            if P_pad != P:
                sl = jnp.pad(sl, ((0, P_pad - P), (0, 0)))
            cols.append(sl)
    return jnp.concatenate(cols, axis=-1) if len(cols) > 1 else cols[0]


# ----------------------------- model ---------------------------------------------------

def block_forward(p, x, pad_value=None):
    """CNNClassifier.Block: relu(c3(relu(c2(relu(c1(x)))))) + skip(x), stride 2.

    c1 and skip run as ONE fused GEMM producing [skip | relu(c1)] from one taps read.
    """
    N, H, W, _ = x.shape
    l = p["c2_w"].shape[1]
    OH, OW = (H - 1) // 2 + 1, (W - 1) // 2 + 1
    P = N * OH * OW
    tp, P_pad = _row_tiling(P)

    # fused skip + c1 over the stride-2 3x3 taps
    xp = _pad_hw(x, ((1, 1), (1, 1)), pad_value)
    taps1 = _im2col(xp, 3, 3, 2, OH, OW, P_pad)
    y = _gemm([taps1], [p["c1skip_w"]], p["c1skip_b"], tp=tp, relu_start=l)  # (P_pad, 2l)
    skip_flat = y[:, :l]                                  # residual for c3 (padded rows kept)
    h = y[:P, l:].reshape(N, OH, OW, l)                   # relu(c1) half feeds c2

    # c2
    taps2 = _im2col(_pad_hw(h, ((1, 1), (1, 1))), 3, 3, 1, OH, OW, P_pad)
    h2 = _gemm([taps2], [p["c2_w"]], p["c2_b"], tp=tp, relu_start=0)
    h2 = h2[:P].reshape(N, OH, OW, l)

    # c3 (+ skip residual added after ReLU inside the kernel)
    taps3 = _im2col(_pad_hw(h2, ((1, 1), (1, 1))), 3, 3, 1, OH, OW, P_pad)
    out = _gemm([taps3], [p["c3_w"]], p["c3_b"], tp=tp, relu_start=0, residual=skip_flat)
    out = out[:P] if P_pad != P else out
    return out.reshape(N, OH, OW, l)


def upblock_forward(p, xs):
    """Detector.UpBlock on the (split) decoder inputs xs = [z] or [z, encoder_skip].

    The ConvTranspose2d(k=3,s=2,p=1,op=1) is one stride-1 2x2 sub-pixel conv producing
    4*Cout channel groups (ee, eo, oe, oo) interleaved into the 2x upsampled map; the
    channel concat is replaced by split-K accumulation inside the GEMM kernel.
    """
    N, H, W, _ = xs[0].shape
    Cout = p["b"].shape[1] // 4
    P = N * H * W
    tp, P_pad = _row_tiling(P)
    taps_list = [_im2col(_pad_hw(v, ((0, 1), (0, 1))), 2, 2, 1, H, W, P_pad) for v in xs]
    y = _gemm(taps_list, p["w_parts"], p["b"], tp=tp, relu_start=0)     # (P_pad, 4*Cout)
    y = (y[:P] if P_pad != P else y).reshape(N, H, W, 2, 2, Cout)       # bf16 interleave
    return jnp.transpose(y, (0, 1, 3, 2, 4, 5)).reshape(N, 2 * H, 2 * W, Cout)


def detector_forward(params, x_nchw):
    """Detector.forward.  x_nchw: (N, 3, H, W) f32 -> (N, n_out, H, W) f32."""
    x = jnp.transpose(x_nchw.astype(jnp.bfloat16), (0, 2, 3, 1))   # bf16 NHWC, cast once
    n_conv = len(params["down"])

    z = x                                                          # normalization folded
    skips = []
    for i in range(n_conv):
        skips.append(z)
        pad_val = params["pad_mean"] if i == 0 else None           # mean-pad == normalized 0-pad
        z = block_forward(params["down"][i], z, pad_value=pad_val)

    zs = [z]                                                       # decoder "concat" as a list
    for i in reversed(range(n_conv)):
        z = upblock_forward(params["up"][i], zs)
        z = z[:, : skips[i].shape[1], : skips[i].shape[2], :]
        zs = [z, skips[i]]

    # classifier: 1x1 conv over [decoder | raw-input skip] via split-K
    N, H, W, _ = zs[0].shape
    P = N * H * W
    tp, P_pad = _row_tiling(P)
    taps_list = [_im2col(v, 1, 1, 1, H, W, P_pad) for v in zs]
    out = _gemm(taps_list, params["cls_w_parts"], params["cls_b"], tp=tp,
                relu_start=None, out_dtype=jnp.float32)
    out = (out[:P] if P_pad != P else out).reshape(N, H, W, -1)
    return jnp.transpose(out, (0, 3, 1, 2))                        # NHWC -> NCHW

# TODO(synk): extract_peak / detect / detect_with_size (top-k over variable-length peak
# lists, .item() Python loops) have no clean Pallas equivalent; only forward() is ported.


# ----------------------------- parameter init + one-time folding -----------------------

def init_params(key, layers=(16, 32, 64, 96, 128), n_output_channels=3, k=3):
    """Raw parameters in torch-equivalent layouts."""
    keys = iter(jax.random.split(key, 256))

    def w(shape, scale=0.05):
        return scale * jax.random.normal(next(keys), shape, dtype=jnp.float32)

    c = 3
    down = []
    for l in layers:
        down.append(dict(
            c1_w=w((k, k, c, l)), c1_b=w((l,), 0.01),
            c2_w=w((k, k, l, l)), c2_b=w((l,), 0.01),
            c3_w=w((k, k, l, l)), c3_b=w((l,), 0.01),
            skip_w=w((1, 1, c, l)), skip_b=w((l,), 0.01),
        ))
        c = l

    skip_layer_size = [3] + list(layers[:-1])
    up = [None] * len(layers)
    for i, l in list(enumerate(layers))[::-1]:
        up[i] = dict(w=w((c, l, k, k)), b=w((l,), 0.01))   # ConvTranspose2d (Cin,Cout,KH,KW)
        c = l + skip_layer_size[i]                         # use_skip=True

    return dict(
        down=down,
        up=up,
        cls_w=w((1, 1, c, n_output_channels)),
        cls_b=w((n_output_channels,), 0.01),
        mean=jnp.array([0.3521554, 0.30068502, 0.28527516], jnp.float32),
        std=jnp.array([0.18182722, 0.18656468, 0.15938024], jnp.float32),
    )


def _subpixel_weight(w):
    """(Cin, Cout, 3, 3) transposed-conv weight -> (2, 2, Cin, 4*Cout) sub-pixel conv
    weight with output groups [ee, eo, oe, oo] (row/col parity of the upsampled pixel)."""
    wt = jnp.transpose(w, (2, 3, 0, 1))                  # (KH, KW, Cin, Cout)
    z = jnp.zeros(wt.shape[2:], wt.dtype)                # (Cin, Cout) zeros
    t00 = jnp.concatenate([wt[1, 1], wt[1, 2], wt[2, 1], wt[2, 2]], axis=-1)
    t01 = jnp.concatenate([z,        wt[1, 0], z,        wt[2, 0]], axis=-1)
    t10 = jnp.concatenate([z,        z,        wt[0, 1], wt[0, 2]], axis=-1)
    t11 = jnp.concatenate([z,        z,        z,        wt[0, 0]], axis=-1)
    row0 = jnp.stack([t00, t01], axis=0)
    row1 = jnp.stack([t10, t11], axis=0)
    return jnp.stack([row0, row1], axis=0)               # (2, 2, Cin, 4*Cout)


def prepare_params(p):
    """One-time exact transforms: fold input normalization into block-0/classifier, fuse
    skip into c1, build sub-pixel weights, split decoder weights along K, and pre-cast
    everything to the kernel dtypes/layouts ((K, Cout) bf16 / (1, Cout) f32)."""
    mean, std = p["mean"], p["std"]
    inv = 1.0 / std
    n_conv = len(p["down"])

    # ---- encoder blocks: fold norm into block 0, fuse [skip | c1], pre-cast ----
    down = []
    for i, d in enumerate(p["down"]):
        c1_w, c1_b = d["c1_w"], d["c1_b"]
        skip_w, skip_b = d["skip_w"], d["skip_b"]
        if i == 0:
            c1_b = c1_b - jnp.einsum("hwco,c->o", c1_w, mean * inv)
            c1_w = c1_w * inv[None, None, :, None]
            skip_b = skip_b - jnp.einsum("hwco,c->o", skip_w, mean * inv)
            skip_w = skip_w * inv[None, None, :, None]
        KH, KW, Cin, l = c1_w.shape
        c1_mat = c1_w.reshape(KH * KW * Cin, l)
        skip_mat = jnp.zeros((KH * KW * Cin, l), jnp.float32)
        center = (1 * KW + 1) * Cin                       # skip = center tap of the 3x3
        skip_mat = skip_mat.at[center:center + Cin].set(skip_w.reshape(Cin, l))
        down.append(dict(
            c1skip_w=jnp.concatenate([skip_mat, c1_mat], axis=1).astype(jnp.bfloat16),
            c1skip_b=jnp.concatenate([skip_b, c1_b]).reshape(1, 2 * l).astype(jnp.float32),
            c2_w=d["c2_w"].reshape(KH * KW * l, l).astype(jnp.bfloat16),
            c2_b=d["c2_b"].reshape(1, l).astype(jnp.float32),
            c3_w=d["c3_w"].reshape(KH * KW * l, l).astype(jnp.bfloat16),
            c3_b=d["c3_b"].reshape(1, l).astype(jnp.float32),
        ))

    # ---- decoder: sub-pixel weights, split along K for the [z | skip] inputs ----
    up = []
    for i, u in enumerate(p["up"]):
        w_sub = _subpixel_weight(u["w"])                  # (2, 2, Cin_total, 4*Cout)
        cin_total, cout4 = w_sub.shape[2], w_sub.shape[3]
        if i == n_conv - 1:
            split = [cin_total]                           # deepest: no skip input yet
        else:
            c_z = p["up"][i + 1]["w"].shape[1]            # channels from previous UpBlock
            split = [c_z, cin_total - c_z]
        parts, off = [], 0
        for s in split:
            parts.append(w_sub[:, :, off:off + s, :].reshape(4 * s, cout4).astype(jnp.bfloat16))
            off += s
        up.append(dict(w_parts=parts,
                       b=jnp.tile(u["b"], 4).reshape(1, cout4).astype(jnp.float32)))

    # ---- classifier: split K into [decoder | raw-input skip], fold norm into skip ----
    n_skip = mean.shape[0]
    cls_w, cls_b = p["cls_w"], p["cls_b"]                 # (1, 1, c, n_out), (n_out,)
    w_main = cls_w[0, 0, :-n_skip, :]
    w_skip = cls_w[0, 0, -n_skip:, :]
    cls_b_f = cls_b - (mean * inv) @ w_skip
    cls_parts = [w_main.astype(jnp.bfloat16),
                 (w_skip * inv[:, None]).astype(jnp.bfloat16)]

    return dict(
        down=down, up=up,
        cls_w_parts=cls_parts,
        cls_b=cls_b_f.reshape(1, -1).astype(jnp.float32),
        pad_mean=mean,                                    # mean-pad == normalized zero-pad
    )


# ----------------------------- main -----------------------------------------------------

if __name__ == "__main__":
    key = jax.random.PRNGKey(0)
    pkey, xkey = jax.random.split(key)
    params = prepare_params(init_params(pkey))

    # small NCHW input; 3 channels as required by the model
    x = jax.random.uniform(xkey, (2, 3, 16, 16), dtype=jnp.float32)

    fwd = jax.jit(detector_forward)
    out = jax.block_until_ready(fwd(params, x))

    assert out.shape == (2, 3, 16, 16), out.shape
    assert out.dtype == jnp.float32
    assert bool(jnp.all(jnp.isfinite(out)))
    print("KERNEL_OK")
</pallas_src>

<mosaic_0001>
module attributes {stable_mosaic.version = 11 : i64} {
  func.func @_gemm_kernel(%arg0: i32, %arg1: memref<64x27xbf16, #tpu.memory_space<vmem>>, %arg2: memref<27x32xbf16, #tpu.memory_space<vmem>>, %arg3: memref<1x32xf32, #tpu.memory_space<vmem>>, %arg4: memref<64x32xbf16, #tpu.memory_space<vmem>>) attributes {dimension_semantics = [#tpu.dimension_semantics<parallel>], iteration_bounds = array<i64: 2>, scalar_prefetch = 0 : i64, scratch_operands = 0 : i64, tpu.core_type = #tpu.core_type<tc>, window_params = [{transform_indices = @transform_0, window_bounds = array<i64: 64, 27>}, {pipeline_mode = #tpu.pipeline_mode<synchronous>, transform_indices = @transform_1, window_bounds = array<i64: 27, 32>}, {pipeline_mode = #tpu.pipeline_mode<synchronous>, transform_indices = @transform_2, window_bounds = array<i64: 1, 32>}, {transform_indices = @transform_3, window_bounds = array<i64: 64, 32>}]} {
    %c0 = arith.constant 0 : index
    %c0_0 = arith.constant 0 : index
    %0 = vector.load %arg1[%c0, %c0_0] : memref<64x27xbf16, #tpu.memory_space<vmem>>, vector<64x27xbf16>
    %c0_1 = arith.constant 0 : index
    %c0_2 = arith.constant 0 : index
    %1 = vector.load %arg2[%c0_1, %c0_2] : memref<27x32xbf16, #tpu.memory_space<vmem>>, vector<27x32xbf16>
    %cst = arith.constant dense<0.000000e+00> : vector<64x32xf32>
    %2 = tpu.matmul %0, %1, %cst {dimension_numbers = #tpu.dot_dimension_numbers<[1], [0], [0], [1], [0, 0, 1, 1], [], []>} : vector<64x27xbf16>, vector<27x32xbf16>, vector<64x32xf32> -> vector<64x32xf32>
    %c0_3 = arith.constant 0 : index
    %c0_4 = arith.constant 0 : index
    %3 = vector.load %arg3[%c0_3, %c0_4] : memref<1x32xf32, #tpu.memory_space<vmem>>, vector<1x32xf32>
    %4 = vector.broadcast %3 : vector<1x32xf32> to vector<64x32xf32>
    %5 = arith.addf %2, %4 : vector<64x32xf32>
    %6 = tpu.iota {dimensions = array<i32: 1>} : vector<64x32xi32>
    %c16_i32 = arith.constant 16 : i32
    %7 = vector.broadcast %c16_i32 : i32 to vector<64x32xi32>
    %8 = arith.cmpi sge, %6, %7 : vector<64x32xi32>
    %cst_5 = arith.constant 0.000000e+00 : f32
    %9 = vector.broadcast %cst_5 : f32 to vector<64x32xf32>
    %10 = arith.maximumf %5, %9 : vector<64x32xf32>
    %11 = arith.select %8, %10, %5 : vector<64x32xi1>, vector<64x32xf32>
    %12 = arith.truncf %11 : vector<64x32xf32> to vector<64x32xbf16>
    %c0_6 = arith.constant 0 : index
    %c0_7 = arith.constant 0 : index
    %13 = vector.load %arg4[%c0_6, %c0_7] : memref<64x32xbf16, #tpu.memory_space<vmem>>, vector<64x32xbf16>
    tpu.vector_store %arg4[%c0_6, %c0_7], %12 {strides = array<i32>} : memref<64x32xbf16, #tpu.memory_space<vmem>>, vector<64x32xbf16>,
    return
  }
  func.func @transform_0(%arg0: i32) -> (i32, i32) {
    %c0_i32 = arith.constant 0 : i32
    %c0_i32_0 = arith.constant 0 : i32
    return %arg0, %c0_i32 : i32, i32
  }
  func.func @transform_1(%arg0: i32) -> (i32, i32) {
    %c0_i32 = arith.constant 0 : i32
    %c0_i32_0 = arith.constant 0 : i32
    %c0_i32_1 = arith.constant 0 : i32
    return %c0_i32, %c0_i32_0 : i32, i32
  }
  func.func @transform_2(%arg0: i32) -> (i32, i32) {
    %c0_i32 = arith.constant 0 : i32
    %c0_i32_0 = arith.constant 0 : i32
    %c0_i32_1 = arith.constant 0 : i32
    return %c0_i32, %c0_i32_0 : i32, i32
  }
  func.func @transform_3(%arg0: i32) -> (i32, i32) {
    %c0_i32 = arith.constant 0 : i32
    %c0_i32_0 = arith.constant 0 : i32
    return %arg0, %c0_i32 : i32, i32
  }
}

module attributes {stable_mosaic.version = 11 : i64} {
  func.func @_gemm_kernel(%arg0: i32, %arg1: memref<64x144xbf16, #tpu.memory_space<vmem>>, %arg2: memref<144x16xbf16, #tpu.memory_space<vmem>>, %arg3: memref<1x16xf32, #tpu.memory_space<vmem>>, %arg4: memref<64x16xbf16, #tpu.memory_space<vmem>>) attributes {dimension_semantics = [#tpu.dimension_semantics<parallel>], iteration_bounds = array<i64: 2>, scalar_prefetch = 0 : i64, scratch_operands = 0 : i64, tpu.core_type = #tpu.core_type<tc>, window_params = [{transform_indices = @transform_0, window_bounds = array<i64: 64, 144>}, {pipeline_mode = #tpu.pipeline_mode<synchronous>, transform_indices = @transform_1, window_bounds = array<i64: 144, 16>}, {pipeline_mode = #tpu.pipeline_mode<synchronous>, transform_indices = @transform_2, window_bounds = array<i64: 1, 16>}, {transform_indices = @transform_3, window_bounds = array<i64: 64, 16>}]} {
    %c0 = arith.constant 0 : index
    %c0_0 = arith.constant 0 : index
    %0 = vector.load %arg1[%c0, %c0_0] : memref<64x144xbf16, #tpu.memory_space<vmem>>, vector<64x144xbf16>
    %c0_1 = arith.constant 0 : index
    %c0_2 = arith.constant 0 : index
    %1 = vector.load %arg2[%c0_1, %c0_2] : memref<144x16xbf16, #tpu.memory_space<vmem>>, vector<144x16xbf16>
    %cst = arith.constant dense<0.000000e+00> : vector<64x16xf32>
    %2 = tpu.matmul %0, %1, %cst {dimension_numbers = #tpu.dot_dimension_numbers<[1], [0], [0], [1], [0, 0, 1, 1], [], []>} : vector<64x144xbf16>, vector<144x16xbf16>, vector<64x16xf32> -> vector<64x16xf32>
    %c0_3 = arith.constant 0 : index
    %c0_4 = arith.constant 0 : index
    %3 = vector.load %arg3[%c0_3, %c0_4] : memref<1x16xf32, #tpu.memory_space<vmem>>, vector<1x16xf32>
    %4 = vector.broadcast %3 : vector<1x16xf32> to vector<64x16xf32>
    %5 = arith.addf %2, %4 : vector<64x16xf32>
    %cst_5 = arith.constant 0.000000e+00 : f32
    %6 = vector.broadcast %cst_5 : f32 to vector<64x16xf32>
    %7 = arith.maximumf %5, %6 : vector<64x16xf32>
    %8 = arith.truncf %7 : vector<64x16xf32> to vector<64x16xbf16>
    %c0_6 = arith.constant 0 : index
    %c0_7 = arith.constant 0 : index
    %9 = vector.load %arg4[%c0_6, %c0_7] : memref<64x16xbf16, #tpu.memory_space<vmem>>, vector<64x16xbf16>
    tpu.vector_store %arg4[%c0_6, %c0_7], %8 {strides = array<i32>} : memref<64x16xbf16, #tpu.memory_space<vmem>>, vector<64x16xbf16>,
    return
  }
  func.func @transform_0(%arg0: i32) -> (i32, i32) {
    %c0_i32 = arith.constant 0 : i32
    %c0_i32_0 = arith.constant 0 : i32
    return %arg0, %c0_i32 : i32, i32
  }
  func.func @transform_1(%arg0: i32) -> (i32, i32) {
    %c0_i32 = arith.constant 0 : i32
    %c0_i32_0 = arith.constant 0 : i32
    %c0_i32_1 = arith.constant 0 : i32
    return %c0_i32, %c0_i32_0 : i32, i32
  }
  func.func @transform_2(%arg0: i32) -> (i32, i32) {
    %c0_i32 = arith.constant 0 : i32
    %c0_i32_0 = arith.constant 0 : i32
    %c0_i32_1 = arith.constant 0 : i32
    return %c0_i32, %c0_i32_0 : i32, i32
  }
  func.func @transform_3(%arg0: i32) -> (i32, i32) {
    %c0_i32 = arith.constant 0 : i32
    %c0_i32_0 = arith.constant 0 : i32
    return %arg0, %c0_i32 : i32, i32
  }
}

module attributes {stable_mosaic.version = 11 : i64} {
  func.func @_gemm_kernel(%arg0: i32, %arg1: memref<64x144xbf16, #tpu.memory_space<vmem>>, %arg2: memref<144x16xbf16, #tpu.memory_space<vmem>>, %arg3: memref<1x16xf32, #tpu.memory_space<vmem>>, %arg4: memref<64x16xbf16, #tpu.memory_space<vmem>>, %arg5: memref<64x16xbf16, #tpu.memory_space<vmem>>) attributes {dimension_semantics = [#tpu.dimension_semantics<parallel>], iteration_bounds = array<i64: 2>, scalar_prefetch = 0 : i64, scratch_operands = 0 : i64, tpu.core_type = #tpu.core_type<tc>, window_params = [{transform_indices = @transform_0, window_bounds = array<i64: 64, 144>}, {pipeline_mode = #tpu.pipeline_mode<synchronous>, transform_indices = @transform_1, window_bounds = array<i64: 144, 16>}, {pipeline_mode = #tpu.pipeline_mode<synchronous>, transform_indices = @transform_2, window_bounds = array<i64: 1, 16>}, {transform_indices = @transform_3, window_bounds = array<i64: 64, 16>}, {transform_indices = @transform_4, window_bounds = array<i64: 64, 16>}]} {
    %c0 = arith.constant 0 : index
    %c0_0 = arith.constant 0 : index
    %0 = vector.load %arg1[%c0, %c0_0] : memref<64x144xbf16, #tpu.memory_space<vmem>>, vector<64x144xbf16>
    %c0_1 = arith.constant 0 : index
    %c0_2 = arith.constant 0 : index
    %1 = vector.load %arg2[%c0_1, %c0_2] : memref<144x16xbf16, #tpu.memory_space<vmem>>, vector<144x16xbf16>
    %cst = arith.constant dense<0.000000e+00> : vector<64x16xf32>
    %2 = tpu.matmul %0, %1, %cst {dimension_numbers = #tpu.dot_dimension_numbers<[1], [0], [0], [1], [0, 0, 1, 1], [], []>} : vector<64x144xbf16>, vector<144x16xbf16>, vector<64x16xf32> -> vector<64x16xf32>
    %c0_3 = arith.constant 0 : index
    %c0_4 = arith.constant 0 : index
    %3 = vector.load %arg3[%c0_3, %c0_4] : memref<1x16xf32, #tpu.memory_space<vmem>>, vector<1x16xf32>
    %4 = vector.broadcast %3 : vector<1x16xf32> to vector<64x16xf32>
    %5 = arith.addf %2, %4 : vector<64x16xf32>
    %cst_5 = arith.constant 0.000000e+00 : f32
    %6 = vector.broadcast %cst_5 : f32 to vector<64x16xf32>
    %7 = arith.maximumf %5, %6 : vector<64x16xf32>
    %c0_6 = arith.constant 0 : index
    %c0_7 = arith.constant 0 : index
    %8 = vector.load %arg4[%c0_6, %c0_7] : memref<64x16xbf16, #tpu.memory_space<vmem>>, vector<64x16xbf16>
    %9 = arith.extf %8 : vector<64x16xbf16> to vector<64x16xf32>
    %10 = arith.addf %7, %9 : vector<64x16xf32>
    %11 = arith.truncf %10 : vector<64x16xf32> to vector<64x16xbf16>
    %c0_8 = arith.constant 0 : index
    %c0_9 = arith.constant 0 : index
    %12 = vector.load %arg5[%c0_8, %c0_9] : memref<64x16xbf16, #tpu.memory_space<vmem>>, vector<64x16xbf16>
    tpu.vector_store %arg5[%c0_8, %c0_9], %11 {strides = array<i32>} : memref<64x16xbf16, #tpu.memory_space<vmem>>, vector<64x16xbf16>,
    return
  }
  func.func @transform_0(%arg0: i32) -> (i32, i32) {
    %c0_i32 = arith.constant 0 : i32
    %c0_i32_0 = arith.constant 0 : i32
    return %arg0, %c0_i32 : i32, i32
  }
  func.func @transform_1(%arg0: i32) -> (i32, i32) {
    %c0_i32 = arith.constant 0 : i32
    %c0_i32_0 = arith.constant 0 : i32
    %c0_i32_1 = arith.constant 0 : i32
    return %c0_i32, %c0_i32_0 : i32, i32
  }
  func.func @transform_2(%arg0: i32) -> (i32, i32) {
    %c0_i32 = arith.constant 0 : i32
    %c0_i32_0 = arith.constant 0 : i32
    %c0_i32_1 = arith.constant 0 : i32
    return %c0_i32, %c0_i32_0 : i32, i32
  }
  func.func @transform_3(%arg0: i32) -> (i32, i32) {
    %c0_i32 = arith.constant 0 : i32
    %c0_i32_0 = arith.constant 0 : i32
    return %arg0, %c0_i32 : i32, i32
  }
  func.func @transform_4(%arg0: i32) -> (i32, i32) {
    %c0_i32 = arith.constant 0 : i32
    %c0_i32_0 = arith.constant 0 : i32
    return %arg0, %c0_i32 : i32, i32
  }
}

module attributes {stable_mosaic.version = 11 : i64} {
  func.func @_gemm_kernel(%arg0: i32, %arg1: memref<16x144xbf16, #tpu.memory_space<vmem>>, %arg2: memref<144x64xbf16, #tpu.memory_space<vmem>>, %arg3: memref<1x64xf32, #tpu.memory_space<vmem>>, %arg4: memref<16x64xbf16, #tpu.memory_space<vmem>>) attributes {dimension_semantics = [#tpu.dimension_semantics<parallel>], iteration_bounds = array<i64: 2>, scalar_prefetch = 0 : i64, scratch_operands = 0 : i64, tpu.core_type = #tpu.core_type<tc>, window_params = [{transform_indices = @transform_0, window_bounds = array<i64: 16, 144>}, {pipeline_mode = #tpu.pipeline_mode<synchronous>, transform_indices = @transform_1, window_bounds = array<i64: 144, 64>}, {pipeline_mode = #tpu.pipeline_mode<synchronous>, transform_indices = @transform_2, window_bounds = array<i64: 1, 64>}, {transform_indices = @transform_3, window_bounds = array<i64: 16, 64>}]} {
    %c0 = arith.constant 0 : index
    %c0_0 = arith.constant 0 : index
    %0 = vector.load %arg1[%c0, %c0_0] : memref<16x144xbf16, #tpu.memory_space<vmem>>, vector<16x144xbf16>
    %c0_1 = arith.constant 0 : index
    %c0_2 = arith.constant 0 : index
    %1 = vector.load %arg2[%c0_1, %c0_2] : memref<144x64xbf16, #tpu.memory_space<vmem>>, vector<144x64xbf16>
    %cst = arith.constant dense<0.000000e+00> : vector<16x64xf32>
    %2 = tpu.matmul %0, %1, %cst {dimension_numbers = #tpu.dot_dimension_numbers<[1], [0], [0], [1], [0, 0, 1, 1], [], []>} : vector<16x144xbf16>, vector<144x64xbf16>, vector<16x64xf32> -> vector<16x64xf32>
    %c0_3 = arith.constant 0 : index
    %c0_4 = arith.constant 0 : index
    %3 = vector.load %arg3[%c0_3, %c0_4] : memref<1x64xf32, #tpu.memory_space<vmem>>, vector<1x64xf32>
    %4 = vector.broadcast %3 : vector<1x64xf32> to vector<16x64xf32>
    %5 = arith.addf %2, %4 : vector<16x64xf32>
    %6 = tpu.iota {dimensions = array<i32: 1>} : vector<16x64xi32>
    %c32_i32 = arith.constant 32 : i32
    %7 = vector.broadcast %c32_i32 : i32 to vector<16x64xi32>
    %8 = arith.cmpi sge, %6, %7 : vector<16x64xi32>
    %cst_5 = arith.constant 0.000000e+00 : f32
    %9 = vector.broadcast %cst_5 : f32 to vector<16x64xf32>
    %10 = arith.maximumf %5, %9 : vector<16x64xf32>
    %11 = arith.select %8, %10, %5 : vector<16x64xi1>, vector<16x64xf32>
    %12 = arith.truncf %11 : vector<16x64xf32> to vector<16x64xbf16>
    %c0_6 = arith.constant 0 : index
    %c0_7 = arith.constant 0 : index
    %13 = vector.load %arg4[%c0_6, %c0_7] : memref<16x64xbf16, #tpu.memory_space<vmem>>, vector<16x64xbf16>
    tpu.vector_store %arg4[%c0_6, %c0_7], %12 {strides = array<i32>} : memref<16x64xbf16, #tpu.memory_space<vmem>>, vector<16x64xbf16>,
    return
  }
  func.func @transform_0(%arg0: i32) -> (i32, i32) {
    %c0_i32 = arith.constant 0 : i32
    %c0_i32_0 = arith.constant 0 : i32
    return %arg0, %c0_i32 : i32, i32
  }
  func.func @transform_1(%arg0: i32) -> (i32, i32) {
    %c0_i32 = arith.constant 0 : i32
    %c0_i32_0 = arith.constant 0 : i32
    %c0_i32_1 = arith.constant 0 : i32
    return %c0_i32, %c0_i32_0 : i32, i32
  }
  func.func @transform_2(%arg0: i32) -> (i32, i32) {
    %c0_i32 = arith.constant 0 : i32
    %c0_i32_0 = arith.constant 0 : i32
    %c0_i32_1 = arith.constant 0 : i32
    return %c0_i32, %c0_i32_0 : i32, i32
  }
  func.func @transform_3(%arg0: i32) -> (i32, i32) {
    %c0_i32 = arith.constant 0 : i32
    %c0_i32_0 = arith.constant 0 : i32
    return %arg0, %c0_i32 : i32, i32
  }
}

module attributes {stable_mosaic.version = 11 : i64} {
  func.func @_gemm_kernel(%arg0: i32, %arg1: memref<16x288xbf16, #tpu.memory_space<vmem>>, %arg2: memref<288x32xbf16, #tpu.memory_space<vmem>>, %arg3: memref<1x32xf32, #tpu.memory_space<vmem>>, %arg4: memref<16x32xbf16, #tpu.memory_space<vmem>>) attributes {dimension_semantics = [#tpu.dimension_semantics<parallel>], iteration_bounds = array<i64: 2>, scalar_prefetch = 0 : i64, scratch_operands = 0 : i64, tpu.core_type = #tpu.core_type<tc>, window_params = [{transform_indices = @transform_0, window_bounds = array<i64: 16, 288>}, {pipeline_mode = #tpu.pipeline_mode<synchronous>, transform_indices = @transform_1, window_bounds = array<i64: 288, 32>}, {pipeline_mode = #tpu.pipeline_mode<synchronous>, transform_indices = @transform_2, window_bounds = array<i64: 1, 32>}, {transform_indices = @transform_3, window_bounds = array<i64: 16, 32>}]} {
    %c0 = arith.constant 0 : index
    %c0_0 = arith.constant 0 : index
    %0 = vector.load %arg1[%c0, %c0_0] : memref<16x288xbf16, #tpu.memory_space<vmem>>, vector<16x288xbf16>
    %c0_1 = arith.constant 0 : index
    %c0_2 = arith.constant 0 : index
    %1 = vector.load %arg2[%c0_1, %c0_2] : memref<288x32xbf16, #tpu.memory_space<vmem>>, vector<288x32xbf16>
    %cst = arith.constant dense<0.000000e+00> : vector<16x32xf32>
    %2 = tpu.matmul %0, %1, %cst {dimension_numbers = #tpu.dot_dimension_numbers<[1], [0], [0], [1], [0, 0, 1, 1], [], []>} : vector<16x288xbf16>, vector<288x32xbf16>, vector<16x32xf32> -> vector<16x32xf32>
    %c0_3 = arith.constant 0 : index
    %c0_4 = arith.constant 0 : index
    %3 = vector.load %arg3[%c0_3, %c0_4] : memref<1x32xf32, #tpu.memory_space<vmem>>, vector<1x32xf32>
    %4 = vector.broadcast %3 : vector<1x32xf32> to vector<16x32xf32>
    %5 = arith.addf %2, %4 : vector<16x32xf32>
    %cst_5 = arith.constant 0.000000e+00 : f32
    %6 = vector.broadcast %cst_5 : f32 to vector<16x32xf32>
    %7 = arith.maximumf %5, %6 : vector<16x32xf32>
    %8 = arith.truncf %7 : vector<16x32xf32> to vector<16x32xbf16>
    %c0_6 = arith.constant 0 : index
    %c0_7 = arith.constant 0 : index
    %9 = vector.load %arg4[%c0_6, %c0_7] : memref<16x32xbf16, #tpu.memory_space<vmem>>, vector<16x32xbf16>
    tpu.vector_store %arg4[%c0_6, %c0_7], %8 {strides = array<i32>} : memref<16x32xbf16, #tpu.memory_space<vmem>>, vector<16x32xbf16>,
    return
  }
  func.func @transform_0(%arg0: i32) -> (i32, i32) {
    %c0_i32 = arith.constant 0 : i32
    %c0_i32_0 = arith.constant 0 : i32
    return %arg0, %c0_i32 : i32, i32
  }
  func.func @transform_1(%arg0: i32) -> (i32, i32) {
    %c0_i32 = arith.constant 0 : i32
    %c0_i32_0 = arith.constant 0 : i32
    %c0_i32_1 = arith.constant 0 : i32
    return %c0_i32, %c0_i32_0 : i32, i32
  }
  func.func @transform_2(%arg0: i32) -> (i32, i32) {
    %c0_i32 = arith.constant 0 : i32
    %c0_i32_0 = arith.constant 0 : i32
    %c0_i32_1 = arith.constant 0 : i32
    return %c0_i32, %c0_i32_0 : i32, i32
  }
  func.func @transform_3(%arg0: i32) -> (i32, i32) {
    %c0_i32 = arith.constant 0 : i32
    %c0_i32_0 = arith.constant 0 : i32
    return %arg0, %c0_i32 : i32, i32
  }
}

module attributes {stable_mosaic.version = 11 : i64} {
  func.func @_gemm_kernel(%arg0: i32, %arg1: memref<16x288xbf16, #tpu.memory_space<vmem>>, %arg2: memref<288x32xbf16, #tpu.memory_space<vmem>>, %arg3: memref<1x32xf32, #tpu.memory_space<vmem>>, %arg4: memref<16x32xbf16, #tpu.memory_space<vmem>>, %arg5: memref<16x32xbf16, #tpu.memory_space<vmem>>) attributes {dimension_semantics = [#tpu.dimension_semantics<parallel>], iteration_bounds = array<i64: 2>, scalar_prefetch = 0 : i64, scratch_operands = 0 : i64, tpu.core_type = #tpu.core_type<tc>, window_params = [{transform_indices = @transform_0, window_bounds = array<i64: 16, 288>}, {pipeline_mode = #tpu.pipeline_mode<synchronous>, transform_indices = @transform_1, window_bounds = array<i64: 288, 32>}, {pipeline_mode = #tpu.pipeline_mode<synchronous>, transform_indices = @transform_2, window_bounds = array<i64: 1, 32>}, {transform_indices = @transform_3, window_bounds = array<i64: 16, 32>}, {transform_indices = @transform_4, window_bounds = array<i64: 16, 32>}]} {
    %c0 = arith.constant 0 : index
    %c0_0 = arith.constant 0 : index
    %0 = vector.load %arg1[%c0, %c0_0] : memref<16x288xbf16, #tpu.memory_space<vmem>>, vector<16x288xbf16>
    %c0_1 = arith.constant 0 : index
    %c0_2 = arith.constant 0 : index
    %1 = vector.load %arg2[%c0_1, %c0_2] : memref<288x32xbf16, #tpu.memory_space<vmem>>, vector<288x32xbf16>
    %cst = arith.constant dense<0.000000e+00> : vector<16x32xf32>
    %2 = tpu.matmul %0, %1, %cst {dimension_numbers = #tpu.dot_dimension_numbers<[1], [0], [0], [1], [0, 0, 1, 1], [], []>} : vector<16x288xbf16>, vector<288x32xbf16>, vector<16x32xf32> -> vector<16x32xf32>
    %c0_3 = arith.constant 0 : index
    %c0_4 = arith.constant 0 : index
    %3 = vector.load %arg3[%c0_3, %c0_4] : memref<1x32xf32, #tpu.memory_space<vmem>>, vector<1x32xf32>
    %4 = vector.broadcast %3 : vector<1x32xf32> to vector<16x32xf32>
    %5 = arith.addf %2, %4 : vector<16x32xf32>
    %cst_5 = arith.constant 0.000000e+00 : f32
    %6 = vector.broadcast %cst_5 : f32 to vector<16x32xf32>
    %7 = arith.maximumf %5, %6 : vector<16x32xf32>
    %c0_6 = arith.constant 0 : index
    %c0_7 = arith.constant 0 : index
    %8 = vector.load %arg4[%c0_6, %c0_7] : memref<16x32xbf16, #tpu.memory_space<vmem>>, vector<16x32xbf16>
    %9 = arith.extf %8 : vector<16x32xbf16> to vector<16x32xf32>
    %10 = arith.addf %7, %9 : vector<16x32xf32>
    %11 = arith.truncf %10 : vector<16x32xf32> to vector<16x32xbf16>
    %c0_8 = arith.constant 0 : index
    %c0_9 = arith.constant 0 : index
    %12 = vector.load %arg5[%c0_8, %c0_9] : memref<16x32xbf16, #tpu.memory_space<vmem>>, vector<16x32xbf16>
    tpu.vector_store %arg5[%c0_8, %c0_9], %11 {strides = array<i32>} : memref<16x32xbf16, #tpu.memory_space<vmem>>, vector<16x32xbf16>,
    return
  }
  func.func @transform_0(%arg0: i32) -> (i32, i32) {
    %c0_i32 = arith.constant 0 : i32
    %c0_i32_0 = arith.constant 0 : i32
    return %arg0, %c0_i32 : i32, i32
  }
  func.func @transform_1(%arg0: i32) -> (i32, i32) {
    %c0_i32 = arith.constant 0 : i32
    %c0_i32_0 = arith.constant 0 : i32
    %c0_i32_1 = arith.constant 0 : i32
    return %c0_i32, %c0_i32_0 : i32, i32
  }
  func.func @transform_2(%arg0: i32) -> (i32, i32) {
    %c0_i32 = arith.constant 0 : i32
    %c0_i32_0 = arith.constant 0 : i32
    %c0_i32_1 = arith.constant 0 : i32
    return %c0_i32, %c0_i32_0 : i32, i32
  }
  func.func @transform_3(%arg0: i32) -> (i32, i32) {
    %c0_i32 = arith.constant 0 : i32
    %c0_i32_0 = arith.constant 0 : i32
    return %arg0, %c0_i32 : i32, i32
  }
  func.func @transform_4(%arg0: i32) -> (i32, i32) {
    %c0_i32 = arith.constant 0 : i32
    %c0_i32_0 = arith.constant 0 : i32
    return %arg0, %c0_i32 : i32, i32
  }
}

module attributes {stable_mosaic.version = 11 : i64} {
  func.func @_gemm_kernel(%arg0: i32, %arg1: memref<8x288xbf16, #tpu.memory_space<vmem>>, %arg2: memref<288x128xbf16, #tpu.memory_space<vmem>>, %arg3: memref<1x128xf32, #tpu.memory_space<vmem>>, %arg4: memref<8x128xbf16, #tpu.memory_space<vmem>>) attributes {dimension_semantics = [#tpu.dimension_semantics<parallel>], iteration_bounds = array<i64: 1>, scalar_prefetch = 0 : i64, scratch_operands = 0 : i64, tpu.core_type = #tpu.core_type<tc>, window_params = [{transform_indices = @transform_0, window_bounds = array<i64: 8, 288>}, {pipeline_mode = #tpu.pipeline_mode<synchronous>, transform_indices = @transform_1, window_bounds = array<i64: 288, 128>}, {pipeline_mode = #tpu.pipeline_mode<synchronous>, transform_indices = @transform_2, window_bounds = array<i64: 1, 128>}, {transform_indices = @transform_3, window_bounds = array<i64: 8, 128>}]} {
    %c0 = arith.constant 0 : index
    %c0_0 = arith.constant 0 : index
    %0 = vector.load %arg1[%c0, %c0_0] : memref<8x288xbf16, #tpu.memory_space<vmem>>, vector<8x288xbf16>
    %c0_1 = arith.constant 0 : index
    %c0_2 = arith.constant 0 : index
    %1 = vector.load %arg2[%c0_1, %c0_2] : memref<288x128xbf16, #tpu.memory_space<vmem>>, vector<288x128xbf16>
    %cst = arith.constant dense<0.000000e+00> : vector<8x128xf32>
    %2 = tpu.matmul %0, %1, %cst {dimension_numbers = #tpu.dot_dimension_numbers<[1], [0], [0], [1], [0, 0, 1, 1], [], []>} : vector<8x288xbf16>, vector<288x128xbf16>, vector<8x128xf32> -> vector<8x128xf32>
    %c0_3 = arith.constant 0 : index
    %c0_4 = arith.constant 0 : index
    %3 = vector.load %arg3[%c0_3, %c0_4] : memref<1x128xf32, #tpu.memory_space<vmem>>, vector<1x128xf32>
    %4 = vector.broadcast %3 : vector<1x128xf32> to vector<8x128xf32>
    %5 = arith.addf %2, %4 : vector<8x128xf32>
    %6 = tpu.iota {dimensions = array<i32: 1>} : vector<8x128xi32>
    %c64_i32 = arith.constant 64 : i32
    %7 = vector.broadcast %c64_i32 : i32 to vector<8x128xi32>
    %8 = arith.cmpi sge, %6, %7 : vector<8x128xi32>
    %cst_5 = arith.constant 0.000000e+00 : f32
    %9 = vector.broadcast %cst_5 : f32 to vector<8x128xf32>
    %10 = arith.maximumf %5, %9 : vector<8x128xf32>
    %11 = arith.select %8, %10, %5 : vector<8x128xi1>, vector<8x128xf32>
    %12 = arith.truncf %11 : vector<8x128xf32> to vector<8x128xbf16>
    %c0_6 = arith.constant 0 : index
    %c0_7 = arith.constant 0 : index
    %13 = vector.load %arg4[%c0_6, %c0_7] : memref<8x128xbf16, #tpu.memory_space<vmem>>, vector<8x128xbf16>
    tpu.vector_store %arg4[%c0_6, %c0_7], %12 {strides = array<i32>} : memref<8x128xbf16, #tpu.memory_space<vmem>>, vector<8x128xbf16>,
    return
  }
  func.func @transform_0(%arg0: i32) -> (i32, i32) {
    %c0_i32 = arith.constant 0 : i32
    %c0_i32_0 = arith.constant 0 : i32
    return %arg0, %c0_i32 : i32, i32
  }
  func.func @transform_1(%arg0: i32) -> (i32, i32) {
    %c0_i32 = arith.constant 0 : i32
    %c0_i32_0 = arith.constant 0 : i32
    %c0_i32_1 = arith.constant 0 : i32
    return %c0_i32, %c0_i32_0 : i32, i32
  }
  func.func @transform_2(%arg0: i32) -> (i32, i32) {
    %c0_i32 = arith.constant 0 : i32
    %c0_i32_0 = arith.constant 0 : i32
    %c0_i32_1 = arith.constant 0 : i32
    return %c0_i32, %c0_i32_0 : i32, i32
  }
  func.func @transform_3(%arg0: i32) -> (i32, i32) {
    %c0_i32 = arith.constant 0 : i32
    %c0_i32_0 = arith.constant 0 : i32
    return %arg0, %c0_i32 : i32, i32
  }
}

module attributes {stable_mosaic.version = 11 : i64} {
  func.func @_gemm_kernel(%arg0: i32, %arg1: memref<8x576xbf16, #tpu.memory_space<vmem>>, %arg2: memref<576x64xbf16, #tpu.memory_space<vmem>>, %arg3: memref<1x64xf32, #tpu.memory_space<vmem>>, %arg4: memref<8x64xbf16, #tpu.memory_space<vmem>>, %arg5: memref<8x64xbf16, #tpu.memory_space<vmem>>) attributes {dimension_semantics = [#tpu.dimension_semantics<parallel>], iteration_bounds = array<i64: 1>, scalar_prefetch = 0 : i64, scratch_operands = 0 : i64, tpu.core_type = #tpu.core_type<tc>, window_params = [{transform_indices = @transform_0, window_bounds = array<i64: 8, 576>}, {pipeline_mode = #tpu.pipeline_mode<synchronous>, transform_indices = @transform_1, window_bounds = array<i64: 576, 64>}, {pipeline_mode = #tpu.pipeline_mode<synchronous>, transform_indices = @transform_2, window_bounds = array<i64: 1, 64>}, {transform_indices = @transform_3, window_bounds = array<i64: 8, 64>}, {transform_indices = @transform_4, window_bounds = array<i64: 8, 64>}]} {
    %c0 = arith.constant 0 : index
    %c0_0 = arith.constant 0 : index
    %0 = vector.load %arg1[%c0, %c0_0] : memref<8x576xbf16, #tpu.memory_space<vmem>>, vector<8x576xbf16>
    %c0_1 = arith.constant 0 : index
    %c0_2 = arith.constant 0 : index
    %1 = vector.load %arg2[%c0_1, %c0_2] : memref<576x64xbf16, #tpu.memory_space<vmem>>, vector<576x64xbf16>
    %cst = arith.constant dense<0.000000e+00> : vector<8x64xf32>
    %2 = tpu.matmul %0, %1, %cst {dimension_numbers = #tpu.dot_dimension_numbers<[1], [0], [0], [1], [0, 0, 1, 1], [], []>} : vector<8x576xbf16>, vector<576x64xbf16>, vector<8x64xf32> -> vector<8x64xf32>
    %c0_3 = arith.constant 0 : index
    %c0_4 = arith.constant 0 : index
    %3 = vector.load %arg3[%c0_3, %c0_4] : memref<1x64xf32, #tpu.memory_space<vmem>>, vector<1x64xf32>
    %4 = vector.broadcast %3 : vector<1x64xf32> to vector<8x64xf32>
    %5 = arith.addf %2, %4 : vector<8x64xf32>
    %cst_5 = arith.constant 0.000000e+00 : f32
    %6 = vector.broadcast %cst_5 : f32 to vector<8x64xf32>
    %7 = arith.maximumf %5, %6 : vector<8x64xf32>
    %c0_6 = arith.constant 0 : index
    %c0_7 = arith.constant 0 : index
    %8 = vector.load %arg4[%c0_6, %c0_7] : memref<8x64xbf16, #tpu.memory_space<vmem>>, vector<8x64xbf16>
    %9 = arith.extf %8 : vector<8x64xbf16> to vector<8x64xf32>
    %10 = arith.addf %7, %9 : vector<8x64xf32>
    %11 = arith.truncf %10 : vector<8x64xf32> to vector<8x64xbf16>
    %c0_8 = arith.constant 0 : index
    %c0_9 = arith.constant 0 : index
    %12 = vector.load %arg5[%c0_8, %c0_9] : memref<8x64xbf16, #tpu.memory_space<vmem>>, vector<8x64xbf16>
    tpu.vector_store %arg5[%c0_8, %c0_9], %11 {strides = array<i32>} : memref<8x64xbf16, #tpu.memory_space<vmem>>, vector<8x64xbf16>,
    return
  }
  func.func @transform_0(%arg0: i32) -> (i32, i32) {
    %c0_i32 = arith.constant 0 : i32
    %c0_i32_0 = arith.constant 0 : i32
    return %arg0, %c0_i32 : i32, i32
  }
  func.func @transform_1(%arg0: i32) -> (i32, i32) {
    %c0_i32 = arith.constant 0 : i32
    %c0_i32_0 = arith.constant 0 : i32
    %c0_i32_1 = arith.constant 0 : i32
    return %c0_i32, %c0_i32_0 : i32, i32
  }
  func.func @transform_2(%arg0: i32) -> (i32, i32) {
    %c0_i32 = arith.constant 0 : i32
    %c0_i32_0 = arith.constant 0 : i32
    %c0_i32_1 = arith.constant 0 : i32
    return %c0_i32, %c0_i32_0 : i32, i32
  }
  func.func @transform_3(%arg0: i32) -> (i32, i32) {
    %c0_i32 = arith.constant 0 : i32
    %c0_i32_0 = arith.constant 0 : i32
    return %arg0, %c0_i32 : i32, i32
  }
  func.func @transform_4(%arg0: i32) -> (i32, i32) {
    %c0_i32 = arith.constant 0 : i32
    %c0_i32_0 = arith.constant 0 : i32
    return %arg0, %c0_i32 : i32, i32
  }
}

module attributes {stable_mosaic.version = 11 : i64} {
  func.func @_gemm_kernel(%arg0: i32, %arg1: memref<8x576xbf16, #tpu.memory_space<vmem>>, %arg2: memref<576x64xbf16, #tpu.memory_space<vmem>>, %arg3: memref<1x64xf32, #tpu.memory_space<vmem>>, %arg4: memref<8x64xbf16, #tpu.memory_space<vmem>>) attributes {dimension_semantics = [#tpu.dimension_semantics<parallel>], iteration_bounds = array<i64: 1>, scalar_prefetch = 0 : i64, scratch_operands = 0 : i64, tpu.core_type = #tpu.core_type<tc>, window_params = [{transform_indices = @transform_0, window_bounds = array<i64: 8, 576>}, {pipeline_mode = #tpu.pipeline_mode<synchronous>, transform_indices = @transform_1, window_bounds = array<i64: 576, 64>}, {pipeline_mode = #tpu.pipeline_mode<synchronous>, transform_indices = @transform_2, window_bounds = array<i64: 1, 64>}, {transform_indices = @transform_3, window_bounds = array<i64: 8, 64>}]} {
    %c0 = arith.constant 0 : index
    %c0_0 = arith.constant 0 : index
    %0 = vector.load %arg1[%c0, %c0_0] : memref<8x576xbf16, #tpu.memory_space<vmem>>, vector<8x576xbf16>
    %c0_1 = arith.constant 0 : index
    %c0_2 = arith.constant 0 : index
    %1 = vector.load %arg2[%c0_1, %c0_2] : memref<576x64xbf16, #tpu.memory_space<vmem>>, vector<576x64xbf16>
    %cst = arith.constant dense<0.000000e+00> : vector<8x64xf32>
    %2 = tpu.matmul %0, %1, %cst {dimension_numbers = #tpu.dot_dimension_numbers<[1], [0], [0], [1], [0, 0, 1, 1], [], []>} : vector<8x576xbf16>, vector<576x64xbf16>, vector<8x64xf32> -> vector<8x64xf32>
    %c0_3 = arith.constant 0 : index
    %c0_4 = arith.constant 0 : index
    %3 = vector.load %arg3[%c0_3, %c0_4] : memref<1x64xf32, #tpu.memory_space<vmem>>, vector<1x64xf32>
    %4 = vector.broadcast %3 : vector<1x64xf32> to vector<8x64xf32>
    %5 = arith.addf %2, %4 : vector<8x64xf32>
    %cst_5 = arith.constant 0.000000e+00 : f32
    %6 = vector.broadcast %cst_5 : f32 to vector<8x64xf32>
    %7 = arith.maximumf %5, %6 : vector<8x64xf32>
    %8 = arith.truncf %7 : vector<8x64xf32> to vector<8x64xbf16>
    %c0_6 = arith.constant 0 : index
    %c0_7 = arith.constant 0 : index
    %9 = vector.load %arg4[%c0_6, %c0_7] : memref<8x64xbf16, #tpu.memory_space<vmem>>, vector<8x64xbf16>
    tpu.vector_store %arg4[%c0_6, %c0_7], %8 {strides = array<i32>} : memref<8x64xbf16, #tpu.memory_space<vmem>>, vector<8x64xbf16>,
    return
  }
  func.func @transform_0(%arg0: i32) -> (i32, i32) {
    %c0_i32 = arith.constant 0 : i32
    %c0_i32_0 = arith.constant 0 : i32
    return %arg0, %c0_i32 : i32, i32
  }
  func.func @transform_1(%arg0: i32) -> (i32, i32) {
    %c0_i32 = arith.constant 0 : i32
    %c0_i32_0 = arith.constant 0 : i32
    %c0_i32_1 = arith.constant 0 : i32
    return %c0_i32, %c0_i32_0 : i32, i32
  }
  func.func @transform_2(%arg0: i32) -> (i32, i32) {
    %c0_i32 = arith.constant 0 : i32
    %c0_i32_0 = arith.constant 0 : i32
    %c0_i32_1 = arith.constant 0 : i32
    return %c0_i32, %c0_i32_0 : i32, i32
  }
  func.func @transform_3(%arg0: i32) -> (i32, i32) {
    %c0_i32 = arith.constant 0 : i32
    %c0_i32_0 = arith.constant 0 : i32
    return %arg0, %c0_i32 : i32, i32
  }
}

module attributes {stable_mosaic.version = 11 : i64} {
  func.func @_gemm_kernel(%arg0: i32, %arg1: memref<8x576xbf16, #tpu.memory_space<vmem>>, %arg2: memref<576x192xbf16, #tpu.memory_space<vmem>>, %arg3: memref<1x192xf32, #tpu.memory_space<vmem>>, %arg4: memref<8x192xbf16, #tpu.memory_space<vmem>>) attributes {dimension_semantics = [#tpu.dimension_semantics<parallel>], iteration_bounds = array<i64: 1>, scalar_prefetch = 0 : i64, scratch_operands = 0 : i64, tpu.core_type = #tpu.core_type<tc>, window_params = [{transform_indices = @transform_0, window_bounds = array<i64: 8, 576>}, {pipeline_mode = #tpu.pipeline_mode<synchronous>, transform_indices = @transform_1, window_bounds = array<i64: 576, 192>}, {pipeline_mode = #tpu.pipeline_mode<synchronous>, transform_indices = @transform_2, window_bounds = array<i64: 1, 192>}, {transform_indices = @transform_3, window_bounds = array<i64: 8, 192>}]} {
    %c0 = arith.constant 0 : index
    %c0_0 = arith.constant 0 : index
    %0 = vector.load %arg1[%c0, %c0_0] : memref<8x576xbf16, #tpu.memory_space<vmem>>, vector<8x576xbf16>
    %c0_1 = arith.constant 0 : index
    %c0_2 = arith.constant 0 : index
    %1 = vector.load %arg2[%c0_1, %c0_2] : memref<576x192xbf16, #tpu.memory_space<vmem>>, vector<576x192xbf16>
    %cst = arith.constant dense<0.000000e+00> : vector<8x192xf32>
    %2 = tpu.matmul %0, %1, %cst {dimension_numbers = #tpu.dot_dimension_numbers<[1], [0], [0], [1], [0, 0, 1, 1], [], []>} : vector<8x576xbf16>, vector<576x192xbf16>, vector<8x192xf32> -> vector<8x192xf32>
    %c0_3 = arith.constant 0 : index
    %c0_4 = arith.constant 0 : index
    %3 = vector.load %arg3[%c0_3, %c0_4] : memref<1x192xf32, #tpu.memory_space<vmem>>, vector<1x192xf32>
    %4 = vector.broadcast %3 : vector<1x192xf32> to vector<8x192xf32>
    %5 = arith.addf %2, %4 : vector<8x192xf32>
    %6 = tpu.iota {dimensions = array<i32: 1>} : vector<8x192xi32>
    %c96_i32 = arith.constant 96 : i32
    %7 = vector.broadcast %c96_i32 : i32 to vector<8x192xi32>
    %8 = arith.cmpi sge, %6, %7 : vector<8x192xi32>
    %cst_5 = arith.constant 0.000000e+00 : f32
    %9 = vector.broadcast %cst_5 : f32 to vector<8x192xf32>
    %10 = arith.maximumf %5, %9 : vector<8x192xf32>
    %11 = arith.select %8, %10, %5 : vector<8x192xi1>, vector<8x192xf32>
    %12 = arith.truncf %11 : vector<8x192xf32> to vector<8x192xbf16>
    %c0_6 = arith.constant 0 : index
    %c0_7 = arith.constant 0 : index
    %13 = vector.load %arg4[%c0_6, %c0_7] : memref<8x192xbf16, #tpu.memory_space<vmem>>, vector<8x192xbf16>
    tpu.vector_store %arg4[%c0_6, %c0_7], %12 {strides = array<i32>} : memref<8x192xbf16, #tpu.memory_space<vmem>>, vector<8x192xbf16>,
    return
  }
  func.func @transform_0(%arg0: i32) -> (i32, i32) {
    %c0_i32 = arith.constant 0 : i32
    %c0_i32_0 = arith.constant 0 : i32
    return %arg0, %c0_i32 : i32, i32
  }
  func.func @transform_1(%arg0: i32) -> (i32, i32) {
    %c0_i32 = arith.constant 0 : i32
    %c0_i32_0 = arith.constant 0 : i32
    %c0_i32_1 = arith.constant 0 : i32
    return %c0_i32, %c0_i32_0 : i32, i32
  }
  func.func @transform_2(%arg0: i32) -> (i32, i32) {
    %c0_i32 = arith.constant 0 : i32
    %c0_i32_0 = arith.constant 0 : i32
    %c0_i32_1 = arith.constant 0 : i32
    return %c0_i32, %c0_i32_0 : i32, i32
  }
  func.func @transform_3(%arg0: i32) -> (i32, i32) {
    %c0_i32 = arith.constant 0 : i32
    %c0_i32_0 = arith.constant 0 : i32
    return %arg0, %c0_i32 : i32, i32
  }
}

module attributes {stable_mosaic.version = 11 : i64} {
  func.func @_gemm_kernel(%arg0: i32, %arg1: memref<8x864xbf16, #tpu.memory_space<vmem>>, %arg2: memref<864x96xbf16, #tpu.memory_space<vmem>>, %arg3: memref<1x96xf32, #tpu.memory_space<vmem>>, %arg4: memref<8x96xbf16, #tpu.memory_space<vmem>>) attributes {dimension_semantics = [#tpu.dimension_semantics<parallel>], iteration_bounds = array<i64: 1>, scalar_prefetch = 0 : i64, scratch_operands = 0 : i64, tpu.core_type = #tpu.core_type<tc>, window_params = [{transform_indices = @transform_0, window_bounds = array<i64: 8, 864>}, {pipeline_mode = #tpu.pipeline_mode<synchronous>, transform_indices = @transform_1, window_bounds = array<i64: 864, 96>}, {pipeline_mode = #tpu.pipeline_mode<synchronous>, transform_indices = @transform_2, window_bounds = array<i64: 1, 96>}, {transform_indices = @transform_3, window_bounds = array<i64: 8, 96>}]} {
    %c0 = arith.constant 0 : index
    %c0_0 = arith.constant 0 : index
    %0 = vector.load %arg1[%c0, %c0_0] : memref<8x864xbf16, #tpu.memory_space<vmem>>, vector<8x864xbf16>
    %c0_1 = arith.constant 0 : index
    %c0_2 = arith.constant 0 : index
    %1 = vector.load %arg2[%c0_1, %c0_2] : memref<864x96xbf16, #tpu.memory_space<vmem>>, vector<864x96xbf16>
    %cst = arith.constant dense<0.000000e+00> : vector<8x96xf32>
    %2 = tpu.matmul %0, %1, %cst {dimension_numbers = #tpu.dot_dimension_numbers<[1], [0], [0], [1], [0, 0, 1, 1], [], []>} : vector<8x864xbf16>, vector<864x96xbf16>, vector<8x96xf32> -> vector<8x96xf32>
    %c0_3 = arith.constant 0 : index
    %c0_4 = arith.constant 0 : index
    %3 = vector.load %arg3[%c0_3, %c0_4] : memref<1x96xf32, #tpu.memory_space<vmem>>, vector<1x96xf32>
    %4 = vector.broadcast %3 : vector<1x96xf32> to vector<8x96xf32>
    %5 = arith.addf %2, %4 : vector<8x96xf32>
    %cst_5 = arith.constant 0.000000e+00 : f32
    %6 = vector.broadcast %cst_5 : f32 to vector<8x96xf32>
    %7 = arith.maximumf %5, %6 : vector<8x96xf32>
    %8 = arith.truncf %7 : vector<8x96xf32> to vector<8x96xbf16>
    %c0_6 = arith.constant 0 : index
    %c0_7 = arith.constant 0 : index
    %9 = vector.load %arg4[%c0_6, %c0_7] : memref<8x96xbf16, #tpu.memory_space<vmem>>, vector<8x96xbf16>
    tpu.vector_store %arg4[%c0_6, %c0_7], %8 {strides = array<i32>} : memref<8x96xbf16, #tpu.memory_space<vmem>>, vector<8x96xbf16>,
    return
  }
  func.func @transform_0(%arg0: i32) -> (i32, i32) {
    %c0_i32 = arith.constant 0 : i32
    %c0_i32_0 = arith.constant 0 : i32
    return %arg0, %c0_i32 : i32, i32
  }
  func.func @transform_1(%arg0: i32) -> (i32, i32) {
    %c0_i32 = arith.constant 0 : i32
    %c0_i32_0 = arith.constant 0 : i32
    %c0_i32_1 = arith.constant 0 : i32
    return %c0_i32, %c0_i32_0 : i32, i32
  }
  func.func @transform_2(%arg0: i32) -> (i32, i32) {
    %c0_i32 = arith.constant 0 : i32
    %c0_i32_0 = arith.constant 0 : i32
    %c0_i32_1 = arith.constant 0 : i32
    return %c0_i32, %c0_i32_0 : i32, i32
  }
  func.func @transform_3(%arg0: i32) -> (i32, i32) {
    %c0_i32 = arith.constant 0 : i32
    %c0_i32_0 = arith.constant 0 : i32
    return %arg0, %c0_i32 : i32, i32
  }
}

module attributes {stable_mosaic.version = 11 : i64} {
  func.func @_gemm_kernel(%arg0: i32, %arg1: memref<8x864xbf16, #tpu.memory_space<vmem>>, %arg2: memref<864x96xbf16, #tpu.memory_space<vmem>>, %arg3: memref<1x96xf32, #tpu.memory_space<vmem>>, %arg4: memref<8x96xbf16, #tpu.memory_space<vmem>>, %arg5: memref<8x96xbf16, #tpu.memory_space<vmem>>) attributes {dimension_semantics = [#tpu.dimension_semantics<parallel>], iteration_bounds = array<i64: 1>, scalar_prefetch = 0 : i64, scratch_operands = 0 : i64, tpu.core_type = #tpu.core_type<tc>, window_params = [{transform_indices = @transform_0, window_bounds = array<i64: 8, 864>}, {pipeline_mode = #tpu.pipeline_mode<synchronous>, transform_indices = @transform_1, window_bounds = array<i64: 864, 96>}, {pipeline_mode = #tpu.pipeline_mode<synchronous>, transform_indices = @transform_2, window_bounds = array<i64: 1, 96>}, {transform_indices = @transform_3, window_bounds = array<i64: 8, 96>}, {transform_indices = @transform_4, window_bounds = array<i64: 8, 96>}]} {
    %c0 = arith.constant 0 : index
    %c0_0 = arith.constant 0 : index
    %0 = vector.load %arg1[%c0, %c0_0] : memref<8x864xbf16, #tpu.memory_space<vmem>>, vector<8x864xbf16>
    %c0_1 = arith.constant 0 : index
    %c0_2 = arith.constant 0 : index
    %1 = vector.load %arg2[%c0_1, %c0_2] : memref<864x96xbf16, #tpu.memory_space<vmem>>, vector<864x96xbf16>
    %cst = arith.constant dense<0.000000e+00> : vector<8x96xf32>
    %2 = tpu.matmul %0, %1, %cst {dimension_numbers = #tpu.dot_dimension_numbers<[1], [0], [0], [1], [0, 0, 1, 1], [], []>} : vector<8x864xbf16>, vector<864x96xbf16>, vector<8x96xf32> -> vector<8x96xf32>
    %c0_3 = arith.constant 0 : index
    %c0_4 = arith.constant 0 : index
    %3 = vector.load %arg3[%c0_3, %c0_4] : memref<1x96xf32, #tpu.memory_space<vmem>>, vector<1x96xf32>
    %4 = vector.broadcast %3 : vector<1x96xf32> to vector<8x96xf32>
    %5 = arith.addf %2, %4 : vector<8x96xf32>
    %cst_5 = arith.constant 0.000000e+00 : f32
    %6 = vector.broadcast %cst_5 : f32 to vector<8x96xf32>
    %7 = arith.maximumf %5, %6 : vector<8x96xf32>
    %c0_6 = arith.constant 0 : index
    %c0_7 = arith.constant 0 : index
    %8 = vector.load %arg4[%c0_6, %c0_7] : memref<8x96xbf16, #tpu.memory_space<vmem>>, vector<8x96xbf16>
    %9 = arith.extf %8 : vector<8x96xbf16> to vector<8x96xf32>
    %10 = arith.addf %7, %9 : vector<8x96xf32>
    %11 = arith.truncf %10 : vector<8x96xf32> to vector<8x96xbf16>
    %c0_8 = arith.constant 0 : index
    %c0_9 = arith.constant 0 : index
    %12 = vector.load %arg5[%c0_8, %c0_9] : memref<8x96xbf16, #tpu.memory_space<vmem>>, vector<8x96xbf16>
    tpu.vector_store %arg5[%c0_8, %c0_9], %11 {strides = array<i32>} : memref<8x96xbf16, #tpu.memory_space<vmem>>, vector<8x96xbf16>,
    return
  }
  func.func @transform_0(%arg0: i32) -> (i32, i32) {
    %c0_i32 = arith.constant 0 : i32
    %c0_i32_0 = arith.constant 0 : i32
    return %arg0, %c0_i32 : i32, i32
  }
  func.func @transform_1(%arg0: i32) -> (i32, i32) {
    %c0_i32 = arith.constant 0 : i32
    %c0_i32_0 = arith.constant 0 : i32
    %c0_i32_1 = arith.constant 0 : i32
    return %c0_i32, %c0_i32_0 : i32, i32
  }
  func.func @transform_2(%arg0: i32) -> (i32, i32) {
    %c0_i32 = arith.constant 0 : i32
    %c0_i32_0 = arith.constant 0 : i32
    %c0_i32_1 = arith.constant 0 : i32
    return %c0_i32, %c0_i32_0 : i32, i32
  }
  func.func @transform_3(%arg0: i32) -> (i32, i32) {
    %c0_i32 = arith.constant 0 : i32
    %c0_i32_0 = arith.constant 0 : i32
    return %arg0, %c0_i32 : i32, i32
  }
  func.func @transform_4(%arg0: i32) -> (i32, i32) {
    %c0_i32 = arith.constant 0 : i32
    %c0_i32_0 = arith.constant 0 : i32
    return %arg0, %c0_i32 : i32, i32
  }
}

module attributes {stable_mosaic.version = 11 : i64} {
  func.func @_gemm_kernel(%arg0: i32, %arg1: memref<8x864xbf16, #tpu.memory_space<vmem>>, %arg2: memref<864x256xbf16, #tpu.memory_space<vmem>>, %arg3: memref<1x256xf32, #tpu.memory_space<vmem>>, %arg4: memref<8x256xbf16, #tpu.memory_space<vmem>>) attributes {dimension_semantics = [#tpu.dimension_semantics<parallel>], iteration_bounds = array<i64: 1>, scalar_prefetch = 0 : i64, scratch_operands = 0 : i64, tpu.core_type = #tpu.core_type<tc>, window_params = [{transform_indices = @transform_0, window_bounds = array<i64: 8, 864>}, {pipeline_mode = #tpu.pipeline_mode<synchronous>, transform_indices = @transform_1, window_bounds = array<i64: 864, 256>}, {pipeline_mode = #tpu.pipeline_mode<synchronous>, transform_indices = @transform_2, window_bounds = array<i64: 1, 256>}, {transform_indices = @transform_3, window_bounds = array<i64: 8, 256>}]} {
    %c0 = arith.constant 0 : index
    %c0_0 = arith.constant 0 : index
    %0 = vector.load %arg1[%c0, %c0_0] : memref<8x864xbf16, #tpu.memory_space<vmem>>, vector<8x864xbf16>
    %c0_1 = arith.constant 0 : index
    %c0_2 = arith.constant 0 : index
    %1 = vector.load %arg2[%c0_1, %c0_2] : memref<864x256xbf16, #tpu.memory_space<vmem>>, vector<864x256xbf16>
    %cst = arith.constant dense<0.000000e+00> : vector<8x256xf32>
    %2 = tpu.matmul %0, %1, %cst {dimension_numbers = #tpu.dot_dimension_numbers<[1], [0], [0], [1], [0, 0, 1, 1], [], []>} : vector<8x864xbf16>, vector<864x256xbf16>, vector<8x256xf32> -> vector<8x256xf32>
    %c0_3 = arith.constant 0 : index
    %c0_4 = arith.constant 0 : index
    %3 = vector.load %arg3[%c0_3, %c0_4] : memref<1x256xf32, #tpu.memory_space<vmem>>, vector<1x256xf32>
    %4 = vector.broadcast %3 : vector<1x256xf32> to vector<8x256xf32>
    %5 = arith.addf %2, %4 : vector<8x256xf32>
    %6 = tpu.iota {dimensions = array<i32: 1>} : vector<8x256xi32>
    %c128_i32 = arith.constant 128 : i32
    %7 = vector.broadcast %c128_i32 : i32 to vector<8x256xi32>
    %8 = arith.cmpi sge, %6, %7 : vector<8x256xi32>
    %cst_5 = arith.constant 0.000000e+00 : f32
    %9 = vector.broadcast %cst_5 : f32 to vector<8x256xf32>
    %10 = arith.maximumf %5, %9 : vector<8x256xf32>
    %11 = arith.select %8, %10, %5 : vector<8x256xi1>, vector<8x256xf32>
    %12 = arith.truncf %11 : vector<8x256xf32> to vector<8x256xbf16>
    %c0_6 = arith.constant 0 : index
    %c0_7 = arith.constant 0 : index
    %13 = vector.load %arg4[%c0_6, %c0_7] : memref<8x256xbf16, #tpu.memory_space<vmem>>, vector<8x256xbf16>
    tpu.vector_store %arg4[%c0_6, %c0_7], %12 {strides = array<i32>} : memref<8x256xbf16, #tpu.memory_space<vmem>>, vector<8x256xbf16>,
    return
  }
  func.func @transform_0(%arg0: i32) -> (i32, i32) {
    %c0_i32 = arith.constant 0 : i32
    %c0_i32_0 = arith.constant 0 : i32
    return %arg0, %c0_i32 : i32, i32
  }
  func.func @transform_1(%arg0: i32) -> (i32, i32) {
    %c0_i32 = arith.constant 0 : i32
    %c0_i32_0 = arith.constant 0 : i32
    %c0_i32_1 = arith.constant 0 : i32
    return %c0_i32, %c0_i32_0 : i32, i32
  }
  func.func @transform_2(%arg0: i32) -> (i32, i32) {
    %c0_i32 = arith.constant 0 : i32
    %c0_i32_0 = arith.constant 0 : i32
    %c0_i32_1 = arith.constant 0 : i32
    return %c0_i32, %c0_i32_0 : i32, i32
  }
  func.func @transform_3(%arg0: i32) -> (i32, i32) {
    %c0_i32 = arith.constant 0 : i32
    %c0_i32_0 = arith.constant 0 : i32
    return %arg0, %c0_i32 : i32, i32
  }
}

module attributes {stable_mosaic.version = 11 : i64} {
  func.func @_gemm_kernel(%arg0: i32, %arg1: memref<8x1152xbf16, #tpu.memory_space<vmem>>, %arg2: memref<1152x128xbf16, #tpu.memory_space<vmem>>, %arg3: memref<1x128xf32, #tpu.memory_space<vmem>>, %arg4: memref<8x128xbf16, #tpu.memory_space<vmem>>) attributes {dimension_semantics = [#tpu.dimension_semantics<parallel>], iteration_bounds = array<i64: 1>, scalar_prefetch = 0 : i64, scratch_operands = 0 : i64, tpu.core_type = #tpu.core_type<tc>, window_params = [{transform_indices = @transform_0, window_bounds = array<i64: 8, 1152>}, {pipeline_mode = #tpu.pipeline_mode<synchronous>, transform_indices = @transform_1, window_bounds = array<i64: 1152, 128>}, {pipeline_mode = #tpu.pipeline_mode<synchronous>, transform_indices = @transform_2, window_bounds = array<i64: 1, 128>}, {transform_indices = @transform_3, window_bounds = array<i64: 8, 128>}]} {
    %c0 = arith.constant 0 : index
    %c0_0 = arith.constant 0 : index
    %0 = vector.load %arg1[%c0, %c0_0] : memref<8x1152xbf16, #tpu.memory_space<vmem>>, vector<8x1152xbf16>
    %c0_1 = arith.constant 0 : index
    %c0_2 = arith.constant 0 : index
    %1 = vector.load %arg2[%c0_1, %c0_2] : memref<1152x128xbf16, #tpu.memory_space<vmem>>, vector<1152x128xbf16>
    %cst = arith.constant dense<0.000000e+00> : vector<8x128xf32>
    %2 = tpu.matmul %0, %1, %cst {dimension_numbers = #tpu.dot_dimension_numbers<[1], [0], [0], [1], [0, 0, 1, 1], [], []>} : vector<8x1152xbf16>, vector<1152x128xbf16>, vector<8x128xf32> -> vector<8x128xf32>
    %c0_3 = arith.constant 0 : index
    %c0_4 = arith.constant 0 : index
    %3 = vector.load %arg3[%c0_3, %c0_4] : memref<1x128xf32, #tpu.memory_space<vmem>>, vector<1x128xf32>
    %4 = vector.broadcast %3 : vector<1x128xf32> to vector<8x128xf32>
    %5 = arith.addf %2, %4 : vector<8x128xf32>
    %cst_5 = arith.constant 0.000000e+00 : f32
    %6 = vector.broadcast %cst_5 : f32 to vector<8x128xf32>
    %7 = arith.maximumf %5, %6 : vector<8x128xf32>
    %8 = arith.truncf %7 : vector<8x128xf32> to vector<8x128xbf16>
    %c0_6 = arith.constant 0 : index
    %c0_7 = arith.constant 0 : index
    %9 = vector.load %arg4[%c0_6, %c0_7] : memref<8x128xbf16, #tpu.memory_space<vmem>>, vector<8x128xbf16>
    tpu.vector_store %arg4[%c0_6, %c0_7], %8 {strides = array<i32>} : memref<8x128xbf16, #tpu.memory_space<vmem>>, vector<8x128xbf16>,
    return
  }
  func.func @transform_0(%arg0: i32) -> (i32, i32) {
    %c0_i32 = arith.constant 0 : i32
    %c0_i32_0 = arith.constant 0 : i32
    return %arg0, %c0_i32 : i32, i32
  }
  func.func @transform_1(%arg0: i32) -> (i32, i32) {
    %c0_i32 = arith.constant 0 : i32
    %c0_i32_0 = arith.constant 0 : i32
    %c0_i32_1 = arith.constant 0 : i32
    return %c0_i32, %c0_i32_0 : i32, i32
  }
  func.func @transform_2(%arg0: i32) -> (i32, i32) {
    %c0_i32 = arith.constant 0 : i32
    %c0_i32_0 = arith.constant 0 : i32
    %c0_i32_1 = arith.constant 0 : i32
    return %c0_i32, %c0_i32_0 : i32, i32
  }
  func.func @transform_3(%arg0: i32) -> (i32, i32) {
    %c0_i32 = arith.constant 0 : i32
    %c0_i32_0 = arith.constant 0 : i32
    return %arg0, %c0_i32 : i32, i32
  }
}

module attributes {stable_mosaic.version = 11 : i64} {
  func.func @_gemm_kernel(%arg0: i32, %arg1: memref<8x1152xbf16, #tpu.memory_space<vmem>>, %arg2: memref<1152x128xbf16, #tpu.memory_space<vmem>>, %arg3: memref<1x128xf32, #tpu.memory_space<vmem>>, %arg4: memref<8x128xbf16, #tpu.memory_space<vmem>>, %arg5: memref<8x128xbf16, #tpu.memory_space<vmem>>) attributes {dimension_semantics = [#tpu.dimension_semantics<parallel>], iteration_bounds = array<i64: 1>, scalar_prefetch = 0 : i64, scratch_operands = 0 : i64, tpu.core_type = #tpu.core_type<tc>, window_params = [{transform_indices = @transform_0, window_bounds = array<i64: 8, 1152>}, {pipeline_mode = #tpu.pipeline_mode<synchronous>, transform_indices = @transform_1, window_bounds = array<i64: 1152, 128>}, {pipeline_mode = #tpu.pipeline_mode<synchronous>, transform_indices = @transform_2, window_bounds = array<i64: 1, 128>}, {transform_indices = @transform_3, window_bounds = array<i64: 8, 128>}, {transform_indices = @transform_4, window_bounds = array<i64: 8, 128>}]} {
    %c0 = arith.constant 0 : index
    %c0_0 = arith.constant 0 : index
    %0 = vector.load %arg1[%c0, %c0_0] : memref<8x1152xbf16, #tpu.memory_space<vmem>>, vector<8x1152xbf16>
    %c0_1 = arith.constant 0 : index
    %c0_2 = arith.constant 0 : index
    %1 = vector.load %arg2[%c0_1, %c0_2] : memref<1152x128xbf16, #tpu.memory_space<vmem>>, vector<1152x128xbf16>
    %cst = arith.constant dense<0.000000e+00> : vector<8x128xf32>
    %2 = tpu.matmul %0, %1, %cst {dimension_numbers = #tpu.dot_dimension_numbers<[1], [0], [0], [1], [0, 0, 1, 1], [], []>} : vector<8x1152xbf16>, vector<1152x128xbf16>, vector<8x128xf32> -> vector<8x128xf32>
    %c0_3 = arith.constant 0 : index
    %c0_4 = arith.constant 0 : index
    %3 = vector.load %arg3[%c0_3, %c0_4] : memref<1x128xf32, #tpu.memory_space<vmem>>, vector<1x128xf32>
    %4 = vector.broadcast %3 : vector<1x128xf32> to vector<8x128xf32>
    %5 = arith.addf %2, %4 : vector<8x128xf32>
    %cst_5 = arith.constant 0.000000e+00 : f32
    %6 = vector.broadcast %cst_5 : f32 to vector<8x128xf32>
    %7 = arith.maximumf %5, %6 : vector<8x128xf32>
    %c0_6 = arith.constant 0 : index
    %c0_7 = arith.constant 0 : index
    %8 = vector.load %arg4[%c0_6, %c0_7] : memref<8x128xbf16, #tpu.memory_space<vmem>>, vector<8x128xbf16>
    %9 = arith.extf %8 : vector<8x128xbf16> to vector<8x128xf32>
    %10 = arith.addf %7, %9 : vector<8x128xf32>
    %11 = arith.truncf %10 : vector<8x128xf32> to vector<8x128xbf16>
    %c0_8 = arith.constant 0 : index
    %c0_9 = arith.constant 0 : index
    %12 = vector.load %arg5[%c0_8, %c0_9] : memref<8x128xbf16, #tpu.memory_space<vmem>>, vector<8x128xbf16>
    tpu.vector_store %arg5[%c0_8, %c0_9], %11 {strides = array<i32>} : memref<8x128xbf16, #tpu.memory_space<vmem>>, vector<8x128xbf16>,
    return
  }
  func.func @transform_0(%arg0: i32) -> (i32, i32) {
    %c0_i32 = arith.constant 0 : i32
    %c0_i32_0 = arith.constant 0 : i32
    return %arg0, %c0_i32 : i32, i32
  }
  func.func @transform_1(%arg0: i32) -> (i32, i32) {
    %c0_i32 = arith.constant 0 : i32
    %c0_i32_0 = arith.constant 0 : i32
    %c0_i32_1 = arith.constant 0 : i32
    return %c0_i32, %c0_i32_0 : i32, i32
  }
  func.func @transform_2(%arg0: i32) -> (i32, i32) {
    %c0_i32 = arith.constant 0 : i32
    %c0_i32_0 = arith.constant 0 : i32
    %c0_i32_1 = arith.constant 0 : i32
    return %c0_i32, %c0_i32_0 : i32, i32
  }
  func.func @transform_3(%arg0: i32) -> (i32, i32) {
    %c0_i32 = arith.constant 0 : i32
    %c0_i32_0 = arith.constant 0 : i32
    return %arg0, %c0_i32 : i32, i32
  }
  func.func @transform_4(%arg0: i32) -> (i32, i32) {
    %c0_i32 = arith.constant 0 : i32
    %c0_i32_0 = arith.constant 0 : i32
    return %arg0, %c0_i32 : i32, i32
  }
}

module attributes {stable_mosaic.version = 11 : i64} {
  func.func @_gemm_kernel(%arg0: i32, %arg1: memref<8x512xbf16, #tpu.memory_space<vmem>>, %arg2: memref<512x512xbf16, #tpu.memory_space<vmem>>, %arg3: memref<1x512xf32, #tpu.memory_space<vmem>>, %arg4: memref<8x512xbf16, #tpu.memory_space<vmem>>) attributes {dimension_semantics = [#tpu.dimension_semantics<parallel>], iteration_bounds = array<i64: 1>, scalar_prefetch = 0 : i64, scratch_operands = 0 : i64, tpu.core_type = #tpu.core_type<tc>, window_params = [{transform_indices = @transform_0, window_bounds = array<i64: 8, 512>}, {pipeline_mode = #tpu.pipeline_mode<synchronous>, transform_indices = @transform_1, window_bounds = array<i64: 512, 512>}, {pipeline_mode = #tpu.pipeline_mode<synchronous>, transform_indices = @transform_2, window_bounds = array<i64: 1, 512>}, {transform_indices = @transform_3, window_bounds = array<i64: 8, 512>}]} {
    %c0 = arith.constant 0 : index
    %c0_0 = arith.constant 0 : index
    %0 = vector.load %arg1[%c0, %c0_0] : memref<8x512xbf16, #tpu.memory_space<vmem>>, vector<8x512xbf16>
    %c0_1 = arith.constant 0 : index
    %c0_2 = arith.constant 0 : index
    %1 = vector.load %arg2[%c0_1, %c0_2] : memref<512x512xbf16, #tpu.memory_space<vmem>>, vector<512x512xbf16>
    %cst = arith.constant dense<0.000000e+00> : vector<8x512xf32>
    %2 = tpu.matmul %0, %1, %cst {dimension_numbers = #tpu.dot_dimension_numbers<[1], [0], [0], [1], [0, 0, 1, 1], [], []>} : vector<8x512xbf16>, vector<512x512xbf16>, vector<8x512xf32> -> vector<8x512xf32>
    %c0_3 = arith.constant 0 : index
    %c0_4 = arith.constant 0 : index
    %3 = vector.load %arg3[%c0_3, %c0_4] : memref<1x512xf32, #tpu.memory_space<vmem>>, vector<1x512xf32>
    %4 = vector.broadcast %3 : vector<1x512xf32> to vector<8x512xf32>
    %5 = arith.addf %2, %4 : vector<8x512xf32>
    %cst_5 = arith.constant 0.000000e+00 : f32
    %6 = vector.broadcast %cst_5 : f32 to vector<8x512xf32>
    %7 = arith.maximumf %5, %6 : vector<8x512xf32>
    %8 = arith.truncf %7 : vector<8x512xf32> to vector<8x512xbf16>
    %c0_6 = arith.constant 0 : index
    %c0_7 = arith.constant 0 : index
    %9 = vector.load %arg4[%c0_6, %c0_7] : memref<8x512xbf16, #tpu.memory_space<vmem>>, vector<8x512xbf16>
    tpu.vector_store %arg4[%c0_6, %c0_7], %8 {strides = array<i32>} : memref<8x512xbf16, #tpu.memory_space<vmem>>, vector<8x512xbf16>,
    return
  }
  func.func @transform_0(%arg0: i32) -> (i32, i32) {
    %c0_i32 = arith.constant 0 : i32
    %c0_i32_0 = arith.constant 0 : i32
    return %arg0, %c0_i32 : i32, i32
  }
  func.func @transform_1(%arg0: i32) -> (i32, i32) {
    %c0_i32 = arith.constant 0 : i32
    %c0_i32_0 = arith.constant 0 : i32
    %c0_i32_1 = arith.constant 0 : i32
    return %c0_i32, %c0_i32_0 : i32, i32
  }
  func.func @transform_2(%arg0: i32) -> (i32, i32) {
    %c0_i32 = arith.constant 0 : i32
    %c0_i32_0 = arith.constant 0 : i32
    %c0_i32_1 = arith.constant 0 : i32
    return %c0_i32, %c0_i32_0 : i32, i32
  }
  func.func @transform_3(%arg0: i32) -> (i32, i32) {
    %c0_i32 = arith.constant 0 : i32
    %c0_i32_0 = arith.constant 0 : i32
    return %arg0, %c0_i32 : i32, i32
  }
}

module attributes {stable_mosaic.version = 11 : i64} {
  func.func @_gemm_kernel(%arg0: i32, %arg1: memref<8x512xbf16, #tpu.memory_space<vmem>>, %arg2: memref<8x384xbf16, #tpu.memory_space<vmem>>, %arg3: memref<512x384xbf16, #tpu.memory_space<vmem>>, %arg4: memref<384x384xbf16, #tpu.memory_space<vmem>>, %arg5: memref<1x384xf32, #tpu.memory_space<vmem>>, %arg6: memref<8x384xbf16, #tpu.memory_space<vmem>>) attributes {dimension_semantics = [#tpu.dimension_semantics<parallel>], iteration_bounds = array<i64: 1>, scalar_prefetch = 0 : i64, scratch_operands = 0 : i64, tpu.core_type = #tpu.core_type<tc>, window_params = [{transform_indices = @transform_0, window_bounds = array<i64: 8, 512>}, {transform_indices = @transform_1, window_bounds = array<i64: 8, 384>}, {pipeline_mode = #tpu.pipeline_mode<synchronous>, transform_indices = @transform_2, window_bounds = array<i64: 512, 384>}, {pipeline_mode = #tpu.pipeline_mode<synchronous>, transform_indices = @transform_3, window_bounds = array<i64: 384, 384>}, {pipeline_mode = #tpu.pipeline_mode<synchronous>, transform_indices = @transform_4, window_bounds = array<i64: 1, 384>}, {transform_indices = @transform_5, window_bounds = array<i64: 8, 384>}]} {
    %c0 = arith.constant 0 : index
    %c0_0 = arith.constant 0 : index
    %0 = vector.load %arg1[%c0, %c0_0] : memref<8x512xbf16, #tpu.memory_space<vmem>>, vector<8x512xbf16>
    %c0_1 = arith.constant 0 : index
    %c0_2 = arith.constant 0 : index
    %1 = vector.load %arg3[%c0_1, %c0_2] : memref<512x384xbf16, #tpu.memory_space<vmem>>, vector<512x384xbf16>
    %cst = arith.constant dense<0.000000e+00> : vector<8x384xf32>
    %2 = tpu.matmul %0, %1, %cst {dimension_numbers = #tpu.dot_dimension_numbers<[1], [0], [0], [1], [0, 0, 1, 1], [], []>} : vector<8x512xbf16>, vector<512x384xbf16>, vector<8x384xf32> -> vector<8x384xf32>
    %c0_3 = arith.constant 0 : index
    %c0_4 = arith.constant 0 : index
    %3 = vector.load %arg2[%c0_3, %c0_4] : memref<8x384xbf16, #tpu.memory_space<vmem>>, vector<8x384xbf16>
    %c0_5 = arith.constant 0 : index
    %c0_6 = arith.constant 0 : index
    %4 = vector.load %arg4[%c0_5, %c0_6] : memref<384x384xbf16, #tpu.memory_space<vmem>>, vector<384x384xbf16>
    %cst_7 = arith.constant dense<0.000000e+00> : vector<8x384xf32>
    %5 = tpu.matmul %3, %4, %cst_7 {dimension_numbers = #tpu.dot_dimension_numbers<[1], [0], [0], [1], [0, 0, 1, 1], [], []>} : vector<8x384xbf16>, vector<384x384xbf16>, vector<8x384xf32> -> vector<8x384xf32>
    %6 = arith.addf %2, %5 : vector<8x384xf32>
    %c0_8 = arith.constant 0 : index
    %c0_9 = arith.constant 0 : index
    %7 = vector.load %arg5[%c0_8, %c0_9] : memref<1x384xf32, #tpu.memory_space<vmem>>, vector<1x384xf32>
    %8 = vector.broadcast %7 : vector<1x384xf32> to vector<8x384xf32>
    %9 = arith.addf %6, %8 : vector<8x384xf32>
    %cst_10 = arith.constant 0.000000e+00 : f32
    %10 = vector.broadcast %cst_10 : f32 to vector<8x384xf32>
    %11 = arith.maximumf %9, %10 : vector<8x384xf32>
    %12 = arith.truncf %11 : vector<8x384xf32> to vector<8x384xbf16>
    %c0_11 = arith.constant 0 : index
    %c0_12 = arith.constant 0 : index
    %13 = vector.load %arg6[%c0_11, %c0_12] : memref<8x384xbf16, #tpu.memory_space<vmem>>, vector<8x384xbf16>
    tpu.vector_store %arg6[%c0_11, %c0_12], %12 {strides = array<i32>} : memref<8x384xbf16, #tpu.memory_space<vmem>>, vector<8x384xbf16>,
    return
  }
  func.func @transform_0(%arg0: i32) -> (i32, i32) {
    %c0_i32 = arith.constant 0 : i32
    %c0_i32_0 = arith.constant 0 : i32
    return %arg0, %c0_i32 : i32, i32
  }
  func.func @transform_1(%arg0: i32) -> (i32, i32) {
    %c0_i32 = arith.constant 0 : i32
    %c0_i32_0 = arith.constant 0 : i32
    return %arg0, %c0_i32 : i32, i32
  }
  func.func @transform_2(%arg0: i32) -> (i32, i32) {
    %c0_i32 = arith.constant 0 : i32
    %c0_i32_0 = arith.constant 0 : i32
    %c0_i32_1 = arith.constant 0 : i32
    return %c0_i32, %c0_i32_0 : i32, i32
  }
  func.func @transform_3(%arg0: i32) -> (i32, i32) {
    %c0_i32 = arith.constant 0 : i32
    %c0_i32_0 = arith.constant 0 : i32
    %c0_i32_1 = arith.constant 0 : i32
    return %c0_i32, %c0_i32_0 : i32, i32
  }
  func.func @transform_4(%arg0: i32) -> (i32, i32) {
    %c0_i32 = arith.constant 0 : i32
    %c0_i32_0 = arith.constant 0 : i32
    %c0_i32_1 = arith.constant 0 : i32
    return %c0_i32, %c0_i32_0 : i32, i32
  }
  func.func @transform_5(%arg0: i32) -> (i32, i32) {
    %c0_i32 = arith.constant 0 : i32
    %c0_i32_0 = arith.constant 0 : i32
    return %arg0, %c0_i32 : i32, i32
  }
}

module attributes {stable_mosaic.version = 11 : i64} {
  func.func @_gemm_kernel(%arg0: i32, %arg1: memref<8x384xbf16, #tpu.memory_space<vmem>>, %arg2: memref<8x256xbf16, #tpu.memory_space<vmem>>, %arg3: memref<384x256xbf16, #tpu.memory_space<vmem>>, %arg4: memref<256x256xbf16, #tpu.memory_space<vmem>>, %arg5: memref<1x256xf32, #tpu.memory_space<vmem>>, %arg6: memref<8x256xbf16, #tpu.memory_space<vmem>>) attributes {dimension_semantics = [#tpu.dimension_semantics<parallel>], iteration_bounds = array<i64: 1>, scalar_prefetch = 0 : i64, scratch_operands = 0 : i64, tpu.core_type = #tpu.core_type<tc>, window_params = [{transform_indices = @transform_0, window_bounds = array<i64: 8, 384>}, {transform_indices = @transform_1, window_bounds = array<i64: 8, 256>}, {pipeline_mode = #tpu.pipeline_mode<synchronous>, transform_indices = @transform_2, window_bounds = array<i64: 384, 256>}, {pipeline_mode = #tpu.pipeline_mode<synchronous>, transform_indices = @transform_3, window_bounds = array<i64: 256, 256>}, {pipeline_mode = #tpu.pipeline_mode<synchronous>, transform_indices = @transform_4, window_bounds = array<i64: 1, 256>}, {transform_indices = @transform_5, window_bounds = array<i64: 8, 256>}]} {
    %c0 = arith.constant 0 : index
    %c0_0 = arith.constant 0 : index
    %0 = vector.load %arg1[%c0, %c0_0] : memref<8x384xbf16, #tpu.memory_space<vmem>>, vector<8x384xbf16>
    %c0_1 = arith.constant 0 : index
    %c0_2 = arith.constant 0 : index
    %1 = vector.load %arg3[%c0_1, %c0_2] : memref<384x256xbf16, #tpu.memory_space<vmem>>, vector<384x256xbf16>
    %cst = arith.constant dense<0.000000e+00> : vector<8x256xf32>
    %2 = tpu.matmul %0, %1, %cst {dimension_numbers = #tpu.dot_dimension_numbers<[1], [0], [0], [1], [0, 0, 1, 1], [], []>} : vector<8x384xbf16>, vector<384x256xbf16>, vector<8x256xf32> -> vector<8x256xf32>
    %c0_3 = arith.constant 0 : index
    %c0_4 = arith.constant 0 : index
    %3 = vector.load %arg2[%c0_3, %c0_4] : memref<8x256xbf16, #tpu.memory_space<vmem>>, vector<8x256xbf16>
    %c0_5 = arith.constant 0 : index
    %c0_6 = arith.constant 0 : index
    %4 = vector.load %arg4[%c0_5, %c0_6] : memref<256x256xbf16, #tpu.memory_space<vmem>>, vector<256x256xbf16>
    %cst_7 = arith.constant dense<0.000000e+00> : vector<8x256xf32>
    %5 = tpu.matmul %3, %4, %cst_7 {dimension_numbers = #tpu.dot_dimension_numbers<[1], [0], [0], [1], [0, 0, 1, 1], [], []>} : vector<8x256xbf16>, vector<256x256xbf16>, vector<8x256xf32> -> vector<8x256xf32>
    %6 = arith.addf %2, %5 : vector<8x256xf32>
    %c0_8 = arith.constant 0 : index
    %c0_9 = arith.constant 0 : index
    %7 = vector.load %arg5[%c0_8, %c0_9] : memref<1x256xf32, #tpu.memory_space<vmem>>, vector<1x256xf32>
    %8 = vector.broadcast %7 : vector<1x256xf32> to vector<8x256xf32>
    %9 = arith.addf %6, %8 : vector<8x256xf32>
    %cst_10 = arith.constant 0.000000e+00 : f32
    %10 = vector.broadcast %cst_10 : f32 to vector<8x256xf32>
    %11 = arith.maximumf %9, %10 : vector<8x256xf32>
    %12 = arith.truncf %11 : vector<8x256xf32> to vector<8x256xbf16>
    %c0_11 = arith.constant 0 : index
    %c0_12 = arith.constant 0 : index
    %13 = vector.load %arg6[%c0_11, %c0_12] : memref<8x256xbf16, #tpu.memory_space<vmem>>, vector<8x256xbf16>
    tpu.vector_store %arg6[%c0_11, %c0_12], %12 {strides = array<i32>} : memref<8x256xbf16, #tpu.memory_space<vmem>>, vector<8x256xbf16>,
    return
  }
  func.func @transform_0(%arg0: i32) -> (i32, i32) {
    %c0_i32 = arith.constant 0 : i32
    %c0_i32_0 = arith.constant 0 : i32
    return %arg0, %c0_i32 : i32, i32
  }
  func.func @transform_1(%arg0: i32) -> (i32, i32) {
    %c0_i32 = arith.constant 0 : i32
    %c0_i32_0 = arith.constant 0 : i32
    return %arg0, %c0_i32 : i32, i32
  }
  func.func @transform_2(%arg0: i32) -> (i32, i32) {
    %c0_i32 = arith.constant 0 : i32
    %c0_i32_0 = arith.constant 0 : i32
    %c0_i32_1 = arith.constant 0 : i32
    return %c0_i32, %c0_i32_0 : i32, i32
  }
  func.func @transform_3(%arg0: i32) -> (i32, i32) {
    %c0_i32 = arith.constant 0 : i32
    %c0_i32_0 = arith.constant 0 : i32
    %c0_i32_1 = arith.constant 0 : i32
    return %c0_i32, %c0_i32_0 : i32, i32
  }
  func.func @transform_4(%arg0: i32) -> (i32, i32) {
    %c0_i32 = arith.constant 0 : i32
    %c0_i32_0 = arith.constant 0 : i32
    %c0_i32_1 = arith.constant 0 : i32
    return %c0_i32, %c0_i32_0 : i32, i32
  }
  func.func @transform_5(%arg0: i32) -> (i32, i32) {
    %c0_i32 = arith.constant 0 : i32
    %c0_i32_0 = arith.constant 0 : i32
    return %arg0, %c0_i32 : i32, i32
  }
}

module attributes {stable_mosaic.version = 11 : i64} {
  func.func @_gemm_kernel(%arg0: i32, %arg1: memref<16x256xbf16, #tpu.memory_space<vmem>>, %arg2: memref<16x128xbf16, #tpu.memory_space<vmem>>, %arg3: memref<256x128xbf16, #tpu.memory_space<vmem>>, %arg4: memref<128x128xbf16, #tpu.memory_space<vmem>>, %arg5: memref<1x128xf32, #tpu.memory_space<vmem>>, %arg6: memref<16x128xbf16, #tpu.memory_space<vmem>>) attributes {dimension_semantics = [#tpu.dimension_semantics<parallel>], iteration_bounds = array<i64: 2>, scalar_prefetch = 0 : i64, scratch_operands = 0 : i64, tpu.core_type = #tpu.core_type<tc>, window_params = [{transform_indices = @transform_0, window_bounds = array<i64: 16, 256>}, {transform_indices = @transform_1, window_bounds = array<i64: 16, 128>}, {pipeline_mode = #tpu.pipeline_mode<synchronous>, transform_indices = @transform_2, window_bounds = array<i64: 256, 128>}, {pipeline_mode = #tpu.pipeline_mode<synchronous>, transform_indices = @transform_3, window_bounds = array<i64: 128, 128>}, {pipeline_mode = #tpu.pipeline_mode<synchronous>, transform_indices = @transform_4, window_bounds = array<i64: 1, 128>}, {transform_indices = @transform_5, window_bounds = array<i64: 16, 128>}]} {
    %c0 = arith.constant 0 : index
    %c0_0 = arith.constant 0 : index
    %0 = vector.load %arg1[%c0, %c0_0] : memref<16x256xbf16, #tpu.memory_space<vmem>>, vector<16x256xbf16>
    %c0_1 = arith.constant 0 : index
    %c0_2 = arith.constant 0 : index
    %1 = vector.load %arg3[%c0_1, %c0_2] : memref<256x128xbf16, #tpu.memory_space<vmem>>, vector<256x128xbf16>
    %cst = arith.constant dense<0.000000e+00> : vector<16x128xf32>
    %2 = tpu.matmul %0, %1, %cst {dimension_numbers = #tpu.dot_dimension_numbers<[1], [0], [0], [1], [0, 0, 1, 1], [], []>} : vector<16x256xbf16>, vector<256x128xbf16>, vector<16x128xf32> -> vector<16x128xf32>
    %c0_3 = arith.constant 0 : index
    %c0_4 = arith.constant 0 : index
    %3 = vector.load %arg2[%c0_3, %c0_4] : memref<16x128xbf16, #tpu.memory_space<vmem>>, vector<16x128xbf16>
    %c0_5 = arith.constant 0 : index
    %c0_6 = arith.constant 0 : index
    %4 = vector.load %arg4[%c0_5, %c0_6] : memref<128x128xbf16, #tpu.memory_space<vmem>>, vector<128x128xbf16>
    %cst_7 = arith.constant dense<0.000000e+00> : vector<16x128xf32>
    %5 = tpu.matmul %3, %4, %cst_7 {dimension_numbers = #tpu.dot_dimension_numbers<[1], [0], [0], [1], [0, 0, 1, 1], [], []>} : vector<16x128xbf16>, vector<128x128xbf16>, vector<16x128xf32> -> vector<16x128xf32>
    %6 = arith.addf %2, %5 : vector<16x128xf32>
    %c0_8 = arith.constant 0 : index
    %c0_9 = arith.constant 0 : index
    %7 = vector.load %arg5[%c0_8, %c0_9] : memref<1x128xf32, #tpu.memory_space<vmem>>, vector<1x128xf32>
    %8 = vector.broadcast %7 : vector<1x128xf32> to vector<16x128xf32>
    %9 = arith.addf %6, %8 : vector<16x128xf32>
    %cst_10 = arith.constant 0.000000e+00 : f32
    %10 = vector.broadcast %cst_10 : f32 to vector<16x128xf32>
    %11 = arith.maximumf %9, %10 : vector<16x128xf32>
    %12 = arith.truncf %11 : vector<16x128xf32> to vector<16x128xbf16>
    %c0_11 = arith.constant 0 : index
    %c0_12 = arith.constant 0 : index
    %13 = vector.load %arg6[%c0_11, %c0_12] : memref<16x128xbf16, #tpu.memory_space<vmem>>, vector<16x128xbf16>
    tpu.vector_store %arg6[%c0_11, %c0_12], %12 {strides = array<i32>} : memref<16x128xbf16, #tpu.memory_space<vmem>>, vector<16x128xbf16>,
    return
  }
  func.func @transform_0(%arg0: i32) -> (i32, i32) {
    %c0_i32 = arith.constant 0 : i32
    %c0_i32_0 = arith.constant 0 : i32
    return %arg0, %c0_i32 : i32, i32
  }
  func.func @transform_1(%arg0: i32) -> (i32, i32) {
    %c0_i32 = arith.constant 0 : i32
    %c0_i32_0 = arith.constant 0 : i32
    return %arg0, %c0_i32 : i32, i32
  }
  func.func @transform_2(%arg0: i32) -> (i32, i32) {
    %c0_i32 = arith.constant 0 : i32
    %c0_i32_0 = arith.constant 0 : i32
    %c0_i32_1 = arith.constant 0 : i32
    return %c0_i32, %c0_i32_0 : i32, i32
  }
  func.func @transform_3(%arg0: i32) -> (i32, i32) {
    %c0_i32 = arith.constant 0 : i32
    %c0_i32_0 = arith.constant 0 : i32
    %c0_i32_1 = arith.constant 0 : i32
    return %c0_i32, %c0_i32_0 : i32, i32
  }
  func.func @transform_4(%arg0: i32) -> (i32, i32) {
    %c0_i32 = arith.constant 0 : i32
    %c0_i32_0 = arith.constant 0 : i32
    %c0_i32_1 = arith.constant 0 : i32
    return %c0_i32, %c0_i32_0 : i32, i32
  }
  func.func @transform_5(%arg0: i32) -> (i32, i32) {
    %c0_i32 = arith.constant 0 : i32
    %c0_i32_0 = arith.constant 0 : i32
    return %arg0, %c0_i32 : i32, i32
  }
}

module attributes {stable_mosaic.version = 11 : i64} {
  func.func @_gemm_kernel(%arg0: i32, %arg1: memref<64x128xbf16, #tpu.memory_space<vmem>>, %arg2: memref<64x64xbf16, #tpu.memory_space<vmem>>, %arg3: memref<128x64xbf16, #tpu.memory_space<vmem>>, %arg4: memref<64x64xbf16, #tpu.memory_space<vmem>>, %arg5: memref<1x64xf32, #tpu.memory_space<vmem>>, %arg6: memref<64x64xbf16, #tpu.memory_space<vmem>>) attributes {dimension_semantics = [#tpu.dimension_semantics<parallel>], iteration_bounds = array<i64: 2>, scalar_prefetch = 0 : i64, scratch_operands = 0 : i64, tpu.core_type = #tpu.core_type<tc>, window_params = [{transform_indices = @transform_0, window_bounds = array<i64: 64, 128>}, {transform_indices = @transform_1, window_bounds = array<i64: 64, 64>}, {pipeline_mode = #tpu.pipeline_mode<synchronous>, transform_indices = @transform_2, window_bounds = array<i64: 128, 64>}, {pipeline_mode = #tpu.pipeline_mode<synchronous>, transform_indices = @transform_3, window_bounds = array<i64: 64, 64>}, {pipeline_mode = #tpu.pipeline_mode<synchronous>, transform_indices = @transform_4, window_bounds = array<i64: 1, 64>}, {transform_indices = @transform_5, window_bounds = array<i64: 64, 64>}]} {
    %c0 = arith.constant 0 : index
    %c0_0 = arith.constant 0 : index
    %0 = vector.load %arg1[%c0, %c0_0] : memref<64x128xbf16, #tpu.memory_space<vmem>>, vector<64x128xbf16>
    %c0_1 = arith.constant 0 : index
    %c0_2 = arith.constant 0 : index
    %1 = vector.load %arg3[%c0_1, %c0_2] : memref<128x64xbf16, #tpu.memory_space<vmem>>, vector<128x64xbf16>
    %cst = arith.constant dense<0.000000e+00> : vector<64x64xf32>
    %2 = tpu.matmul %0, %1, %cst {dimension_numbers = #tpu.dot_dimension_numbers<[1], [0], [0], [1], [0, 0, 1, 1], [], []>} : vector<64x128xbf16>, vector<128x64xbf16>, vector<64x64xf32> -> vector<64x64xf32>
    %c0_3 = arith.constant 0 : index
    %c0_4 = arith.constant 0 : index
    %3 = vector.load %arg2[%c0_3, %c0_4] : memref<64x64xbf16, #tpu.memory_space<vmem>>, vector<64x64xbf16>
    %c0_5 = arith.constant 0 : index
    %c0_6 = arith.constant 0 : index
    %4 = vector.load %arg4[%c0_5, %c0_6] : memref<64x64xbf16, #tpu.memory_space<vmem>>, vector<64x64xbf16>
    %cst_7 = arith.constant dense<0.000000e+00> : vector<64x64xf32>
    %5 = tpu.matmul %3, %4, %cst_7 {dimension_numbers = #tpu.dot_dimension_numbers<[1], [0], [0], [1], [0, 0, 1, 1], [], []>} : vector<64x64xbf16>, vector<64x64xbf16>, vector<64x64xf32> -> vector<64x64xf32>
    %6 = arith.addf %2, %5 : vector<64x64xf32>
    %c0_8 = arith.constant 0 : index
    %c0_9 = arith.constant 0 : index
    %7 = vector.load %arg5[%c0_8, %c0_9] : memref<1x64xf32, #tpu.memory_space<vmem>>, vector<1x64xf32>
    %8 = vector.broadcast %7 : vector<1x64xf32> to vector<64x64xf32>
    %9 = arith.addf %6, %8 : vector<64x64xf32>
    %cst_10 = arith.constant 0.000000e+00 : f32
    %10 = vector.broadcast %cst_10 : f32 to vector<64x64xf32>
    %11 = arith.maximumf %9, %10 : vector<64x64xf32>
    %12 = arith.truncf %11 : vector<64x64xf32> to vector<64x64xbf16>
    %c0_11 = arith.constant 0 : index
    %c0_12 = arith.constant 0 : index
    %13 = vector.load %arg6[%c0_11, %c0_12] : memref<64x64xbf16, #tpu.memory_space<vmem>>, vector<64x64xbf16>
    tpu.vector_store %arg6[%c0_11, %c0_12], %12 {strides = array<i32>} : memref<64x64xbf16, #tpu.memory_space<vmem>>, vector<64x64xbf16>,
    return
  }
  func.func @transform_0(%arg0: i32) -> (i32, i32) {
    %c0_i32 = arith.constant 0 : i32
    %c0_i32_0 = arith.constant 0 : i32
    return %arg0, %c0_i32 : i32, i32
  }
  func.func @transform_1(%arg0: i32) -> (i32, i32) {
    %c0_i32 = arith.constant 0 : i32
    %c0_i32_0 = arith.constant 0 : i32
    return %arg0, %c0_i32 : i32, i32
  }
  func.func @transform_2(%arg0: i32) -> (i32, i32) {
    %c0_i32 = arith.constant 0 : i32
    %c0_i32_0 = arith.constant 0 : i32
    %c0_i32_1 = arith.constant 0 : i32
    return %c0_i32, %c0_i32_0 : i32, i32
  }
  func.func @transform_3(%arg0: i32) -> (i32, i32) {
    %c0_i32 = arith.constant 0 : i32
    %c0_i32_0 = arith.constant 0 : i32
    %c0_i32_1 = arith.constant 0 : i32
    return %c0_i32, %c0_i32_0 : i32, i32
  }
  func.func @transform_4(%arg0: i32) -> (i32, i32) {
    %c0_i32 = arith.constant 0 : i32
    %c0_i32_0 = arith.constant 0 : i32
    %c0_i32_1 = arith.constant 0 : i32
    return %c0_i32, %c0_i32_0 : i32, i32
  }
  func.func @transform_5(%arg0: i32) -> (i32, i32) {
    %c0_i32 = arith.constant 0 : i32
    %c0_i32_0 = arith.constant 0 : i32
    return %arg0, %c0_i32 : i32, i32
  }
}

module attributes {stable_mosaic.version = 11 : i64} {
  func.func @_gemm_kernel(%arg0: i32, %arg1: memref<256x16xbf16, #tpu.memory_space<vmem>>, %arg2: memref<256x3xbf16, #tpu.memory_space<vmem>>, %arg3: memref<16x3xbf16, #tpu.memory_space<vmem>>, %arg4: memref<3x3xbf16, #tpu.memory_space<vmem>>, %arg5: memref<1x3xf32, #tpu.memory_space<vmem>>, %arg6: memref<256x3xf32, #tpu.memory_space<vmem>>) attributes {dimension_semantics = [#tpu.dimension_semantics<parallel>], iteration_bounds = array<i64: 2>, scalar_prefetch = 0 : i64, scratch_operands = 0 : i64, tpu.core_type = #tpu.core_type<tc>, window_params = [{transform_indices = @transform_0, window_bounds = array<i64: 256, 16>}, {transform_indices = @transform_1, window_bounds = array<i64: 256, 3>}, {pipeline_mode = #tpu.pipeline_mode<synchronous>, transform_indices = @transform_2, window_bounds = array<i64: 16, 3>}, {pipeline_mode = #tpu.pipeline_mode<synchronous>, transform_indices = @transform_3, window_bounds = array<i64: 3, 3>}, {pipeline_mode = #tpu.pipeline_mode<synchronous>, transform_indices = @transform_4, window_bounds = array<i64: 1, 3>}, {transform_indices = @transform_5, window_bounds = array<i64: 256, 3>}]} {
    %c0 = arith.constant 0 : index
    %c0_0 = arith.constant 0 : index
    %0 = vector.load %arg1[%c0, %c0_0] : memref<256x16xbf16, #tpu.memory_space<vmem>>, vector<256x16xbf16>
    %c0_1 = arith.constant 0 : index
    %c0_2 = arith.constant 0 : index
    %1 = vector.load %arg3[%c0_1, %c0_2] : memref<16x3xbf16, #tpu.memory_space<vmem>>, vector<16x3xbf16>
    %cst = arith.constant dense<0.000000e+00> : vector<256x3xf32>
    %2 = tpu.matmul %0, %1, %cst {dimension_numbers = #tpu.dot_dimension_numbers<[1], [0], [0], [1], [0, 0, 1, 1], [], []>} : vector<256x16xbf16>, vector<16x3xbf16>, vector<256x3xf32> -> vector<256x3xf32>
    %c0_3 = arith.constant 0 : index
    %c0_4 = arith.constant 0 : index
    %3 = vector.load %arg2[%c0_3, %c0_4] : memref<256x3xbf16, #tpu.memory_space<vmem>>, vector<256x3xbf16>
    %c0_5 = arith.constant 0 : index
    %c0_6 = arith.constant 0 : index
    %4 = vector.load %arg4[%c0_5, %c0_6] : memref<3x3xbf16, #tpu.memory_space<vmem>>, vector<3x3xbf16>
    %cst_7 = arith.constant dense<0.000000e+00> : vector<256x3xf32>
    %5 = tpu.matmul %3, %4, %cst_7 {dimension_numbers = #tpu.dot_dimension_numbers<[1], [0], [0], [1], [0, 0, 1, 1], [], []>} : vector<256x3xbf16>, vector<3x3xbf16>, vector<256x3xf32> -> vector<256x3xf32>
    %6 = arith.addf %2, %5 : vector<256x3xf32>
    %c0_8 = arith.constant 0 : index
    %c0_9 = arith.constant 0 : index
    %7 = vector.load %arg5[%c0_8, %c0_9] : memref<1x3xf32, #tpu.memory_space<vmem>>, vector<1x3xf32>
    %8 = vector.broadcast %7 : vector<1x3xf32> to vector<256x3xf32>
    %9 = arith.addf %6, %8 : vector<256x3xf32>
    %c0_10 = arith.constant 0 : index
    %c0_11 = arith.constant 0 : index
    %10 = vector.load %arg6[%c0_10, %c0_11] : memref<256x3xf32, #tpu.memory_space<vmem>>, vector<256x3xf32>
    tpu.vector_store %arg6[%c0_10, %c0_11], %9 {strides = array<i32>} : memref<256x3xf32, #tpu.memory_space<vmem>>, vector<256x3xf32>,
    return
  }
  func.func @transform_0(%arg0: i32) -> (i32, i32) {
    %c0_i32 = arith.constant 0 : i32
    %c0_i32_0 = arith.constant 0 : i32
    return %arg0, %c0_i32 : i32, i32
  }
  func.func @transform_1(%arg0: i32) -> (i32, i32) {
    %c0_i32 = arith.constant 0 : i32
    %c0_i32_0 = arith.constant 0 : i32
    return %arg0, %c0_i32 : i32, i32
  }
  func.func @transform_2(%arg0: i32) -> (i32, i32) {
    %c0_i32 = arith.constant 0 : i32
    %c0_i32_0 = arith.constant 0 : i32
    %c0_i32_1 = arith.constant 0 : i32
    return %c0_i32, %c0_i32_0 : i32, i32
  }
  func.func @transform_3(%arg0: i32) -> (i32, i32) {
    %c0_i32 = arith.constant 0 : i32
    %c0_i32_0 = arith.constant 0 : i32
    %c0_i32_1 = arith.constant 0 : i32
    return %c0_i32, %c0_i32_0 : i32, i32
  }
  func.func @transform_4(%arg0: i32) -> (i32, i32) {
    %c0_i32 = arith.constant 0 : i32
    %c0_i32_0 = arith.constant 0 : i32
    %c0_i32_1 = arith.constant 0 : i32
    return %c0_i32, %c0_i32_0 : i32, i32
  }
  func.func @transform_5(%arg0: i32) -> (i32, i32) {
    %c0_i32 = arith.constant 0 : i32
    %c0_i32_0 = arith.constant 0 : i32
    return %arg0, %c0_i32 : i32, i32
  }
}

</mosaic_0001>

<bundles_post_ra>
// kernel: detector_forward.21
= control target key start
LH: loop header
LB: loop body
LE: loop exit
PB: predicated region body
PF: predicated region fallthrough
CT: control target
= control target key end

     0   :  { %s530_s12 = smov 0   ;;  %s579_s0 = inlined_call_operand.vmem [shape: bf16[128,27], index: 0, kind: input, shape index: {}]   ;;  %s580_s1 = inlined_call_operand.vmem [shape: bf16[27,32], index: 1, kind: input, shape index: {}]   ;;  %s581_s2 = inlined_call_operand.vmem [shape: f32[1,32], index: 2, kind: input, shape index: {}]   ;;  %s582_s3 = inlined_call_operand.vmem [shape: bf16[128,32], index: 3, kind: output, shape index: {}]  }
   0x1 LB: > { %s426_s13 = sadd.s32 4294967295, %s507_s12   ;;  %p430_p0 = scmp.ge.s32.totalorder %s507_s12, 1  ;;  %s507_s12 = sphi %s530_s12, %s13_s12  }
   0x2   : > { %p138_p1 = scmp.lt.s32.totalorder %s507_s12, 3 }
   0x4   : > { %p139_p2 = pnand %p430_p0, %p138_p1 }
   0x5   : > { %v495_v0 = vld [vmem:[%s580_s1] sm:$0xff] (!%p139_p2)   ;;  %vm238_vm0 = vcmask (!%p139_p2), 1044480   ;;  %v496_v1 = vld [vmem:[%s580_s1 + $0x8] sm:$0x3f] (!%p139_p2)   ;;  %vm239_vm1 = vcmask (!%p139_p2), 1045504   ;;  %s431_s18 = sshll.u32 (!%p139_p2), %s426_s13, 3  ;;  %v310_v10 = vlaneseq (!%p139_p2) }
   0x6   : > { %142 = sbr.rel (%p139_p2) target bundleno = 243 (0xf3), region = 32  ;;  %470 = vmatprep.subr.bf16.mxu0 (!%p139_p2), %v495_v0  ;;  %482 = vmatprep.subr.bf16.mxu1 (!%p139_p2), %v495_v0  ;;  %v509_v2 = vmov (!%p139_p2), 65535   ;;  %p163_p3 = scmp.lt.s32.totalorder (!%p139_p2), %s431_s18, 15  ;;  %vm225_vm2 = vcmask (!%p139_p2), 220160   ;;  %v435_v11 = vld [vmem:[%s581_s2] ss:$0 sm:$0xff] (!%p139_p2) }
   0x7   : > { %471 = vmatpush3.bf16.msra.mxu0 (!%p139_p2), %v495_v0  ;;  %484 = vmatpush3.bf16.msra.mxu1 (!%p139_p2), %v495_v0  ;;  %v240_v3 = vsel (!%p139_p2), %vm238_vm0, 4294967295, %v509_v2  ;;  %v311_v12 = vand.u32 (!%p139_p2), 127, %v310_v10  ;;  %vm361_vm4 = vcmask (!%p139_p2), 257024  }
   0x8   : > { %v241_v4 = vsel (!%p139_p2), %vm239_vm1, %v240_v3, 0 }
   0x9   : > { %v243_v5 = vand.u32 (!%p139_p2), %v496_v1, %v241_v4  ;;  %vm312_vm3 = vcmp.ge.s32.totalorder (!%p139_p2), %v311_v12, 16 }
   0xb   : > { %472 = vmatprep.subr.bf16.mxu0 (!%p139_p2), %v243_v5  ;;  %483 = vmatprep.subr.bf16.mxu1 (!%p139_p2), %v243_v5 }
   0xc   : > { %473 = vmatpush3.bf16.msra.mxu0 (!%p139_p2), %v243_v5  ;;  %485 = vmatpush3.bf16.msra.mxu1 (!%p139_p2), %v243_v5 }
   0xd   : > { %s584_s18 = smov (!%p163_p3, %s431_s18), 15 }
   0xe   : > { %s432_s19 = sshll.u32 %s584_s18, 2 }
   0xf   : > { %s166_s22 = scalar_lea.vmem %s579_s0, %s432_s19  ;;  %s172_s27 = scalar_lea.vmem %s582_s3, %s432_s19 }
  0x10   : > { %v497_v6 = vld [vmem:[%s166_s22] sm:$0xff]   ;;  %v498_v7 = vld [vmem:[%s166_s22 + $0x10] sm:$0xff]   ;;  %v499_v8 = vld [vmem:[%s166_s22 + $0x8] sm:$0xff]  }
  0x11   : > { %474 = vmatprep.mubr.msk.bf16.mxu0 %vm225_vm2, %v497_v6  ;;  %478 = vmatprep.mubr.msk.bf16.mxu1 %vm225_vm2, %v498_v7  ;;  %v500_v9 = vld [vmem:[%s166_s22 + $0x18] sm:$0xff]  }
  0x12   : > { %475 = vmatmul.mubr.msk.bf16.vlgmr.msra.gmra.mrb[0].mxu0 %vm225_vm2, %v499_v8  ;;  %479 = vmatmul.mubr.msk.bf16.vlgmr.msra.gmra.mrb[0].mxu1 %vm225_vm2, %v500_v9 }
  0xe5   : > { %v476_v13 = vpop.f32.mrb[0].mxu0  ;;  %v480_v15 = vpop.f32.mrb[0].mxu1 }
  0xe6   : > { %v288_v14 = vadd.f32 %v476_v13, %v435_v11  ;;  %v279_v16 = vpop.f32.mrb[1].mxu0  ;;  %v304_v17 = vadd.f32 %v480_v15, %v435_v11  ;;  %v295_v19 = vpop.f32.mrb[1].mxu1 }
  0xe7   : > { %v280_v18 = vadd.f32 %v435_v11, %v279_v16  ;;  %v477_v20 = vpop.f32.mrb[2].mxu0  ;;  %v296_v22 = vadd.f32 %v435_v11, %v295_v19  ;;  %v481_v24 = vpop.f32.mrb[2].mxu1 }
  0xe8   : > { %v315_v21 = vmax.f32 %v288_v14, 0.0  ;;  %v291_v23 = vadd.f32 %v477_v20, %v435_v11  ;;  %v282_v25 = vpop.f32.mrb[3].mxu0  ;;  %v319_v26 = vmax.f32 %v304_v17, 0.0  ;;  %v307_v28 = vadd.f32 %v481_v24, %v435_v11  ;;  %v298_v30 = vpop.f32.mrb[3].mxu1 }
  0xe9   : > { %v313_v27 = vmax.f32 %v280_v18, 0.0  ;;  %v283_v29 = vadd.f32 %v435_v11, %v282_v25  ;;  %v317_v32 = vmax.f32 %v296_v22, 0.0  ;;  %v299_v34 = vadd.f32 %v435_v11, %v298_v30 }
  0xea   : > { %v323_v31 = vsel %vm312_vm3, %v315_v21, %v288_v14  ;;  %v316_v33 = vmax.f32 %v291_v23, 0.0  ;;  %v327_v36 = vsel %vm312_vm3, %v319_v26, %v304_v17  ;;  %v320_v38 = vmax.f32 %v307_v28, 0.0 }
  0xeb   : > { %v458_v35 = vpack.c.bf16 %v323_v31, %v323_v31  ;;  %v321_v37 = vsel %vm312_vm3, %v313_v27, %v280_v18  ;;  %v462_v39 = vpack.c.bf16 %v327_v36, %v327_v36  ;;  %v325_v41 = vsel %vm312_vm3, %v317_v32, %v296_v22 }
  0xec   : > { %v456_v40 = vpack.c.bf16 %v321_v37, %v321_v37  ;;  %v324_v42 = vsel %vm312_vm3, %v316_v33, %v291_v23  ;;  %v460_v43 = vpack.c.bf16 %v325_v41, %v325_v41  ;;  %v328_v45 = vsel %vm312_vm3, %v320_v38, %v307_v28 }
  0xed   : > { %364 = vst.msk [vmem:[%s172_s27 + $0x8] sm:$0xf] %vm361_vm4, %v458_v35  ;;  %v459_v44 = vpack.c.bf16 %v324_v42, %v324_v42  ;;  %v314_v46 = vmax.f32 %v283_v29, 0.0  ;;  %368 = vst.msk [vmem:[%s172_s27 + $0x18] sm:$0xf] %vm361_vm4, %v462_v39  ;;  %v463_v47 = vpack.c.bf16 %v328_v45, %v328_v45  ;;  %v318_v48 = vmax.f32 %v299_v34, 0.0 }
  0xee   : > { %362 = vst.msk [vmem:[%s172_s27] sm:$0xf] %vm361_vm4, %v456_v40  ;;  %366 = vst.msk [vmem:[%s172_s27 + $0x10] sm:$0xf] %vm361_vm4, %v460_v43 }
  0xef   : > { %365 = vst.msk [vmem:[%s172_s27 + $0xc] sm:$0xf] %vm361_vm4, %v459_v44  ;;  %v322_v49 = vsel %vm312_vm3, %v314_v46, %v283_v29  ;;  %369 = vst.msk [vmem:[%s172_s27 + $0x1c] sm:$0xf] %vm361_vm4, %v463_v47  ;;  %v326_v51 = vsel %vm312_vm3, %v318_v48, %v299_v34 }
  0xf0   : > { %v457_v50 = vpack.c.bf16 %v322_v49, %v322_v49  ;;  %v461_v52 = vpack.c.bf16 %v326_v51, %v326_v51 }
  0xf2   : > { %363 = vst.msk [vmem:[%s172_s27 + $0x4] sm:$0xf] %vm361_vm4, %v457_v50  ;;  %367 = vst.msk [vmem:[%s172_s27 + $0x14] sm:$0xf] %vm361_vm4, %v461_v52 }
  0xf3 PF: > { %s13_s12 = sadd.s32 1, %s507_s12  }
  0xf4   : > { %p10_p4 = scmp.ge.s32.totalorder %s13_s12, 4  }
  0xf6   :  { %12 = sbr.rel (!%p10_p4) target bundleno = 1 (0x1), region = 62 }

// kernel: detector_forward.22
= control target key start
LH: loop header
LB: loop body
LE: loop exit
PB: predicated region body
PF: predicated region fallthrough
CT: control target
= control target key end

     0   :  { %s612_s12 = smov 0   ;;  %s695_s0 = inlined_call_operand.vmem [shape: bf16[128,144], index: 0, kind: input, shape index: {}]   ;;  %s696_s1 = inlined_call_operand.vmem [shape: bf16[144,16], index: 1, kind: input, shape index: {}]   ;;  %s697_s2 = inlined_call_operand.vmem [shape: f32[1,16], index: 2, kind: input, shape index: {}]   ;;  %s698_s3 = inlined_call_operand.vmem [shape: bf16[128,16], index: 3, kind: output, shape index: {}]  }
   0x1 LB: > { %s484_s13 = sadd.s32 4294967295, %s589_s12   ;;  %p488_p0 = scmp.ge.s32.totalorder %s589_s12, 1  ;;  %s589_s12 = sphi %s612_s12, %s13_s12  }
   0x2   : > { %p139_p1 = scmp.lt.s32.totalorder %s589_s12, 3 }
   0x4   : > { %p140_p2 = pnand %p488_p0, %p139_p1 }
   0x5   : > { %v562_v0 = vld [vmem:[%s696_s1] sm:$0xff] (!%p140_p2)   ;;  %v591_v1 = vmov (!%p140_p2), 0   ;;  %s489_s16 = sshll.u32 (!%p140_p2), %s484_s13, 3  ;;  %v563_v2 = vld [vmem:[%s696_s1 + $0x8] sm:$0xff] (!%p140_p2)   ;;  %v564_v3 = vld [vmem:[%s696_s1 + $0x10] sm:$0xff] (!%p140_p2)   ;;  %vm301_vm0 = vcmask (!%p140_p2), 130048  }
   0x6   : > { %143 = sbr.rel (%p140_p2) target bundleno = 271 (0x10f), region = 32  ;;  %314 = vmatprep.subr.bf16.mxu0 (!%p140_p2), %v591_v1  ;;  %535 = vmatprep.subr.bf16.mxu1 (!%p140_p2), %v591_v1  ;;  %p165_p3 = scmp.lt.s32.totalorder (!%p140_p2), %s489_s16, 15  ;;  %v565_v4 = vld [vmem:[%s696_s1 + $0x18] sm:$0xff] (!%p140_p2)   ;;  %v566_v7 = vld [vmem:[%s696_s1 + $0x20] sm:$0xff] (!%p140_p2)   ;;  %v567_v8 = vld [vmem:[%s696_s1 + $0x28] sm:$0xff] (!%p140_p2)   ;;  %vm419_vm1 = vcmask (!%p140_p2), 125952  }
   0x7   : > { %315 = vmatpush1.bf16.msra.mxu0 (!%p140_p2), %v562_v0  ;;  %544 = vmatpush1.bf16.msra.mxu1 (!%p140_p2), %v562_v0  ;;  %v568_v9 = vld [vmem:[%s696_s1 + $0x30] sm:$0xff] (!%p140_p2)   ;;  %v569_v10 = vld [vmem:[%s696_s1 + $0x38] sm:$0xff] (!%p140_p2)   ;;  %v570_v11 = vld [vmem:[%s696_s1 + $0x40] sm:$0xff] (!%p140_p2)  }
   0x8   : > { %316 = vmatprep.subr.bf16.mxu0 (!%p140_p2), %v591_v1  ;;  %536 = vmatprep.subr.bf16.mxu1 (!%p140_p2), %v591_v1  ;;  %v494_v18 = vld [vmem:[%s697_s2] ss:$0 sm:$0xff] (!%p140_p2) }
   0xb   : > { %317 = vmatpush1.bf16.msra.mxu0 (!%p140_p2), %v563_v2  ;;  %545 = vmatpush1.bf16.msra.mxu1 (!%p140_p2), %v563_v2 }
   0xc   : > { %318 = vmatprep.subr.bf16.mxu0 (!%p140_p2), %v591_v1  ;;  %537 = vmatprep.subr.bf16.mxu1 (!%p140_p2), %v591_v1 }
   0xd   : > { %s700_s16 = smov (!%p165_p3, %s489_s16), 15 }
   0xe   : > { %s526_s21 = sshll.u32 %s700_s16, 3  ;;  %s493_s13 = sshll.u32 %s700_s16, 2 }
   0xf   : > { %s635_s24 = scalar_lea.vmem %s695_s0, %s526_s21  ;;  %319 = vmatpush1.bf16.msra.mxu0 %v564_v3  ;;  %546 = vmatpush1.bf16.msra.mxu1 %v564_v3  ;;  %s674_s17 = scalar_lea.vmem %s698_s3, %s493_s13 }
  0x10   : > { %v573_v5 = vld [vmem:[%s635_s24 + $0x4] ss:$8 sps:$4 sm:$0xff]   ;;  %320 = vmatprep.subr.bf16.mxu0 %v591_v1  ;;  %538 = vmatprep.subr.bf16.mxu1 %v591_v1  ;;  %v571_v12 = vld [vmem:[%s635_s24] ss:$8 sps:$4 sm:$0xff]   ;;  %v577_v14 = vld [vmem:[%s635_s24 + $0x14] ss:$8 sps:$4 sm:$0xff]  }
  0x11   : > { %v576_v6 = vld [vmem:[%s635_s24 + $0x24] ss:$8 sps:$4 sm:$0xff]   ;;  %512 = vmatprep.mubr.msk.bf16.mxu0 %vm301_vm0, %v573_v5  ;;  %v574_v13 = vld [vmem:[%s635_s24 + $0x20] ss:$8 sps:$4 sm:$0xff]   ;;  %v579_v15 = vld [vmem:[%s635_s24 + $0x34] ss:$8 sps:$4 sm:$0xff]  }
  0x12   : > { %514 = vmatprep.mubr.msk.bf16.mxu1 %vm301_vm0, %v576_v6  ;;  %v581_v16 = vld [vmem:[%s635_s24 + $0x10] ss:$8 sps:$4 sm:$0xff]  }
  0x13   : > { %321 = vmatpush1.bf16.msra.mxu0 %v565_v4  ;;  %547 = vmatpush1.bf16.msra.mxu1 %v565_v4  ;;  %v582_v17 = vld [vmem:[%s635_s24 + $0x30] ss:$8 sps:$4 sm:$0xff]  }
  0x14   : > { %322 = vmatprep.subr.bf16.mxu0 %v591_v1  ;;  %539 = vmatprep.subr.bf16.mxu1 %v591_v1 }
  0x17   : > { %323 = vmatpush1.bf16.msra.mxu0 %v566_v7  ;;  %548 = vmatpush1.bf16.msra.mxu1 %v566_v7 }
  0x18   : > { %324 = vmatprep.subr.bf16.mxu0 %v591_v1  ;;  %540 = vmatprep.subr.bf16.mxu1 %v591_v1 }
  0x1b   : > { %325 = vmatpush1.bf16.msra.mxu0 %v567_v8  ;;  %549 = vmatpush1.bf16.msra.mxu1 %v567_v8 }
  0x1c   : > { %326 = vmatprep.subr.bf16.mxu0 %v591_v1  ;;  %541 = vmatprep.subr.bf16.mxu1 %v591_v1 }
  0x1f   : > { %327 = vmatpush1.bf16.msra.mxu0 %v568_v9  ;;  %550 = vmatpush1.bf16.msra.mxu1 %v568_v9 }
  0x20   : > { %328 = vmatprep.subr.bf16.mxu0 %v591_v1  ;;  %542 = vmatprep.subr.bf16.mxu1 %v591_v1 }
  0x23   : > { %329 = vmatpush1.bf16.msra.mxu0 %v569_v10  ;;  %551 = vmatpush1.bf16.msra.mxu1 %v569_v10 }
  0x24   : > { %330 = vmatprep.subr.bf16.mxu0 %v591_v1  ;;  %543 = vmatprep.subr.bf16.mxu1 %v591_v1 }
  0x27   : > { %331 = vmatpush1.bf16.msra.mxu0 %v570_v11  ;;  %552 = vmatpush1.bf16.msra.mxu1 %v570_v11 }
  0x2a   : > { %347 = vmatmul.mubr.bf16.vlgmr.msra.gmra.mrb[0].mxu0 %v571_v12  ;;  %363 = vmatmul.mubr.bf16.vlgmr.msra.gmra.mrb[0].mxu1 %v574_v13 }
  0x2b   : > { %513 = vmatprep.mubr.msk.bf16.mxu0 %vm301_vm0, %v577_v14  ;;  %515 = vmatprep.mubr.msk.bf16.mxu1 %vm301_vm0, %v579_v15 }
  0x32   : > { %355 = vmatmul.mubr.bf16.gmra.mrb[4].mxu0 %v581_v16  ;;  %371 = vmatmul.mubr.bf16.gmra.mrb[4].mxu1 %v582_v17 }
  0xfd   : > { %v348_v19 = vpop.f32.mrb[0].mxu0  ;;  %v364_v20 = vpop.f32.mrb[0].mxu1 }
  0xfe   : > { %v349_v21 = vadd.f32 %v494_v18, %v348_v19  ;;  %v365_v22 = vadd.f32 %v494_v18, %v364_v20  ;;  %v350_v23 = vpop.f32.mrb[1].mxu0  ;;  %v366_v24 = vpop.f32.mrb[1].mxu1 }
  0xff   : > { %v351_v25 = vpop.f32.mrb[2].mxu0  ;;  %v367_v26 = vpop.f32.mrb[2].mxu1 }
 0x100   : > { %v379_v27 = vmax.f32 %v349_v21, 0.0  ;;  %v383_v28 = vmax.f32 %v365_v22, 0.0  ;;  %v352_v29 = vadd.f32 %v494_v18, %v351_v25  ;;  %v368_v30 = vadd.f32 %v494_v18, %v367_v26  ;;  %v353_v31 = vpop.f32.mrb[3].mxu0  ;;  %v369_v32 = vpop.f32.mrb[3].mxu1 }
 0x102   : > { %v527_v33 = vpack.c.bf16 %v379_v27, %v379_v27  ;;  %v531_v34 = vpack.c.bf16 %v383_v28, %v383_v28  ;;  %v380_v35 = vmax.f32 %v352_v29, 0.0  ;;  %v384_v36 = vmax.f32 %v368_v30, 0.0 }
 0x104   : > { %420 = vst.msk [vmem:[%s674_s17] sm:$0xf] %vm419_vm1, %v527_v33  ;;  %424 = vst.msk [vmem:[%s674_s17 + $0x10] sm:$0xf] %vm419_vm1, %v531_v34  ;;  %v528_v37 = vpack.c.bf16 %v380_v35, %v380_v35  ;;  %v532_v38 = vpack.c.bf16 %v384_v36, %v384_v36 }
 0x105   : > { %v356_v39 = vpop.f32.mrb[4].mxu0  ;;  %v372_v40 = vpop.f32.mrb[4].mxu1 }
 0x106   : > { %421 = vst.msk [vmem:[%s674_s17 + $0x4] sm:$0xf] %vm419_vm1, %v528_v37  ;;  %425 = vst.msk [vmem:[%s674_s17 + $0x14] sm:$0xf] %vm419_vm1, %v532_v38  ;;  %v357_v41 = vadd.f32 %v494_v18, %v356_v39  ;;  %v373_v42 = vadd.f32 %v494_v18, %v372_v40  ;;  %v358_v43 = vpop.f32.mrb[5].mxu0  ;;  %v374_v44 = vpop.f32.mrb[5].mxu1 }
 0x107   : > { %v359_v45 = vpop.f32.mrb[6].mxu0  ;;  %v375_v46 = vpop.f32.mrb[6].mxu1 }
 0x108   : > { %v381_v47 = vmax.f32 %v357_v41, 0.0  ;;  %v385_v48 = vmax.f32 %v373_v42, 0.0  ;;  %v360_v49 = vadd.f32 %v494_v18, %v359_v45  ;;  %v376_v50 = vadd.f32 %v494_v18, %v375_v46  ;;  %v361_v51 = vpop.f32.mrb[7].mxu0  ;;  %v377_v52 = vpop.f32.mrb[7].mxu1 }
 0x10a   : > { %v529_v53 = vpack.c.bf16 %v381_v47, %v381_v47  ;;  %v533_v54 = vpack.c.bf16 %v385_v48, %v385_v48  ;;  %v382_v55 = vmax.f32 %v360_v49, 0.0  ;;  %v386_v56 = vmax.f32 %v376_v50, 0.0 }
 0x10c   : > { %422 = vst.msk [vmem:[%s674_s17 + $0x8] sm:$0xf] %vm419_vm1, %v529_v53  ;;  %426 = vst.msk [vmem:[%s674_s17 + $0x18] sm:$0xf] %vm419_vm1, %v533_v54  ;;  %v530_v57 = vpack.c.bf16 %v382_v55, %v382_v55  ;;  %v534_v58 = vpack.c.bf16 %v386_v56, %v386_v56 }
 0x10e   : > { %423 = vst.msk [vmem:[%s674_s17 + $0xc] sm:$0xf] %vm419_vm1, %v530_v57  ;;  %427 = vst.msk [vmem:[%s674_s17 + $0x1c] sm:$0xf] %vm419_vm1, %v534_v58 }
 0x10f PF: > { %s13_s12 = sadd.s32 1, %s589_s12  }
 0x110   : > { %p10_p4 = scmp.ge.s32.totalorder %s13_s12, 4  }
 0x112   :  { %12 = sbr.rel (!%p10_p4) target bundleno = 1 (0x1), region = 62 }

// kernel: detector_forward.23
= control target key start
LH: loop header
LB: loop body
LE: loop exit
PB: predicated region body
PF: predicated region fallthrough
CT: control target
= control target key end

     0   :  { %s723_s15 = smov 0   ;;  %s813_s0 = inlined_call_operand.vmem [shape: bf16[128,144], index: 0, kind: input, shape index: {}]   ;;  %s814_s1 = inlined_call_operand.vmem [shape: bf16[144,16], index: 1, kind: input, shape index: {}]   ;;  %s815_s2 = inlined_call_operand.vmem [shape: f32[1,16], index: 2, kind: input, shape index: {}]   ;;  %s816_s3 = inlined_call_operand.vmem [shape: bf16[128,16], index: 3, kind: input, shape index: {}]   ;;  %s817_s4 = inlined_call_operand.vmem [shape: bf16[128,16], index: 4, kind: output, shape index: {}]  }
   0x1 LB: > { %s569_s16 = sadd.s32 4294967295, %s695_s15   ;;  %p573_p0 = scmp.ge.s32.totalorder %s695_s15, 1  ;;  %s695_s15 = sphi %s723_s15, %s14_s15  }
   0x2   : > { %p175_p1 = scmp.lt.s32.totalorder %s695_s15, 3 }
   0x4   : > { %p176_p2 = pnand %p573_p0, %p175_p1 }
   0x5   : > { %v668_v0 = vld [vmem:[%s814_s1] sm:$0xff] (!%p176_p2)   ;;  %v697_v1 = vmov (!%p176_p2), 0   ;;  %s574_s19 = sshll.u32 (!%p176_p2), %s569_s16, 3  ;;  %v669_v2 = vld [vmem:[%s814_s1 + $0x8] sm:$0xff] (!%p176_p2)   ;;  %v670_v3 = vld [vmem:[%s814_s1 + $0x10] sm:$0xff] (!%p176_p2)   ;;  %vm350_vm0 = vcmask (!%p176_p2), 130048  }
   0x6   : > { %179 = sbr.rel (%p176_p2) target bundleno = 273 (0x111), region = 36  ;;  %363 = vmatprep.subr.bf16.mxu0 (!%p176_p2), %v697_v1  ;;  %641 = vmatprep.subr.bf16.mxu1 (!%p176_p2), %v697_v1  ;;  %p208_p3 = scmp.lt.s32.totalorder (!%p176_p2), %s574_s19, 15  ;;  %v671_v4 = vld [vmem:[%s814_s1 + $0x18] sm:$0xff] (!%p176_p2)   ;;  %v672_v7 = vld [vmem:[%s814_s1 + $0x20] sm:$0xff] (!%p176_p2)   ;;  %v673_v8 = vld [vmem:[%s814_s1 + $0x28] sm:$0xff] (!%p176_p2)   ;;  %vm492_vm1 = vcmask (!%p176_p2), 125952  }
   0x7   : > { %364 = vmatpush1.bf16.msra.mxu0 (!%p176_p2), %v668_v0  ;;  %650 = vmatpush1.bf16.msra.mxu1 (!%p176_p2), %v668_v0  ;;  %v674_v9 = vld [vmem:[%s814_s1 + $0x30] sm:$0xff] (!%p176_p2)   ;;  %v675_v10 = vld [vmem:[%s814_s1 + $0x38] sm:$0xff] (!%p176_p2)   ;;  %v676_v11 = vld [vmem:[%s814_s1 + $0x40] sm:$0xff] (!%p176_p2)  }
   0x8   : > { %365 = vmatprep.subr.bf16.mxu0 (!%p176_p2), %v697_v1  ;;  %642 = vmatprep.subr.bf16.mxu1 (!%p176_p2), %v697_v1  ;;  %v581_v18 = vld [vmem:[%s815_s2] ss:$0 sm:$0xff] (!%p176_p2) }
   0xb   : > { %366 = vmatpush1.bf16.msra.mxu0 (!%p176_p2), %v669_v2  ;;  %651 = vmatpush1.bf16.msra.mxu1 (!%p176_p2), %v669_v2 }
   0xc   : > { %367 = vmatprep.subr.bf16.mxu0 (!%p176_p2), %v697_v1  ;;  %643 = vmatprep.subr.bf16.mxu1 (!%p176_p2), %v697_v1 }
   0xd   : > { %s819_s19 = smov (!%p208_p3, %s574_s19), 15 }
   0xe   : > { %s613_s24 = sshll.u32 %s819_s19, 3  ;;  %s578_s14 = sshll.u32 %s819_s19, 2 }
   0xf   : > { %s746_s27 = scalar_lea.vmem %s813_s0, %s613_s24  ;;  %368 = vmatpush1.bf16.msra.mxu0 %v670_v3  ;;  %652 = vmatpush1.bf16.msra.mxu1 %v670_v3  ;;  %s218_s18 = scalar_lea.vmem %s816_s3, %s578_s14 }
  0x10   : > { %v679_v5 = vld [vmem:[%s746_s27 + $0x4] ss:$8 sps:$4 sm:$0xff]   ;;  %369 = vmatprep.subr.bf16.mxu0 %v697_v1  ;;  %644 = vmatprep.subr.bf16.mxu1 %v697_v1  ;;  %v677_v12 = vld [vmem:[%s746_s27] ss:$8 sps:$4 sm:$0xff]   ;;  %v683_v14 = vld [vmem:[%s746_s27 + $0x14] ss:$8 sps:$4 sm:$0xff]   ;;  %s792_s24 = scalar_lea.vmem %s817_s4, %s578_s14 }
  0x11   : > { %v682_v6 = vld [vmem:[%s746_s27 + $0x24] ss:$8 sps:$4 sm:$0xff]   ;;  %599 = vmatprep.mubr.msk.bf16.mxu0 %vm350_vm0, %v679_v5  ;;  %v680_v13 = vld [vmem:[%s746_s27 + $0x20] ss:$8 sps:$4 sm:$0xff]   ;;  %v685_v15 = vld [vmem:[%s746_s27 + $0x34] ss:$8 sps:$4 sm:$0xff]  }
  0x12   : > { %601 = vmatprep.mubr.msk.bf16.mxu1 %vm350_vm0, %v682_v6  ;;  %v687_v16 = vld [vmem:[%s746_s27 + $0x10] ss:$8 sps:$4 sm:$0xff]   ;;  %v623_v19 = vld [vmem:[%s218_s18] sm:$0xff]   ;;  %v638_v43 = vld [vmem:[%s218_s18 + $0x8] sm:$0xff]  }
  0x13   : > { %370 = vmatpush1.bf16.msra.mxu0 %v671_v4  ;;  %653 = vmatpush1.bf16.msra.mxu1 %v671_v4  ;;  %v688_v17 = vld [vmem:[%s746_s27 + $0x30] ss:$8 sps:$4 sm:$0xff]   ;;  %v624_v24 = vunpack.c.l.bf16 %v623_v19  ;;  %v625_v30 = vunpack.c.h.bf16 %v623_v19  ;;  %v628_v50 = vunpack.c.l.bf16 %v638_v43  ;;  %v629_v60 = vunpack.c.h.bf16 %v638_v43 }
  0x14   : > { %371 = vmatprep.subr.bf16.mxu0 %v697_v1  ;;  %645 = vmatprep.subr.bf16.mxu1 %v697_v1  ;;  %v639_v20 = vld [vmem:[%s218_s18 + $0x10] sm:$0xff]   ;;  %v640_v44 = vld [vmem:[%s218_s18 + $0x18] sm:$0xff]  }
  0x15   : > { %v632_v26 = vunpack.c.l.bf16 %v639_v20  ;;  %v633_v32 = vunpack.c.h.bf16 %v639_v20  ;;  %v636_v52 = vunpack.c.l.bf16 %v640_v44  ;;  %v637_v62 = vunpack.c.h.bf16 %v640_v44 }
  0x17   : > { %372 = vmatpush1.bf16.msra.mxu0 %v672_v7  ;;  %654 = vmatpush1.bf16.msra.mxu1 %v672_v7 }
  0x18   : > { %373 = vmatprep.subr.bf16.mxu0 %v697_v1  ;;  %646 = vmatprep.subr.bf16.mxu1 %v697_v1 }
  0x1b   : > { %374 = vmatpush1.bf16.msra.mxu0 %v673_v8  ;;  %655 = vmatpush1.bf16.msra.mxu1 %v673_v8 }
  0x1c   : > { %375 = vmatprep.subr.bf16.mxu0 %v697_v1  ;;  %647 = vmatprep.subr.bf16.mxu1 %v697_v1 }
  0x1f   : > { %376 = vmatpush1.bf16.msra.mxu0 %v674_v9  ;;  %656 = vmatpush1.bf16.msra.mxu1 %v674_v9 }
  0x20   : > { %377 = vmatprep.subr.bf16.mxu0 %v697_v1  ;;  %648 = vmatprep.subr.bf16.mxu1 %v697_v1 }
  0x23   : > { %378 = vmatpush1.bf16.msra.mxu0 %v675_v10  ;;  %657 = vmatpush1.bf16.msra.mxu1 %v675_v10 }
  0x24   : > { %379 = vmatprep.subr.bf16.mxu0 %v697_v1  ;;  %649 = vmatprep.subr.bf16.mxu1 %v697_v1 }
  0x27   : > { %380 = vmatpush1.bf16.msra.mxu0 %v676_v11  ;;  %658 = vmatpush1.bf16.msra.mxu1 %v676_v11 }
  0x2a   : > { %396 = vmatmul.mubr.bf16.vlgmr.msra.gmra.mrb[0].mxu0 %v677_v12  ;;  %412 = vmatmul.mubr.bf16.vlgmr.msra.gmra.mrb[0].mxu1 %v680_v13 }
  0x2b   : > { %600 = vmatprep.mubr.msk.bf16.mxu0 %vm350_vm0, %v683_v14  ;;  %602 = vmatprep.mubr.msk.bf16.mxu1 %vm350_vm0, %v685_v15 }
  0x32   : > { %404 = vmatmul.mubr.bf16.gmra.mrb[4].mxu0 %v687_v16  ;;  %420 = vmatmul.mubr.bf16.gmra.mrb[4].mxu1 %v688_v17 }
  0xfd   : > { %v397_v21 = vpop.f32.mrb[0].mxu0  ;;  %v413_v22 = vpop.f32.mrb[0].mxu1 }
  0xfe   : > { %v398_v23 = vadd.f32 %v581_v18, %v397_v21  ;;  %v414_v25 = vadd.f32 %v581_v18, %v413_v22  ;;  %v399_v27 = vpop.f32.mrb[1].mxu0  ;;  %v415_v28 = vpop.f32.mrb[1].mxu1 }
  0xff   : > { %v400_v29 = vpop.f32.mrb[2].mxu0  ;;  %v416_v31 = vpop.f32.mrb[2].mxu1 }
 0x100   : > { %v428_v33 = vmax.f32 %v398_v23, 0.0  ;;  %v432_v34 = vmax.f32 %v414_v25, 0.0  ;;  %v401_v35 = vadd.f32 %v581_v18, %v400_v29  ;;  %v417_v36 = vadd.f32 %v581_v18, %v416_v31  ;;  %v402_v37 = vpop.f32.mrb[3].mxu0  ;;  %v418_v38 = vpop.f32.mrb[3].mxu1 }
 0x102   : > { %v452_v39 = vadd.f32 %v624_v24, %v428_v33  ;;  %v456_v40 = vadd.f32 %v632_v26, %v432_v34  ;;  %v429_v41 = vmax.f32 %v401_v35, 0.0  ;;  %v433_v42 = vmax.f32 %v417_v36, 0.0 }
 0x104   : > { %v614_v45 = vpack.c.bf16 %v452_v39, %v452_v39  ;;  %v618_v46 = vpack.c.bf16 %v456_v40, %v456_v40  ;;  %v453_v47 = vadd.f32 %v625_v30, %v429_v41  ;;  %v457_v48 = vadd.f32 %v633_v32, %v433_v42 }
 0x105   : > { %v405_v49 = vpop.f32.mrb[4].mxu0  ;;  %v421_v51 = vpop.f32.mrb[4].mxu1 }
 0x106   : > { %493 = vst.msk [vmem:[%s792_s24] sm:$0xf] %vm492_vm1, %v614_v45  ;;  %497 = vst.msk [vmem:[%s792_s24 + $0x10] sm:$0xf] %vm492_vm1, %v618_v46  ;;  %v615_v53 = vpack.c.bf16 %v453_v47, %v453_v47  ;;  %v619_v54 = vpack.c.bf16 %v457_v48, %v457_v48  ;;  %v406_v55 = vadd.f32 %v581_v18, %v405_v49  ;;  %v407_v57 = vpop.f32.mrb[5].mxu0  ;;  %v423_v58 = vpop.f32.mrb[5].mxu1 }
 0x107   : > { %v422_v56 = vadd.f32 %v581_v18, %v421_v51  ;;  %v408_v59 = vpop.f32.mrb[6].mxu0  ;;  %v424_v61 = vpop.f32.mrb[6].mxu1 }
 0x108   : > { %494 = vst.msk [vmem:[%s792_s24 + $0x4] sm:$0xf] %vm492_vm1, %v615_v53  ;;  %498 = vst.msk [vmem:[%s792_s24 + $0x14] sm:$0xf] %vm492_vm1, %v619_v54  ;;  %v430_v63 = vmax.f32 %v406_v55, 0.0  ;;  %v409_v1 = vadd.f32 %v581_v18, %v408_v59  ;;  %v425_v2 = vadd.f32 %v581_v18, %v424_v61  ;;  %v410_v3 = vpop.f32.mrb[7].mxu0 }
 0x109   : > { %v434_v0 = vmax.f32 %v422_v56, 0.0  ;;  %v426_v4 = vpop.f32.mrb[7].mxu1 }
 0x10a   : > { %v454_v5 = vadd.f32 %v628_v50, %v430_v63  ;;  %v431_v7 = vmax.f32 %v409_v1, 0.0  ;;  %v435_v8 = vmax.f32 %v425_v2, 0.0 }
 0x10b   : > { %v458_v6 = vadd.f32 %v636_v52, %v434_v0 }
 0x10c   : > { %v616_v9 = vpack.c.bf16 %v454_v5, %v454_v5  ;;  %v455_v11 = vadd.f32 %v629_v60, %v431_v7  ;;  %v459_v12 = vadd.f32 %v637_v62, %v435_v8 }
 0x10d   : > { %v620_v10 = vpack.c.bf16 %v458_v6, %v458_v6 }
 0x10e   : > { %495 = vst.msk [vmem:[%s792_s24 + $0x8] sm:$0xf] %vm492_vm1, %v616_v9  ;;  %v617_v13 = vpack.c.bf16 %v455_v11, %v455_v11  ;;  %v621_v14 = vpack.c.bf16 %v459_v12, %v459_v12 }
 0x10f   : > { %499 = vst.msk [vmem:[%s792_s24 + $0x18] sm:$0xf] %vm492_vm1, %v620_v10 }
 0x110   : > { %496 = vst.msk [vmem:[%s792_s24 + $0xc] sm:$0xf] %vm492_vm1, %v617_v13  ;;  %500 = vst.msk [vmem:[%s792_s24 + $0x1c] sm:$0xf] %vm492_vm1, %v621_v14 }
 0x111 PF: > { %s14_s15 = sadd.s32 1, %s695_s15  }
 0x112   : > { %p11_p4 = scmp.ge.s32.totalorder %s14_s15, 4  }
 0x114   :  { %13 = sbr.rel (!%p11_p4) target bundleno = 1 (0x1), region = 69 }

// kernel: detector_forward.24
= control target key start
LH: loop header
LB: loop body
LE: loop exit
PB: predicated region body
PF: predicated region fallthrough
CT: control target
= control target key end

     0   :  { %s467_s12 = smov 0   ;;  %s518_s0 = inlined_call_operand.vmem [shape: bf16[32,144], index: 0, kind: input, shape index: {}]   ;;  %s519_s1 = inlined_call_operand.vmem [shape: bf16[144,64], index: 1, kind: input, shape index: {}]   ;;  %s520_s2 = inlined_call_operand.vmem [shape: f32[1,64], index: 2, kind: input, shape index: {}]   ;;  %s521_s3 = inlined_call_operand.vmem [shape: bf16[32,64], index: 3, kind: output, shape index: {}]  }
   0x1 LB: > { %s387_s13 = sadd.s32 4294967295, %s444_s12   ;;  %p391_p0 = scmp.ge.s32.totalorder %s444_s12, 1  ;;  %s444_s12 = sphi %s467_s12, %s13_s12  }
   0x2   : > { %p139_p1 = scmp.lt.s32.totalorder %s444_s12, 3 }
   0x4   : > { %p140_p2 = pnand %p391_p0, %p139_p1 }
   0x5   : > { %v426_v0 = vld [vmem:[%s519_s1] sm:$0xff] (!%p140_p2)   ;;  %v446_v1 = vmov (!%p140_p2), 0   ;;  %s392_s16 = sshll.u32 (!%p140_p2), %s387_s13, 1  ;;  %v427_v2 = vld [vmem:[%s519_s1 + $0x8] sm:$0xff] (!%p140_p2)   ;;  %v428_v3 = vld [vmem:[%s519_s1 + $0x10] sm:$0xff] (!%p140_p2)   ;;  %vm268_vm0 = vcmask (!%p140_p2), 130048   ;;  %v313_v12 = vlaneseq (!%p140_p2) }
   0x6   : > { %143 = sbr.rel (%p140_p2) target bundleno = 264 (0x108), region = 32  ;;  %272 = vmatprep.subr.bf16.mxu0 (!%p140_p2), %v446_v1  ;;  %p165_p3 = scmp.lt.s32.totalorder (!%p140_p2), %s392_s16, 3  ;;  %v429_v4 = vld [vmem:[%s519_s1 + $0x18] sm:$0xff] (!%p140_p2)   ;;  %v430_v6 = vld [vmem:[%s519_s1 + $0x20] sm:$0xff] (!%p140_p2)   ;;  %v431_v7 = vld [vmem:[%s519_s1 + $0x28] sm:$0xff] (!%p140_p2)   ;;  %vm328_vm2 = vcmask (!%p140_p2), 519168  }
   0x7   : > { %273 = vmatpush1.bf16.msra.mxu0 (!%p140_p2), %v426_v0  ;;  %v432_v8 = vld [vmem:[%s519_s1 + $0x30] sm:$0xff] (!%p140_p2)   ;;  %v433_v9 = vld [vmem:[%s519_s1 + $0x38] sm:$0xff] (!%p140_p2)   ;;  %v434_v10 = vld [vmem:[%s519_s1 + $0x40] sm:$0xff] (!%p140_p2)   ;;  %v314_v14 = vand.u32 (!%p140_p2), 127, %v313_v12 }
   0x8   : > { %274 = vmatprep.subr.bf16.mxu0 (!%p140_p2), %v446_v1  ;;  %v397_v13 = vld [vmem:[%s520_s2] ss:$0 sm:$0xff] (!%p140_p2) }
   0x9   : > { %vm315_vm1 = vcmp.ge.s32.totalorder (!%p140_p2), %v314_v14, 32 }
   0xb   : > { %275 = vmatpush1.bf16.msra.mxu0 (!%p140_p2), %v427_v2 }
   0xc   : > { %276 = vmatprep.subr.bf16.mxu0 (!%p140_p2), %v446_v1 }
   0xd   : > { %s523_s16 = smov (!%p165_p3, %s392_s16), 3 }
   0xe   : > { %s414_s21 = sshll.u32 %s523_s16, 3  ;;  %s396_s13 = sshll.u32 %s523_s16, 2 }
   0xf   : > { %s169_s24 = scalar_lea.vmem %s518_s0, %s414_s21  ;;  %277 = vmatpush1.bf16.msra.mxu0 %v428_v3  ;;  %s175_s17 = scalar_lea.vmem %s521_s3, %s396_s13 }
  0x10   : > { %v437_v5 = vld [vmem:[%s169_s24 + $0x4] ss:$8 sps:$4 sm:$0xff]   ;;  %278 = vmatprep.subr.bf16.mxu0 %v446_v1  ;;  %v435_v11 = vld [vmem:[%s169_s24] ss:$8 sps:$4 sm:$0xff]  }
  0x11   : > { %409 = vmatprep.mubr.msk.bf16.mxu0 %vm268_vm0, %v437_v5 }
  0x13   : > { %279 = vmatpush1.bf16.msra.mxu0 %v429_v4 }
  0x14   : > { %280 = vmatprep.subr.bf16.mxu0 %v446_v1 }
  0x17   : > { %281 = vmatpush1.bf16.msra.mxu0 %v430_v6 }
  0x18   : > { %282 = vmatprep.subr.bf16.mxu0 %v446_v1 }
  0x1b   : > { %283 = vmatpush1.bf16.msra.mxu0 %v431_v7 }
  0x1c   : > { %284 = vmatprep.subr.bf16.mxu0 %v446_v1 }
  0x1f   : > { %285 = vmatpush1.bf16.msra.mxu0 %v432_v8 }
  0x20   : > { %286 = vmatprep.subr.bf16.mxu0 %v446_v1 }
  0x23   : > { %287 = vmatpush1.bf16.msra.mxu0 %v433_v9 }
  0x24   : > { %288 = vmatprep.subr.bf16.mxu0 %v446_v1 }
  0x27   : > { %289 = vmatpush1.bf16.msra.mxu0 %v434_v10 }
  0x2a   : > { %305 = vmatmul.mubr.bf16.vlgmr.msra.gmra.mrb[0].mxu0 %v435_v11 }
  0xfd   : > { %v306_v15 = vpop.f32.mrb[0].mxu0 }
  0xfe   : > { %v307_v16 = vadd.f32 %v397_v13, %v306_v15  ;;  %v308_v17 = vpop.f32.mrb[1].mxu0 }
  0xff   : > { %v309_v18 = vpop.f32.mrb[2].mxu0 }
 0x100   : > { %v316_v19 = vmax.f32 %v307_v16, 0.0  ;;  %v310_v20 = vadd.f32 %v397_v13, %v309_v18  ;;  %v311_v21 = vpop.f32.mrb[3].mxu0 }
 0x102   : > { %v318_v22 = vsel %vm315_vm1, %v316_v19, %v307_v16  ;;  %v317_v23 = vmax.f32 %v310_v20, 0.0 }
 0x103   : > { %v415_v24 = vpack.c.bf16 %v318_v22, %v318_v22 }
 0x104   : > { %v319_v25 = vsel %vm315_vm1, %v317_v23, %v310_v20 }
 0x105   : > { %329 = vst.msk [vmem:[%s175_s17] sm:$0xf] %vm328_vm2, %v415_v24  ;;  %v416_v26 = vpack.c.bf16 %v319_v25, %v319_v25 }
 0x107   : > { %330 = vst.msk [vmem:[%s175_s17 + $0x4] sm:$0xf] %vm328_vm2, %v416_v26 }
 0x108 PF: > { %s13_s12 = sadd.s32 1, %s444_s12  }
 0x109   : > { %p10_p4 = scmp.ge.s32.totalorder %s13_s12, 4  }
 0x10b   :  { %12 = sbr.rel (!%p10_p4) target bundleno = 1 (0x1), region = 62 }

// kernel: detector_forward.25
= control target key start
LH: loop header
LB: loop body
LE: loop exit
PB: predicated region body
PF: predicated region fallthrough
CT: control target
= control target key end

     0   :  { %s637_s12 = smov 0   ;;  %s715_s0 = inlined_call_operand.vmem [shape: bf16[32,288], index: 0, kind: input, shape index: {}]   ;;  %s716_s1 = inlined_call_operand.vmem [shape: bf16[288,32], index: 1, kind: input, shape index: {}]   ;;  %s717_s2 = inlined_call_operand.vmem [shape: f32[1,32], index: 2, kind: input, shape index: {}]   ;;  %s718_s3 = inlined_call_operand.vmem [shape: bf16[32,32], index: 3, kind: output, shape index: {}]  }
   0x1 LB: > { %s503_s13 = sadd.s32 4294967295, %s613_s12   ;;  %p507_p0 = scmp.ge.s32.totalorder %s613_s12, 1  ;;  %s613_s12 = sphi %s637_s12, %s13_s12  }
   0x2   : > { %p139_p1 = scmp.lt.s32.totalorder %s613_s12, 3 }
   0x4   : > { %p140_p2 = pnand %p507_p0, %p139_p1 }
   0x5   : > { %v585_v0 = vld [vmem:[%s716_s1 + $0x40] sm:$0xff] (!%p140_p2)   ;;  %v615_v2 = vmov (!%p140_p2), 0.0   ;;  %s508_s18 = sshll.u32 (!%p140_p2), %s503_s13, 1  ;;  %v587_v3 = vld [vmem:[%s716_s1 + $0x48] sm:$0xff] (!%p140_p2)   ;;  %v589_v5 = vld [vmem:[%s716_s1 + $0x50] sm:$0xff] (!%p140_p2)   ;;  %vm616_vm0 = vmmov (!%p140_p2), 0  }
   0x6   : > { %143 = sbr.rel (%p140_p2) target bundleno = 264 (0x108), region = 32  ;;  %v586_v1 = vld [vmem:[%s716_s1] sm:$0xff] (!%p140_p2)   ;;  %566 = vmatprep.subr.bf16.mxu1 (!%p140_p2), %v615_v2  ;;  %541 = vmatprep.subr.bf16.mxu0 (!%p140_p2), %v585_v0  ;;  %p165_p3 = scmp.lt.s32.totalorder (!%p140_p2), %s508_s18, 3  ;;  %v588_v4 = vld [vmem:[%s716_s1 + $0x8] sm:$0xff] (!%p140_p2)   ;;  %v590_v6 = vld [vmem:[%s716_s1 + $0x10] sm:$0xff] (!%p140_p2)   ;;  %vm348_vm1 = vcmask (!%p140_p2), 261120  }
   0x7   : > { %542 = vmatpush3.bf16.msra.mxu0 (!%p140_p2), %v586_v1  ;;  %570 = vmatprep.mubr.msk.bf16.mxu1 (!%p140_p2), %vm616_vm0, %v615_v2  ;;  %v591_v7 = vld [vmem:[%s716_s1 + $0x58] sm:$0xff] (!%p140_p2)   ;;  %v593_v9 = vld [vmem:[%s716_s1 + $0x60] sm:$0xff] (!%p140_p2)   ;;  %v595_v12 = vld [vmem:[%s716_s1 + $0x68] sm:$0xff] (!%p140_p2)   ;;  %vm444_vm2 = vcmask (!%p140_p2), 257024  }
   0x8   : > { %543 = vmatprep.subr.bf16.mxu0 (!%p140_p2), %v587_v3  ;;  %v592_v8 = vld [vmem:[%s716_s1 + $0x18] sm:$0xff] (!%p140_p2)   ;;  %v599_v10 = vld [vmem:[%s716_s1 + $0x80] sm:$0xff] (!%p140_p2)   ;;  %v596_v13 = vld [vmem:[%s716_s1 + $0x28] sm:$0xff] (!%p140_p2)  }
   0x9   : > { %v594_v11 = vld [vmem:[%s716_s1 + $0x20] sm:$0xff] (!%p140_p2)   ;;  %567 = vmatpush3.bf16.msra.mxu1 (!%p140_p2), %v599_v10  ;;  %v605_v15 = vld [vmem:[%s716_s1 + $0x88] sm:$0xff] (!%p140_p2)   ;;  %v597_v16 = vld [vmem:[%s716_s1 + $0x70] sm:$0xff] (!%p140_p2)  }
   0xa   : > { %568 = vmatprep.subr.bf16.mxu1 (!%p140_p2), %v615_v2  ;;  %v598_v18 = vld [vmem:[%s716_s1 + $0x30] sm:$0xff] (!%p140_p2)   ;;  %v600_v19 = vld [vmem:[%s716_s1 + $0x78] sm:$0xff] (!%p140_p2)   ;;  %v512_v28 = vld [vmem:[%s717_s2] ss:$0 sm:$0xff] (!%p140_p2) }
   0xb   : > { %544 = vmatpush3.bf16.msra.mxu0 (!%p140_p2), %v588_v4  ;;  %v601_v20 = vld [vmem:[%s716_s1 + $0x38] sm:$0xff] (!%p140_p2)  }
   0xc   : > { %545 = vmatprep.subr.bf16.mxu0 (!%p140_p2), %v589_v5 }
   0xd   : > { %s720_s18 = smov (!%p165_p3, %s508_s18), 3  ;;  %569 = vmatpush3.bf16.msra.mxu1 %v605_v15 }
   0xe   : > { %s574_s4 = smul.u32 12, %s720_s18  ;;  %s511_s5 = sshll.u32 %s720_s18, 2 }
   0xf   : > { %546 = vmatpush3.bf16.msra.mxu0 %v590_v6  ;;  %s175_s8 = scalar_lea.vmem %s718_s3, %s511_s5 }
  0x10   : > { %547 = vmatprep.subr.bf16.mxu0 %v591_v7  ;;  %s169_s14 = scalar_lea.vmem %s715_s0, %s574_s4 }
  0x11   : > { %v604_v14 = vld [vmem:[%s169_s14 + $0x4] ss:$12 sps:$4 sm:$0xff]   ;;  %v606_v17 = vld [vmem:[%s169_s14 + $0x8] ss:$12 sps:$4 sm:$0xff]   ;;  %v602_v21 = vld [vmem:[%s169_s14] ss:$12 sps:$4 sm:$0xff]  }
  0x12   : > { %384 = vmatprep.mubr.bf16.mxu0 %v604_v14  ;;  %571 = vmatmul.mubr.msk.bf16.vlgmr.msra.gmra.mrb[0].mxu1 %vm348_vm1, %v606_v17 }
  0x13   : > { %548 = vmatpush3.bf16.msra.mxu0 %v592_v8 }
  0x14   : > { %549 = vmatprep.subr.bf16.mxu0 %v593_v9 }
  0x17   : > { %550 = vmatpush3.bf16.msra.mxu0 %v594_v11 }
  0x18   : > { %551 = vmatprep.subr.bf16.mxu0 %v595_v12 }
  0x1b   : > { %552 = vmatpush3.bf16.msra.mxu0 %v596_v13 }
  0x1c   : > { %553 = vmatprep.subr.bf16.mxu0 %v597_v16 }
  0x1f   : > { %554 = vmatpush3.bf16.msra.mxu0 %v598_v18 }
  0x20   : > { %555 = vmatprep.subr.bf16.mxu0 %v600_v19 }
  0x23   : > { %556 = vmatpush3.bf16.msra.mxu0 %v601_v20 }
  0x26   : > { %385 = vmatmul.mubr.bf16.vlgmr.msra.gmra.mrb[0].mxu0 %v602_v21 }
  0xe5   : > { %v427_v22 = vpop.f32.mrb[0].mxu1 }
  0xe6   : > { %v572_v23 = vpop.f32.mrb[1].mxu1 }
  0xe7   : > { %v430_v24 = vpop.f32.mrb[2].mxu1 }
  0xe8   : > { %v573_v25 = vpop.f32.mrb[3].mxu1 }
  0xf9   : > { %v557_v26 = vpop.f32.mrb[0].mxu0 }
  0xfa   : > { %v558_v27 = vpop.f32.mrb[1].mxu0 }
  0xfb   : > { %v559_v29 = vadd.f32 %v558_v27, %v557_v26  ;;  %v560_v30 = vpop.f32.mrb[2].mxu0 }
  0xfc   : > { %v561_v31 = vpop.f32.mrb[3].mxu0 }
  0xfd   : > { %v387_v32 = vadd.f32 %v559_v29, %v512_v28  ;;  %v562_v33 = vadd.f32 %v561_v31, %v560_v30 }
  0xff   : > { %v428_v34 = vadd.f32 %v427_v22, %v387_v32  ;;  %v390_v35 = vadd.f32 %v562_v33, %v512_v28 }
 0x101   : > { %v434_v36 = vmax.f32 %v428_v34, 0.0  ;;  %v431_v37 = vadd.f32 %v430_v24, %v390_v35 }
 0x103   : > { %v539_v38 = vpack.c.bf16 %v434_v36, %v434_v36  ;;  %v435_v39 = vmax.f32 %v431_v37, 0.0 }
 0x105   : > { %445 = vst.msk [vmem:[%s175_s8] sm:$0xf] %vm444_vm2, %v539_v38  ;;  %v540_v40 = vpack.c.bf16 %v435_v39, %v435_v39 }
 0x107   : > { %446 = vst.msk [vmem:[%s175_s8 + $0x4] sm:$0xf] %vm444_vm2, %v540_v40 }
 0x108 PF: > { %s13_s12 = sadd.s32 1, %s613_s12  }
 0x109   : > { %p10_p4 = scmp.ge.s32.totalorder %s13_s12, 4  }
 0x10b   :  { %12 = sbr.rel (!%p10_p4) target bundleno = 1 (0x1), region = 62 }

// kernel: detector_forward.26
= control target key start
LH: loop header
LB: loop body
LE: loop exit
PB: predicated region body
PF: predicated region fallthrough
CT: control target
= control target key end

     0   :  { %s715_s15 = smov 0   ;;  %s796_s0 = inlined_call_operand.vmem [shape: bf16[32,288], index: 0, kind: input, shape index: {}]   ;;  %s797_s1 = inlined_call_operand.vmem [shape: bf16[288,32], index: 1, kind: input, shape index: {}]   ;;  %s798_s2 = inlined_call_operand.vmem [shape: f32[1,32], index: 2, kind: input, shape index: {}]   ;;  %s799_s3 = inlined_call_operand.vmem [shape: bf16[32,32], index: 3, kind: input, shape index: {}]   ;;  %s800_s4 = inlined_call_operand.vmem [shape: bf16[32,32], index: 4, kind: output, shape index: {}]  }
   0x1 LB: > { %s570_s16 = sadd.s32 4294967295, %s686_s15   ;;  %p574_p0 = scmp.ge.s32.totalorder %s686_s15, 1  ;;  %s686_s15 = sphi %s715_s15, %s14_s15  }
   0x2   : > { %p175_p1 = scmp.lt.s32.totalorder %s686_s15, 3 }
   0x4   : > { %p176_p2 = pnand %p574_p0, %p175_p1 }
   0x5   : > { %v658_v0 = vld [vmem:[%s797_s1 + $0x40] sm:$0xff] (!%p176_p2)   ;;  %v688_v2 = vmov (!%p176_p2), 0.0   ;;  %s575_s21 = sshll.u32 (!%p176_p2), %s570_s16, 1  ;;  %v660_v3 = vld [vmem:[%s797_s1 + $0x48] sm:$0xff] (!%p176_p2)   ;;  %v662_v5 = vld [vmem:[%s797_s1 + $0x50] sm:$0xff] (!%p176_p2)   ;;  %vm689_vm0 = vmmov (!%p176_p2), 0  }
   0x6   : > { %179 = sbr.rel (%p176_p2) target bundleno = 266 (0x10a), region = 36  ;;  %v659_v1 = vld [vmem:[%s797_s1] sm:$0xff] (!%p176_p2)   ;;  %639 = vmatprep.subr.bf16.mxu1 (!%p176_p2), %v688_v2  ;;  %614 = vmatprep.subr.bf16.mxu0 (!%p176_p2), %v658_v0  ;;  %p208_p3 = scmp.lt.s32.totalorder (!%p176_p2), %s575_s21, 3  ;;  %v661_v4 = vld [vmem:[%s797_s1 + $0x8] sm:$0xff] (!%p176_p2)   ;;  %v663_v6 = vld [vmem:[%s797_s1 + $0x10] sm:$0xff] (!%p176_p2)   ;;  %vm397_vm1 = vcmask (!%p176_p2), 261120  }
   0x7   : > { %615 = vmatpush3.bf16.msra.mxu0 (!%p176_p2), %v659_v1  ;;  %643 = vmatprep.mubr.msk.bf16.mxu1 (!%p176_p2), %vm689_vm0, %v688_v2  ;;  %v664_v7 = vld [vmem:[%s797_s1 + $0x58] sm:$0xff] (!%p176_p2)   ;;  %v666_v9 = vld [vmem:[%s797_s1 + $0x60] sm:$0xff] (!%p176_p2)   ;;  %v668_v12 = vld [vmem:[%s797_s1 + $0x68] sm:$0xff] (!%p176_p2)   ;;  %vm499_vm2 = vcmask (!%p176_p2), 257024  }
   0x8   : > { %616 = vmatprep.subr.bf16.mxu0 (!%p176_p2), %v660_v3  ;;  %v665_v8 = vld [vmem:[%s797_s1 + $0x18] sm:$0xff] (!%p176_p2)   ;;  %v672_v10 = vld [vmem:[%s797_s1 + $0x80] sm:$0xff] (!%p176_p2)   ;;  %v669_v13 = vld [vmem:[%s797_s1 + $0x28] sm:$0xff] (!%p176_p2)  }
   0x9   : > { %v667_v11 = vld [vmem:[%s797_s1 + $0x20] sm:$0xff] (!%p176_p2)   ;;  %640 = vmatpush3.bf16.msra.mxu1 (!%p176_p2), %v672_v10  ;;  %v678_v15 = vld [vmem:[%s797_s1 + $0x88] sm:$0xff] (!%p176_p2)   ;;  %v670_v16 = vld [vmem:[%s797_s1 + $0x70] sm:$0xff] (!%p176_p2)  }
   0xa   : > { %641 = vmatprep.subr.bf16.mxu1 (!%p176_p2), %v688_v2  ;;  %v671_v18 = vld [vmem:[%s797_s1 + $0x30] sm:$0xff] (!%p176_p2)   ;;  %v673_v19 = vld [vmem:[%s797_s1 + $0x78] sm:$0xff] (!%p176_p2)   ;;  %v581_v28 = vld [vmem:[%s798_s2] ss:$0 sm:$0xff] (!%p176_p2) }
   0xb   : > { %617 = vmatpush3.bf16.msra.mxu0 (!%p176_p2), %v661_v4  ;;  %v674_v20 = vld [vmem:[%s797_s1 + $0x38] sm:$0xff] (!%p176_p2)  }
   0xc   : > { %618 = vmatprep.subr.bf16.mxu0 (!%p176_p2), %v662_v5 }
   0xd   : > { %s802_s21 = smov (!%p208_p3, %s575_s21), 3  ;;  %642 = vmatpush3.bf16.msra.mxu1 %v678_v15 }
   0xe   : > { %s647_s8 = smul.u32 12, %s802_s21 }
   0xf   : > { %619 = vmatpush3.bf16.msra.mxu0 %v663_v6 }
  0x10   : > { %620 = vmatprep.subr.bf16.mxu0 %v664_v7  ;;  %s212_s18 = scalar_lea.vmem %s796_s0, %s647_s8  ;;  %s578_s8 = sshll.u32 %s802_s21, 2 }
  0x11   : > { %v677_v14 = vld [vmem:[%s212_s18 + $0x4] ss:$12 sps:$4 sm:$0xff]   ;;  %v679_v17 = vld [vmem:[%s212_s18 + $0x8] ss:$12 sps:$4 sm:$0xff]   ;;  %v675_v21 = vld [vmem:[%s212_s18] ss:$12 sps:$4 sm:$0xff]   ;;  %s218_s11 = scalar_lea.vmem %s799_s3, %s578_s8  ;;  %s224_s16 = scalar_lea.vmem %s800_s4, %s578_s8 }
  0x12   : > { %433 = vmatprep.mubr.bf16.mxu0 %v677_v14  ;;  %644 = vmatmul.mubr.msk.bf16.vlgmr.msra.gmra.mrb[0].mxu1 %vm397_vm1, %v679_v17  ;;  %v611_v31 = vld [vmem:[%s218_s11] sm:$0xff]  }
  0x13   : > { %621 = vmatpush3.bf16.msra.mxu0 %v665_v8  ;;  %v612_v36 = vunpack.c.l.bf16 %v611_v31  ;;  %v613_v40 = vunpack.c.h.bf16 %v611_v31 }
  0x14   : > { %622 = vmatprep.subr.bf16.mxu0 %v666_v9 }
  0x17   : > { %623 = vmatpush3.bf16.msra.mxu0 %v667_v11 }
  0x18   : > { %624 = vmatprep.subr.bf16.mxu0 %v668_v12 }
  0x1b   : > { %625 = vmatpush3.bf16.msra.mxu0 %v669_v13 }
  0x1c   : > { %626 = vmatprep.subr.bf16.mxu0 %v670_v16 }
  0x1f   : > { %627 = vmatpush3.bf16.msra.mxu0 %v671_v18 }
  0x20   : > { %628 = vmatprep.subr.bf16.mxu0 %v673_v19 }
  0x23   : > { %629 = vmatpush3.bf16.msra.mxu0 %v674_v20 }
  0x26   : > { %434 = vmatmul.mubr.bf16.vlgmr.msra.gmra.mrb[0].mxu0 %v675_v21 }
  0xe5   : > { %v476_v22 = vpop.f32.mrb[0].mxu1 }
  0xe6   : > { %v645_v23 = vpop.f32.mrb[1].mxu1 }
  0xe7   : > { %v479_v24 = vpop.f32.mrb[2].mxu1 }
  0xe8   : > { %v646_v25 = vpop.f32.mrb[3].mxu1 }
  0xf9   : > { %v630_v26 = vpop.f32.mrb[0].mxu0 }
  0xfa   : > { %v631_v27 = vpop.f32.mrb[1].mxu0 }
  0xfb   : > { %v632_v29 = vadd.f32 %v631_v27, %v630_v26  ;;  %v633_v30 = vpop.f32.mrb[2].mxu0 }
  0xfc   : > { %v634_v32 = vpop.f32.mrb[3].mxu0 }
  0xfd   : > { %v436_v33 = vadd.f32 %v632_v29, %v581_v28  ;;  %v635_v34 = vadd.f32 %v634_v32, %v633_v30 }
  0xff   : > { %v477_v35 = vadd.f32 %v476_v22, %v436_v33  ;;  %v439_v37 = vadd.f32 %v635_v34, %v581_v28 }
 0x101   : > { %v483_v38 = vmax.f32 %v477_v35, 0.0  ;;  %v480_v39 = vadd.f32 %v479_v24, %v439_v37 }
 0x103   : > { %v489_v41 = vadd.f32 %v612_v36, %v483_v38  ;;  %v484_v42 = vmax.f32 %v480_v39, 0.0 }
 0x105   : > { %v608_v43 = vpack.c.bf16 %v489_v41, %v489_v41  ;;  %v490_v44 = vadd.f32 %v613_v40, %v484_v42 }
 0x107   : > { %500 = vst.msk [vmem:[%s224_s16] sm:$0xf] %vm499_vm2, %v608_v43  ;;  %v609_v45 = vpack.c.bf16 %v490_v44, %v490_v44 }
 0x109   : > { %501 = vst.msk [vmem:[%s224_s16 + $0x4] sm:$0xf] %vm499_vm2, %v609_v45 }
 0x10a PF: > { %s14_s15 = sadd.s32 1, %s686_s15  }
 0x10b   : > { %p11_p4 = scmp.ge.s32.totalorder %s14_s15, 4  }
 0x10d   :  { %13 = sbr.rel (!%p11_p4) target bundleno = 1 (0x1), region = 69 }

// kernel: detector_forward.27
= control target key start
LH: loop header
LB: loop body
LE: loop exit
PB: predicated region body
PF: predicated region fallthrough
CT: control target
= control target key end

     0   :  { %v352_v1 = vmov 0.0   ;;  %vm353_vm0 = vmmov 0   ;;  %vm178_vm1 = vcmask 261120   ;;  %v262_v27 = vlaneseq  ;;  %s440_s1 = inlined_call_operand.vmem [shape: bf16[288,128], index: 1, kind: input, shape index: {}]   ;;  %s441_s0 = inlined_call_operand.vmem [shape: bf16[8,288], index: 0, kind: input, shape index: {}]   ;;  %s442_s2 = inlined_call_operand.vmem [shape: f32[1,128], index: 2, kind: input, shape index: {}]   ;;  %s443_s3 = inlined_call_operand.vmem [shape: bf16[8,128], index: 3, kind: output, shape index: {}]  }
   0x1   :  { %v331_v0 = vld [vmem:[%s440_s1 + $0x40] sm:$0xff]   ;;  %321 = vmatprep.subr.bf16.mxu1 %v352_v1  ;;  %325 = vmatprep.mubr.msk.bf16.mxu1 %vm353_vm0, %v352_v1  ;;  %v333_v3 = vld [vmem:[%s440_s1 + $0x48] sm:$0xff]   ;;  %v335_v5 = vld [vmem:[%s440_s1 + $0x50] sm:$0xff]  }
   0x2   :  { %v332_v2 = vld [vmem:[%s440_s1] sm:$0xff]   ;;  %296 = vmatprep.subr.bf16.mxu0 %v331_v0  ;;  %v334_v4 = vld [vmem:[%s440_s1 + $0x8] sm:$0xff]   ;;  %v336_v6 = vld [vmem:[%s440_s1 + $0x10] sm:$0xff]   ;;  %v263_v33 = vand.u32 127, %v262_v27 }
   0x3   :  { %297 = vmatpush3.bf16.msra.mxu0 %v332_v2  ;;  %v337_v7 = vld [vmem:[%s440_s1 + $0x58] sm:$0xff]   ;;  %v339_v9 = vld [vmem:[%s440_s1 + $0x60] sm:$0xff]   ;;  %v341_v12 = vld [vmem:[%s440_s1 + $0x68] sm:$0xff]  }
   0x4   :  { %298 = vmatprep.subr.bf16.mxu0 %v333_v3  ;;  %v338_v8 = vld [vmem:[%s440_s1 + $0x18] sm:$0xff]   ;;  %v345_v10 = vld [vmem:[%s440_s1 + $0x80] sm:$0xff]   ;;  %v351_v15 = vld [vmem:[%s440_s1 + $0x88] sm:$0xff]   ;;  %vm264_vm2 = vcmp.ge.s32.totalorder %v263_v33, 64 }
   0x5   :  { %v340_v11 = vld [vmem:[%s440_s1 + $0x20] sm:$0xff]   ;;  %322 = vmatpush3.bf16.msra.mxu1 %v345_v10  ;;  %v342_v16 = vld [vmem:[%s440_s1 + $0x28] sm:$0xff]   ;;  %v343_v17 = vld [vmem:[%s440_s1 + $0x70] sm:$0xff]  }
   0x6   :  { %323 = vmatprep.subr.bf16.mxu1 %v352_v1  ;;  %v15_v13 = vld [vmem:[%s441_s0] sm:$0xff]  ;;  %v350_v18 = vld [vmem:[%s441_s0 + $0x8] ss:$0 sps:$4 sm:$0xff]   ;;  %v344_v19 = vld [vmem:[%s440_s1 + $0x30] sm:$0xff]  }
   0x7   :  { %299 = vmatpush3.bf16.msra.mxu0 %v334_v4  ;;  %v275_v14 = vcombine.high %v15_v13, %v15_v13  ;;  %v346_v20 = vld [vmem:[%s440_s1 + $0x78] sm:$0xff]   ;;  %v274_v22 = vcombine.low %v15_v13, %v15_v13  ;;  %v273_v30 = vld [vmem:[%s442_s2] ss:$0 sm:$0xff] }
   0x8   :  { %300 = vmatprep.subr.bf16.mxu0 %v335_v5  ;;  %v347_v21 = vld [vmem:[%s440_s1 + $0x38] sm:$0xff]  }
   0x9   :  { %214 = vmatprep.mubr.bf16.mxu0 %v275_v14  ;;  %324 = vmatpush3.bf16.msra.mxu1 %v351_v15 }
   0xb   :  { %301 = vmatpush3.bf16.msra.mxu0 %v336_v6 }
   0xc   :  { %302 = vmatprep.subr.bf16.mxu0 %v337_v7  ;;  %326 = vmatmul.mubr.msk.bf16.vlgmr.msra.gmra.mrb[0].mxu1 %vm178_vm1, %v350_v18 }
   0xf   :  { %303 = vmatpush3.bf16.msra.mxu0 %v338_v8 }
  0x10   :  { %304 = vmatprep.subr.bf16.mxu0 %v339_v9 }
  0x13   :  { %305 = vmatpush3.bf16.msra.mxu0 %v340_v11 }
  0x14   :  { %306 = vmatprep.subr.bf16.mxu0 %v341_v12 }
  0x17   :  { %307 = vmatpush3.bf16.msra.mxu0 %v342_v16 }
  0x18   :  { %308 = vmatprep.subr.bf16.mxu0 %v343_v17 }
  0x1b   :  { %309 = vmatpush3.bf16.msra.mxu0 %v344_v19 }
  0x1c   :  { %310 = vmatprep.subr.bf16.mxu0 %v346_v20 }
  0x1f   :  { %311 = vmatpush3.bf16.msra.mxu0 %v347_v21 }
  0x22   :  { %215 = vmatmul.mubr.bf16.vlgmr.msra.gmra.mrb[0].mxu0 %v274_v22 }
  0xdf   :  { %v256_v23 = vpop.f32.mrb[0].mxu1 }
  0xe0   :  { %v327_v24 = vpop.f32.mrb[1].mxu1 }
  0xe1   :  { %v259_v25 = vpop.f32.mrb[2].mxu1 }
  0xe2   :  { %v328_v26 = vpop.f32.mrb[3].mxu1 }
  0xf5   :  { %v312_v28 = vpop.f32.mrb[0].mxu0 }
  0xf6   :  { %v313_v29 = vpop.f32.mrb[1].mxu0 }
  0xf7   :  { %v314_v31 = vadd.f32 %v313_v29, %v312_v28  ;;  %v315_v32 = vpop.f32.mrb[2].mxu0 }
  0xf8   :  { %v316_v34 = vpop.f32.mrb[3].mxu0 }
  0xf9   :  { %v217_v35 = vadd.f32 %v314_v31, %v273_v30 }
  0xfb   :  { %v257_v36 = vadd.f32 %v256_v23, %v217_v35 }
  0xfd   :  { %v265_v37 = vmax.f32 %v257_v36, 0.0 }
  0xff   :  { %v266_v38 = vsel %vm264_vm2, %v265_v37, %v257_v36 }
 0x100   :  { %v267_v39 = vpack.c.bf16 %v266_v38, %v266_v38 }
 0x102   :  { %268 = vst [vmem:[%s443_s3] sm:$0xf] %v267_v39 }

// kernel: detector_forward.29
= control target key start
LH: loop header
LB: loop body
LE: loop exit
PB: predicated region body
PF: predicated region fallthrough
CT: control target
= control target key end

     0   :  { %v615_v35 = vmov 0.0   ;;  %vm616_vm0 = vmmov 0   ;;  %vm333_vm1 = vcmask 523264   ;;  %vm462_vm2 = vcmask 519168   ;;  %s768_s1 = inlined_call_operand.vmem [shape: bf16[576,64], index: 1, kind: input, shape index: {}]   ;;  %s769_s0 = inlined_call_operand.vmem [shape: bf16[8,576], index: 0, kind: input, shape index: {}]   ;;  %s770_s2 = inlined_call_operand.vmem [shape: f32[1,64], index: 2, kind: input, shape index: {}]   ;;  %s771_s3 = inlined_call_operand.vmem [shape: bf16[8,64], index: 3, kind: input, shape index: {}]   ;;  %s772_s4 = inlined_call_operand.vmem [shape: bf16[8,64], index: 4, kind: output, shape index: {}]  }
   0x1   :  { %v574_v0 = vld [vmem:[%s768_s1 + $0x40] sm:$0xff]   ;;  %v578_v4 = vld [vmem:[%s768_s1 + $0x48] sm:$0xff]   ;;  %v582_v8 = vld [vmem:[%s768_s1 + $0x50] sm:$0xff]  }
   0x2   :  { %v575_v1 = vld [vmem:[%s768_s1] sm:$0xff]   ;;  %511 = vmatprep.subr.bf16.mxu0 %v574_v0  ;;  %v579_v5 = vld [vmem:[%s768_s1 + $0x8] sm:$0xff]   ;;  %v583_v9 = vld [vmem:[%s768_s1 + $0x10] sm:$0xff]  }
   0x3   :  { %v576_v2 = vld [vmem:[%s768_s1 + $0xc0] sm:$0xff]   ;;  %512 = vmatpush3.bf16.msra.mxu0 %v575_v1  ;;  %v580_v6 = vld [vmem:[%s768_s1 + $0xc8] sm:$0xff]   ;;  %v584_v10 = vld [vmem:[%s768_s1 + $0xd0] sm:$0xff]  }
   0x4   :  { %v577_v3 = vld [vmem:[%s768_s1 + $0x80] sm:$0xff]   ;;  %533 = vmatprep.subr.bf16.mxu1 %v576_v2  ;;  %513 = vmatprep.subr.bf16.mxu0 %v578_v4  ;;  %v581_v7 = vld [vmem:[%s768_s1 + $0x88] sm:$0xff]   ;;  %v585_v11 = vld [vmem:[%s768_s1 + $0x90] sm:$0xff]  }
   0x5   :  { %534 = vmatpush3.bf16.msra.mxu1 %v577_v3  ;;  %v586_v12 = vld [vmem:[%s768_s1 + $0x58] sm:$0xff]   ;;  %v590_v16 = vld [vmem:[%s768_s1 + $0x60] sm:$0xff]   ;;  %v594_v20 = vld [vmem:[%s768_s1 + $0x68] sm:$0xff]  }
   0x6   :  { %535 = vmatprep.subr.bf16.mxu1 %v580_v6  ;;  %v587_v13 = vld [vmem:[%s768_s1 + $0x18] sm:$0xff]   ;;  %v591_v17 = vld [vmem:[%s768_s1 + $0x20] sm:$0xff]   ;;  %v595_v21 = vld [vmem:[%s768_s1 + $0x28] sm:$0xff]  }
   0x7   :  { %514 = vmatpush3.bf16.msra.mxu0 %v579_v5  ;;  %v588_v14 = vld [vmem:[%s768_s1 + $0xd8] sm:$0xff]   ;;  %v592_v18 = vld [vmem:[%s768_s1 + $0xe0] sm:$0xff]   ;;  %v596_v22 = vld [vmem:[%s768_s1 + $0xe8] sm:$0xff]  }
   0x8   :  { %515 = vmatprep.subr.bf16.mxu0 %v582_v8  ;;  %v589_v15 = vld [vmem:[%s768_s1 + $0x98] sm:$0xff]   ;;  %v593_v19 = vld [vmem:[%s768_s1 + $0xa0] sm:$0xff]   ;;  %v597_v23 = vld [vmem:[%s768_s1 + $0xa8] sm:$0xff]  }
   0x9   :  { %536 = vmatpush3.bf16.msra.mxu1 %v581_v7  ;;  %v598_v24 = vld [vmem:[%s768_s1 + $0x70] sm:$0xff]   ;;  %v602_v28 = vld [vmem:[%s768_s1 + $0x78] sm:$0xff]   ;;  %v18_v31 = vld [vmem:[%s769_s0] sm:$0xff] }
   0xa   :  { %537 = vmatprep.subr.bf16.mxu1 %v584_v10  ;;  %v599_v25 = vld [vmem:[%s768_s1 + $0x30] sm:$0xff]   ;;  %v603_v29 = vld [vmem:[%s768_s1 + $0x38] sm:$0xff]   ;;  %v469_v32 = vcombine.low %v18_v31, %v18_v31  ;;  %v470_v33 = vcombine.high %v18_v31, %v18_v31  ;;  %v19_v36 = vld [vmem:[%s769_s0 + $0x8] sm:$0xff] }
   0xb   :  { %516 = vmatpush3.bf16.msra.mxu0 %v583_v9  ;;  %v600_v26 = vld [vmem:[%s768_s1 + $0xf0] sm:$0xff]   ;;  %v604_v30 = vld [vmem:[%s768_s1 + $0xf8] sm:$0xff]   ;;  %v471_v37 = vcombine.low %v19_v36, %v19_v36  ;;  %v472_v38 = vcombine.high %v19_v36, %v19_v36  ;;  %v611_v39 = vld [vmem:[%s768_s1 + $0x100] sm:$0xff]  }
   0xc   :  { %517 = vmatprep.subr.bf16.mxu0 %v586_v12  ;;  %v601_v27 = vld [vmem:[%s768_s1 + $0xb0] sm:$0xff]   ;;  %v608_v34 = vld [vmem:[%s768_s1 + $0xb8] sm:$0xff]   ;;  %369 = vmatprep.mubr.bf16.mxu0 %v470_v33  ;;  %v612_v40 = vld [vmem:[%s768_s1 + $0x108] sm:$0xff]  }
   0xd   :  { %538 = vmatpush3.bf16.msra.mxu1 %v585_v11  ;;  %409 = vmatprep.mubr.bf16.mxu1 %v472_v38  ;;  %v613_v41 = vld [vmem:[%s768_s1 + $0x110] sm:$0xff]   ;;  %v614_v42 = vld [vmem:[%s768_s1 + $0x118] sm:$0xff]   ;;  %v468_v45 = vld [vmem:[%s770_s2] ss:$0 sm:$0xff] }
   0xe   :  { %539 = vmatprep.subr.bf16.mxu1 %v588_v14  ;;  %v607_v43 = vld [vmem:[%s769_s0 + $0x10] ss:$0 sps:$4 sm:$0xff]   ;;  %v458_v57 = vld [vmem:[%s771_s3] sm:$0xf] }
   0xf   :  { %518 = vmatpush3.bf16.msra.mxu0 %v587_v13  ;;  %v459_v60 = vunpack.c.l.bf16 %v458_v57 }
  0x10   :  { %519 = vmatprep.subr.bf16.mxu0 %v590_v16 }
  0x11   :  { %540 = vmatpush3.bf16.msra.mxu1 %v589_v15 }
  0x12   :  { %541 = vmatprep.subr.bf16.mxu1 %v592_v18 }
  0x13   :  { %520 = vmatpush3.bf16.msra.mxu0 %v591_v17 }
  0x14   :  { %521 = vmatprep.subr.bf16.mxu0 %v594_v20 }
  0x15   :  { %542 = vmatpush3.bf16.msra.mxu1 %v593_v19 }
  0x16   :  { %543 = vmatprep.subr.bf16.mxu1 %v596_v22 }
  0x17   :  { %522 = vmatpush3.bf16.msra.mxu0 %v595_v21 }
  0x18   :  { %523 = vmatprep.subr.bf16.mxu0 %v598_v24 }
  0x19   :  { %544 = vmatpush3.bf16.msra.mxu1 %v597_v23 }
  0x1a   :  { %545 = vmatprep.subr.bf16.mxu1 %v600_v26 }
  0x1b   :  { %524 = vmatpush3.bf16.msra.mxu0 %v599_v25 }
  0x1c   :  { %525 = vmatprep.subr.bf16.mxu0 %v602_v28 }
  0x1d   :  { %546 = vmatpush3.bf16.msra.mxu1 %v601_v27 }
  0x1e   :  { %547 = vmatprep.subr.bf16.mxu1 %v604_v30 }
  0x1f   :  { %526 = vmatpush3.bf16.msra.mxu0 %v603_v29 }
  0x20   :  { %560 = vmatprep.subr.bf16.mxu0 %v615_v35 }
  0x21   :  { %548 = vmatpush3.bf16.msra.mxu1 %v608_v34 }
  0x22   :  { %370 = vmatmul.mubr.bf16.vlgmr.msra.gmra.mrb[0].mxu0 %v469_v32 }
  0x23   :  { %561 = vmatpush3.bf16.msra.mxu0 %v611_v39  ;;  %568 = vmatprep.mubr.msk.bf16.mxu0 %vm616_vm0, %v615_v35 }
  0x24   :  { %410 = vmatmul.mubr.bf16.vlgmr.msra.gmra.mrb[0].mxu1 %v471_v37  ;;  %562 = vmatprep.subr.bf16.mxu0 %v615_v35 }
  0x27   :  { %563 = vmatpush3.bf16.msra.mxu0 %v612_v40 }
  0x28   :  { %564 = vmatprep.subr.bf16.mxu0 %v615_v35 }
  0x2b   :  { %565 = vmatpush3.bf16.msra.mxu0 %v613_v41 }
  0x2c   :  { %566 = vmatprep.subr.bf16.mxu0 %v615_v35 }
  0x2f   :  { %567 = vmatpush3.bf16.msra.mxu0 %v614_v42 }
  0x32   :  { %569 = vmatmul.mubr.msk.bf16.vlgmr.msra.gmra.mrb[4].mxu0 %vm333_vm1, %v607_v43 }
  0xf5   :  { %v527_v44 = vpop.f32.mrb[0].mxu0 }
  0xf6   :  { %v528_v46 = vpop.f32.mrb[1].mxu0 }
  0xf7   :  { %v529_v47 = vadd.f32 %v528_v46, %v527_v44  ;;  %v530_v48 = vpop.f32.mrb[2].mxu0  ;;  %v549_v49 = vpop.f32.mrb[0].mxu1 }
  0xf8   :  { %v531_v50 = vpop.f32.mrb[3].mxu0  ;;  %v550_v51 = vpop.f32.mrb[1].mxu1 }
  0xf9   :  { %v372_v52 = vadd.f32 %v529_v47, %v468_v45  ;;  %v551_v53 = vadd.f32 %v550_v51, %v549_v49  ;;  %v552_v54 = vpop.f32.mrb[2].mxu1 }
  0xfa   :  { %v553_v55 = vpop.f32.mrb[3].mxu1 }
  0xfb   :  { %v412_v56 = vadd.f32 %v551_v53, %v372_v52 }
 0x105   :  { %v451_v58 = vpop.f32.mrb[4].mxu0 }
 0x106   :  { %v452_v59 = vadd.f32 %v451_v58, %v412_v56  ;;  %v570_v61 = vpop.f32.mrb[5].mxu0 }
 0x107   :  { %v454_v62 = vpop.f32.mrb[6].mxu0 }
 0x108   :  { %v457_v63 = vmax.f32 %v452_v59, 0.0  ;;  %v571_v0 = vpop.f32.mrb[7].mxu0 }
 0x10a   :  { %v460_v1 = vadd.f32 %v459_v60, %v457_v63 }
 0x10c   :  { %v461_v2 = vpack.c.bf16 %v460_v1, %v460_v1 }
 0x10e   :  { %463 = vst.msk [vmem:[%s772_s4] sm:$0xf] %vm462_vm2, %v461_v2 }

// kernel: detector_forward.28
= control target key start
LH: loop header
LB: loop body
LE: loop exit
PB: predicated region body
PF: predicated region fallthrough
CT: control target
= control target key end

     0   :  { %v609_v35 = vmov 0.0   ;;  %vm610_vm0 = vmmov 0   ;;  %vm330_vm1 = vcmask 523264   ;;  %vm456_vm2 = vcmask 519168   ;;  %s754_s1 = inlined_call_operand.vmem [shape: bf16[576,64], index: 1, kind: input, shape index: {}]   ;;  %s755_s0 = inlined_call_operand.vmem [shape: bf16[8,576], index: 0, kind: input, shape index: {}]   ;;  %s756_s2 = inlined_call_operand.vmem [shape: f32[1,64], index: 2, kind: input, shape index: {}]   ;;  %s757_s3 = inlined_call_operand.vmem [shape: bf16[8,64], index: 3, kind: output, shape index: {}]  }
   0x1   :  { %v568_v0 = vld [vmem:[%s754_s1 + $0x40] sm:$0xff]   ;;  %v572_v4 = vld [vmem:[%s754_s1 + $0x48] sm:$0xff]   ;;  %v576_v8 = vld [vmem:[%s754_s1 + $0x50] sm:$0xff]  }
   0x2   :  { %v569_v1 = vld [vmem:[%s754_s1] sm:$0xff]   ;;  %505 = vmatprep.subr.bf16.mxu0 %v568_v0  ;;  %v573_v5 = vld [vmem:[%s754_s1 + $0x8] sm:$0xff]   ;;  %v577_v9 = vld [vmem:[%s754_s1 + $0x10] sm:$0xff]  }
   0x3   :  { %v570_v2 = vld [vmem:[%s754_s1 + $0xc0] sm:$0xff]   ;;  %506 = vmatpush3.bf16.msra.mxu0 %v569_v1  ;;  %v574_v6 = vld [vmem:[%s754_s1 + $0xc8] sm:$0xff]   ;;  %v578_v10 = vld [vmem:[%s754_s1 + $0xd0] sm:$0xff]  }
   0x4   :  { %v571_v3 = vld [vmem:[%s754_s1 + $0x80] sm:$0xff]   ;;  %527 = vmatprep.subr.bf16.mxu1 %v570_v2  ;;  %507 = vmatprep.subr.bf16.mxu0 %v572_v4  ;;  %v575_v7 = vld [vmem:[%s754_s1 + $0x88] sm:$0xff]   ;;  %v579_v11 = vld [vmem:[%s754_s1 + $0x90] sm:$0xff]  }
   0x5   :  { %528 = vmatpush3.bf16.msra.mxu1 %v571_v3  ;;  %v580_v12 = vld [vmem:[%s754_s1 + $0x58] sm:$0xff]   ;;  %v584_v16 = vld [vmem:[%s754_s1 + $0x60] sm:$0xff]   ;;  %v588_v20 = vld [vmem:[%s754_s1 + $0x68] sm:$0xff]  }
   0x6   :  { %529 = vmatprep.subr.bf16.mxu1 %v574_v6  ;;  %v581_v13 = vld [vmem:[%s754_s1 + $0x18] sm:$0xff]   ;;  %v585_v17 = vld [vmem:[%s754_s1 + $0x20] sm:$0xff]   ;;  %v589_v21 = vld [vmem:[%s754_s1 + $0x28] sm:$0xff]  }
   0x7   :  { %508 = vmatpush3.bf16.msra.mxu0 %v573_v5  ;;  %v582_v14 = vld [vmem:[%s754_s1 + $0xd8] sm:$0xff]   ;;  %v586_v18 = vld [vmem:[%s754_s1 + $0xe0] sm:$0xff]   ;;  %v590_v22 = vld [vmem:[%s754_s1 + $0xe8] sm:$0xff]  }
   0x8   :  { %509 = vmatprep.subr.bf16.mxu0 %v576_v8  ;;  %v583_v15 = vld [vmem:[%s754_s1 + $0x98] sm:$0xff]   ;;  %v587_v19 = vld [vmem:[%s754_s1 + $0xa0] sm:$0xff]   ;;  %v591_v23 = vld [vmem:[%s754_s1 + $0xa8] sm:$0xff]  }
   0x9   :  { %530 = vmatpush3.bf16.msra.mxu1 %v575_v7  ;;  %v592_v24 = vld [vmem:[%s754_s1 + $0x70] sm:$0xff]   ;;  %v596_v28 = vld [vmem:[%s754_s1 + $0x78] sm:$0xff]   ;;  %v15_v31 = vld [vmem:[%s755_s0] sm:$0xff] }
   0xa   :  { %531 = vmatprep.subr.bf16.mxu1 %v578_v10  ;;  %v593_v25 = vld [vmem:[%s754_s1 + $0x30] sm:$0xff]   ;;  %v597_v29 = vld [vmem:[%s754_s1 + $0x38] sm:$0xff]   ;;  %v463_v32 = vcombine.low %v15_v31, %v15_v31  ;;  %v464_v33 = vcombine.high %v15_v31, %v15_v31  ;;  %v16_v36 = vld [vmem:[%s755_s0 + $0x8] sm:$0xff] }
   0xb   :  { %510 = vmatpush3.bf16.msra.mxu0 %v577_v9  ;;  %v594_v26 = vld [vmem:[%s754_s1 + $0xf0] sm:$0xff]   ;;  %v598_v30 = vld [vmem:[%s754_s1 + $0xf8] sm:$0xff]   ;;  %v465_v37 = vcombine.low %v16_v36, %v16_v36  ;;  %v466_v38 = vcombine.high %v16_v36, %v16_v36  ;;  %v605_v39 = vld [vmem:[%s754_s1 + $0x100] sm:$0xff]  }
   0xc   :  { %511 = vmatprep.subr.bf16.mxu0 %v580_v12  ;;  %v595_v27 = vld [vmem:[%s754_s1 + $0xb0] sm:$0xff]   ;;  %v602_v34 = vld [vmem:[%s754_s1 + $0xb8] sm:$0xff]   ;;  %366 = vmatprep.mubr.bf16.mxu0 %v464_v33  ;;  %v606_v40 = vld [vmem:[%s754_s1 + $0x108] sm:$0xff]  }
   0xd   :  { %532 = vmatpush3.bf16.msra.mxu1 %v579_v11  ;;  %406 = vmatprep.mubr.bf16.mxu1 %v466_v38  ;;  %v607_v41 = vld [vmem:[%s754_s1 + $0x110] sm:$0xff]   ;;  %v608_v42 = vld [vmem:[%s754_s1 + $0x118] sm:$0xff]   ;;  %v462_v45 = vld [vmem:[%s756_s2] ss:$0 sm:$0xff] }
   0xe   :  { %533 = vmatprep.subr.bf16.mxu1 %v582_v14  ;;  %v601_v43 = vld [vmem:[%s755_s0 + $0x10] ss:$0 sps:$4 sm:$0xff]  }
   0xf   :  { %512 = vmatpush3.bf16.msra.mxu0 %v581_v13 }
  0x10   :  { %513 = vmatprep.subr.bf16.mxu0 %v584_v16 }
  0x11   :  { %534 = vmatpush3.bf16.msra.mxu1 %v583_v15 }
  0x12   :  { %535 = vmatprep.subr.bf16.mxu1 %v586_v18 }
  0x13   :  { %514 = vmatpush3.bf16.msra.mxu0 %v585_v17 }
  0x14   :  { %515 = vmatprep.subr.bf16.mxu0 %v588_v20 }
  0x15   :  { %536 = vmatpush3.bf16.msra.mxu1 %v587_v19 }
  0x16   :  { %537 = vmatprep.subr.bf16.mxu1 %v590_v22 }
  0x17   :  { %516 = vmatpush3.bf16.msra.mxu0 %v589_v21 }
  0x18   :  { %517 = vmatprep.subr.bf16.mxu0 %v592_v24 }
  0x19   :  { %538 = vmatpush3.bf16.msra.mxu1 %v591_v23 }
  0x1a   :  { %539 = vmatprep.subr.bf16.mxu1 %v594_v26 }
  0x1b   :  { %518 = vmatpush3.bf16.msra.mxu0 %v593_v25 }
  0x1c   :  { %519 = vmatprep.subr.bf16.mxu0 %v596_v28 }
  0x1d   :  { %540 = vmatpush3.bf16.msra.mxu1 %v595_v27 }
  0x1e   :  { %541 = vmatprep.subr.bf16.mxu1 %v598_v30 }
  0x1f   :  { %520 = vmatpush3.bf16.msra.mxu0 %v597_v29 }
  0x20   :  { %554 = vmatprep.subr.bf16.mxu0 %v609_v35 }
  0x21   :  { %542 = vmatpush3.bf16.msra.mxu1 %v602_v34 }
  0x22   :  { %367 = vmatmul.mubr.bf16.vlgmr.msra.gmra.mrb[0].mxu0 %v463_v32 }
  0x23   :  { %555 = vmatpush3.bf16.msra.mxu0 %v605_v39  ;;  %562 = vmatprep.mubr.msk.bf16.mxu0 %vm610_vm0, %v609_v35 }
  0x24   :  { %407 = vmatmul.mubr.bf16.vlgmr.msra.gmra.mrb[0].mxu1 %v465_v37  ;;  %556 = vmatprep.subr.bf16.mxu0 %v609_v35 }
  0x27   :  { %557 = vmatpush3.bf16.msra.mxu0 %v606_v40 }
  0x28   :  { %558 = vmatprep.subr.bf16.mxu0 %v609_v35 }
  0x2b   :  { %559 = vmatpush3.bf16.msra.mxu0 %v607_v41 }
  0x2c   :  { %560 = vmatprep.subr.bf16.mxu0 %v609_v35 }
  0x2f   :  { %561 = vmatpush3.bf16.msra.mxu0 %v608_v42 }
  0x32   :  { %563 = vmatmul.mubr.msk.bf16.vlgmr.msra.gmra.mrb[4].mxu0 %vm330_vm1, %v601_v43 }
  0xf5   :  { %v521_v44 = vpop.f32.mrb[0].mxu0 }
  0xf6   :  { %v522_v46 = vpop.f32.mrb[1].mxu0 }
  0xf7   :  { %v523_v47 = vadd.f32 %v522_v46, %v521_v44  ;;  %v524_v48 = vpop.f32.mrb[2].mxu0  ;;  %v543_v49 = vpop.f32.mrb[0].mxu1 }
  0xf8   :  { %v525_v50 = vpop.f32.mrb[3].mxu0  ;;  %v544_v51 = vpop.f32.mrb[1].mxu1 }
  0xf9   :  { %v369_v52 = vadd.f32 %v523_v47, %v462_v45  ;;  %v545_v53 = vadd.f32 %v544_v51, %v543_v49  ;;  %v546_v54 = vpop.f32.mrb[2].mxu1 }
  0xfa   :  { %v547_v55 = vpop.f32.mrb[3].mxu1 }
  0xfb   :  { %v409_v56 = vadd.f32 %v545_v53, %v369_v52 }
 0x105   :  { %v448_v57 = vpop.f32.mrb[4].mxu0 }
 0x106   :  { %v449_v58 = vadd.f32 %v448_v57, %v409_v56  ;;  %v564_v59 = vpop.f32.mrb[5].mxu0 }
 0x107   :  { %v451_v60 = vpop.f32.mrb[6].mxu0 }
 0x108   :  { %v454_v61 = vmax.f32 %v449_v58, 0.0  ;;  %v565_v62 = vpop.f32.mrb[7].mxu0 }
 0x10a   :  { %v455_v63 = vpack.c.bf16 %v454_v61, %v454_v61 }
 0x10c   :  { %457 = vst.msk [vmem:[%s757_s3] sm:$0xf] %vm456_vm2, %v455_v63 }

// kernel: detector_forward.30
= control target key start
LH: loop header
LB: loop body
LE: loop exit
PB: predicated region body
PF: predicated region fallthrough
CT: control target
= control target key end

     0   :  { %vm479_vm0 = vcmask 523264   ;;  %vm623_vm2 = vcmask 1043456   ;;  %vm624_vm3 = vcmask 523268   ;;  %s1085_s1 = inlined_call_operand.vmem [shape: bf16[576,192], index: 1, kind: input, shape index: {}]   ;;  %s1086_s0 = inlined_call_operand.vmem [shape: bf16[8,576], index: 0, kind: input, shape index: {}]   ;;  %s1087_s2 = inlined_call_operand.vmem [shape: f32[1,192], index: 2, kind: input, shape index: {}]   ;;  %s1088_s3 = inlined_call_operand.vmem [shape: bf16[8,192], index: 3, kind: output, shape index: {}]  }
   0x1   :  { %v720_v0 = vld [vmem:[%s1085_s1 + $0x104] ss:$8 sps:$4 sm:$0xff]   ;;  %v722_v1 = vld [vmem:[%s1085_s1 + $0x100] ss:$8 sps:$4 sm:$0xff]   ;;  %v723_v2 = vld [vmem:[%s1085_s1 + $0x114] ss:$8 sps:$4 sm:$0xff]  }
   0x2   :  { %524 = vmatprep.subr.bf16.mxu0 %v720_v0  ;;  %v725_v3 = vld [vmem:[%s1085_s1 + $0x110] ss:$8 sps:$4 sm:$0xff]   ;;  %v726_v4 = vld [vmem:[%s1085_s1 + $0x124] ss:$8 sps:$4 sm:$0xff]   ;;  %v731_v6 = vld [vmem:[%s1085_s1] ss:$8 sps:$4 sm:$0xff]  }
   0x3   :  { %525 = vmatpush1.bf16.msra.mxu0 %v722_v1  ;;  %v729_v5 = vld [vmem:[%s1085_s1 + $0x4] ss:$8 sps:$4 sm:$0xff]   ;;  %v728_v7 = vld [vmem:[%s1085_s1 + $0x120] ss:$8 sps:$4 sm:$0xff]   ;;  %v735_v8 = vld [vmem:[%s1085_s1 + $0x14] ss:$8 sps:$4 sm:$0xff]  }
   0x4   :  { %526 = vmatprep.subr.bf16.mxu0 %v723_v2  ;;  %483 = vmatprep.subr.bf16.mxu1 %v729_v5  ;;  %v737_v9 = vld [vmem:[%s1085_s1 + $0x10] ss:$8 sps:$4 sm:$0xff]   ;;  %v732_v10 = vld [vmem:[%s1085_s1 + $0x134] ss:$8 sps:$4 sm:$0xff]   ;;  %v741_v12 = vld [vmem:[%s1085_s1 + $0x24] ss:$8 sps:$4 sm:$0xff]  }
   0x5   :  { %484 = vmatpush1.bf16.msra.mxu1 %v731_v6  ;;  %v734_v11 = vld [vmem:[%s1085_s1 + $0x130] ss:$8 sps:$4 sm:$0xff]   ;;  %v738_v13 = vld [vmem:[%s1085_s1 + $0x144] ss:$8 sps:$4 sm:$0xff]   ;;  %v743_v14 = vld [vmem:[%s1085_s1 + $0x20] ss:$8 sps:$4 sm:$0xff]  }
   0x6   :  { %485 = vmatprep.subr.bf16.mxu1 %v735_v8  ;;  %v747_v15 = vld [vmem:[%s1085_s1 + $0x34] ss:$8 sps:$4 sm:$0xff]   ;;  %v740_v16 = vld [vmem:[%s1085_s1 + $0x140] ss:$8 sps:$4 sm:$0xff]   ;;  %v749_v18 = vld [vmem:[%s1085_s1 + $0x30] ss:$8 sps:$4 sm:$0xff]  }
   0x7   :  { %527 = vmatpush1.bf16.msra.mxu0 %v725_v3  ;;  %v744_v17 = vld [vmem:[%s1085_s1 + $0x154] ss:$8 sps:$4 sm:$0xff]   ;;  %v753_v19 = vld [vmem:[%s1085_s1 + $0x44] ss:$8 sps:$4 sm:$0xff]   ;;  %v746_v20 = vld [vmem:[%s1085_s1 + $0x150] ss:$8 sps:$4 sm:$0xff]  }
   0x8   :  { %528 = vmatprep.subr.bf16.mxu0 %v726_v4  ;;  %v750_v21 = vld [vmem:[%s1085_s1 + $0x164] ss:$8 sps:$4 sm:$0xff]   ;;  %v755_v22 = vld [vmem:[%s1085_s1 + $0x40] ss:$8 sps:$4 sm:$0xff]   ;;  %v759_v23 = vld [vmem:[%s1085_s1 + $0x54] ss:$8 sps:$4 sm:$0xff]  }
   0x9   :  { %486 = vmatpush1.bf16.msra.mxu1 %v737_v9  ;;  %v752_v24 = vld [vmem:[%s1085_s1 + $0x160] ss:$8 sps:$4 sm:$0xff]   ;;  %v756_v25 = vld [vmem:[%s1085_s1 + $0x174] ss:$8 sps:$4 sm:$0xff]   ;;  %v761_v26 = vld [vmem:[%s1085_s1 + $0x50] ss:$8 sps:$4 sm:$0xff]  }
   0xa   :  { %487 = vmatprep.subr.bf16.mxu1 %v741_v12  ;;  %v765_v27 = vld [vmem:[%s1085_s1 + $0x64] ss:$8 sps:$4 sm:$0xff]   ;;  %v758_v28 = vld [vmem:[%s1085_s1 + $0x170] ss:$8 sps:$4 sm:$0xff]   ;;  %v767_v30 = vld [vmem:[%s1085_s1 + $0x60] ss:$8 sps:$4 sm:$0xff]  }
   0xb   :  { %529 = vmatpush1.bf16.msra.mxu0 %v728_v7  ;;  %v762_v29 = vld [vmem:[%s1085_s1 + $0x184] ss:$8 sps:$4 sm:$0xff]   ;;  %v771_v31 = vld [vmem:[%s1085_s1 + $0x74] ss:$8 sps:$4 sm:$0xff]   ;;  %v764_v32 = vld [vmem:[%s1085_s1 + $0x180] ss:$8 sps:$4 sm:$0xff]  }
   0xc   :  { %530 = vmatprep.subr.bf16.mxu0 %v732_v10  ;;  %v768_v33 = vld [vmem:[%s1085_s1 + $0x194] ss:$8 sps:$4 sm:$0xff]   ;;  %v773_v34 = vld [vmem:[%s1085_s1 + $0x70] ss:$8 sps:$4 sm:$0xff]   ;;  %v777_v35 = vld [vmem:[%s1085_s1 + $0x84] ss:$8 sps:$4 sm:$0xff]  }
   0xd   :  { %488 = vmatpush1.bf16.msra.mxu1 %v743_v14  ;;  %v770_v36 = vld [vmem:[%s1085_s1 + $0x190] ss:$8 sps:$4 sm:$0xff]   ;;  %v774_v37 = vld [vmem:[%s1085_s1 + $0x1a4] ss:$8 sps:$4 sm:$0xff]   ;;  %v779_v38 = vld [vmem:[%s1085_s1 + $0x80] ss:$8 sps:$4 sm:$0xff]  }
   0xe   :  { %489 = vmatprep.subr.bf16.mxu1 %v747_v15  ;;  %v783_v39 = vld [vmem:[%s1085_s1 + $0x94] ss:$8 sps:$4 sm:$0xff]   ;;  %v776_v40 = vld [vmem:[%s1085_s1 + $0x1a0] ss:$8 sps:$4 sm:$0xff]   ;;  %v785_v42 = vld [vmem:[%s1085_s1 + $0x90] ss:$8 sps:$4 sm:$0xff]  }
   0xf   :  { %531 = vmatpush1.bf16.msra.mxu0 %v734_v11  ;;  %v780_v41 = vld [vmem:[%s1085_s1 + $0x1b4] ss:$8 sps:$4 sm:$0xff]   ;;  %v789_v43 = vld [vmem:[%s1085_s1 + $0xa4] ss:$8 sps:$4 sm:$0xff]   ;;  %v782_v46 = vld [vmem:[%s1085_s1 + $0x1b0] ss:$8 sps:$4 sm:$0xff]  }
  0x10   :  { %532 = vmatprep.subr.bf16.mxu0 %v738_v13  ;;  %v16_v44 = vld [vmem:[%s1086_s0 + $0x8] sm:$0xff]  ;;  %v795_v49 = vld [vmem:[%s1085_s1 + $0xb4] ss:$8 sps:$4 sm:$0xff]   ;;  %v797_v52 = vld [vmem:[%s1085_s1 + $0xb0] ss:$8 sps:$4 sm:$0xff]   ;;  %v833_v11 = vmov 0  }
  0x11   :  { %490 = vmatpush1.bf16.msra.mxu1 %v749_v18  ;;  %v634_v45 = vcombine.high %v16_v44, %v16_v44  ;;  %v791_v47 = vld [vmem:[%s1085_s1 + $0xa0] ss:$8 sps:$4 sm:$0xff]   ;;  %v786_v48 = vld [vmem:[%s1085_s1 + $0x1c4] ss:$8 sps:$4 sm:$0xff]   ;;  %v792_v51 = vld [vmem:[%s1085_s1 + $0x1d4] ss:$8 sps:$4 sm:$0xff]   ;;  %v633_v4 = vcombine.low %v16_v44, %v16_v44 }
  0x12   :  { %491 = vmatprep.subr.bf16.mxu1 %v753_v19  ;;  %v788_v50 = vld [vmem:[%s1085_s1 + $0x1c0] ss:$8 sps:$4 sm:$0xff]   ;;  %v801_v54 = vld [vmem:[%s1085_s1 + $0xc4] ss:$8 sps:$4 sm:$0xff]   ;;  %v794_v56 = vld [vmem:[%s1085_s1 + $0x1d0] ss:$8 sps:$4 sm:$0xff]  }
  0x13   :  { %533 = vmatpush1.bf16.msra.mxu0 %v740_v16  ;;  %556 = vmatprep.mubr.bf16.mxu0 %v634_v45  ;;  %v15_v53 = vld [vmem:[%s1086_s0] sm:$0xff]  ;;  %v807_v59 = vld [vmem:[%s1085_s1 + $0xd4] ss:$8 sps:$4 sm:$0xff]   ;;  %v809_v61 = vld [vmem:[%s1085_s1 + $0xd0] ss:$8 sps:$4 sm:$0xff]   ;;  %v92_v16 = vlaneseq }
  0x14   :  { %534 = vmatprep.subr.bf16.mxu0 %v744_v17  ;;  %v632_v55 = vcombine.high %v15_v53, %v15_v53  ;;  %v803_v57 = vld [vmem:[%s1085_s1 + $0xc0] ss:$8 sps:$4 sm:$0xff]   ;;  %v798_v58 = vld [vmem:[%s1085_s1 + $0x1e4] ss:$8 sps:$4 sm:$0xff]   ;;  %v804_v62 = vld [vmem:[%s1085_s1 + $0x1f4] ss:$8 sps:$4 sm:$0xff]   ;;  %v631_v8 = vcombine.low %v15_v53, %v15_v53 }
  0x15   :  { %492 = vmatpush1.bf16.msra.mxu1 %v755_v22  ;;  %v800_v60 = vld [vmem:[%s1085_s1 + $0x1e0] ss:$8 sps:$4 sm:$0xff]   ;;  %v816_v63 = vld [vmem:[%s1085_s1 + $0xe4] ss:$8 sps:$4 sm:$0xff]   ;;  %v806_v0 = vld [vmem:[%s1085_s1 + $0x1f0] ss:$8 sps:$4 sm:$0xff]  }
  0x16   :  { %493 = vmatprep.subr.bf16.mxu1 %v759_v23  ;;  %515 = vmatprep.mubr.bf16.mxu1 %v632_v55  ;;  %v818_v1 = vld [vmem:[%s1085_s1 + $0xe0] ss:$8 sps:$4 sm:$0xff]   ;;  %v815_v2 = vld [vmem:[%s1085_s1 + $0x204] ss:$8 sps:$4 sm:$0xff]   ;;  %v822_v3 = vld [vmem:[%s1085_s1 + $0xf4] ss:$8 sps:$4 sm:$0xff]  }
  0x17   :  { %535 = vmatpush1.bf16.msra.mxu0 %v746_v20  ;;  %v813_v5 = vld [vmem:[%s1085_s1 + $0x200] ss:$8 sps:$4 sm:$0xff]   ;;  %v824_v6 = vld [vmem:[%s1085_s1 + $0xf0] ss:$8 sps:$4 sm:$0xff]   ;;  %v821_v7 = vld [vmem:[%s1085_s1 + $0x214] ss:$8 sps:$4 sm:$0xff]  }
  0x18   :  { %536 = vmatprep.subr.bf16.mxu0 %v750_v21  ;;  %v819_v9 = vld [vmem:[%s1085_s1 + $0x210] ss:$8 sps:$4 sm:$0xff]   ;;  %v827_v10 = vld [vmem:[%s1085_s1 + $0x224] ss:$8 sps:$4 sm:$0xff]   ;;  %v825_v12 = vld [vmem:[%s1085_s1 + $0x220] ss:$8 sps:$4 sm:$0xff]  }
  0x19   :  { %494 = vmatpush1.bf16.msra.mxu1 %v761_v26  ;;  %v832_v13 = vld [vmem:[%s1085_s1 + $0x234] ss:$8 sps:$4 sm:$0xff]   ;;  %v830_v14 = vld [vmem:[%s1085_s1 + $0x230] ss:$8 sps:$4 sm:$0xff]   ;;  %v93_v17 = vshrl.u32 %v92_v16, 7  ;;  %vm625_vm4 = vmor %vm624_vm3, %vm623_vm2 }
  0x1a   :  { %495 = vmatprep.subr.bf16.mxu1 %v765_v27  ;;  %v812_v15 = vld [vmem:[%s1086_s0 + $0x10] ss:$0 sps:$4 sm:$0xff]   ;;  %v90_v21 = vld [vmem:[%s1087_s2] sm:$0x3] }
  0x1b   :  { %537 = vmatpush1.bf16.msra.mxu0 %v752_v24  ;;  %v94_v19 = vsub.s32 0, %v93_v17  ;;  %v98_v22 = vsub.s32 1, %v93_v17 }
  0x1c   :  { %538 = vmatprep.subr.bf16.mxu0 %v756_v25 }
  0x1d   :  { %496 = vmatpush1.bf16.msra.mxu1 %v767_v30  ;;  %v95_v25 = vrot.slane %v90_v21, %v94_v19  ;;  %v99_v26 = vrot.slane %v90_v21, %v98_v22 }
  0x1e   :  { %497 = vmatprep.subr.bf16.mxu1 %v771_v31 }
  0x1f   :  { %539 = vmatpush1.bf16.msra.mxu0 %v758_v28 }
  0x20   :  { %540 = vmatprep.subr.bf16.mxu0 %v762_v29  ;;  %v607_v29 = vand.u32 127, %v92_v16 }
  0x21   :  { %498 = vmatpush1.bf16.msra.mxu1 %v773_v34 }
  0x22   :  { %499 = vmatprep.subr.bf16.mxu1 %v777_v35  ;;  %vm609_vm1 = vcmp.ge.s32.totalorder %v607_v29, 96 }
  0x23   :  { %541 = vmatpush1.bf16.msra.mxu0 %v764_v32 }
  0x24   :  { %542 = vmatprep.subr.bf16.mxu0 %v768_v33 }
  0x25   :  { %500 = vmatpush1.bf16.msra.mxu1 %v779_v38 }
  0x26   :  { %501 = vmatprep.subr.bf16.mxu1 %v783_v39 }
  0x27   :  { %543 = vmatpush1.bf16.msra.mxu0 %v770_v36 }
  0x28   :  { %544 = vmatprep.subr.bf16.mxu0 %v774_v37 }
  0x29   :  { %502 = vmatpush1.bf16.msra.mxu1 %v785_v42 }
  0x2a   :  { %503 = vmatprep.subr.bf16.mxu1 %v789_v43 }
  0x2b   :  { %545 = vmatpush1.bf16.msra.mxu0 %v776_v40 }
  0x2c   :  { %546 = vmatprep.subr.bf16.mxu0 %v780_v41 }
  0x2d   :  { %504 = vmatpush1.bf16.msra.mxu1 %v791_v47 }
  0x2e   :  { %505 = vmatprep.subr.bf16.mxu1 %v795_v49 }
  0x2f   :  { %547 = vmatpush1.bf16.msra.mxu0 %v782_v46 }
  0x30   :  { %548 = vmatprep.subr.bf16.mxu0 %v786_v48 }
  0x31   :  { %506 = vmatpush1.bf16.msra.mxu1 %v797_v52 }
  0x32   :  { %507 = vmatprep.subr.bf16.mxu1 %v801_v54 }
  0x33   :  { %549 = vmatpush1.bf16.msra.mxu0 %v788_v50 }
  0x34   :  { %550 = vmatprep.subr.bf16.mxu0 %v792_v51 }
  0x35   :  { %508 = vmatpush1.bf16.msra.mxu1 %v803_v57 }
  0x36   :  { %509 = vmatprep.subr.bf16.mxu1 %v807_v59 }
  0x37   :  { %551 = vmatpush1.bf16.msra.mxu0 %v794_v56 }
  0x38   :  { %552 = vmatprep.subr.bf16.mxu0 %v798_v58 }
  0x39   :  { %510 = vmatpush1.bf16.msra.mxu1 %v809_v61 }
  0x3a   :  { %511 = vmatprep.subr.bf16.mxu1 %v816_v63 }
  0x3b   :  { %553 = vmatpush1.bf16.msra.mxu0 %v800_v60 }
  0x3c   :  { %554 = vmatprep.subr.bf16.mxu0 %v804_v62 }
  0x3d   :  { %512 = vmatpush1.bf16.msra.mxu1 %v818_v1 }
  0x3e   :  { %513 = vmatprep.subr.bf16.mxu1 %v822_v3 }
  0x3f   :  { %555 = vmatpush1.bf16.msra.mxu0 %v806_v0 }
  0x40   :  { %565 = vmatprep.subr.bf16.mxu0 %v815_v2 }
  0x41   :  { %514 = vmatpush1.bf16.msra.mxu1 %v824_v6 }
  0x42   :  { %557 = vmatmul.mubr.bf16.vlgmr.msra.gmra.mrb[0].mxu0 %v633_v4 }
  0x43   :  { %566 = vmatpush1.bf16.msra.mxu0 %v813_v5  ;;  %597 = vmatprep.mubr.bf16.mxu0 %v833_v11 }
  0x44   :  { %567 = vmatprep.subr.bf16.mxu0 %v821_v7  ;;  %516 = vmatmul.mubr.bf16.vlgmr.msra.gmra.mrb[0].mxu1 %v631_v8 }
  0x47   :  { %568 = vmatpush1.bf16.msra.mxu0 %v819_v9 }
  0x48   :  { %569 = vmatprep.subr.bf16.mxu0 %v827_v10 }
  0x4b   :  { %570 = vmatpush1.bf16.msra.mxu0 %v825_v12 }
  0x4c   :  { %571 = vmatprep.subr.bf16.mxu0 %v832_v13 }
  0x4f   :  { %572 = vmatpush1.bf16.msra.mxu0 %v830_v14 }
  0x52   :  { %708 = vmatmul.mubr.msk.bf16.vlgmr.msra.gmra.mrb[0].mxu0 %vm479_vm0, %v812_v15 }
 0x117   :  { %v517_v18 = vpop.f32.mrb[0].mxu1 }
 0x118   :  { %v519_v20 = vpop.f32.mrb[1].mxu1  ;;  %v518_v27 = vadd.f32 %v517_v18, %v95_v25 }
 0x119   :  { %v521_v23 = vpop.f32.mrb[2].mxu1  ;;  %v520_v28 = vadd.f32 %v519_v20, %v99_v26 }
 0x11a   :  { %v522_v24 = vpop.f32.mrb[3].mxu1 }
 0x125   :  { %v599_v30 = vpop.f32.mrb[0].mxu0 }
 0x126   :  { %v712_v31 = vadd.f32 %v599_v30, %v518_v27  ;;  %v601_v32 = vpop.f32.mrb[1].mxu0 }
 0x127   :  { %v714_v33 = vadd.f32 %v601_v32, %v520_v28  ;;  %v603_v34 = vpop.f32.mrb[2].mxu0 }
 0x128   :  { %v611_v35 = vmax.f32 %v712_v31, 0.0  ;;  %v604_v36 = vpop.f32.mrb[3].mxu0 }
 0x129   :  { %v612_v37 = vmax.f32 %v714_v33, 0.0 }
 0x12a   :  { %v613_v38 = vsel %vm609_vm1, %v611_v35, %v712_v31 }
 0x12b   :  { %v710_v39 = vpack.c.bf16 %v612_v37, %v613_v38 }
 0x12d   :  { %626 = vst.msk [vmem:[%s1088_s3] sm:$0xff] %vm625_vm4, %v710_v39 }

// kernel: detector_forward.31
= control target key start
LH: loop header
LB: loop body
LE: loop exit
PB: predicated region body
PF: predicated region fallthrough
CT: control target
= control target key end

     0   :  { %v869_v41 = vmov 0.0   ;;  %vm870_vm0 = vmmov 0   ;;  %vm482_vm1 = vcmask 785408   ;;  %vm648_vm2 = vcmask 781312   ;;  %s1071_s1 = inlined_call_operand.vmem [shape: bf16[864,96], index: 1, kind: input, shape index: {}]   ;;  %s1072_s0 = inlined_call_operand.vmem [shape: bf16[8,864], index: 0, kind: input, shape index: {}]   ;;  %s1073_s2 = inlined_call_operand.vmem [shape: f32[1,96], index: 2, kind: input, shape index: {}]   ;;  %s1074_s3 = inlined_call_operand.vmem [shape: bf16[8,96], index: 3, kind: output, shape index: {}]  }
   0x1   :  { %v808_v0 = vld [vmem:[%s1071_s1 + $0x40] sm:$0xff]   ;;  %v812_v4 = vld [vmem:[%s1071_s1 + $0x48] sm:$0xff]   ;;  %v816_v8 = vld [vmem:[%s1071_s1 + $0x50] sm:$0xff]  }
   0x2   :  { %v809_v1 = vld [vmem:[%s1071_s1] sm:$0xff]   ;;  %717 = vmatprep.subr.bf16.mxu0 %v808_v0  ;;  %v813_v5 = vld [vmem:[%s1071_s1 + $0x8] sm:$0xff]   ;;  %v817_v9 = vld [vmem:[%s1071_s1 + $0x10] sm:$0xff]  }
   0x3   :  { %v810_v2 = vld [vmem:[%s1071_s1 + $0xc0] sm:$0xff]   ;;  %718 = vmatpush3.bf16.msra.mxu0 %v809_v1  ;;  %v814_v6 = vld [vmem:[%s1071_s1 + $0xc8] sm:$0xff]   ;;  %v818_v10 = vld [vmem:[%s1071_s1 + $0xd0] sm:$0xff]  }
   0x4   :  { %v811_v3 = vld [vmem:[%s1071_s1 + $0x80] sm:$0xff]   ;;  %739 = vmatprep.subr.bf16.mxu1 %v810_v2  ;;  %719 = vmatprep.subr.bf16.mxu0 %v812_v4  ;;  %v815_v7 = vld [vmem:[%s1071_s1 + $0x88] sm:$0xff]   ;;  %v819_v11 = vld [vmem:[%s1071_s1 + $0x90] sm:$0xff]  }
   0x5   :  { %740 = vmatpush3.bf16.msra.mxu1 %v811_v3  ;;  %v820_v12 = vld [vmem:[%s1071_s1 + $0x58] sm:$0xff]   ;;  %v824_v16 = vld [vmem:[%s1071_s1 + $0x60] sm:$0xff]   ;;  %v828_v20 = vld [vmem:[%s1071_s1 + $0x68] sm:$0xff]  }
   0x6   :  { %741 = vmatprep.subr.bf16.mxu1 %v814_v6  ;;  %v821_v13 = vld [vmem:[%s1071_s1 + $0x18] sm:$0xff]   ;;  %v825_v17 = vld [vmem:[%s1071_s1 + $0x20] sm:$0xff]   ;;  %v829_v21 = vld [vmem:[%s1071_s1 + $0x28] sm:$0xff]  }
   0x7   :  { %720 = vmatpush3.bf16.msra.mxu0 %v813_v5  ;;  %v822_v14 = vld [vmem:[%s1071_s1 + $0xd8] sm:$0xff]   ;;  %v826_v18 = vld [vmem:[%s1071_s1 + $0xe0] sm:$0xff]   ;;  %v830_v22 = vld [vmem:[%s1071_s1 + $0xe8] sm:$0xff]  }
   0x8   :  { %721 = vmatprep.subr.bf16.mxu0 %v816_v8  ;;  %v823_v15 = vld [vmem:[%s1071_s1 + $0x98] sm:$0xff]   ;;  %v827_v19 = vld [vmem:[%s1071_s1 + $0xa0] sm:$0xff]   ;;  %v831_v23 = vld [vmem:[%s1071_s1 + $0xa8] sm:$0xff]  }
   0x9   :  { %742 = vmatpush3.bf16.msra.mxu1 %v815_v7  ;;  %v832_v24 = vld [vmem:[%s1071_s1 + $0x70] sm:$0xff]   ;;  %v836_v28 = vld [vmem:[%s1071_s1 + $0x78] sm:$0xff]   ;;  %v15_v31 = vld [vmem:[%s1072_s0] sm:$0xff] }
   0xa   :  { %743 = vmatprep.subr.bf16.mxu1 %v818_v10  ;;  %v833_v25 = vld [vmem:[%s1071_s1 + $0x30] sm:$0xff]   ;;  %v837_v29 = vld [vmem:[%s1071_s1 + $0x38] sm:$0xff]   ;;  %v655_v32 = vcombine.low %v15_v31, %v15_v31  ;;  %v656_v33 = vcombine.high %v15_v31, %v15_v31  ;;  %v843_v35 = vld [vmem:[%s1071_s1 + $0x140] sm:$0xff]  }
   0xb   :  { %722 = vmatpush3.bf16.msra.mxu0 %v817_v9  ;;  %v834_v26 = vld [vmem:[%s1071_s1 + $0xf0] sm:$0xff]   ;;  %v838_v30 = vld [vmem:[%s1071_s1 + $0xf8] sm:$0xff]   ;;  %v16_v36 = vld [vmem:[%s1072_s0 + $0x8] sm:$0xff] }
   0xc   :  { %723 = vmatprep.subr.bf16.mxu0 %v820_v12  ;;  %v835_v27 = vld [vmem:[%s1071_s1 + $0xb0] sm:$0xff]   ;;  %v842_v34 = vld [vmem:[%s1071_s1 + $0xb8] sm:$0xff]   ;;  %518 = vmatprep.mubr.bf16.mxu0 %v656_v33  ;;  %v657_v37 = vcombine.low %v16_v36, %v16_v36  ;;  %v658_v38 = vcombine.high %v16_v36, %v16_v36  ;;  %v846_v39 = vld [vmem:[%s1071_s1 + $0x100] sm:$0xff]  }
   0xd   :  { %744 = vmatpush3.bf16.msra.mxu1 %v819_v11  ;;  %v847_v40 = vld [vmem:[%s1071_s1 + $0x148] sm:$0xff]   ;;  %v849_v43 = vld [vmem:[%s1071_s1 + $0x150] sm:$0xff]   ;;  %v851_v44 = vld [vmem:[%s1071_s1 + $0x180] sm:$0xff]  }
   0xe   :  { %745 = vmatprep.subr.bf16.mxu1 %v822_v14  ;;  %558 = vmatprep.mubr.bf16.mxu1 %v658_v38  ;;  %v848_v42 = vld [vmem:[%s1071_s1 + $0x108] sm:$0xff]   ;;  %v850_v45 = vld [vmem:[%s1071_s1 + $0x110] sm:$0xff]   ;;  %v852_v46 = vld [vmem:[%s1071_s1 + $0x158] sm:$0xff]  }
   0xf   :  { %724 = vmatpush3.bf16.msra.mxu0 %v821_v13  ;;  %v854_v47 = vld [vmem:[%s1071_s1 + $0x188] sm:$0xff]   ;;  %v853_v48 = vld [vmem:[%s1071_s1 + $0x118] sm:$0xff]   ;;  %v855_v49 = vld [vmem:[%s1071_s1 + $0x160] sm:$0xff]  }
  0x10   :  { %725 = vmatprep.subr.bf16.mxu0 %v824_v16  ;;  %v857_v50 = vld [vmem:[%s1071_s1 + $0x190] sm:$0xff]   ;;  %v856_v51 = vld [vmem:[%s1071_s1 + $0x120] sm:$0xff]   ;;  %v858_v52 = vld [vmem:[%s1071_s1 + $0x168] sm:$0xff]  }
  0x11   :  { %746 = vmatpush3.bf16.msra.mxu1 %v823_v15  ;;  %v860_v53 = vld [vmem:[%s1071_s1 + $0x198] sm:$0xff]   ;;  %v859_v54 = vld [vmem:[%s1071_s1 + $0x128] sm:$0xff]   ;;  %v861_v55 = vld [vmem:[%s1071_s1 + $0x170] sm:$0xff]  }
  0x12   :  { %747 = vmatprep.subr.bf16.mxu1 %v826_v18  ;;  %v863_v56 = vld [vmem:[%s1071_s1 + $0x1a0] sm:$0xff]   ;;  %v17_v57 = vld [vmem:[%s1072_s0 + $0x10] sm:$0xff]  ;;  %v864_v60 = vld [vmem:[%s1071_s1 + $0x178] sm:$0xff]  }
  0x13   :  { %726 = vmatpush3.bf16.msra.mxu0 %v825_v17  ;;  %v660_v58 = vcombine.high %v17_v57, %v17_v57  ;;  %v862_v59 = vld [vmem:[%s1071_s1 + $0x130] sm:$0xff]   ;;  %v868_v61 = vld [vmem:[%s1071_s1 + $0x1a8] sm:$0xff]   ;;  %v841_v62 = vld [vmem:[%s1072_s0 + $0x18] ss:$0 sps:$4 sm:$0xff]   ;;  %v659_v0 = vcombine.low %v17_v57, %v17_v57 }
  0x14   :  { %727 = vmatprep.subr.bf16.mxu0 %v828_v20  ;;  %v865_v63 = vld [vmem:[%s1071_s1 + $0x138] sm:$0xff]   ;;  %v654_v2 = vld [vmem:[%s1073_s2] ss:$0 sm:$0xff] }
  0x15   :  { %748 = vmatpush3.bf16.msra.mxu1 %v827_v19 }
  0x16   :  { %749 = vmatprep.subr.bf16.mxu1 %v830_v22 }
  0x17   :  { %728 = vmatpush3.bf16.msra.mxu0 %v829_v21 }
  0x18   :  { %729 = vmatprep.subr.bf16.mxu0 %v832_v24 }
  0x19   :  { %750 = vmatpush3.bf16.msra.mxu1 %v831_v23 }
  0x1a   :  { %751 = vmatprep.subr.bf16.mxu1 %v834_v26 }
  0x1b   :  { %730 = vmatpush3.bf16.msra.mxu0 %v833_v25 }
  0x1c   :  { %731 = vmatprep.subr.bf16.mxu0 %v836_v28 }
  0x1d   :  { %752 = vmatpush3.bf16.msra.mxu1 %v835_v27 }
  0x1e   :  { %753 = vmatprep.subr.bf16.mxu1 %v838_v30 }
  0x1f   :  { %732 = vmatpush3.bf16.msra.mxu0 %v837_v29 }
  0x20   :  { %761 = vmatprep.subr.bf16.mxu0 %v843_v35 }
  0x21   :  { %754 = vmatpush3.bf16.msra.mxu1 %v842_v34 }
  0x22   :  { %519 = vmatmul.mubr.bf16.vlgmr.msra.gmra.mrb[0].mxu0 %v655_v32  ;;  %790 = vmatprep.subr.bf16.mxu1 %v869_v41 }
  0x23   :  { %762 = vmatpush3.bf16.msra.mxu0 %v846_v39  ;;  %598 = vmatprep.mubr.bf16.mxu0 %v660_v58 }
  0x24   :  { %559 = vmatmul.mubr.bf16.vlgmr.msra.gmra.mrb[0].mxu1 %v657_v37  ;;  %763 = vmatprep.subr.bf16.mxu0 %v847_v40 }
  0x25   :  { %802 = vmatprep.mubr.msk.bf16.mxu1 %vm870_vm0, %v869_v41  ;;  %791 = vmatpush3.bf16.msra.mxu1 %v851_v44 }
  0x26   :  { %792 = vmatprep.subr.bf16.mxu1 %v869_v41 }
  0x27   :  { %764 = vmatpush3.bf16.msra.mxu0 %v848_v42 }
  0x28   :  { %765 = vmatprep.subr.bf16.mxu0 %v849_v43 }
  0x29   :  { %793 = vmatpush3.bf16.msra.mxu1 %v854_v47 }
  0x2a   :  { %794 = vmatprep.subr.bf16.mxu1 %v869_v41 }
  0x2b   :  { %766 = vmatpush3.bf16.msra.mxu0 %v850_v45 }
  0x2c   :  { %767 = vmatprep.subr.bf16.mxu0 %v852_v46 }
  0x2d   :  { %795 = vmatpush3.bf16.msra.mxu1 %v857_v50 }
  0x2e   :  { %796 = vmatprep.subr.bf16.mxu1 %v869_v41 }
  0x2f   :  { %768 = vmatpush3.bf16.msra.mxu0 %v853_v48 }
  0x30   :  { %769 = vmatprep.subr.bf16.mxu0 %v855_v49 }
  0x31   :  { %797 = vmatpush3.bf16.msra.mxu1 %v860_v53 }
  0x32   :  { %798 = vmatprep.subr.bf16.mxu1 %v869_v41 }
  0x33   :  { %770 = vmatpush3.bf16.msra.mxu0 %v856_v51 }
  0x34   :  { %771 = vmatprep.subr.bf16.mxu0 %v858_v52 }
  0x35   :  { %799 = vmatpush3.bf16.msra.mxu1 %v863_v56 }
  0x36   :  { %800 = vmatprep.subr.bf16.mxu1 %v869_v41 }
  0x37   :  { %772 = vmatpush3.bf16.msra.mxu0 %v859_v54 }
  0x38   :  { %773 = vmatprep.subr.bf16.mxu0 %v861_v55 }
  0x39   :  { %801 = vmatpush3.bf16.msra.mxu1 %v868_v61 }
  0x3b   :  { %774 = vmatpush3.bf16.msra.mxu0 %v862_v59 }
  0x3c   :  { %775 = vmatprep.subr.bf16.mxu0 %v864_v60  ;;  %803 = vmatmul.mubr.msk.bf16.vlgmr.msra.gmra.mrb[4].mxu1 %vm482_vm1, %v841_v62 }
  0x3f   :  { %776 = vmatpush3.bf16.msra.mxu0 %v865_v63 }
  0x42   :  { %599 = vmatmul.mubr.bf16.vlgmr.msra.gmra.mrb[4].mxu0 %v659_v0 }
  0xf5   :  { %v733_v1 = vpop.f32.mrb[0].mxu0 }
  0xf6   :  { %v734_v3 = vpop.f32.mrb[1].mxu0 }
  0xf7   :  { %v735_v4 = vadd.f32 %v734_v3, %v733_v1  ;;  %v736_v5 = vpop.f32.mrb[2].mxu0  ;;  %v755_v6 = vpop.f32.mrb[0].mxu1 }
  0xf8   :  { %v737_v7 = vpop.f32.mrb[3].mxu0  ;;  %v756_v9 = vpop.f32.mrb[1].mxu1 }
  0xf9   :  { %v521_v8 = vadd.f32 %v735_v4, %v654_v2  ;;  %v757_v10 = vadd.f32 %v756_v9, %v755_v6  ;;  %v758_v11 = vpop.f32.mrb[2].mxu1 }
  0xfa   :  { %v759_v12 = vpop.f32.mrb[3].mxu1 }
  0xfb   :  { %v561_v13 = vadd.f32 %v757_v10, %v521_v8 }
 0x10f   :  { %v640_v14 = vpop.f32.mrb[4].mxu1 }
 0x110   :  { %v804_v15 = vpop.f32.mrb[5].mxu1 }
 0x111   :  { %v643_v16 = vpop.f32.mrb[6].mxu1 }
 0x112   :  { %v805_v18 = vpop.f32.mrb[7].mxu1 }
 0x115   :  { %v777_v17 = vpop.f32.mrb[4].mxu0 }
 0x116   :  { %v778_v19 = vpop.f32.mrb[5].mxu0 }
 0x117   :  { %v779_v20 = vadd.f32 %v778_v19, %v777_v17  ;;  %v780_v21 = vpop.f32.mrb[6].mxu0 }
 0x118   :  { %v781_v22 = vpop.f32.mrb[7].mxu0 }
 0x119   :  { %v601_v23 = vadd.f32 %v779_v20, %v561_v13 }
 0x11b   :  { %v641_v24 = vadd.f32 %v640_v14, %v601_v23 }
 0x11d   :  { %v646_v25 = vmax.f32 %v641_v24, 0.0 }
 0x11f   :  { %v647_v26 = vpack.c.bf16 %v646_v25, %v646_v25 }
 0x121   :  { %649 = vst.msk [vmem:[%s1074_s3] sm:$0xf] %vm648_vm2, %v647_v26 }

// kernel: detector_forward.32
= control target key start
LH: loop header
LB: loop body
LE: loop exit
PB: predicated region body
PF: predicated region fallthrough
CT: control target
= control target key end

     0   :  { %v875_v41 = vmov 0.0   ;;  %vm876_vm0 = vmmov 0   ;;  %vm485_vm1 = vcmask 785408   ;;  %vm654_vm2 = vcmask 781312   ;;  %s1085_s1 = inlined_call_operand.vmem [shape: bf16[864,96], index: 1, kind: input, shape index: {}]   ;;  %s1086_s0 = inlined_call_operand.vmem [shape: bf16[8,864], index: 0, kind: input, shape index: {}]   ;;  %s1087_s2 = inlined_call_operand.vmem [shape: f32[1,96], index: 2, kind: input, shape index: {}]   ;;  %s1088_s3 = inlined_call_operand.vmem [shape: bf16[8,96], index: 3, kind: input, shape index: {}]   ;;  %s1089_s4 = inlined_call_operand.vmem [shape: bf16[8,96], index: 4, kind: output, shape index: {}]  }
   0x1   :  { %v814_v0 = vld [vmem:[%s1085_s1 + $0x40] sm:$0xff]   ;;  %v818_v4 = vld [vmem:[%s1085_s1 + $0x48] sm:$0xff]   ;;  %v822_v8 = vld [vmem:[%s1085_s1 + $0x50] sm:$0xff]  }
   0x2   :  { %v815_v1 = vld [vmem:[%s1085_s1] sm:$0xff]   ;;  %723 = vmatprep.subr.bf16.mxu0 %v814_v0  ;;  %v819_v5 = vld [vmem:[%s1085_s1 + $0x8] sm:$0xff]   ;;  %v823_v9 = vld [vmem:[%s1085_s1 + $0x10] sm:$0xff]  }
   0x3   :  { %v816_v2 = vld [vmem:[%s1085_s1 + $0xc0] sm:$0xff]   ;;  %724 = vmatpush3.bf16.msra.mxu0 %v815_v1  ;;  %v820_v6 = vld [vmem:[%s1085_s1 + $0xc8] sm:$0xff]   ;;  %v824_v10 = vld [vmem:[%s1085_s1 + $0xd0] sm:$0xff]  }
   0x4   :  { %v817_v3 = vld [vmem:[%s1085_s1 + $0x80] sm:$0xff]   ;;  %745 = vmatprep.subr.bf16.mxu1 %v816_v2  ;;  %725 = vmatprep.subr.bf16.mxu0 %v818_v4  ;;  %v821_v7 = vld [vmem:[%s1085_s1 + $0x88] sm:$0xff]   ;;  %v825_v11 = vld [vmem:[%s1085_s1 + $0x90] sm:$0xff]  }
   0x5   :  { %746 = vmatpush3.bf16.msra.mxu1 %v817_v3  ;;  %v826_v12 = vld [vmem:[%s1085_s1 + $0x58] sm:$0xff]   ;;  %v830_v16 = vld [vmem:[%s1085_s1 + $0x60] sm:$0xff]   ;;  %v834_v20 = vld [vmem:[%s1085_s1 + $0x68] sm:$0xff]  }
   0x6   :  { %747 = vmatprep.subr.bf16.mxu1 %v820_v6  ;;  %v827_v13 = vld [vmem:[%s1085_s1 + $0x18] sm:$0xff]   ;;  %v831_v17 = vld [vmem:[%s1085_s1 + $0x20] sm:$0xff]   ;;  %v835_v21 = vld [vmem:[%s1085_s1 + $0x28] sm:$0xff]  }
   0x7   :  { %726 = vmatpush3.bf16.msra.mxu0 %v819_v5  ;;  %v828_v14 = vld [vmem:[%s1085_s1 + $0xd8] sm:$0xff]   ;;  %v832_v18 = vld [vmem:[%s1085_s1 + $0xe0] sm:$0xff]   ;;  %v836_v22 = vld [vmem:[%s1085_s1 + $0xe8] sm:$0xff]  }
   0x8   :  { %727 = vmatprep.subr.bf16.mxu0 %v822_v8  ;;  %v829_v15 = vld [vmem:[%s1085_s1 + $0x98] sm:$0xff]   ;;  %v833_v19 = vld [vmem:[%s1085_s1 + $0xa0] sm:$0xff]   ;;  %v837_v23 = vld [vmem:[%s1085_s1 + $0xa8] sm:$0xff]  }
   0x9   :  { %748 = vmatpush3.bf16.msra.mxu1 %v821_v7  ;;  %v838_v24 = vld [vmem:[%s1085_s1 + $0x70] sm:$0xff]   ;;  %v842_v28 = vld [vmem:[%s1085_s1 + $0x78] sm:$0xff]   ;;  %v18_v31 = vld [vmem:[%s1086_s0] sm:$0xff] }
   0xa   :  { %749 = vmatprep.subr.bf16.mxu1 %v824_v10  ;;  %v839_v25 = vld [vmem:[%s1085_s1 + $0x30] sm:$0xff]   ;;  %v843_v29 = vld [vmem:[%s1085_s1 + $0x38] sm:$0xff]   ;;  %v661_v32 = vcombine.low %v18_v31, %v18_v31  ;;  %v662_v33 = vcombine.high %v18_v31, %v18_v31  ;;  %v849_v35 = vld [vmem:[%s1085_s1 + $0x140] sm:$0xff]  }
   0xb   :  { %728 = vmatpush3.bf16.msra.mxu0 %v823_v9  ;;  %v840_v26 = vld [vmem:[%s1085_s1 + $0xf0] sm:$0xff]   ;;  %v844_v30 = vld [vmem:[%s1085_s1 + $0xf8] sm:$0xff]   ;;  %v19_v36 = vld [vmem:[%s1086_s0 + $0x8] sm:$0xff] }
   0xc   :  { %729 = vmatprep.subr.bf16.mxu0 %v826_v12  ;;  %v841_v27 = vld [vmem:[%s1085_s1 + $0xb0] sm:$0xff]   ;;  %v848_v34 = vld [vmem:[%s1085_s1 + $0xb8] sm:$0xff]   ;;  %521 = vmatprep.mubr.bf16.mxu0 %v662_v33  ;;  %v663_v37 = vcombine.low %v19_v36, %v19_v36  ;;  %v664_v38 = vcombine.high %v19_v36, %v19_v36  ;;  %v852_v39 = vld [vmem:[%s1085_s1 + $0x100] sm:$0xff]  }
   0xd   :  { %750 = vmatpush3.bf16.msra.mxu1 %v825_v11  ;;  %v853_v40 = vld [vmem:[%s1085_s1 + $0x148] sm:$0xff]   ;;  %v855_v43 = vld [vmem:[%s1085_s1 + $0x150] sm:$0xff]   ;;  %v857_v44 = vld [vmem:[%s1085_s1 + $0x180] sm:$0xff]  }
   0xe   :  { %751 = vmatprep.subr.bf16.mxu1 %v828_v14  ;;  %561 = vmatprep.mubr.bf16.mxu1 %v664_v38  ;;  %v854_v42 = vld [vmem:[%s1085_s1 + $0x108] sm:$0xff]   ;;  %v856_v45 = vld [vmem:[%s1085_s1 + $0x110] sm:$0xff]   ;;  %v858_v46 = vld [vmem:[%s1085_s1 + $0x158] sm:$0xff]  }
   0xf   :  { %730 = vmatpush3.bf16.msra.mxu0 %v827_v13  ;;  %v860_v47 = vld [vmem:[%s1085_s1 + $0x188] sm:$0xff]   ;;  %v859_v48 = vld [vmem:[%s1085_s1 + $0x118] sm:$0xff]   ;;  %v861_v49 = vld [vmem:[%s1085_s1 + $0x160] sm:$0xff]  }
  0x10   :  { %731 = vmatprep.subr.bf16.mxu0 %v830_v16  ;;  %v863_v50 = vld [vmem:[%s1085_s1 + $0x190] sm:$0xff]   ;;  %v862_v51 = vld [vmem:[%s1085_s1 + $0x120] sm:$0xff]   ;;  %v864_v52 = vld [vmem:[%s1085_s1 + $0x168] sm:$0xff]  }
  0x11   :  { %752 = vmatpush3.bf16.msra.mxu1 %v829_v15  ;;  %v866_v53 = vld [vmem:[%s1085_s1 + $0x198] sm:$0xff]   ;;  %v865_v54 = vld [vmem:[%s1085_s1 + $0x128] sm:$0xff]   ;;  %v867_v55 = vld [vmem:[%s1085_s1 + $0x170] sm:$0xff]  }
  0x12   :  { %753 = vmatprep.subr.bf16.mxu1 %v832_v18  ;;  %v869_v56 = vld [vmem:[%s1085_s1 + $0x1a0] sm:$0xff]   ;;  %v20_v57 = vld [vmem:[%s1086_s0 + $0x10] sm:$0xff]  ;;  %v870_v60 = vld [vmem:[%s1085_s1 + $0x178] sm:$0xff]  }
  0x13   :  { %732 = vmatpush3.bf16.msra.mxu0 %v831_v17  ;;  %v666_v58 = vcombine.high %v20_v57, %v20_v57  ;;  %v868_v59 = vld [vmem:[%s1085_s1 + $0x130] sm:$0xff]   ;;  %v874_v61 = vld [vmem:[%s1085_s1 + $0x1a8] sm:$0xff]   ;;  %v847_v62 = vld [vmem:[%s1086_s0 + $0x18] ss:$0 sps:$4 sm:$0xff]   ;;  %v665_v0 = vcombine.low %v20_v57, %v20_v57 }
  0x14   :  { %733 = vmatprep.subr.bf16.mxu0 %v834_v20  ;;  %v871_v63 = vld [vmem:[%s1085_s1 + $0x138] sm:$0xff]   ;;  %v660_v2 = vld [vmem:[%s1087_s2] ss:$0 sm:$0xff] }
  0x15   :  { %754 = vmatpush3.bf16.msra.mxu1 %v833_v19 }
  0x16   :  { %755 = vmatprep.subr.bf16.mxu1 %v836_v22  ;;  %v650_v22 = vld [vmem:[%s1088_s3] sm:$0xf] }
  0x17   :  { %734 = vmatpush3.bf16.msra.mxu0 %v835_v21 }
  0x18   :  { %735 = vmatprep.subr.bf16.mxu0 %v838_v24 }
  0x19   :  { %756 = vmatpush3.bf16.msra.mxu1 %v837_v23 }
  0x1a   :  { %757 = vmatprep.subr.bf16.mxu1 %v840_v26  ;;  %v651_v26 = vunpack.c.l.bf16 %v650_v22 }
  0x1b   :  { %736 = vmatpush3.bf16.msra.mxu0 %v839_v25 }
  0x1c   :  { %737 = vmatprep.subr.bf16.mxu0 %v842_v28 }
  0x1d   :  { %758 = vmatpush3.bf16.msra.mxu1 %v841_v27 }
  0x1e   :  { %759 = vmatprep.subr.bf16.mxu1 %v844_v30 }
  0x1f   :  { %738 = vmatpush3.bf16.msra.mxu0 %v843_v29 }
  0x20   :  { %767 = vmatprep.subr.bf16.mxu0 %v849_v35 }
  0x21   :  { %760 = vmatpush3.bf16.msra.mxu1 %v848_v34 }
  0x22   :  { %522 = vmatmul.mubr.bf16.vlgmr.msra.gmra.mrb[0].mxu0 %v661_v32  ;;  %796 = vmatprep.subr.bf16.mxu1 %v875_v41 }
  0x23   :  { %768 = vmatpush3.bf16.msra.mxu0 %v852_v39  ;;  %601 = vmatprep.mubr.bf16.mxu0 %v666_v58 }
  0x24   :  { %562 = vmatmul.mubr.bf16.vlgmr.msra.gmra.mrb[0].mxu1 %v663_v37  ;;  %769 = vmatprep.subr.bf16.mxu0 %v853_v40 }
  0x25   :  { %808 = vmatprep.mubr.msk.bf16.mxu1 %vm876_vm0, %v875_v41  ;;  %797 = vmatpush3.bf16.msra.mxu1 %v857_v44 }
  0x26   :  { %798 = vmatprep.subr.bf16.mxu1 %v875_v41 }
  0x27   :  { %770 = vmatpush3.bf16.msra.mxu0 %v854_v42 }
  0x28   :  { %771 = vmatprep.subr.bf16.mxu0 %v855_v43 }
  0x29   :  { %799 = vmatpush3.bf16.msra.mxu1 %v860_v47 }
  0x2a   :  { %800 = vmatprep.subr.bf16.mxu1 %v875_v41 }
  0x2b   :  { %772 = vmatpush3.bf16.msra.mxu0 %v856_v45 }
  0x2c   :  { %773 = vmatprep.subr.bf16.mxu0 %v858_v46 }
  0x2d   :  { %801 = vmatpush3.bf16.msra.mxu1 %v863_v50 }
  0x2e   :  { %802 = vmatprep.subr.bf16.mxu1 %v875_v41 }
  0x2f   :  { %774 = vmatpush3.bf16.msra.mxu0 %v859_v48 }
  0x30   :  { %775 = vmatprep.subr.bf16.mxu0 %v861_v49 }
  0x31   :  { %803 = vmatpush3.bf16.msra.mxu1 %v866_v53 }
  0x32   :  { %804 = vmatprep.subr.bf16.mxu1 %v875_v41 }
  0x33   :  { %776 = vmatpush3.bf16.msra.mxu0 %v862_v51 }
  0x34   :  { %777 = vmatprep.subr.bf16.mxu0 %v864_v52 }
  0x35   :  { %805 = vmatpush3.bf16.msra.mxu1 %v869_v56 }
  0x36   :  { %806 = vmatprep.subr.bf16.mxu1 %v875_v41 }
  0x37   :  { %778 = vmatpush3.bf16.msra.mxu0 %v865_v54 }
  0x38   :  { %779 = vmatprep.subr.bf16.mxu0 %v867_v55 }
  0x39   :  { %807 = vmatpush3.bf16.msra.mxu1 %v874_v61 }
  0x3b   :  { %780 = vmatpush3.bf16.msra.mxu0 %v868_v59 }
  0x3c   :  { %781 = vmatprep.subr.bf16.mxu0 %v870_v60  ;;  %809 = vmatmul.mubr.msk.bf16.vlgmr.msra.gmra.mrb[4].mxu1 %vm485_vm1, %v847_v62 }
  0x3f   :  { %782 = vmatpush3.bf16.msra.mxu0 %v871_v63 }
  0x42   :  { %602 = vmatmul.mubr.bf16.vlgmr.msra.gmra.mrb[4].mxu0 %v665_v0 }
  0xf5   :  { %v739_v1 = vpop.f32.mrb[0].mxu0 }
  0xf6   :  { %v740_v3 = vpop.f32.mrb[1].mxu0 }
  0xf7   :  { %v741_v4 = vadd.f32 %v740_v3, %v739_v1  ;;  %v742_v5 = vpop.f32.mrb[2].mxu0  ;;  %v761_v6 = vpop.f32.mrb[0].mxu1 }
  0xf8   :  { %v743_v7 = vpop.f32.mrb[3].mxu0  ;;  %v762_v9 = vpop.f32.mrb[1].mxu1 }
  0xf9   :  { %v524_v8 = vadd.f32 %v741_v4, %v660_v2  ;;  %v763_v10 = vadd.f32 %v762_v9, %v761_v6  ;;  %v764_v11 = vpop.f32.mrb[2].mxu1 }
  0xfa   :  { %v765_v12 = vpop.f32.mrb[3].mxu1 }
  0xfb   :  { %v564_v13 = vadd.f32 %v763_v10, %v524_v8 }
 0x10f   :  { %v643_v14 = vpop.f32.mrb[4].mxu1 }
 0x110   :  { %v810_v15 = vpop.f32.mrb[5].mxu1 }
 0x111   :  { %v646_v16 = vpop.f32.mrb[6].mxu1 }
 0x112   :  { %v811_v18 = vpop.f32.mrb[7].mxu1 }
 0x115   :  { %v783_v17 = vpop.f32.mrb[4].mxu0 }
 0x116   :  { %v784_v19 = vpop.f32.mrb[5].mxu0 }
 0x117   :  { %v785_v20 = vadd.f32 %v784_v19, %v783_v17  ;;  %v786_v21 = vpop.f32.mrb[6].mxu0 }
 0x118   :  { %v787_v23 = vpop.f32.mrb[7].mxu0 }
 0x119   :  { %v604_v24 = vadd.f32 %v785_v20, %v564_v13 }
 0x11b   :  { %v644_v25 = vadd.f32 %v643_v14, %v604_v24 }
 0x11d   :  { %v649_v27 = vmax.f32 %v644_v25, 0.0 }
 0x11f   :  { %v652_v28 = vadd.f32 %v651_v26, %v649_v27 }
 0x121   :  { %v653_v29 = vpack.c.bf16 %v652_v28, %v652_v28 }
 0x123   :  { %655 = vst.msk [vmem:[%s1089_s4] sm:$0xf] %vm654_vm2, %v653_v29 }

// kernel: detector_forward.33
= control target key start
LH: loop header
LB: loop body
LE: loop exit
PB: predicated region body
PF: predicated region fallthrough
CT: control target
= control target key end

     0   :  { %vm703_vm0 = vcmask 785408   ;;  %s1568_s1 = inlined_call_operand.vmem [shape: bf16[864,256], index: 1, kind: input, shape index: {}]   ;;  %s1569_s0 = inlined_call_operand.vmem [shape: bf16[8,864], index: 0, kind: input, shape index: {}]   ;;  %s1570_s2 = inlined_call_operand.vmem [shape: f32[1,256], index: 2, kind: input, shape index: {}]   ;;  %s1571_s3 = inlined_call_operand.vmem [shape: bf16[8,256], index: 3, kind: output, shape index: {}]  }
   0x1   :  { %v1024_v0 = vld [vmem:[%s1568_s1 + $0x4] ss:$8 sps:$4 sm:$0xff]   ;;  %v1026_v1 = vld [vmem:[%s1568_s1] ss:$8 sps:$4 sm:$0xff]   ;;  %v1027_v2 = vld [vmem:[%s1568_s1 + $0x14] ss:$8 sps:$4 sm:$0xff]  }
   0x2   :  { %707 = vmatprep.subr.bf16.mxu1 %v1024_v0  ;;  %v1029_v3 = vld [vmem:[%s1568_s1 + $0x10] ss:$8 sps:$4 sm:$0xff]   ;;  %v1030_v4 = vld [vmem:[%s1568_s1 + $0x24] ss:$8 sps:$4 sm:$0xff]   ;;  %v1032_v5 = vld [vmem:[%s1568_s1 + $0x20] ss:$8 sps:$4 sm:$0xff]  }
   0x3   :  { %708 = vmatpush1.bf16.msra.mxu1 %v1026_v1  ;;  %v1038_v6 = vld [vmem:[%s1568_s1 + $0x204] ss:$8 sps:$4 sm:$0xff]   ;;  %v1041_v7 = vld [vmem:[%s1568_s1 + $0x200] ss:$8 sps:$4 sm:$0xff]   ;;  %v1033_v8 = vld [vmem:[%s1568_s1 + $0x34] ss:$8 sps:$4 sm:$0xff]  }
   0x4   :  { %709 = vmatprep.subr.bf16.mxu1 %v1027_v2  ;;  %789 = vmatprep.subr.bf16.mxu0 %v1038_v6  ;;  %v1044_v9 = vld [vmem:[%s1568_s1 + $0x214] ss:$8 sps:$4 sm:$0xff]   ;;  %v1047_v10 = vld [vmem:[%s1568_s1 + $0x210] ss:$8 sps:$4 sm:$0xff]   ;;  %v1036_v12 = vld [vmem:[%s1568_s1 + $0x44] ss:$8 sps:$4 sm:$0xff]  }
   0x5   :  { %790 = vmatpush1.bf16.msra.mxu0 %v1041_v7  ;;  %v1035_v11 = vld [vmem:[%s1568_s1 + $0x30] ss:$8 sps:$4 sm:$0xff]   ;;  %v1050_v13 = vld [vmem:[%s1568_s1 + $0x224] ss:$8 sps:$4 sm:$0xff]   ;;  %v1053_v14 = vld [vmem:[%s1568_s1 + $0x220] ss:$8 sps:$4 sm:$0xff]  }
   0x6   :  { %791 = vmatprep.subr.bf16.mxu0 %v1044_v9  ;;  %v1040_v15 = vld [vmem:[%s1568_s1 + $0x40] ss:$8 sps:$4 sm:$0xff]   ;;  %v1056_v16 = vld [vmem:[%s1568_s1 + $0x234] ss:$8 sps:$4 sm:$0xff]   ;;  %v1046_v18 = vld [vmem:[%s1568_s1 + $0x50] ss:$8 sps:$4 sm:$0xff]  }
   0x7   :  { %710 = vmatpush1.bf16.msra.mxu1 %v1029_v3  ;;  %v1042_v17 = vld [vmem:[%s1568_s1 + $0x54] ss:$8 sps:$4 sm:$0xff]   ;;  %v1059_v19 = vld [vmem:[%s1568_s1 + $0x230] ss:$8 sps:$4 sm:$0xff]   ;;  %v1062_v20 = vld [vmem:[%s1568_s1 + $0x244] ss:$8 sps:$4 sm:$0xff]  }
   0x8   :  { %711 = vmatprep.subr.bf16.mxu1 %v1030_v4  ;;  %v1048_v21 = vld [vmem:[%s1568_s1 + $0x64] ss:$8 sps:$4 sm:$0xff]   ;;  %v1065_v22 = vld [vmem:[%s1568_s1 + $0x240] ss:$8 sps:$4 sm:$0xff]   ;;  %v1068_v24 = vld [vmem:[%s1568_s1 + $0x254] ss:$8 sps:$4 sm:$0xff]  }
   0x9   :  { %792 = vmatpush1.bf16.msra.mxu0 %v1047_v10  ;;  %v1052_v23 = vld [vmem:[%s1568_s1 + $0x60] ss:$8 sps:$4 sm:$0xff]   ;;  %v1054_v25 = vld [vmem:[%s1568_s1 + $0x74] ss:$8 sps:$4 sm:$0xff]   ;;  %v1058_v26 = vld [vmem:[%s1568_s1 + $0x70] ss:$8 sps:$4 sm:$0xff]  }
   0xa   :  { %793 = vmatprep.subr.bf16.mxu0 %v1050_v13  ;;  %v1071_v27 = vld [vmem:[%s1568_s1 + $0x250] ss:$8 sps:$4 sm:$0xff]   ;;  %v1074_v28 = vld [vmem:[%s1568_s1 + $0x264] ss:$8 sps:$4 sm:$0xff]   ;;  %v1077_v30 = vld [vmem:[%s1568_s1 + $0x260] ss:$8 sps:$4 sm:$0xff]  }
   0xb   :  { %712 = vmatpush1.bf16.msra.mxu1 %v1032_v5  ;;  %v1060_v29 = vld [vmem:[%s1568_s1 + $0x84] ss:$8 sps:$4 sm:$0xff]   ;;  %v1064_v31 = vld [vmem:[%s1568_s1 + $0x80] ss:$8 sps:$4 sm:$0xff]   ;;  %v1080_v32 = vld [vmem:[%s1568_s1 + $0x274] ss:$8 sps:$4 sm:$0xff]  }
   0xc   :  { %713 = vmatprep.subr.bf16.mxu1 %v1033_v8  ;;  %v1066_v33 = vld [vmem:[%s1568_s1 + $0x94] ss:$8 sps:$4 sm:$0xff]   ;;  %v1070_v34 = vld [vmem:[%s1568_s1 + $0x90] ss:$8 sps:$4 sm:$0xff]   ;;  %v1086_v36 = vld [vmem:[%s1568_s1 + $0x284] ss:$8 sps:$4 sm:$0xff]  }
   0xd   :  { %794 = vmatpush1.bf16.msra.mxu0 %v1053_v14  ;;  %v1083_v35 = vld [vmem:[%s1568_s1 + $0x270] ss:$8 sps:$4 sm:$0xff]   ;;  %v1072_v37 = vld [vmem:[%s1568_s1 + $0xa4] ss:$8 sps:$4 sm:$0xff]   ;;  %v1089_v39 = vld [vmem:[%s1568_s1 + $0x280] ss:$8 sps:$4 sm:$0xff]  }
   0xe   :  { %795 = vmatprep.subr.bf16.mxu0 %v1056_v16  ;;  %v1331_v38 = vld [vmem:[%s1569_s0] sm:$0xff]  ;;  %v1092_v42 = vld [vmem:[%s1568_s1 + $0x294] ss:$8 sps:$4 sm:$0xff]   ;;  %v1095_v44 = vld [vmem:[%s1568_s1 + $0x290] ss:$8 sps:$4 sm:$0xff]  }
   0xf   :  { %714 = vmatpush1.bf16.msra.mxu1 %v1035_v11  ;;  %v894_v40 = vcombine.high %v1331_v38, %v1331_v38  ;;  %v1076_v41 = vld [vmem:[%s1568_s1 + $0xa0] ss:$8 sps:$4 sm:$0xff]   ;;  %v1078_v43 = vld [vmem:[%s1568_s1 + $0xb4] ss:$8 sps:$4 sm:$0xff]   ;;  %v1082_v45 = vld [vmem:[%s1568_s1 + $0xb0] ss:$8 sps:$4 sm:$0xff]   ;;  %v893_v2 = vcombine.low %v1331_v38, %v1331_v38 }
  0x10   :  { %715 = vmatprep.subr.bf16.mxu1 %v1036_v12  ;;  %v1098_v46 = vld [vmem:[%s1568_s1 + $0x2a4] ss:$8 sps:$4 sm:$0xff]   ;;  %v1101_v48 = vld [vmem:[%s1568_s1 + $0x2a0] ss:$8 sps:$4 sm:$0xff]   ;;  %v1104_v50 = vld [vmem:[%s1568_s1 + $0x2b4] ss:$8 sps:$4 sm:$0xff]  }
  0x11   :  { %796 = vmatpush1.bf16.msra.mxu0 %v1059_v19  ;;  %739 = vmatprep.mubr.bf16.mxu1 %v894_v40  ;;  %v1084_v47 = vld [vmem:[%s1568_s1 + $0xc4] ss:$8 sps:$4 sm:$0xff]   ;;  %v1088_v49 = vld [vmem:[%s1568_s1 + $0xc0] ss:$8 sps:$4 sm:$0xff]   ;;  %v1090_v51 = vld [vmem:[%s1568_s1 + $0xd4] ss:$8 sps:$4 sm:$0xff]  }
  0x12   :  { %797 = vmatprep.subr.bf16.mxu0 %v1062_v20  ;;  %v1107_v52 = vld [vmem:[%s1568_s1 + $0x2b0] ss:$8 sps:$4 sm:$0xff]   ;;  %v1114_v55 = vld [vmem:[%s1568_s1 + $0x2c4] ss:$8 sps:$4 sm:$0xff]   ;;  %v1116_v58 = vld [vmem:[%s1568_s1 + $0x2c0] ss:$8 sps:$4 sm:$0xff]  }
  0x13   :  { %716 = vmatpush1.bf16.msra.mxu1 %v1040_v15  ;;  %v17_v53 = vld [vmem:[%s1569_s0 + $0x10] sm:$0xff]  ;;  %v1096_v57 = vld [vmem:[%s1568_s1 + $0xe4] ss:$8 sps:$4 sm:$0xff]   ;;  %v1100_v59 = vld [vmem:[%s1568_s1 + $0xe0] ss:$8 sps:$4 sm:$0xff]  }
  0x14   :  { %717 = vmatprep.subr.bf16.mxu1 %v1042_v17  ;;  %v1094_v54 = vld [vmem:[%s1568_s1 + $0xd0] ss:$8 sps:$4 sm:$0xff]   ;;  %v898_v56 = vcombine.high %v17_v53, %v17_v53  ;;  %v1120_v60 = vld [vmem:[%s1568_s1 + $0x2d4] ss:$8 sps:$4 sm:$0xff]   ;;  %v1126_v0 = vld [vmem:[%s1568_s1 + $0x2e4] ss:$8 sps:$4 sm:$0xff]   ;;  %v897_v11 = vcombine.low %v17_v53, %v17_v53 }
  0x15   :  { %798 = vmatpush1.bf16.msra.mxu0 %v1065_v22  ;;  %v1102_v61 = vld [vmem:[%s1568_s1 + $0xf4] ss:$8 sps:$4 sm:$0xff]   ;;  %v1122_v62 = vld [vmem:[%s1568_s1 + $0x2d0] ss:$8 sps:$4 sm:$0xff]   ;;  %v1113_v1 = vld [vmem:[%s1568_s1 + $0x104] ss:$8 sps:$4 sm:$0xff]  }
  0x16   :  { %799 = vmatprep.subr.bf16.mxu0 %v1068_v24  ;;  %821 = vmatprep.mubr.bf16.mxu0 %v898_v56  ;;  %v1106_v63 = vld [vmem:[%s1568_s1 + $0xf0] ss:$8 sps:$4 sm:$0xff]   ;;  %v1128_v3 = vld [vmem:[%s1568_s1 + $0x2e0] ss:$8 sps:$4 sm:$0xff]   ;;  %v1132_v5 = vld [vmem:[%s1568_s1 + $0x2f4] ss:$8 sps:$4 sm:$0xff]  }
  0x17   :  { %718 = vmatpush1.bf16.msra.mxu1 %v1046_v18  ;;  %v1111_v4 = vld [vmem:[%s1568_s1 + $0x100] ss:$8 sps:$4 sm:$0xff]   ;;  %v1119_v6 = vld [vmem:[%s1568_s1 + $0x114] ss:$8 sps:$4 sm:$0xff]   ;;  %v1134_v7 = vld [vmem:[%s1568_s1 + $0x2f0] ss:$8 sps:$4 sm:$0xff]  }
  0x18   :  { %719 = vmatprep.subr.bf16.mxu1 %v1048_v21  ;;  %v1117_v8 = vld [vmem:[%s1568_s1 + $0x110] ss:$8 sps:$4 sm:$0xff]   ;;  %v1142_v9 = vld [vmem:[%s1568_s1 + $0x304] ss:$8 sps:$4 sm:$0xff]   ;;  %v1140_v12 = vld [vmem:[%s1568_s1 + $0x300] ss:$8 sps:$4 sm:$0xff]  }
  0x19   :  { %800 = vmatpush1.bf16.msra.mxu0 %v1071_v27  ;;  %v1125_v10 = vld [vmem:[%s1568_s1 + $0x124] ss:$8 sps:$4 sm:$0xff]   ;;  %v1123_v13 = vld [vmem:[%s1568_s1 + $0x120] ss:$8 sps:$4 sm:$0xff]   ;;  %v1148_v14 = vld [vmem:[%s1568_s1 + $0x314] ss:$8 sps:$4 sm:$0xff]  }
  0x1a   :  { %801 = vmatprep.subr.bf16.mxu0 %v1074_v28  ;;  %v1131_v15 = vld [vmem:[%s1568_s1 + $0x134] ss:$8 sps:$4 sm:$0xff]   ;;  %v1451_v16 = vld [vmem:[%s1569_s0 + $0x8] sm:$0xff]  ;;  %v1146_v17 = vld [vmem:[%s1568_s1 + $0x310] ss:$8 sps:$4 sm:$0xff]   ;;  %v1193_v18 = vmov 0  }
  0x1b   :  { %720 = vmatpush1.bf16.msra.mxu1 %v1052_v23  ;;  %v896_v19 = vcombine.high %v1451_v16, %v1451_v16  ;;  %v1129_v20 = vld [vmem:[%s1568_s1 + $0x130] ss:$8 sps:$4 sm:$0xff]   ;;  %v1154_v21 = vld [vmem:[%s1568_s1 + $0x324] ss:$8 sps:$4 sm:$0xff]   ;;  %v1152_v23 = vld [vmem:[%s1568_s1 + $0x320] ss:$8 sps:$4 sm:$0xff]  }
  0x1c   :  { %721 = vmatprep.subr.bf16.mxu1 %v1054_v25  ;;  %v1137_v22 = vld [vmem:[%s1568_s1 + $0x144] ss:$8 sps:$4 sm:$0xff]   ;;  %v1135_v24 = vld [vmem:[%s1568_s1 + $0x140] ss:$8 sps:$4 sm:$0xff]   ;;  %v1160_v25 = vld [vmem:[%s1568_s1 + $0x334] ss:$8 sps:$4 sm:$0xff]  }
  0x1d   :  { %802 = vmatpush1.bf16.msra.mxu0 %v1077_v30  ;;  %v1158_v27 = vld [vmem:[%s1568_s1 + $0x330] ss:$8 sps:$4 sm:$0xff]   ;;  %v1151_v30 = vld [vmem:[%s1568_s1 + $0x164] ss:$8 sps:$4 sm:$0xff]   ;;  %v1169_v40 = vld [vmem:[%s1568_s1 + $0x194] ss:$8 sps:$4 sm:$0xff]  }
  0x1e   :  { %803 = vmatprep.subr.bf16.mxu0 %v1080_v32  ;;  %v1143_v28 = vld [vmem:[%s1568_s1 + $0x150] ss:$8 sps:$4 sm:$0xff]   ;;  %v1149_v32 = vld [vmem:[%s1568_s1 + $0x160] ss:$8 sps:$4 sm:$0xff]  }
  0x1f   :  { %722 = vmatpush1.bf16.msra.mxu1 %v1058_v26  ;;  %v1145_v26 = vld [vmem:[%s1568_s1 + $0x154] ss:$8 sps:$4 sm:$0xff]   ;;  %v1110_v38 = vld [vmem:[%s1569_s0 + $0x18] ss:$0 sps:$4 sm:$0xff]  }
  0x20   :  { %723 = vmatprep.subr.bf16.mxu1 %v1060_v29  ;;  %v1166_v29 = vld [vmem:[%s1568_s1 + $0x344] ss:$8 sps:$4 sm:$0xff]   ;;  %v1188_v53 = vld [vmem:[%s1568_s1 + $0x1f0] ss:$8 sps:$4 sm:$0xff]  }
  0x21   :  { %804 = vmatpush1.bf16.msra.mxu0 %v1083_v35  ;;  %v1170_v35 = vld [vmem:[%s1568_s1 + $0x350] ss:$8 sps:$4 sm:$0xff]  }
  0x22   :  { %805 = vmatprep.subr.bf16.mxu0 %v1086_v36  ;;  %v1155_v36 = vld [vmem:[%s1568_s1 + $0x170] ss:$8 sps:$4 sm:$0xff]  }
  0x23   :  { %724 = vmatpush1.bf16.msra.mxu1 %v1064_v31  ;;  %v1164_v31 = vld [vmem:[%s1568_s1 + $0x340] ss:$8 sps:$4 sm:$0xff]  }
  0x24   :  { %725 = vmatprep.subr.bf16.mxu1 %v1066_v33  ;;  %v1172_v33 = vld [vmem:[%s1568_s1 + $0x354] ss:$8 sps:$4 sm:$0xff]  }
  0x25   :  { %806 = vmatpush1.bf16.msra.mxu0 %v1089_v39  ;;  %v1161_v39 = vld [vmem:[%s1568_s1 + $0x180] ss:$8 sps:$4 sm:$0xff]  }
  0x26   :  { %807 = vmatprep.subr.bf16.mxu0 %v1092_v42  ;;  %v1175_v42 = vld [vmem:[%s1568_s1 + $0x1a4] ss:$8 sps:$4 sm:$0xff]  }
  0x27   :  { %726 = vmatpush1.bf16.msra.mxu1 %v1070_v34  ;;  %v1157_v34 = vld [vmem:[%s1568_s1 + $0x174] ss:$8 sps:$4 sm:$0xff]  }
  0x28   :  { %727 = vmatprep.subr.bf16.mxu1 %v1072_v37  ;;  %v1163_v37 = vld [vmem:[%s1568_s1 + $0x184] ss:$8 sps:$4 sm:$0xff]  }
  0x29   :  { %808 = vmatpush1.bf16.msra.mxu0 %v1095_v44  ;;  %v1178_v44 = vld [vmem:[%s1568_s1 + $0x1b4] ss:$8 sps:$4 sm:$0xff]  }
  0x2a   :  { %809 = vmatprep.subr.bf16.mxu0 %v1098_v46  ;;  %v1181_v46 = vld [vmem:[%s1568_s1 + $0x1c4] ss:$8 sps:$4 sm:$0xff]  }
  0x2b   :  { %728 = vmatpush1.bf16.msra.mxu1 %v1076_v41  ;;  %v1167_v41 = vld [vmem:[%s1568_s1 + $0x190] ss:$8 sps:$4 sm:$0xff]  }
  0x2c   :  { %729 = vmatprep.subr.bf16.mxu1 %v1078_v43  ;;  %v1173_v43 = vld [vmem:[%s1568_s1 + $0x1a0] ss:$8 sps:$4 sm:$0xff]  }
  0x2d   :  { %810 = vmatpush1.bf16.msra.mxu0 %v1101_v48  ;;  %v1184_v48 = vld [vmem:[%s1568_s1 + $0x1d4] ss:$8 sps:$4 sm:$0xff]  }
  0x2e   :  { %811 = vmatprep.subr.bf16.mxu0 %v1104_v50  ;;  %v1187_v50 = vld [vmem:[%s1568_s1 + $0x1e4] ss:$8 sps:$4 sm:$0xff]  }
  0x2f   :  { %730 = vmatpush1.bf16.msra.mxu1 %v1082_v45  ;;  %v1176_v45 = vld [vmem:[%s1568_s1 + $0x1b0] ss:$8 sps:$4 sm:$0xff]  }
  0x30   :  { %731 = vmatprep.subr.bf16.mxu1 %v1084_v47  ;;  %v1179_v47 = vld [vmem:[%s1568_s1 + $0x1c0] ss:$8 sps:$4 sm:$0xff]  }
  0x31   :  { %812 = vmatpush1.bf16.msra.mxu0 %v1107_v52  ;;  %v1190_v52 = vld [vmem:[%s1568_s1 + $0x1f4] ss:$8 sps:$4 sm:$0xff]  }
  0x32   :  { %813 = vmatprep.subr.bf16.mxu0 %v1114_v55 }
  0x33   :  { %732 = vmatpush1.bf16.msra.mxu1 %v1088_v49  ;;  %v1182_v49 = vld [vmem:[%s1568_s1 + $0x1d0] ss:$8 sps:$4 sm:$0xff]  }
  0x34   :  { %733 = vmatprep.subr.bf16.mxu1 %v1090_v51  ;;  %v1185_v51 = vld [vmem:[%s1568_s1 + $0x1e0] ss:$8 sps:$4 sm:$0xff]  }
  0x35   :  { %814 = vmatpush1.bf16.msra.mxu0 %v1116_v58 }
  0x36   :  { %815 = vmatprep.subr.bf16.mxu0 %v1120_v60 }
  0x37   :  { %734 = vmatpush1.bf16.msra.mxu1 %v1094_v54  ;;  %v895_v54 = vcombine.low %v1451_v16, %v1451_v16 }
  0x38   :  { %735 = vmatprep.subr.bf16.mxu1 %v1096_v57 }
  0x39   :  { %816 = vmatpush1.bf16.msra.mxu0 %v1122_v62  ;;  %v127_v62 = vld [vmem:[%s1570_s2] sm:$0x3] }
  0x3a   :  { %817 = vmatprep.subr.bf16.mxu0 %v1126_v0 }
  0x3b   :  { %736 = vmatpush1.bf16.msra.mxu1 %v1100_v59  ;;  %v129_v59 = vlaneseq }
  0x3c   :  { %737 = vmatprep.subr.bf16.mxu1 %v1102_v61 }
  0x3d   :  { %818 = vmatpush1.bf16.msra.mxu0 %v1128_v3  ;;  %v130_v60 = vshrl.u32 %v129_v59, 7 }
  0x3e   :  { %819 = vmatprep.subr.bf16.mxu0 %v1132_v5 }
  0x3f   :  { %738 = vmatpush1.bf16.msra.mxu1 %v1106_v63  ;;  %v131_v61 = vsub.s32 0, %v130_v60  ;;  %v135_v63 = vsub.s32 1, %v130_v60 }
  0x40   :  { %748 = vmatprep.subr.bf16.mxu1 %v1113_v1 }
  0x41   :  { %820 = vmatpush1.bf16.msra.mxu0 %v1134_v7  ;;  %v132_v0 = vrot.slane %v127_v62, %v131_v61  ;;  %v136_v1 = vrot.slane %v127_v62, %v135_v63 }
  0x42   :  { %740 = vmatmul.mubr.bf16.vlgmr.msra.gmra.mrb[0].mxu1 %v893_v2  ;;  %830 = vmatprep.subr.bf16.mxu0 %v1142_v9 }
  0x43   :  { %749 = vmatpush1.bf16.msra.mxu1 %v1111_v4  ;;  %780 = vmatprep.mubr.bf16.mxu1 %v896_v19 }
  0x44   :  { %750 = vmatprep.subr.bf16.mxu1 %v1119_v6  ;;  %822 = vmatmul.mubr.bf16.vlgmr.msra.gmra.mrb[0].mxu0 %v897_v11 }
  0x45   :  { %831 = vmatpush1.bf16.msra.mxu0 %v1140_v12  ;;  %862 = vmatprep.mubr.bf16.mxu0 %v1193_v18 }
  0x46   :  { %832 = vmatprep.subr.bf16.mxu0 %v1148_v14 }
  0x47   :  { %751 = vmatpush1.bf16.msra.mxu1 %v1117_v8 }
  0x48   :  { %752 = vmatprep.subr.bf16.mxu1 %v1125_v10 }
  0x49   :  { %833 = vmatpush1.bf16.msra.mxu0 %v1146_v17 }
  0x4a   :  { %834 = vmatprep.subr.bf16.mxu0 %v1154_v21 }
  0x4b   :  { %753 = vmatpush1.bf16.msra.mxu1 %v1123_v13 }
  0x4c   :  { %754 = vmatprep.subr.bf16.mxu1 %v1131_v15 }
  0x4d   :  { %835 = vmatpush1.bf16.msra.mxu0 %v1152_v23 }
  0x4e   :  { %836 = vmatprep.subr.bf16.mxu0 %v1160_v25 }
  0x4f   :  { %755 = vmatpush1.bf16.msra.mxu1 %v1129_v20 }
  0x50   :  { %756 = vmatprep.subr.bf16.mxu1 %v1137_v22 }
  0x51   :  { %837 = vmatpush1.bf16.msra.mxu0 %v1158_v27 }
  0x52   :  { %838 = vmatprep.subr.bf16.mxu0 %v1166_v29 }
  0x53   :  { %757 = vmatpush1.bf16.msra.mxu1 %v1135_v24 }
  0x54   :  { %758 = vmatprep.subr.bf16.mxu1 %v1145_v26 }
  0x55   :  { %839 = vmatpush1.bf16.msra.mxu0 %v1164_v31 }
  0x56   :  { %840 = vmatprep.subr.bf16.mxu0 %v1172_v33 }
  0x57   :  { %759 = vmatpush1.bf16.msra.mxu1 %v1143_v28 }
  0x58   :  { %760 = vmatprep.subr.bf16.mxu1 %v1151_v30 }
  0x59   :  { %841 = vmatpush1.bf16.msra.mxu0 %v1170_v35 }
  0x5b   :  { %761 = vmatpush1.bf16.msra.mxu1 %v1149_v32 }
  0x5c   :  { %762 = vmatprep.subr.bf16.mxu1 %v1157_v34  ;;  %1008 = vmatmul.mubr.msk.bf16.vlgmr.msra.gmra.mrb[0].mxu0 %vm703_vm0, %v1110_v38 }
  0x5f   :  { %763 = vmatpush1.bf16.msra.mxu1 %v1155_v36 }
  0x60   :  { %764 = vmatprep.subr.bf16.mxu1 %v1163_v37 }
  0x63   :  { %765 = vmatpush1.bf16.msra.mxu1 %v1161_v39 }
  0x64   :  { %766 = vmatprep.subr.bf16.mxu1 %v1169_v40 }
  0x67   :  { %767 = vmatpush1.bf16.msra.mxu1 %v1167_v41 }
  0x68   :  { %768 = vmatprep.subr.bf16.mxu1 %v1175_v42 }
  0x6b   :  { %769 = vmatpush1.bf16.msra.mxu1 %v1173_v43 }
  0x6c   :  { %770 = vmatprep.subr.bf16.mxu1 %v1178_v44 }
  0x6f   :  { %771 = vmatpush1.bf16.msra.mxu1 %v1176_v45 }
  0x70   :  { %772 = vmatprep.subr.bf16.mxu1 %v1181_v46 }
  0x73   :  { %773 = vmatpush1.bf16.msra.mxu1 %v1179_v47 }
  0x74   :  { %774 = vmatprep.subr.bf16.mxu1 %v1184_v48 }
  0x77   :  { %775 = vmatpush1.bf16.msra.mxu1 %v1182_v49 }
  0x78   :  { %776 = vmatprep.subr.bf16.mxu1 %v1187_v50 }
  0x7b   :  { %777 = vmatpush1.bf16.msra.mxu1 %v1185_v51 }
  0x7c   :  { %778 = vmatprep.subr.bf16.mxu1 %v1190_v52 }
  0x7f   :  { %779 = vmatpush1.bf16.msra.mxu1 %v1188_v53 }
  0x82   :  { %781 = vmatmul.mubr.bf16.vlgmr.msra.gmra.mrb[0].mxu1 %v895_v54 }
 0x12f   :  { %v864_v55 = vpop.f32.mrb[0].mxu0 }
 0x130   :  { %v866_v56 = vpop.f32.mrb[1].mxu0 }
 0x131   :  { %v868_v57 = vpop.f32.mrb[2].mxu0 }
 0x132   :  { %v869_v58 = vpop.f32.mrb[3].mxu0 }
 0x155   :  { %v782_v2 = vpop.f32.mrb[0].mxu1 }
 0x156   :  { %v1011_v3 = vadd.f32 %v782_v2, %v132_v0  ;;  %v784_v4 = vpop.f32.mrb[1].mxu1 }
 0x157   :  { %v1013_v5 = vadd.f32 %v784_v4, %v136_v1  ;;  %v786_v6 = vpop.f32.mrb[2].mxu1 }
 0x158   :  { %v1012_v7 = vadd.f32 %v1011_v3, %v864_v55  ;;  %v787_v8 = vpop.f32.mrb[3].mxu1 }
 0x159   :  { %v1014_v9 = vadd.f32 %v1013_v5, %v866_v56 }
 0x15b   :  { %v877_v10 = vmax.f32 %v1014_v9, 0.0 }
 0x15d   :  { %v1010_v11 = vpack.c.bf16 %v877_v10, %v1012_v7 }
 0x15f   :  { %888 = vst [vmem:[%s1571_s3] sm:$0xff] %v1010_v11 }

// kernel: detector_forward.34
= control target key start
LH: loop header
LB: loop body
LE: loop exit
PB: predicated region body
PF: predicated region fallthrough
CT: control target
= control target key end

     0   :  { %vm1125_vm0 = vmmov 0   ;;  %s1383_s1 = inlined_call_operand.vmem [shape: bf16[1152,128], index: 1, kind: input, shape index: {}]   ;;  %s1384_s0 = inlined_call_operand.vmem [shape: bf16[8,1152], index: 0, kind: input, shape index: {}]   ;;  %s1385_s2 = inlined_call_operand.vmem [shape: f32[1,128], index: 2, kind: input, shape index: {}]   ;;  %s1386_s3 = inlined_call_operand.vmem [shape: bf16[8,128], index: 3, kind: output, shape index: {}]  }
   0x1   :  { %v1043_v0 = vld [vmem:[%s1383_s1 + $0x40] sm:$0xff]   ;;  %v1047_v4 = vld [vmem:[%s1383_s1 + $0x48] sm:$0xff]   ;;  %v1051_v8 = vld [vmem:[%s1383_s1 + $0x50] sm:$0xff]  }
   0x2   :  { %v1044_v1 = vld [vmem:[%s1383_s1] sm:$0xff]   ;;  %924 = vmatprep.subr.bf16.mxu0 %v1043_v0  ;;  %v1048_v5 = vld [vmem:[%s1383_s1 + $0x8] sm:$0xff]   ;;  %v1052_v9 = vld [vmem:[%s1383_s1 + $0x10] sm:$0xff]  }
   0x3   :  { %v1045_v2 = vld [vmem:[%s1383_s1 + $0xc0] sm:$0xff]   ;;  %925 = vmatpush3.bf16.msra.mxu0 %v1044_v1  ;;  %v1049_v6 = vld [vmem:[%s1383_s1 + $0xc8] sm:$0xff]   ;;  %v1053_v10 = vld [vmem:[%s1383_s1 + $0xd0] sm:$0xff]  }
   0x4   :  { %v1046_v3 = vld [vmem:[%s1383_s1 + $0x80] sm:$0xff]   ;;  %946 = vmatprep.subr.bf16.mxu1 %v1045_v2  ;;  %926 = vmatprep.subr.bf16.mxu0 %v1047_v4  ;;  %v1050_v7 = vld [vmem:[%s1383_s1 + $0x88] sm:$0xff]   ;;  %v1054_v11 = vld [vmem:[%s1383_s1 + $0x90] sm:$0xff]  }
   0x5   :  { %947 = vmatpush3.bf16.msra.mxu1 %v1046_v3  ;;  %v1055_v12 = vld [vmem:[%s1383_s1 + $0x58] sm:$0xff]   ;;  %v1059_v16 = vld [vmem:[%s1383_s1 + $0x60] sm:$0xff]   ;;  %v1063_v20 = vld [vmem:[%s1383_s1 + $0x68] sm:$0xff]  }
   0x6   :  { %948 = vmatprep.subr.bf16.mxu1 %v1049_v6  ;;  %v1056_v13 = vld [vmem:[%s1383_s1 + $0x18] sm:$0xff]   ;;  %v1060_v17 = vld [vmem:[%s1383_s1 + $0x20] sm:$0xff]   ;;  %v1064_v21 = vld [vmem:[%s1383_s1 + $0x28] sm:$0xff]  }
   0x7   :  { %927 = vmatpush3.bf16.msra.mxu0 %v1048_v5  ;;  %v1057_v14 = vld [vmem:[%s1383_s1 + $0xd8] sm:$0xff]   ;;  %v1061_v18 = vld [vmem:[%s1383_s1 + $0xe0] sm:$0xff]   ;;  %v1065_v22 = vld [vmem:[%s1383_s1 + $0xe8] sm:$0xff]  }
   0x8   :  { %928 = vmatprep.subr.bf16.mxu0 %v1051_v8  ;;  %v1058_v15 = vld [vmem:[%s1383_s1 + $0x98] sm:$0xff]   ;;  %v1062_v19 = vld [vmem:[%s1383_s1 + $0xa0] sm:$0xff]   ;;  %v1066_v23 = vld [vmem:[%s1383_s1 + $0xa8] sm:$0xff]  }
   0x9   :  { %949 = vmatpush3.bf16.msra.mxu1 %v1050_v7  ;;  %v1067_v24 = vld [vmem:[%s1383_s1 + $0x70] sm:$0xff]   ;;  %v1071_v28 = vld [vmem:[%s1383_s1 + $0x78] sm:$0xff]   ;;  %v15_v31 = vld [vmem:[%s1384_s0] sm:$0xff] }
   0xa   :  { %950 = vmatprep.subr.bf16.mxu1 %v1053_v10  ;;  %v1068_v25 = vld [vmem:[%s1383_s1 + $0x30] sm:$0xff]   ;;  %v1072_v29 = vld [vmem:[%s1383_s1 + $0x38] sm:$0xff]   ;;  %v843_v32 = vcombine.low %v15_v31, %v15_v31  ;;  %v844_v33 = vcombine.high %v15_v31, %v15_v31  ;;  %v1077_v35 = vld [vmem:[%s1383_s1 + $0x140] sm:$0xff]  }
   0xb   :  { %929 = vmatpush3.bf16.msra.mxu0 %v1052_v9  ;;  %v1069_v26 = vld [vmem:[%s1383_s1 + $0xf0] sm:$0xff]   ;;  %v1073_v30 = vld [vmem:[%s1383_s1 + $0xf8] sm:$0xff]   ;;  %v16_v36 = vld [vmem:[%s1384_s0 + $0x8] sm:$0xff]  ;;  %v1124_v9 = vmov 0.0  }
   0xc   :  { %930 = vmatprep.subr.bf16.mxu0 %v1055_v12  ;;  %v1070_v27 = vld [vmem:[%s1383_s1 + $0xb0] sm:$0xff]   ;;  %v1076_v34 = vld [vmem:[%s1383_s1 + $0xb8] sm:$0xff]   ;;  %667 = vmatprep.mubr.bf16.mxu0 %v844_v33  ;;  %v845_v37 = vcombine.low %v16_v36, %v16_v36  ;;  %v846_v38 = vcombine.high %v16_v36, %v16_v36  ;;  %v1080_v39 = vld [vmem:[%s1383_s1 + $0x100] sm:$0xff]  }
   0xd   :  { %951 = vmatpush3.bf16.msra.mxu1 %v1054_v11  ;;  %v1081_v40 = vld [vmem:[%s1383_s1 + $0x1c0] sm:$0xff]   ;;  %v1083_v42 = vld [vmem:[%s1383_s1 + $0x148] sm:$0xff]   ;;  %v1087_v46 = vld [vmem:[%s1383_s1 + $0x150] sm:$0xff]  }
   0xe   :  { %952 = vmatprep.subr.bf16.mxu1 %v1057_v14  ;;  %707 = vmatprep.mubr.bf16.mxu1 %v846_v38  ;;  %v1082_v41 = vld [vmem:[%s1383_s1 + $0x180] sm:$0xff]   ;;  %v1084_v43 = vld [vmem:[%s1383_s1 + $0x108] sm:$0xff]   ;;  %v1088_v47 = vld [vmem:[%s1383_s1 + $0x110] sm:$0xff]  }
   0xf   :  { %931 = vmatpush3.bf16.msra.mxu0 %v1056_v13  ;;  %v1085_v44 = vld [vmem:[%s1383_s1 + $0x1c8] sm:$0xff]   ;;  %v1089_v48 = vld [vmem:[%s1383_s1 + $0x1d0] sm:$0xff]   ;;  %v1091_v50 = vld [vmem:[%s1383_s1 + $0x158] sm:$0xff]  }
  0x10   :  { %932 = vmatprep.subr.bf16.mxu0 %v1059_v16  ;;  %v1086_v45 = vld [vmem:[%s1383_s1 + $0x188] sm:$0xff]   ;;  %v1090_v49 = vld [vmem:[%s1383_s1 + $0x190] sm:$0xff]   ;;  %v1092_v51 = vld [vmem:[%s1383_s1 + $0x118] sm:$0xff]  }
  0x11   :  { %953 = vmatpush3.bf16.msra.mxu1 %v1058_v15  ;;  %v1093_v52 = vld [vmem:[%s1383_s1 + $0x1d8] sm:$0xff]   ;;  %v1095_v54 = vld [vmem:[%s1383_s1 + $0x160] sm:$0xff]   ;;  %v1099_v58 = vld [vmem:[%s1383_s1 + $0x168] sm:$0xff]  }
  0x12   :  { %954 = vmatprep.subr.bf16.mxu1 %v1061_v18  ;;  %v1094_v53 = vld [vmem:[%s1383_s1 + $0x198] sm:$0xff]   ;;  %v1096_v55 = vld [vmem:[%s1383_s1 + $0x120] sm:$0xff]   ;;  %v1100_v59 = vld [vmem:[%s1383_s1 + $0x128] sm:$0xff]  }
  0x13   :  { %933 = vmatpush3.bf16.msra.mxu0 %v1060_v17  ;;  %v1097_v56 = vld [vmem:[%s1383_s1 + $0x1e0] sm:$0xff]   ;;  %v1101_v60 = vld [vmem:[%s1383_s1 + $0x1e8] sm:$0xff]   ;;  %v1103_v62 = vld [vmem:[%s1383_s1 + $0x170] sm:$0xff]  }
  0x14   :  { %934 = vmatprep.subr.bf16.mxu0 %v1063_v20  ;;  %v1098_v57 = vld [vmem:[%s1383_s1 + $0x1a0] sm:$0xff]   ;;  %v1102_v61 = vld [vmem:[%s1383_s1 + $0x1a8] sm:$0xff]   ;;  %v1104_v63 = vld [vmem:[%s1383_s1 + $0x130] sm:$0xff]  }
  0x15   :  { %955 = vmatpush3.bf16.msra.mxu1 %v1062_v19  ;;  %v1105_v0 = vld [vmem:[%s1383_s1 + $0x1f0] sm:$0xff]   ;;  %v1107_v2 = vld [vmem:[%s1383_s1 + $0x178] sm:$0xff]   ;;  %v1115_v13 = vld [vmem:[%s1383_s1 + $0x200] sm:$0xff]  }
  0x16   :  { %956 = vmatprep.subr.bf16.mxu1 %v1065_v22  ;;  %v1106_v1 = vld [vmem:[%s1383_s1 + $0x1b0] sm:$0xff]   ;;  %v1108_v3 = vld [vmem:[%s1383_s1 + $0x138] sm:$0xff]   ;;  %v1116_v14 = vld [vmem:[%s1383_s1 + $0x208] sm:$0xff]  }
  0x17   :  { %935 = vmatpush3.bf16.msra.mxu0 %v1064_v21  ;;  %v1109_v4 = vld [vmem:[%s1383_s1 + $0x1f8] sm:$0xff]   ;;  %v17_v5 = vld [vmem:[%s1384_s0 + $0x10] sm:$0xff]  ;;  %v1119_v17 = vld [vmem:[%s1383_s1 + $0x220] sm:$0xff]  }
  0x18   :  { %936 = vmatprep.subr.bf16.mxu0 %v1067_v24  ;;  %v847_v6 = vcombine.low %v17_v5, %v17_v5  ;;  %v848_v7 = vcombine.high %v17_v5, %v17_v5  ;;  %v1112_v8 = vld [vmem:[%s1383_s1 + $0x1b8] sm:$0xff]   ;;  %v1117_v15 = vld [vmem:[%s1383_s1 + $0x210] sm:$0xff]   ;;  %v1120_v18 = vld [vmem:[%s1383_s1 + $0x228] sm:$0xff]  }
  0x19   :  { %957 = vmatpush3.bf16.msra.mxu1 %v1066_v23  ;;  %v18_v10 = vld [vmem:[%s1384_s0 + $0x18] sm:$0xff]  ;;  %v1121_v19 = vld [vmem:[%s1383_s1 + $0x230] sm:$0xff]   ;;  %v1123_v21 = vld [vmem:[%s1384_s0 + $0x20] ss:$0 sps:$4 sm:$0xff]  }
  0x1a   :  { %958 = vmatprep.subr.bf16.mxu1 %v1069_v26  ;;  %v849_v11 = vcombine.low %v18_v10, %v18_v10  ;;  %v850_v12 = vcombine.high %v18_v10, %v18_v10  ;;  %v1118_v16 = vld [vmem:[%s1383_s1 + $0x218] sm:$0xff]   ;;  %v842_v23 = vld [vmem:[%s1385_s2] ss:$0 sm:$0xff] }
  0x1b   :  { %937 = vmatpush3.bf16.msra.mxu0 %v1068_v25  ;;  %v1122_v20 = vld [vmem:[%s1383_s1 + $0x238] sm:$0xff]  }
  0x1c   :  { %938 = vmatprep.subr.bf16.mxu0 %v1071_v28 }
  0x1d   :  { %959 = vmatpush3.bf16.msra.mxu1 %v1070_v27 }
  0x1e   :  { %960 = vmatprep.subr.bf16.mxu1 %v1073_v30 }
  0x1f   :  { %939 = vmatpush3.bf16.msra.mxu0 %v1072_v29 }
  0x20   :  { %968 = vmatprep.subr.bf16.mxu0 %v1077_v35 }
  0x21   :  { %961 = vmatpush3.bf16.msra.mxu1 %v1076_v34 }
  0x22   :  { %668 = vmatmul.mubr.bf16.vlgmr.msra.gmra.mrb[0].mxu0 %v843_v32  ;;  %990 = vmatprep.subr.bf16.mxu1 %v1081_v40 }
  0x23   :  { %969 = vmatpush3.bf16.msra.mxu0 %v1080_v39  ;;  %747 = vmatprep.mubr.bf16.mxu0 %v848_v7 }
  0x24   :  { %708 = vmatmul.mubr.bf16.vlgmr.msra.gmra.mrb[0].mxu1 %v845_v37  ;;  %970 = vmatprep.subr.bf16.mxu0 %v1083_v42 }
  0x25   :  { %991 = vmatpush3.bf16.msra.mxu1 %v1082_v41  ;;  %787 = vmatprep.mubr.bf16.mxu1 %v850_v12 }
  0x26   :  { %992 = vmatprep.subr.bf16.mxu1 %v1085_v44 }
  0x27   :  { %971 = vmatpush3.bf16.msra.mxu0 %v1084_v43 }
  0x28   :  { %972 = vmatprep.subr.bf16.mxu0 %v1087_v46 }
  0x29   :  { %993 = vmatpush3.bf16.msra.mxu1 %v1086_v45 }
  0x2a   :  { %994 = vmatprep.subr.bf16.mxu1 %v1089_v48 }
  0x2b   :  { %973 = vmatpush3.bf16.msra.mxu0 %v1088_v47 }
  0x2c   :  { %974 = vmatprep.subr.bf16.mxu0 %v1091_v50 }
  0x2d   :  { %995 = vmatpush3.bf16.msra.mxu1 %v1090_v49 }
  0x2e   :  { %996 = vmatprep.subr.bf16.mxu1 %v1093_v52 }
  0x2f   :  { %975 = vmatpush3.bf16.msra.mxu0 %v1092_v51 }
  0x30   :  { %976 = vmatprep.subr.bf16.mxu0 %v1095_v54 }
  0x31   :  { %997 = vmatpush3.bf16.msra.mxu1 %v1094_v53 }
  0x32   :  { %998 = vmatprep.subr.bf16.mxu1 %v1097_v56 }
  0x33   :  { %977 = vmatpush3.bf16.msra.mxu0 %v1096_v55 }
  0x34   :  { %978 = vmatprep.subr.bf16.mxu0 %v1099_v58 }
  0x35   :  { %999 = vmatpush3.bf16.msra.mxu1 %v1098_v57 }
  0x36   :  { %1000 = vmatprep.subr.bf16.mxu1 %v1101_v60 }
  0x37   :  { %979 = vmatpush3.bf16.msra.mxu0 %v1100_v59 }
  0x38   :  { %980 = vmatprep.subr.bf16.mxu0 %v1103_v62 }
  0x39   :  { %1001 = vmatpush3.bf16.msra.mxu1 %v1102_v61 }
  0x3a   :  { %1002 = vmatprep.subr.bf16.mxu1 %v1105_v0 }
  0x3b   :  { %981 = vmatpush3.bf16.msra.mxu0 %v1104_v63 }
  0x3c   :  { %982 = vmatprep.subr.bf16.mxu0 %v1107_v2 }
  0x3d   :  { %1003 = vmatpush3.bf16.msra.mxu1 %v1106_v1 }
  0x3e   :  { %1004 = vmatprep.subr.bf16.mxu1 %v1109_v4 }
  0x3f   :  { %983 = vmatpush3.bf16.msra.mxu0 %v1108_v3 }
  0x40   :  { %1021 = vmatprep.subr.bf16.mxu0 %v1124_v9 }
  0x41   :  { %1005 = vmatpush3.bf16.msra.mxu1 %v1112_v8 }
  0x42   :  { %748 = vmatmul.mubr.bf16.vlgmr.msra.gmra.mrb[4].mxu0 %v847_v6 }
  0x43   :  { %1022 = vmatpush3.bf16.msra.mxu0 %v1115_v13  ;;  %1037 = vmatprep.mubr.msk.bf16.mxu0 %vm1125_vm0, %v1124_v9 }
  0x44   :  { %788 = vmatmul.mubr.bf16.vlgmr.msra.gmra.mrb[4].mxu1 %v849_v11  ;;  %1023 = vmatprep.subr.bf16.mxu0 %v1124_v9 }
  0x47   :  { %1024 = vmatpush3.bf16.msra.mxu0 %v1116_v14 }
  0x48   :  { %1025 = vmatprep.subr.bf16.mxu0 %v1124_v9 }
  0x4b   :  { %1026 = vmatpush3.bf16.msra.mxu0 %v1117_v15 }
  0x4c   :  { %1027 = vmatprep.subr.bf16.mxu0 %v1124_v9 }
  0x4f   :  { %1028 = vmatpush3.bf16.msra.mxu0 %v1118_v16 }
  0x50   :  { %1029 = vmatprep.subr.bf16.mxu0 %v1124_v9 }
  0x53   :  { %1030 = vmatpush3.bf16.msra.mxu0 %v1119_v17 }
  0x54   :  { %1031 = vmatprep.subr.bf16.mxu0 %v1124_v9 }
  0x57   :  { %1032 = vmatpush3.bf16.msra.mxu0 %v1120_v18 }
  0x58   :  { %1033 = vmatprep.subr.bf16.mxu0 %v1124_v9 }
  0x5b   :  { %1034 = vmatpush3.bf16.msra.mxu0 %v1121_v19 }
  0x5c   :  { %1035 = vmatprep.subr.bf16.mxu0 %v1124_v9 }
  0x5f   :  { %1036 = vmatpush3.bf16.msra.mxu0 %v1122_v20 }
  0x62   :  { %1038 = vmatmul.mubr.bf16.vlgmr.msra.gmra.mrb[8].mxu0 %v1123_v21 }
  0xf5   :  { %v940_v22 = vpop.f32.mrb[0].mxu0 }
  0xf6   :  { %v941_v24 = vpop.f32.mrb[1].mxu0 }
  0xf7   :  { %v942_v25 = vadd.f32 %v941_v24, %v940_v22  ;;  %v943_v26 = vpop.f32.mrb[2].mxu0  ;;  %v962_v27 = vpop.f32.mrb[0].mxu1 }
  0xf8   :  { %v944_v28 = vpop.f32.mrb[3].mxu0  ;;  %v963_v29 = vpop.f32.mrb[1].mxu1 }
  0xf9   :  { %v670_v30 = vadd.f32 %v942_v25, %v842_v23  ;;  %v964_v31 = vadd.f32 %v963_v29, %v962_v27  ;;  %v965_v32 = vpop.f32.mrb[2].mxu1 }
  0xfa   :  { %v966_v33 = vpop.f32.mrb[3].mxu1 }
  0xfb   :  { %v710_v34 = vadd.f32 %v964_v31, %v670_v30 }
 0x115   :  { %v984_v35 = vpop.f32.mrb[4].mxu0 }
 0x116   :  { %v985_v36 = vpop.f32.mrb[5].mxu0 }
 0x117   :  { %v986_v37 = vadd.f32 %v985_v36, %v984_v35  ;;  %v987_v38 = vpop.f32.mrb[6].mxu0  ;;  %v1006_v39 = vpop.f32.mrb[4].mxu1 }
 0x118   :  { %v988_v40 = vpop.f32.mrb[7].mxu0  ;;  %v1007_v41 = vpop.f32.mrb[5].mxu1 }
 0x119   :  { %v750_v42 = vadd.f32 %v986_v37, %v710_v34  ;;  %v1008_v43 = vadd.f32 %v1007_v41, %v1006_v39  ;;  %v1009_v44 = vpop.f32.mrb[6].mxu1 }
 0x11a   :  { %v1010_v45 = vpop.f32.mrb[7].mxu1 }
 0x11b   :  { %v790_v46 = vadd.f32 %v1008_v43, %v750_v42 }
 0x135   :  { %v829_v47 = vpop.f32.mrb[8].mxu0 }
 0x136   :  { %v830_v48 = vadd.f32 %v829_v47, %v790_v46  ;;  %v1039_v49 = vpop.f32.mrb[9].mxu0 }
 0x137   :  { %v832_v50 = vpop.f32.mrb[10].mxu0 }
 0x138   :  { %v835_v51 = vmax.f32 %v830_v48, 0.0  ;;  %v1040_v52 = vpop.f32.mrb[11].mxu0 }
 0x13a   :  { %v836_v53 = vpack.c.bf16 %v835_v51, %v835_v51 }
 0x13c   :  { %837 = vst [vmem:[%s1386_s3] sm:$0xf] %v836_v53 }

// kernel: detector_forward.35
= control target key start
LH: loop header
LB: loop body
LE: loop exit
PB: predicated region body
PF: predicated region fallthrough
CT: control target
= control target key end

     0   :  { %vm1131_vm0 = vmmov 0   ;;  %s1397_s1 = inlined_call_operand.vmem [shape: bf16[1152,128], index: 1, kind: input, shape index: {}]   ;;  %s1398_s0 = inlined_call_operand.vmem [shape: bf16[8,1152], index: 0, kind: input, shape index: {}]   ;;  %s1399_s2 = inlined_call_operand.vmem [shape: f32[1,128], index: 2, kind: input, shape index: {}]   ;;  %s1400_s3 = inlined_call_operand.vmem [shape: bf16[8,128], index: 3, kind: input, shape index: {}]   ;;  %s1401_s4 = inlined_call_operand.vmem [shape: bf16[8,128], index: 4, kind: output, shape index: {}]  }
   0x1   :  { %v1049_v0 = vld [vmem:[%s1397_s1 + $0x40] sm:$0xff]   ;;  %v1053_v4 = vld [vmem:[%s1397_s1 + $0x48] sm:$0xff]   ;;  %v1057_v8 = vld [vmem:[%s1397_s1 + $0x50] sm:$0xff]  }
   0x2   :  { %v1050_v1 = vld [vmem:[%s1397_s1] sm:$0xff]   ;;  %930 = vmatprep.subr.bf16.mxu0 %v1049_v0  ;;  %v1054_v5 = vld [vmem:[%s1397_s1 + $0x8] sm:$0xff]   ;;  %v1058_v9 = vld [vmem:[%s1397_s1 + $0x10] sm:$0xff]  }
   0x3   :  { %v1051_v2 = vld [vmem:[%s1397_s1 + $0xc0] sm:$0xff]   ;;  %931 = vmatpush3.bf16.msra.mxu0 %v1050_v1  ;;  %v1055_v6 = vld [vmem:[%s1397_s1 + $0xc8] sm:$0xff]   ;;  %v1059_v10 = vld [vmem:[%s1397_s1 + $0xd0] sm:$0xff]  }
   0x4   :  { %v1052_v3 = vld [vmem:[%s1397_s1 + $0x80] sm:$0xff]   ;;  %952 = vmatprep.subr.bf16.mxu1 %v1051_v2  ;;  %932 = vmatprep.subr.bf16.mxu0 %v1053_v4  ;;  %v1056_v7 = vld [vmem:[%s1397_s1 + $0x88] sm:$0xff]   ;;  %v1060_v11 = vld [vmem:[%s1397_s1 + $0x90] sm:$0xff]  }
   0x5   :  { %953 = vmatpush3.bf16.msra.mxu1 %v1052_v3  ;;  %v1061_v12 = vld [vmem:[%s1397_s1 + $0x58] sm:$0xff]   ;;  %v1065_v16 = vld [vmem:[%s1397_s1 + $0x60] sm:$0xff]   ;;  %v1069_v20 = vld [vmem:[%s1397_s1 + $0x68] sm:$0xff]  }
   0x6   :  { %954 = vmatprep.subr.bf16.mxu1 %v1055_v6  ;;  %v1062_v13 = vld [vmem:[%s1397_s1 + $0x18] sm:$0xff]   ;;  %v1066_v17 = vld [vmem:[%s1397_s1 + $0x20] sm:$0xff]   ;;  %v1070_v21 = vld [vmem:[%s1397_s1 + $0x28] sm:$0xff]  }
   0x7   :  { %933 = vmatpush3.bf16.msra.mxu0 %v1054_v5  ;;  %v1063_v14 = vld [vmem:[%s1397_s1 + $0xd8] sm:$0xff]   ;;  %v1067_v18 = vld [vmem:[%s1397_s1 + $0xe0] sm:$0xff]   ;;  %v1071_v22 = vld [vmem:[%s1397_s1 + $0xe8] sm:$0xff]  }
   0x8   :  { %934 = vmatprep.subr.bf16.mxu0 %v1057_v8  ;;  %v1064_v15 = vld [vmem:[%s1397_s1 + $0x98] sm:$0xff]   ;;  %v1068_v19 = vld [vmem:[%s1397_s1 + $0xa0] sm:$0xff]   ;;  %v1072_v23 = vld [vmem:[%s1397_s1 + $0xa8] sm:$0xff]  }
   0x9   :  { %955 = vmatpush3.bf16.msra.mxu1 %v1056_v7  ;;  %v1073_v24 = vld [vmem:[%s1397_s1 + $0x70] sm:$0xff]   ;;  %v1077_v28 = vld [vmem:[%s1397_s1 + $0x78] sm:$0xff]   ;;  %v18_v31 = vld [vmem:[%s1398_s0] sm:$0xff] }
   0xa   :  { %956 = vmatprep.subr.bf16.mxu1 %v1059_v10  ;;  %v1074_v25 = vld [vmem:[%s1397_s1 + $0x30] sm:$0xff]   ;;  %v1078_v29 = vld [vmem:[%s1397_s1 + $0x38] sm:$0xff]   ;;  %v849_v32 = vcombine.low %v18_v31, %v18_v31  ;;  %v850_v33 = vcombine.high %v18_v31, %v18_v31  ;;  %v1083_v35 = vld [vmem:[%s1397_s1 + $0x140] sm:$0xff]  }
   0xb   :  { %935 = vmatpush3.bf16.msra.mxu0 %v1058_v9  ;;  %v1075_v26 = vld [vmem:[%s1397_s1 + $0xf0] sm:$0xff]   ;;  %v1079_v30 = vld [vmem:[%s1397_s1 + $0xf8] sm:$0xff]   ;;  %v19_v36 = vld [vmem:[%s1398_s0 + $0x8] sm:$0xff]  ;;  %v1130_v9 = vmov 0.0  }
   0xc   :  { %936 = vmatprep.subr.bf16.mxu0 %v1061_v12  ;;  %v1076_v27 = vld [vmem:[%s1397_s1 + $0xb0] sm:$0xff]   ;;  %v1082_v34 = vld [vmem:[%s1397_s1 + $0xb8] sm:$0xff]   ;;  %670 = vmatprep.mubr.bf16.mxu0 %v850_v33  ;;  %v851_v37 = vcombine.low %v19_v36, %v19_v36  ;;  %v852_v38 = vcombine.high %v19_v36, %v19_v36  ;;  %v1086_v39 = vld [vmem:[%s1397_s1 + $0x100] sm:$0xff]  }
   0xd   :  { %957 = vmatpush3.bf16.msra.mxu1 %v1060_v11  ;;  %v1087_v40 = vld [vmem:[%s1397_s1 + $0x1c0] sm:$0xff]   ;;  %v1089_v42 = vld [vmem:[%s1397_s1 + $0x148] sm:$0xff]   ;;  %v1093_v46 = vld [vmem:[%s1397_s1 + $0x150] sm:$0xff]  }
   0xe   :  { %958 = vmatprep.subr.bf16.mxu1 %v1063_v14  ;;  %710 = vmatprep.mubr.bf16.mxu1 %v852_v38  ;;  %v1088_v41 = vld [vmem:[%s1397_s1 + $0x180] sm:$0xff]   ;;  %v1090_v43 = vld [vmem:[%s1397_s1 + $0x108] sm:$0xff]   ;;  %v1094_v47 = vld [vmem:[%s1397_s1 + $0x110] sm:$0xff]  }
   0xf   :  { %937 = vmatpush3.bf16.msra.mxu0 %v1062_v13  ;;  %v1091_v44 = vld [vmem:[%s1397_s1 + $0x1c8] sm:$0xff]   ;;  %v1095_v48 = vld [vmem:[%s1397_s1 + $0x1d0] sm:$0xff]   ;;  %v1097_v50 = vld [vmem:[%s1397_s1 + $0x158] sm:$0xff]  }
  0x10   :  { %938 = vmatprep.subr.bf16.mxu0 %v1065_v16  ;;  %v1092_v45 = vld [vmem:[%s1397_s1 + $0x188] sm:$0xff]   ;;  %v1096_v49 = vld [vmem:[%s1397_s1 + $0x190] sm:$0xff]   ;;  %v1098_v51 = vld [vmem:[%s1397_s1 + $0x118] sm:$0xff]  }
  0x11   :  { %959 = vmatpush3.bf16.msra.mxu1 %v1064_v15  ;;  %v1099_v52 = vld [vmem:[%s1397_s1 + $0x1d8] sm:$0xff]   ;;  %v1101_v54 = vld [vmem:[%s1397_s1 + $0x160] sm:$0xff]   ;;  %v1105_v58 = vld [vmem:[%s1397_s1 + $0x168] sm:$0xff]  }
  0x12   :  { %960 = vmatprep.subr.bf16.mxu1 %v1067_v18  ;;  %v1100_v53 = vld [vmem:[%s1397_s1 + $0x198] sm:$0xff]   ;;  %v1102_v55 = vld [vmem:[%s1397_s1 + $0x120] sm:$0xff]   ;;  %v1106_v59 = vld [vmem:[%s1397_s1 + $0x128] sm:$0xff]  }
  0x13   :  { %939 = vmatpush3.bf16.msra.mxu0 %v1066_v17  ;;  %v1103_v56 = vld [vmem:[%s1397_s1 + $0x1e0] sm:$0xff]   ;;  %v1107_v60 = vld [vmem:[%s1397_s1 + $0x1e8] sm:$0xff]   ;;  %v1109_v62 = vld [vmem:[%s1397_s1 + $0x170] sm:$0xff]  }
  0x14   :  { %940 = vmatprep.subr.bf16.mxu0 %v1069_v20  ;;  %v1104_v57 = vld [vmem:[%s1397_s1 + $0x1a0] sm:$0xff]   ;;  %v1108_v61 = vld [vmem:[%s1397_s1 + $0x1a8] sm:$0xff]   ;;  %v1110_v63 = vld [vmem:[%s1397_s1 + $0x130] sm:$0xff]  }
  0x15   :  { %961 = vmatpush3.bf16.msra.mxu1 %v1068_v19  ;;  %v1111_v0 = vld [vmem:[%s1397_s1 + $0x1f0] sm:$0xff]   ;;  %v1113_v2 = vld [vmem:[%s1397_s1 + $0x178] sm:$0xff]   ;;  %v1121_v13 = vld [vmem:[%s1397_s1 + $0x200] sm:$0xff]  }
  0x16   :  { %962 = vmatprep.subr.bf16.mxu1 %v1071_v22  ;;  %v1112_v1 = vld [vmem:[%s1397_s1 + $0x1b0] sm:$0xff]   ;;  %v1114_v3 = vld [vmem:[%s1397_s1 + $0x138] sm:$0xff]   ;;  %v1122_v14 = vld [vmem:[%s1397_s1 + $0x208] sm:$0xff]  }
  0x17   :  { %941 = vmatpush3.bf16.msra.mxu0 %v1070_v21  ;;  %v1115_v4 = vld [vmem:[%s1397_s1 + $0x1f8] sm:$0xff]   ;;  %v20_v5 = vld [vmem:[%s1398_s0 + $0x10] sm:$0xff]  ;;  %v1125_v17 = vld [vmem:[%s1397_s1 + $0x220] sm:$0xff]  }
  0x18   :  { %942 = vmatprep.subr.bf16.mxu0 %v1073_v24  ;;  %v853_v6 = vcombine.low %v20_v5, %v20_v5  ;;  %v854_v7 = vcombine.high %v20_v5, %v20_v5  ;;  %v1118_v8 = vld [vmem:[%s1397_s1 + $0x1b8] sm:$0xff]   ;;  %v1123_v15 = vld [vmem:[%s1397_s1 + $0x210] sm:$0xff]   ;;  %v1126_v18 = vld [vmem:[%s1397_s1 + $0x228] sm:$0xff]  }
  0x19   :  { %963 = vmatpush3.bf16.msra.mxu1 %v1072_v23  ;;  %v21_v10 = vld [vmem:[%s1398_s0 + $0x18] sm:$0xff]  ;;  %v1127_v19 = vld [vmem:[%s1397_s1 + $0x230] sm:$0xff]   ;;  %v1129_v21 = vld [vmem:[%s1398_s0 + $0x20] ss:$0 sps:$4 sm:$0xff]  }
  0x1a   :  { %964 = vmatprep.subr.bf16.mxu1 %v1075_v26  ;;  %v855_v11 = vcombine.low %v21_v10, %v21_v10  ;;  %v856_v12 = vcombine.high %v21_v10, %v21_v10  ;;  %v1124_v16 = vld [vmem:[%s1397_s1 + $0x218] sm:$0xff]   ;;  %v848_v23 = vld [vmem:[%s1399_s2] ss:$0 sm:$0xff] }
  0x1b   :  { %943 = vmatpush3.bf16.msra.mxu0 %v1074_v25  ;;  %v1128_v20 = vld [vmem:[%s1397_s1 + $0x238] sm:$0xff]  }
  0x1c   :  { %944 = vmatprep.subr.bf16.mxu0 %v1077_v28 }
  0x1d   :  { %965 = vmatpush3.bf16.msra.mxu1 %v1076_v27 }
  0x1e   :  { %966 = vmatprep.subr.bf16.mxu1 %v1079_v30 }
  0x1f   :  { %945 = vmatpush3.bf16.msra.mxu0 %v1078_v29 }
  0x20   :  { %974 = vmatprep.subr.bf16.mxu0 %v1083_v35 }
  0x21   :  { %967 = vmatpush3.bf16.msra.mxu1 %v1082_v34 }
  0x22   :  { %671 = vmatmul.mubr.bf16.vlgmr.msra.gmra.mrb[0].mxu0 %v849_v32  ;;  %996 = vmatprep.subr.bf16.mxu1 %v1087_v40 }
  0x23   :  { %975 = vmatpush3.bf16.msra.mxu0 %v1086_v39  ;;  %750 = vmatprep.mubr.bf16.mxu0 %v854_v7 }
  0x24   :  { %711 = vmatmul.mubr.bf16.vlgmr.msra.gmra.mrb[0].mxu1 %v851_v37  ;;  %976 = vmatprep.subr.bf16.mxu0 %v1089_v42 }
  0x25   :  { %997 = vmatpush3.bf16.msra.mxu1 %v1088_v41  ;;  %790 = vmatprep.mubr.bf16.mxu1 %v856_v12 }
  0x26   :  { %998 = vmatprep.subr.bf16.mxu1 %v1091_v44 }
  0x27   :  { %977 = vmatpush3.bf16.msra.mxu0 %v1090_v43 }
  0x28   :  { %978 = vmatprep.subr.bf16.mxu0 %v1093_v46 }
  0x29   :  { %999 = vmatpush3.bf16.msra.mxu1 %v1092_v45 }
  0x2a   :  { %1000 = vmatprep.subr.bf16.mxu1 %v1095_v48 }
  0x2b   :  { %979 = vmatpush3.bf16.msra.mxu0 %v1094_v47  ;;  %v839_v47 = vld [vmem:[%s1400_s3] sm:$0xf] }
  0x2c   :  { %980 = vmatprep.subr.bf16.mxu0 %v1097_v50  ;;  %v840_v50 = vunpack.c.l.bf16 %v839_v47 }
  0x2d   :  { %1001 = vmatpush3.bf16.msra.mxu1 %v1096_v49 }
  0x2e   :  { %1002 = vmatprep.subr.bf16.mxu1 %v1099_v52 }
  0x2f   :  { %981 = vmatpush3.bf16.msra.mxu0 %v1098_v51 }
  0x30   :  { %982 = vmatprep.subr.bf16.mxu0 %v1101_v54 }
  0x31   :  { %1003 = vmatpush3.bf16.msra.mxu1 %v1100_v53 }
  0x32   :  { %1004 = vmatprep.subr.bf16.mxu1 %v1103_v56 }
  0x33   :  { %983 = vmatpush3.bf16.msra.mxu0 %v1102_v55 }
  0x34   :  { %984 = vmatprep.subr.bf16.mxu0 %v1105_v58 }
  0x35   :  { %1005 = vmatpush3.bf16.msra.mxu1 %v1104_v57 }
  0x36   :  { %1006 = vmatprep.subr.bf16.mxu1 %v1107_v60 }
  0x37   :  { %985 = vmatpush3.bf16.msra.mxu0 %v1106_v59 }
  0x38   :  { %986 = vmatprep.subr.bf16.mxu0 %v1109_v62 }
  0x39   :  { %1007 = vmatpush3.bf16.msra.mxu1 %v1108_v61 }
  0x3a   :  { %1008 = vmatprep.subr.bf16.mxu1 %v1111_v0 }
  0x3b   :  { %987 = vmatpush3.bf16.msra.mxu0 %v1110_v63 }
  0x3c   :  { %988 = vmatprep.subr.bf16.mxu0 %v1113_v2 }
  0x3d   :  { %1009 = vmatpush3.bf16.msra.mxu1 %v1112_v1 }
  0x3e   :  { %1010 = vmatprep.subr.bf16.mxu1 %v1115_v4 }
  0x3f   :  { %989 = vmatpush3.bf16.msra.mxu0 %v1114_v3 }
  0x40   :  { %1027 = vmatprep.subr.bf16.mxu0 %v1130_v9 }
  0x41   :  { %1011 = vmatpush3.bf16.msra.mxu1 %v1118_v8 }
  0x42   :  { %751 = vmatmul.mubr.bf16.vlgmr.msra.gmra.mrb[4].mxu0 %v853_v6 }
  0x43   :  { %1028 = vmatpush3.bf16.msra.mxu0 %v1121_v13  ;;  %1043 = vmatprep.mubr.msk.bf16.mxu0 %vm1131_vm0, %v1130_v9 }
  0x44   :  { %791 = vmatmul.mubr.bf16.vlgmr.msra.gmra.mrb[4].mxu1 %v855_v11  ;;  %1029 = vmatprep.subr.bf16.mxu0 %v1130_v9 }
  0x47   :  { %1030 = vmatpush3.bf16.msra.mxu0 %v1122_v14 }
  0x48   :  { %1031 = vmatprep.subr.bf16.mxu0 %v1130_v9 }
  0x4b   :  { %1032 = vmatpush3.bf16.msra.mxu0 %v1123_v15 }
  0x4c   :  { %1033 = vmatprep.subr.bf16.mxu0 %v1130_v9 }
  0x4f   :  { %1034 = vmatpush3.bf16.msra.mxu0 %v1124_v16 }
  0x50   :  { %1035 = vmatprep.subr.bf16.mxu0 %v1130_v9 }
  0x53   :  { %1036 = vmatpush3.bf16.msra.mxu0 %v1125_v17 }
  0x54   :  { %1037 = vmatprep.subr.bf16.mxu0 %v1130_v9 }
  0x57   :  { %1038 = vmatpush3.bf16.msra.mxu0 %v1126_v18 }
  0x58   :  { %1039 = vmatprep.subr.bf16.mxu0 %v1130_v9 }
  0x5b   :  { %1040 = vmatpush3.bf16.msra.mxu0 %v1127_v19 }
  0x5c   :  { %1041 = vmatprep.subr.bf16.mxu0 %v1130_v9 }
  0x5f   :  { %1042 = vmatpush3.bf16.msra.mxu0 %v1128_v20 }
  0x62   :  { %1044 = vmatmul.mubr.bf16.vlgmr.msra.gmra.mrb[8].mxu0 %v1129_v21 }
  0xf5   :  { %v946_v22 = vpop.f32.mrb[0].mxu0 }
  0xf6   :  { %v947_v24 = vpop.f32.mrb[1].mxu0 }
  0xf7   :  { %v948_v25 = vadd.f32 %v947_v24, %v946_v22  ;;  %v949_v26 = vpop.f32.mrb[2].mxu0  ;;  %v968_v27 = vpop.f32.mrb[0].mxu1 }
  0xf8   :  { %v950_v28 = vpop.f32.mrb[3].mxu0  ;;  %v969_v29 = vpop.f32.mrb[1].mxu1 }
  0xf9   :  { %v673_v30 = vadd.f32 %v948_v25, %v848_v23  ;;  %v970_v31 = vadd.f32 %v969_v29, %v968_v27  ;;  %v971_v32 = vpop.f32.mrb[2].mxu1 }
  0xfa   :  { %v972_v33 = vpop.f32.mrb[3].mxu1 }
  0xfb   :  { %v713_v34 = vadd.f32 %v970_v31, %v673_v30 }
 0x115   :  { %v990_v35 = vpop.f32.mrb[4].mxu0 }
 0x116   :  { %v991_v36 = vpop.f32.mrb[5].mxu0 }
 0x117   :  { %v992_v37 = vadd.f32 %v991_v36, %v990_v35  ;;  %v993_v38 = vpop.f32.mrb[6].mxu0  ;;  %v1012_v39 = vpop.f32.mrb[4].mxu1 }
 0x118   :  { %v994_v40 = vpop.f32.mrb[7].mxu0  ;;  %v1013_v41 = vpop.f32.mrb[5].mxu1 }
 0x119   :  { %v753_v42 = vadd.f32 %v992_v37, %v713_v34  ;;  %v1014_v43 = vadd.f32 %v1013_v41, %v1012_v39  ;;  %v1015_v44 = vpop.f32.mrb[6].mxu1 }
 0x11a   :  { %v1016_v45 = vpop.f32.mrb[7].mxu1 }
 0x11b   :  { %v793_v46 = vadd.f32 %v1014_v43, %v753_v42 }
 0x135   :  { %v832_v48 = vpop.f32.mrb[8].mxu0 }
 0x136   :  { %v833_v49 = vadd.f32 %v832_v48, %v793_v46  ;;  %v1045_v51 = vpop.f32.mrb[9].mxu0 }
 0x137   :  { %v835_v52 = vpop.f32.mrb[10].mxu0 }
 0x138   :  { %v838_v53 = vmax.f32 %v833_v49, 0.0  ;;  %v1046_v54 = vpop.f32.mrb[11].mxu0 }
 0x13a   :  { %v841_v55 = vadd.f32 %v840_v50, %v838_v53 }
 0x13c   :  { %v842_v56 = vpack.c.bf16 %v841_v55, %v841_v55 }
 0x13e   :  { %843 = vst [vmem:[%s1401_s4] sm:$0xf] %v842_v56 }

// kernel: detector_forward.36
= control target key start
LH: loop header
LB: loop body
LE: loop exit
PB: predicated region body
PF: predicated region fallthrough
CT: control target
= control target key end

     0   :  { %s1779_s1 = inlined_call_operand.vmem [shape: bf16[512,512], index: 1, kind: input, shape index: {}]   ;;  %s1780_s0 = inlined_call_operand.vmem [shape: bf16[8,512], index: 0, kind: input, shape index: {}]   ;;  %s1781_s2 = inlined_call_operand.vmem [shape: f32[1,512], index: 2, kind: input, shape index: {}]   ;;  %s1782_s3 = inlined_call_operand.vmem [shape: bf16[8,512], index: 3, kind: output, shape index: {}]  }
   0x1   :  { %v1158_v0 = vld [vmem:[%s1779_s1 + $0x4] ss:$16 sps:$4 sm:$0xff]   ;;  %v1160_v1 = vld [vmem:[%s1779_s1 + $0xc] ss:$16 sps:$4 sm:$0xff]   ;;  %v1162_v2 = vld [vmem:[%s1779_s1] ss:$16 sps:$4 sm:$0xff]  }
   0x2   :  { %820 = vmatprep.subr.bf16.mxu0 %v1158_v0  ;;  %v1163_v3 = vld [vmem:[%s1779_s1 + $0x8] ss:$16 sps:$4 sm:$0xff]   ;;  %902 = vmatprep.subr.bf16.mxu1 %v1160_v1  ;;  %v1164_v4 = vld [vmem:[%s1779_s1 + $0x24] ss:$16 sps:$4 sm:$0xff]   ;;  %v1166_v5 = vld [vmem:[%s1779_s1 + $0x2c] ss:$16 sps:$4 sm:$0xff]  }
   0x3   :  { %821 = vmatpush1.bf16.msra.mxu0 %v1162_v2  ;;  %903 = vmatpush1.bf16.msra.mxu1 %v1163_v3  ;;  %v1168_v6 = vld [vmem:[%s1779_s1 + $0x20] ss:$16 sps:$4 sm:$0xff]   ;;  %v1169_v7 = vld [vmem:[%s1779_s1 + $0x28] ss:$16 sps:$4 sm:$0xff]   ;;  %v1170_v8 = vld [vmem:[%s1779_s1 + $0x44] ss:$16 sps:$4 sm:$0xff]  }
   0x4   :  { %822 = vmatprep.subr.bf16.mxu0 %v1164_v4  ;;  %904 = vmatprep.subr.bf16.mxu1 %v1166_v5  ;;  %v1172_v9 = vld [vmem:[%s1779_s1 + $0x4c] ss:$16 sps:$4 sm:$0xff]   ;;  %v1174_v10 = vld [vmem:[%s1779_s1 + $0x40] ss:$16 sps:$4 sm:$0xff]   ;;  %v1175_v11 = vld [vmem:[%s1779_s1 + $0x48] ss:$16 sps:$4 sm:$0xff]  }
   0x5   :  { %v1176_v12 = vld [vmem:[%s1779_s1 + $0x64] ss:$16 sps:$4 sm:$0xff]   ;;  %v1178_v13 = vld [vmem:[%s1779_s1 + $0x6c] ss:$16 sps:$4 sm:$0xff]   ;;  %v1180_v14 = vld [vmem:[%s1779_s1 + $0x60] ss:$16 sps:$4 sm:$0xff]  }
   0x6   :  { %v1181_v15 = vld [vmem:[%s1779_s1 + $0x68] ss:$16 sps:$4 sm:$0xff]   ;;  %v1182_v16 = vld [vmem:[%s1779_s1 + $0x84] ss:$16 sps:$4 sm:$0xff]   ;;  %v1184_v17 = vld [vmem:[%s1779_s1 + $0x8c] ss:$16 sps:$4 sm:$0xff]  }
   0x7   :  { %823 = vmatpush1.bf16.msra.mxu0 %v1168_v6  ;;  %905 = vmatpush1.bf16.msra.mxu1 %v1169_v7  ;;  %v1186_v18 = vld [vmem:[%s1779_s1 + $0x80] ss:$16 sps:$4 sm:$0xff]   ;;  %v1187_v19 = vld [vmem:[%s1779_s1 + $0x88] ss:$16 sps:$4 sm:$0xff]   ;;  %v1188_v20 = vld [vmem:[%s1779_s1 + $0xa4] ss:$16 sps:$4 sm:$0xff]  }
   0x8   :  { %824 = vmatprep.subr.bf16.mxu0 %v1170_v8  ;;  %906 = vmatprep.subr.bf16.mxu1 %v1172_v9  ;;  %v1190_v21 = vld [vmem:[%s1779_s1 + $0xac] ss:$16 sps:$4 sm:$0xff]   ;;  %v1192_v22 = vld [vmem:[%s1779_s1 + $0xa0] ss:$16 sps:$4 sm:$0xff]   ;;  %v1193_v23 = vld [vmem:[%s1779_s1 + $0xa8] ss:$16 sps:$4 sm:$0xff]  }
   0x9   :  { %v1194_v24 = vld [vmem:[%s1779_s1 + $0xc4] ss:$16 sps:$4 sm:$0xff]   ;;  %v1196_v25 = vld [vmem:[%s1779_s1 + $0xcc] ss:$16 sps:$4 sm:$0xff]   ;;  %v1198_v26 = vld [vmem:[%s1779_s1 + $0xc0] ss:$16 sps:$4 sm:$0xff]  }
   0xa   :  { %v1199_v27 = vld [vmem:[%s1779_s1 + $0xc8] ss:$16 sps:$4 sm:$0xff]   ;;  %v1200_v28 = vld [vmem:[%s1779_s1 + $0xe4] ss:$16 sps:$4 sm:$0xff]   ;;  %v1202_v29 = vld [vmem:[%s1779_s1 + $0xec] ss:$16 sps:$4 sm:$0xff]  }
   0xb   :  { %825 = vmatpush1.bf16.msra.mxu0 %v1174_v10  ;;  %907 = vmatpush1.bf16.msra.mxu1 %v1175_v11  ;;  %v1204_v30 = vld [vmem:[%s1779_s1 + $0xe0] ss:$16 sps:$4 sm:$0xff]   ;;  %v1205_v31 = vld [vmem:[%s1779_s1 + $0xe8] ss:$16 sps:$4 sm:$0xff]   ;;  %v1206_v32 = vld [vmem:[%s1779_s1 + $0x104] ss:$16 sps:$4 sm:$0xff]  }
   0xc   :  { %826 = vmatprep.subr.bf16.mxu0 %v1176_v12  ;;  %908 = vmatprep.subr.bf16.mxu1 %v1178_v13  ;;  %v1208_v33 = vld [vmem:[%s1779_s1 + $0x10c] ss:$16 sps:$4 sm:$0xff]   ;;  %v1210_v34 = vld [vmem:[%s1779_s1 + $0x100] ss:$16 sps:$4 sm:$0xff]   ;;  %v1211_v35 = vld [vmem:[%s1779_s1 + $0x108] ss:$16 sps:$4 sm:$0xff]  }
   0xd   :  { %v1212_v36 = vld [vmem:[%s1779_s1 + $0x124] ss:$16 sps:$4 sm:$0xff]   ;;  %v1214_v37 = vld [vmem:[%s1779_s1 + $0x12c] ss:$16 sps:$4 sm:$0xff]   ;;  %v1216_v38 = vld [vmem:[%s1779_s1 + $0x120] ss:$16 sps:$4 sm:$0xff]  }
   0xe   :  { %v1217_v39 = vld [vmem:[%s1779_s1 + $0x128] ss:$16 sps:$4 sm:$0xff]   ;;  %v1218_v40 = vld [vmem:[%s1779_s1 + $0x144] ss:$16 sps:$4 sm:$0xff]   ;;  %v1220_v41 = vld [vmem:[%s1779_s1 + $0x14c] ss:$16 sps:$4 sm:$0xff]  }
   0xf   :  { %827 = vmatpush1.bf16.msra.mxu0 %v1180_v14  ;;  %909 = vmatpush1.bf16.msra.mxu1 %v1181_v15  ;;  %v1222_v42 = vld [vmem:[%s1779_s1 + $0x140] ss:$16 sps:$4 sm:$0xff]   ;;  %v1223_v43 = vld [vmem:[%s1779_s1 + $0x148] ss:$16 sps:$4 sm:$0xff]   ;;  %v1224_v44 = vld [vmem:[%s1779_s1 + $0x164] ss:$16 sps:$4 sm:$0xff]  }
  0x10   :  { %828 = vmatprep.subr.bf16.mxu0 %v1182_v16  ;;  %910 = vmatprep.subr.bf16.mxu1 %v1184_v17  ;;  %v1226_v45 = vld [vmem:[%s1779_s1 + $0x16c] ss:$16 sps:$4 sm:$0xff]   ;;  %v14_v46 = vld [vmem:[%s1780_s0] sm:$0xff]  ;;  %v1229_v49 = vld [vmem:[%s1779_s1 + $0x168] ss:$16 sps:$4 sm:$0xff]  }
  0x11   :  { %v1011_v47 = vcombine.high %v14_v46, %v14_v46  ;;  %v1228_v48 = vld [vmem:[%s1779_s1 + $0x160] ss:$16 sps:$4 sm:$0xff]   ;;  %v1230_v50 = vld [vmem:[%s1779_s1 + $0x184] ss:$16 sps:$4 sm:$0xff]   ;;  %v1232_v51 = vld [vmem:[%s1779_s1 + $0x18c] ss:$16 sps:$4 sm:$0xff]   ;;  %v1010_v5 = vcombine.low %v14_v46, %v14_v46 }
  0x12   :  { %v1234_v52 = vld [vmem:[%s1779_s1 + $0x180] ss:$16 sps:$4 sm:$0xff]   ;;  %v1235_v53 = vld [vmem:[%s1779_s1 + $0x188] ss:$16 sps:$4 sm:$0xff]   ;;  %v1236_v54 = vld [vmem:[%s1779_s1 + $0x1a4] ss:$16 sps:$4 sm:$0xff]  }
  0x13   :  { %829 = vmatpush1.bf16.msra.mxu0 %v1186_v18  ;;  %911 = vmatpush1.bf16.msra.mxu1 %v1187_v19  ;;  %v1238_v55 = vld [vmem:[%s1779_s1 + $0x1ac] ss:$16 sps:$4 sm:$0xff]   ;;  %v1240_v56 = vld [vmem:[%s1779_s1 + $0x1a0] ss:$16 sps:$4 sm:$0xff]   ;;  %v1241_v57 = vld [vmem:[%s1779_s1 + $0x1a8] ss:$16 sps:$4 sm:$0xff]  }
  0x14   :  { %830 = vmatprep.subr.bf16.mxu0 %v1188_v20  ;;  %912 = vmatprep.subr.bf16.mxu1 %v1190_v21  ;;  %v1242_v58 = vld [vmem:[%s1779_s1 + $0x1c4] ss:$16 sps:$4 sm:$0xff]   ;;  %v1244_v59 = vld [vmem:[%s1779_s1 + $0x1cc] ss:$16 sps:$4 sm:$0xff]   ;;  %v1246_v60 = vld [vmem:[%s1779_s1 + $0x1c0] ss:$16 sps:$4 sm:$0xff]  }
  0x15   :  { %852 = vmatprep.mubr.bf16.mxu0 %v1011_v47  ;;  %934 = vmatprep.mubr.bf16.mxu1 %v1011_v47  ;;  %v1247_v61 = vld [vmem:[%s1779_s1 + $0x1c8] ss:$16 sps:$4 sm:$0xff]   ;;  %v1248_v62 = vld [vmem:[%s1779_s1 + $0x1e4] ss:$16 sps:$4 sm:$0xff]   ;;  %v1250_v63 = vld [vmem:[%s1779_s1 + $0x1ec] ss:$16 sps:$4 sm:$0xff]  }
  0x16   :  { %v1252_v0 = vld [vmem:[%s1779_s1 + $0x1e0] ss:$16 sps:$4 sm:$0xff]   ;;  %v1253_v1 = vld [vmem:[%s1779_s1 + $0x1e8] ss:$16 sps:$4 sm:$0xff]   ;;  %v1259_v2 = vld [vmem:[%s1779_s1 + $0x204] ss:$16 sps:$4 sm:$0xff]  }
  0x17   :  { %831 = vmatpush1.bf16.msra.mxu0 %v1192_v22  ;;  %913 = vmatpush1.bf16.msra.mxu1 %v1193_v23  ;;  %v1262_v3 = vld [vmem:[%s1779_s1 + $0x20c] ss:$16 sps:$4 sm:$0xff]   ;;  %v1257_v6 = vld [vmem:[%s1779_s1 + $0x200] ss:$16 sps:$4 sm:$0xff]   ;;  %v1260_v7 = vld [vmem:[%s1779_s1 + $0x208] ss:$16 sps:$4 sm:$0xff]  }
  0x18   :  { %832 = vmatprep.subr.bf16.mxu0 %v1194_v24  ;;  %914 = vmatprep.subr.bf16.mxu1 %v1196_v25  ;;  %v1578_v4 = vld [vmem:[%s1780_s0 + $0x8] sm:$0xff]  ;;  %v1265_v8 = vld [vmem:[%s1779_s1 + $0x224] ss:$16 sps:$4 sm:$0xff]   ;;  %v1263_v11 = vld [vmem:[%s1779_s1 + $0x220] ss:$16 sps:$4 sm:$0xff]  }
  0x19   :  { %v1268_v9 = vld [vmem:[%s1779_s1 + $0x22c] ss:$16 sps:$4 sm:$0xff]   ;;  %v1013_v10 = vcombine.high %v1578_v4, %v1578_v4  ;;  %v1266_v12 = vld [vmem:[%s1779_s1 + $0x228] ss:$16 sps:$4 sm:$0xff]   ;;  %v1271_v13 = vld [vmem:[%s1779_s1 + $0x244] ss:$16 sps:$4 sm:$0xff]  }
  0x1a   :  { %v1274_v14 = vld [vmem:[%s1779_s1 + $0x24c] ss:$16 sps:$4 sm:$0xff]   ;;  %v1269_v15 = vld [vmem:[%s1779_s1 + $0x240] ss:$16 sps:$4 sm:$0xff]   ;;  %v1272_v16 = vld [vmem:[%s1779_s1 + $0x248] ss:$16 sps:$4 sm:$0xff]  }
  0x1b   :  { %833 = vmatpush1.bf16.msra.mxu0 %v1198_v26  ;;  %915 = vmatpush1.bf16.msra.mxu1 %v1199_v27  ;;  %v1277_v17 = vld [vmem:[%s1779_s1 + $0x264] ss:$16 sps:$4 sm:$0xff]   ;;  %v1280_v18 = vld [vmem:[%s1779_s1 + $0x26c] ss:$16 sps:$4 sm:$0xff]   ;;  %v1275_v19 = vld [vmem:[%s1779_s1 + $0x260] ss:$16 sps:$4 sm:$0xff]  }
  0x1c   :  { %834 = vmatprep.subr.bf16.mxu0 %v1200_v28  ;;  %916 = vmatprep.subr.bf16.mxu1 %v1202_v29  ;;  %v1278_v20 = vld [vmem:[%s1779_s1 + $0x268] ss:$16 sps:$4 sm:$0xff]   ;;  %v1283_v21 = vld [vmem:[%s1779_s1 + $0x284] ss:$16 sps:$4 sm:$0xff]   ;;  %v1286_v22 = vld [vmem:[%s1779_s1 + $0x28c] ss:$16 sps:$4 sm:$0xff]  }
  0x1d   :  { %v1281_v23 = vld [vmem:[%s1779_s1 + $0x280] ss:$16 sps:$4 sm:$0xff]   ;;  %v1284_v24 = vld [vmem:[%s1779_s1 + $0x288] ss:$16 sps:$4 sm:$0xff]   ;;  %v1289_v25 = vld [vmem:[%s1779_s1 + $0x2a4] ss:$16 sps:$4 sm:$0xff]  }
  0x1e   :  { %v1292_v26 = vld [vmem:[%s1779_s1 + $0x2ac] ss:$16 sps:$4 sm:$0xff]   ;;  %v1287_v27 = vld [vmem:[%s1779_s1 + $0x2a0] ss:$16 sps:$4 sm:$0xff]   ;;  %v1290_v28 = vld [vmem:[%s1779_s1 + $0x2a8] ss:$16 sps:$4 sm:$0xff]  }
  0x1f   :  { %835 = vmatpush1.bf16.msra.mxu0 %v1204_v30  ;;  %917 = vmatpush1.bf16.msra.mxu1 %v1205_v31  ;;  %v1295_v29 = vld [vmem:[%s1779_s1 + $0x2c4] ss:$16 sps:$4 sm:$0xff]   ;;  %v1298_v30 = vld [vmem:[%s1779_s1 + $0x2cc] ss:$16 sps:$4 sm:$0xff]   ;;  %v1293_v31 = vld [vmem:[%s1779_s1 + $0x2c0] ss:$16 sps:$4 sm:$0xff]  }
  0x20   :  { %836 = vmatprep.subr.bf16.mxu0 %v1206_v32  ;;  %918 = vmatprep.subr.bf16.mxu1 %v1208_v33  ;;  %v1296_v32 = vld [vmem:[%s1779_s1 + $0x2c8] ss:$16 sps:$4 sm:$0xff]   ;;  %v1301_v33 = vld [vmem:[%s1779_s1 + $0x2e4] ss:$16 sps:$4 sm:$0xff]   ;;  %v1322_v46 = vld [vmem:[%s1779_s1 + $0x34c] ss:$16 sps:$4 sm:$0xff]  }
  0x21   :  { %v1317_v47 = vld [vmem:[%s1779_s1 + $0x340] ss:$16 sps:$4 sm:$0xff]  }
  0x23   :  { %837 = vmatpush1.bf16.msra.mxu0 %v1210_v34  ;;  %919 = vmatpush1.bf16.msra.mxu1 %v1211_v35  ;;  %v1304_v34 = vld [vmem:[%s1779_s1 + $0x2ec] ss:$16 sps:$4 sm:$0xff]   ;;  %v1299_v35 = vld [vmem:[%s1779_s1 + $0x2e0] ss:$16 sps:$4 sm:$0xff]  }
  0x24   :  { %838 = vmatprep.subr.bf16.mxu0 %v1212_v36  ;;  %920 = vmatprep.subr.bf16.mxu1 %v1214_v37  ;;  %v1302_v36 = vld [vmem:[%s1779_s1 + $0x2e8] ss:$16 sps:$4 sm:$0xff]   ;;  %v1307_v37 = vld [vmem:[%s1779_s1 + $0x304] ss:$16 sps:$4 sm:$0xff]  }
  0x27   :  { %839 = vmatpush1.bf16.msra.mxu0 %v1216_v38  ;;  %921 = vmatpush1.bf16.msra.mxu1 %v1217_v39  ;;  %v1310_v38 = vld [vmem:[%s1779_s1 + $0x30c] ss:$16 sps:$4 sm:$0xff]   ;;  %v1305_v39 = vld [vmem:[%s1779_s1 + $0x300] ss:$16 sps:$4 sm:$0xff]  }
  0x28   :  { %840 = vmatprep.subr.bf16.mxu0 %v1218_v40  ;;  %922 = vmatprep.subr.bf16.mxu1 %v1220_v41  ;;  %v1308_v40 = vld [vmem:[%s1779_s1 + $0x308] ss:$16 sps:$4 sm:$0xff]   ;;  %v1313_v41 = vld [vmem:[%s1779_s1 + $0x324] ss:$16 sps:$4 sm:$0xff]  }
  0x2b   :  { %841 = vmatpush1.bf16.msra.mxu0 %v1222_v42  ;;  %923 = vmatpush1.bf16.msra.mxu1 %v1223_v43  ;;  %v1316_v42 = vld [vmem:[%s1779_s1 + $0x32c] ss:$16 sps:$4 sm:$0xff]   ;;  %v1311_v43 = vld [vmem:[%s1779_s1 + $0x320] ss:$16 sps:$4 sm:$0xff]  }
  0x2c   :  { %842 = vmatprep.subr.bf16.mxu0 %v1224_v44  ;;  %924 = vmatprep.subr.bf16.mxu1 %v1226_v45  ;;  %v1314_v44 = vld [vmem:[%s1779_s1 + $0x328] ss:$16 sps:$4 sm:$0xff]   ;;  %v1319_v45 = vld [vmem:[%s1779_s1 + $0x344] ss:$16 sps:$4 sm:$0xff]  }
  0x2f   :  { %843 = vmatpush1.bf16.msra.mxu0 %v1228_v48  ;;  %925 = vmatpush1.bf16.msra.mxu1 %v1229_v49  ;;  %v1320_v48 = vld [vmem:[%s1779_s1 + $0x348] ss:$16 sps:$4 sm:$0xff]   ;;  %v1325_v49 = vld [vmem:[%s1779_s1 + $0x364] ss:$16 sps:$4 sm:$0xff]  }
  0x30   :  { %844 = vmatprep.subr.bf16.mxu0 %v1230_v50  ;;  %926 = vmatprep.subr.bf16.mxu1 %v1232_v51  ;;  %v1328_v50 = vld [vmem:[%s1779_s1 + $0x36c] ss:$16 sps:$4 sm:$0xff]   ;;  %v1323_v51 = vld [vmem:[%s1779_s1 + $0x360] ss:$16 sps:$4 sm:$0xff]  }
  0x33   :  { %845 = vmatpush1.bf16.msra.mxu0 %v1234_v52  ;;  %927 = vmatpush1.bf16.msra.mxu1 %v1235_v53  ;;  %v1326_v52 = vld [vmem:[%s1779_s1 + $0x368] ss:$16 sps:$4 sm:$0xff]   ;;  %v1331_v53 = vld [vmem:[%s1779_s1 + $0x384] ss:$16 sps:$4 sm:$0xff]  }
  0x34   :  { %846 = vmatprep.subr.bf16.mxu0 %v1236_v54  ;;  %928 = vmatprep.subr.bf16.mxu1 %v1238_v55  ;;  %v1334_v54 = vld [vmem:[%s1779_s1 + $0x38c] ss:$16 sps:$4 sm:$0xff]   ;;  %v1329_v55 = vld [vmem:[%s1779_s1 + $0x380] ss:$16 sps:$4 sm:$0xff]  }
  0x37   :  { %847 = vmatpush1.bf16.msra.mxu0 %v1240_v56  ;;  %929 = vmatpush1.bf16.msra.mxu1 %v1241_v57  ;;  %v1332_v56 = vld [vmem:[%s1779_s1 + $0x388] ss:$16 sps:$4 sm:$0xff]   ;;  %v1337_v57 = vld [vmem:[%s1779_s1 + $0x3a4] ss:$16 sps:$4 sm:$0xff]  }
  0x38   :  { %848 = vmatprep.subr.bf16.mxu0 %v1242_v58  ;;  %930 = vmatprep.subr.bf16.mxu1 %v1244_v59  ;;  %v1340_v58 = vld [vmem:[%s1779_s1 + $0x3ac] ss:$16 sps:$4 sm:$0xff]   ;;  %v1335_v59 = vld [vmem:[%s1779_s1 + $0x3a0] ss:$16 sps:$4 sm:$0xff]  }
  0x3b   :  { %849 = vmatpush1.bf16.msra.mxu0 %v1246_v60  ;;  %931 = vmatpush1.bf16.msra.mxu1 %v1247_v61  ;;  %v1338_v60 = vld [vmem:[%s1779_s1 + $0x3a8] ss:$16 sps:$4 sm:$0xff]   ;;  %v1343_v61 = vld [vmem:[%s1779_s1 + $0x3c4] ss:$16 sps:$4 sm:$0xff]  }
  0x3c   :  { %850 = vmatprep.subr.bf16.mxu0 %v1248_v62  ;;  %932 = vmatprep.subr.bf16.mxu1 %v1250_v63  ;;  %v1346_v62 = vld [vmem:[%s1779_s1 + $0x3cc] ss:$16 sps:$4 sm:$0xff]   ;;  %v1341_v63 = vld [vmem:[%s1779_s1 + $0x3c0] ss:$16 sps:$4 sm:$0xff]  }
  0x3f   :  { %851 = vmatpush1.bf16.msra.mxu0 %v1252_v0  ;;  %933 = vmatpush1.bf16.msra.mxu1 %v1253_v1  ;;  %v1344_v0 = vld [vmem:[%s1779_s1 + $0x3c8] ss:$16 sps:$4 sm:$0xff]   ;;  %v1349_v1 = vld [vmem:[%s1779_s1 + $0x3e4] ss:$16 sps:$4 sm:$0xff]  }
  0x40   :  { %861 = vmatprep.subr.bf16.mxu0 %v1259_v2  ;;  %943 = vmatprep.subr.bf16.mxu1 %v1262_v3  ;;  %v1352_v2 = vld [vmem:[%s1779_s1 + $0x3ec] ss:$16 sps:$4 sm:$0xff]   ;;  %v1347_v3 = vld [vmem:[%s1779_s1 + $0x3e0] ss:$16 sps:$4 sm:$0xff]  }
  0x42   :  { %853 = vmatmul.mubr.bf16.vlgmr.msra.gmra.mrb[0].mxu0 %v1010_v5  ;;  %935 = vmatmul.mubr.bf16.vlgmr.msra.gmra.mrb[0].mxu1 %v1010_v5  ;;  %v1350_v5 = vld [vmem:[%s1779_s1 + $0x3e8] ss:$16 sps:$4 sm:$0xff]  }
  0x43   :  { %862 = vmatpush1.bf16.msra.mxu0 %v1257_v6  ;;  %944 = vmatpush1.bf16.msra.mxu1 %v1260_v7  ;;  %v1012_v6 = vcombine.low %v1578_v4, %v1578_v4  ;;  %v146_v7 = vlaneseq }
  0x44   :  { %863 = vmatprep.subr.bf16.mxu0 %v1265_v8  ;;  %945 = vmatprep.subr.bf16.mxu1 %v1268_v9 }
  0x45   :  { %893 = vmatprep.mubr.bf16.mxu0 %v1013_v10  ;;  %975 = vmatprep.mubr.bf16.mxu1 %v1013_v10  ;;  %v147_v8 = vshrl.u32 %v146_v7, 7 }
  0x47   :  { %864 = vmatpush1.bf16.msra.mxu0 %v1263_v11  ;;  %946 = vmatpush1.bf16.msra.mxu1 %v1266_v12  ;;  %v148_v9 = vsub.s32 0, %v147_v8  ;;  %v156_v10 = vsub.s32 2, %v147_v8  ;;  %v144_v11 = vld [vmem:[%s1781_s2] sm:$0xf]  ;;  %v152_v12 = vsub.s32 1, %v147_v8 }
  0x48   :  { %865 = vmatprep.subr.bf16.mxu0 %v1271_v13  ;;  %947 = vmatprep.subr.bf16.mxu1 %v1274_v14  ;;  %v160_v13 = vsub.s32 3, %v147_v8 }
  0x49   :  { %v149_v14 = vrot.slane %v144_v11, %v148_v9 }
  0x4b   :  { %866 = vmatpush1.bf16.msra.mxu0 %v1269_v15  ;;  %948 = vmatpush1.bf16.msra.mxu1 %v1272_v16  ;;  %v157_v15 = vrot.slane %v144_v11, %v156_v10  ;;  %v153_v16 = vrot.slane %v144_v11, %v152_v12 }
  0x4c   :  { %867 = vmatprep.subr.bf16.mxu0 %v1277_v17  ;;  %949 = vmatprep.subr.bf16.mxu1 %v1280_v18  ;;  %v161_v17 = vrot.slane %v144_v11, %v160_v13 }
  0x4f   :  { %868 = vmatpush1.bf16.msra.mxu0 %v1275_v19  ;;  %950 = vmatpush1.bf16.msra.mxu1 %v1278_v20 }
  0x50   :  { %869 = vmatprep.subr.bf16.mxu0 %v1283_v21  ;;  %951 = vmatprep.subr.bf16.mxu1 %v1286_v22 }
  0x53   :  { %870 = vmatpush1.bf16.msra.mxu0 %v1281_v23  ;;  %952 = vmatpush1.bf16.msra.mxu1 %v1284_v24 }
  0x54   :  { %871 = vmatprep.subr.bf16.mxu0 %v1289_v25  ;;  %953 = vmatprep.subr.bf16.mxu1 %v1292_v26 }
  0x57   :  { %872 = vmatpush1.bf16.msra.mxu0 %v1287_v27  ;;  %954 = vmatpush1.bf16.msra.mxu1 %v1290_v28 }
  0x58   :  { %873 = vmatprep.subr.bf16.mxu0 %v1295_v29  ;;  %955 = vmatprep.subr.bf16.mxu1 %v1298_v30 }
  0x5b   :  { %874 = vmatpush1.bf16.msra.mxu0 %v1293_v31  ;;  %956 = vmatpush1.bf16.msra.mxu1 %v1296_v32 }
  0x5c   :  { %875 = vmatprep.subr.bf16.mxu0 %v1301_v33  ;;  %957 = vmatprep.subr.bf16.mxu1 %v1304_v34 }
  0x5f   :  { %876 = vmatpush1.bf16.msra.mxu0 %v1299_v35  ;;  %958 = vmatpush1.bf16.msra.mxu1 %v1302_v36 }
  0x60   :  { %877 = vmatprep.subr.bf16.mxu0 %v1307_v37  ;;  %959 = vmatprep.subr.bf16.mxu1 %v1310_v38 }
  0x63   :  { %878 = vmatpush1.bf16.msra.mxu0 %v1305_v39  ;;  %960 = vmatpush1.bf16.msra.mxu1 %v1308_v40 }
  0x64   :  { %879 = vmatprep.subr.bf16.mxu0 %v1313_v41  ;;  %961 = vmatprep.subr.bf16.mxu1 %v1316_v42 }
  0x67   :  { %880 = vmatpush1.bf16.msra.mxu0 %v1311_v43  ;;  %962 = vmatpush1.bf16.msra.mxu1 %v1314_v44 }
  0x68   :  { %881 = vmatprep.subr.bf16.mxu0 %v1319_v45  ;;  %963 = vmatprep.subr.bf16.mxu1 %v1322_v46 }
  0x6b   :  { %882 = vmatpush1.bf16.msra.mxu0 %v1317_v47  ;;  %964 = vmatpush1.bf16.msra.mxu1 %v1320_v48 }
  0x6c   :  { %883 = vmatprep.subr.bf16.mxu0 %v1325_v49  ;;  %965 = vmatprep.subr.bf16.mxu1 %v1328_v50 }
  0x6f   :  { %884 = vmatpush1.bf16.msra.mxu0 %v1323_v51  ;;  %966 = vmatpush1.bf16.msra.mxu1 %v1326_v52 }
  0x70   :  { %885 = vmatprep.subr.bf16.mxu0 %v1331_v53  ;;  %967 = vmatprep.subr.bf16.mxu1 %v1334_v54 }
  0x73   :  { %886 = vmatpush1.bf16.msra.mxu0 %v1329_v55  ;;  %968 = vmatpush1.bf16.msra.mxu1 %v1332_v56 }
  0x74   :  { %887 = vmatprep.subr.bf16.mxu0 %v1337_v57  ;;  %969 = vmatprep.subr.bf16.mxu1 %v1340_v58 }
  0x77   :  { %888 = vmatpush1.bf16.msra.mxu0 %v1335_v59  ;;  %970 = vmatpush1.bf16.msra.mxu1 %v1338_v60 }
  0x78   :  { %889 = vmatprep.subr.bf16.mxu0 %v1343_v61  ;;  %971 = vmatprep.subr.bf16.mxu1 %v1346_v62 }
  0x7b   :  { %890 = vmatpush1.bf16.msra.mxu0 %v1341_v63  ;;  %972 = vmatpush1.bf16.msra.mxu1 %v1344_v0 }
  0x7c   :  { %891 = vmatprep.subr.bf16.mxu0 %v1349_v1  ;;  %973 = vmatprep.subr.bf16.mxu1 %v1352_v2 }
  0x7f   :  { %892 = vmatpush1.bf16.msra.mxu0 %v1347_v3  ;;  %974 = vmatpush1.bf16.msra.mxu1 %v1350_v5 }
  0x82   :  { %894 = vmatmul.mubr.bf16.vlgmr.msra.gmra.mrb[0].mxu0 %v1012_v6  ;;  %976 = vmatmul.mubr.bf16.vlgmr.msra.gmra.mrb[0].mxu1 %v1012_v6 }
 0x155   :  { %v895_v18 = vpop.f32.mrb[0].mxu0  ;;  %v977_v4 = vpop.f32.mrb[0].mxu1 }
 0x156   :  { %v1146_v19 = vadd.f32 %v895_v18, %v149_v14  ;;  %v1148_v20 = vadd.f32 %v977_v4, %v157_v15  ;;  %v897_v21 = vpop.f32.mrb[1].mxu0  ;;  %v979_v22 = vpop.f32.mrb[1].mxu1 }
 0x157   :  { %v1147_v23 = vadd.f32 %v897_v21, %v153_v16  ;;  %v1149_v24 = vadd.f32 %v979_v22, %v161_v17  ;;  %v899_v25 = vpop.f32.mrb[2].mxu0  ;;  %v981_v26 = vpop.f32.mrb[2].mxu1 }
 0x158   :  { %v984_v27 = vmax.f32 %v1146_v19, 0.0  ;;  %v986_v28 = vmax.f32 %v1148_v20, 0.0  ;;  %v900_v29 = vpop.f32.mrb[3].mxu0  ;;  %v982_v30 = vpop.f32.mrb[3].mxu1 }
 0x159   :  { %v985_v31 = vmax.f32 %v1147_v23, 0.0  ;;  %v987_v32 = vmax.f32 %v1149_v24, 0.0 }
 0x15b   :  { %v1144_v33 = vpack.c.bf16 %v985_v31, %v984_v27  ;;  %v1145_v34 = vpack.c.bf16 %v987_v32, %v986_v28 }
 0x15d   :  { %1004 = vst [vmem:[%s1782_s3] sm:$0xff] %v1144_v33  ;;  %1005 = vst [vmem:[%s1782_s3 + $0x8] sm:$0xff] %v1145_v34 }

// kernel: detector_forward.38
= control target key start
LH: loop header
LB: loop body
LE: loop exit
PB: predicated region body
PF: predicated region fallthrough
CT: control target
= control target key end

     0   :  { %s1173_s3 = inlined_call_operand.vmem [shape: bf16[256,256], index: 3, kind: input, shape index: {}]   ;;  %s1174_s2 = inlined_call_operand.vmem [shape: bf16[384,256], index: 2, kind: input, shape index: {}]   ;;  %s1175_s1 = inlined_call_operand.vmem [shape: bf16[8,256], index: 1, kind: input, shape index: {}]   ;;  %s1176_s0 = inlined_call_operand.vmem [shape: bf16[8,384], index: 0, kind: input, shape index: {}]   ;;  %s1177_s4 = inlined_call_operand.vmem [shape: f32[1,256], index: 4, kind: input, shape index: {}]   ;;  %s1178_s5 = inlined_call_operand.vmem [shape: bf16[8,256], index: 5, kind: output, shape index: {}]  }
   0x1   :  { %v762_v0 = vld [vmem:[%s1173_s3 + $0x4] ss:$8 sps:$4 sm:$0xff]   ;;  %v766_v2 = vld [vmem:[%s1173_s3] ss:$8 sps:$4 sm:$0xff]   ;;  %v768_v4 = vld [vmem:[%s1173_s3 + $0x14] ss:$8 sps:$4 sm:$0xff]  }
   0x2   :  { %v764_v1 = vld [vmem:[%s1174_s2 + $0x4] ss:$8 sps:$4 sm:$0xff]   ;;  %271 = vmatprep.subr.bf16.mxu0 %v762_v0  ;;  %v767_v3 = vld [vmem:[%s1174_s2] ss:$8 sps:$4 sm:$0xff]   ;;  %v770_v5 = vld [vmem:[%s1174_s2 + $0x14] ss:$8 sps:$4 sm:$0xff]  }
   0x3   :  { %563 = vmatprep.subr.bf16.mxu1 %v764_v1  ;;  %272 = vmatpush1.bf16.msra.mxu0 %v766_v2  ;;  %v772_v6 = vld [vmem:[%s1173_s3 + $0x10] ss:$8 sps:$4 sm:$0xff]   ;;  %v774_v8 = vld [vmem:[%s1173_s3 + $0x24] ss:$8 sps:$4 sm:$0xff]   ;;  %v778_v10 = vld [vmem:[%s1173_s3 + $0x20] ss:$8 sps:$4 sm:$0xff]  }
   0x4   :  { %564 = vmatpush1.bf16.msra.mxu1 %v767_v3  ;;  %273 = vmatprep.subr.bf16.mxu0 %v768_v4  ;;  %v773_v7 = vld [vmem:[%s1174_s2 + $0x10] ss:$8 sps:$4 sm:$0xff]   ;;  %v776_v9 = vld [vmem:[%s1174_s2 + $0x24] ss:$8 sps:$4 sm:$0xff]   ;;  %v779_v11 = vld [vmem:[%s1174_s2 + $0x20] ss:$8 sps:$4 sm:$0xff]  }
   0x5   :  { %565 = vmatprep.subr.bf16.mxu1 %v770_v5  ;;  %v780_v12 = vld [vmem:[%s1173_s3 + $0x34] ss:$8 sps:$4 sm:$0xff]   ;;  %v784_v14 = vld [vmem:[%s1173_s3 + $0x30] ss:$8 sps:$4 sm:$0xff]   ;;  %v786_v16 = vld [vmem:[%s1173_s3 + $0x44] ss:$8 sps:$4 sm:$0xff]  }
   0x6   :  { %v782_v13 = vld [vmem:[%s1174_s2 + $0x34] ss:$8 sps:$4 sm:$0xff]   ;;  %v785_v15 = vld [vmem:[%s1174_s2 + $0x30] ss:$8 sps:$4 sm:$0xff]   ;;  %v788_v17 = vld [vmem:[%s1174_s2 + $0x44] ss:$8 sps:$4 sm:$0xff]  }
   0x7   :  { %274 = vmatpush1.bf16.msra.mxu0 %v772_v6  ;;  %v790_v18 = vld [vmem:[%s1173_s3 + $0x40] ss:$8 sps:$4 sm:$0xff]   ;;  %v792_v20 = vld [vmem:[%s1173_s3 + $0x54] ss:$8 sps:$4 sm:$0xff]   ;;  %v796_v22 = vld [vmem:[%s1173_s3 + $0x50] ss:$8 sps:$4 sm:$0xff]  }
   0x8   :  { %566 = vmatpush1.bf16.msra.mxu1 %v773_v7  ;;  %275 = vmatprep.subr.bf16.mxu0 %v774_v8  ;;  %v791_v19 = vld [vmem:[%s1174_s2 + $0x40] ss:$8 sps:$4 sm:$0xff]   ;;  %v794_v21 = vld [vmem:[%s1174_s2 + $0x54] ss:$8 sps:$4 sm:$0xff]   ;;  %v797_v23 = vld [vmem:[%s1174_s2 + $0x50] ss:$8 sps:$4 sm:$0xff]  }
   0x9   :  { %567 = vmatprep.subr.bf16.mxu1 %v776_v9  ;;  %v798_v24 = vld [vmem:[%s1173_s3 + $0x64] ss:$8 sps:$4 sm:$0xff]   ;;  %v802_v26 = vld [vmem:[%s1173_s3 + $0x60] ss:$8 sps:$4 sm:$0xff]   ;;  %v804_v28 = vld [vmem:[%s1173_s3 + $0x74] ss:$8 sps:$4 sm:$0xff]  }
   0xa   :  { %v800_v25 = vld [vmem:[%s1174_s2 + $0x64] ss:$8 sps:$4 sm:$0xff]   ;;  %v803_v27 = vld [vmem:[%s1174_s2 + $0x60] ss:$8 sps:$4 sm:$0xff]   ;;  %v806_v29 = vld [vmem:[%s1174_s2 + $0x74] ss:$8 sps:$4 sm:$0xff]  }
   0xb   :  { %276 = vmatpush1.bf16.msra.mxu0 %v778_v10  ;;  %v808_v30 = vld [vmem:[%s1173_s3 + $0x70] ss:$8 sps:$4 sm:$0xff]   ;;  %v810_v32 = vld [vmem:[%s1173_s3 + $0x84] ss:$8 sps:$4 sm:$0xff]   ;;  %v814_v34 = vld [vmem:[%s1173_s3 + $0x80] ss:$8 sps:$4 sm:$0xff]  }
   0xc   :  { %568 = vmatpush1.bf16.msra.mxu1 %v779_v11  ;;  %277 = vmatprep.subr.bf16.mxu0 %v780_v12  ;;  %v809_v31 = vld [vmem:[%s1174_s2 + $0x70] ss:$8 sps:$4 sm:$0xff]   ;;  %v812_v33 = vld [vmem:[%s1174_s2 + $0x84] ss:$8 sps:$4 sm:$0xff]   ;;  %v815_v35 = vld [vmem:[%s1174_s2 + $0x80] ss:$8 sps:$4 sm:$0xff]  }
   0xd   :  { %569 = vmatprep.subr.bf16.mxu1 %v782_v13  ;;  %v816_v36 = vld [vmem:[%s1173_s3 + $0x94] ss:$8 sps:$4 sm:$0xff]   ;;  %v820_v38 = vld [vmem:[%s1173_s3 + $0x90] ss:$8 sps:$4 sm:$0xff]   ;;  %v822_v40 = vld [vmem:[%s1173_s3 + $0xa4] ss:$8 sps:$4 sm:$0xff]  }
   0xe   :  { %v818_v37 = vld [vmem:[%s1174_s2 + $0x94] ss:$8 sps:$4 sm:$0xff]   ;;  %v821_v39 = vld [vmem:[%s1174_s2 + $0x90] ss:$8 sps:$4 sm:$0xff]   ;;  %v824_v41 = vld [vmem:[%s1174_s2 + $0xa4] ss:$8 sps:$4 sm:$0xff]  }
   0xf   :  { %278 = vmatpush1.bf16.msra.mxu0 %v784_v14  ;;  %v826_v42 = vld [vmem:[%s1173_s3 + $0xa0] ss:$8 sps:$4 sm:$0xff]   ;;  %v828_v44 = vld [vmem:[%s1173_s3 + $0xb4] ss:$8 sps:$4 sm:$0xff]   ;;  %v832_v46 = vld [vmem:[%s1173_s3 + $0xb0] ss:$8 sps:$4 sm:$0xff]  }
  0x10   :  { %570 = vmatpush1.bf16.msra.mxu1 %v785_v15  ;;  %279 = vmatprep.subr.bf16.mxu0 %v786_v16  ;;  %v827_v43 = vld [vmem:[%s1174_s2 + $0xa0] ss:$8 sps:$4 sm:$0xff]   ;;  %v830_v45 = vld [vmem:[%s1174_s2 + $0xb4] ss:$8 sps:$4 sm:$0xff]   ;;  %v833_v48 = vld [vmem:[%s1174_s2 + $0xb0] ss:$8 sps:$4 sm:$0xff]  }
  0x11   :  { %571 = vmatprep.subr.bf16.mxu1 %v788_v17  ;;  %v71_v47 = vld [vmem:[%s1175_s1] sm:$0xff]  ;;  %v840_v56 = vld [vmem:[%s1173_s3 + $0xd4] ss:$8 sps:$4 sm:$0xff]   ;;  %v844_v58 = vld [vmem:[%s1173_s3 + $0xd0] ss:$8 sps:$4 sm:$0xff]   ;;  %v887_v10 = vmov 0  }
  0x12   :  { %v675_v49 = vcombine.high %v71_v47, %v71_v47  ;;  %v21_v50 = vld [vmem:[%s1176_s0] sm:$0xff]  ;;  %v842_v57 = vld [vmem:[%s1174_s2 + $0xd4] ss:$8 sps:$4 sm:$0xff]   ;;  %v845_v59 = vld [vmem:[%s1174_s2 + $0xd0] ss:$8 sps:$4 sm:$0xff]   ;;  %v674_v5 = vcombine.low %v71_v47, %v71_v47 }
  0x13   :  { %280 = vmatpush1.bf16.msra.mxu0 %v790_v18  ;;  %v834_v51 = vld [vmem:[%s1173_s3 + $0xc4] ss:$8 sps:$4 sm:$0xff]   ;;  %v709_v52 = vcombine.high %v21_v50, %v21_v50  ;;  %v838_v54 = vld [vmem:[%s1173_s3 + $0xc0] ss:$8 sps:$4 sm:$0xff]   ;;  %v852_v0 = vld [vmem:[%s1173_s3 + $0xf4] ss:$8 sps:$4 sm:$0xff]   ;;  %v708_v6 = vcombine.low %v21_v50, %v21_v50 }
  0x14   :  { %572 = vmatpush1.bf16.msra.mxu1 %v791_v19  ;;  %281 = vmatprep.subr.bf16.mxu0 %v792_v20  ;;  %v836_v53 = vld [vmem:[%s1174_s2 + $0xc4] ss:$8 sps:$4 sm:$0xff]   ;;  %v839_v55 = vld [vmem:[%s1174_s2 + $0xc0] ss:$8 sps:$4 sm:$0xff]   ;;  %v854_v1 = vld [vmem:[%s1174_s2 + $0xf4] ss:$8 sps:$4 sm:$0xff]  }
  0x15   :  { %573 = vmatprep.subr.bf16.mxu1 %v794_v21  ;;  %303 = vmatprep.mubr.bf16.mxu0 %v675_v49  ;;  %v846_v60 = vld [vmem:[%s1173_s3 + $0xe4] ss:$8 sps:$4 sm:$0xff]   ;;  %v850_v62 = vld [vmem:[%s1173_s3 + $0xe0] ss:$8 sps:$4 sm:$0xff]   ;;  %v856_v2 = vld [vmem:[%s1173_s3 + $0xf0] ss:$8 sps:$4 sm:$0xff]  }
  0x16   :  { %595 = vmatprep.mubr.bf16.mxu1 %v709_v52  ;;  %v848_v61 = vld [vmem:[%s1174_s2 + $0xe4] ss:$8 sps:$4 sm:$0xff]   ;;  %v851_v63 = vld [vmem:[%s1174_s2 + $0xe0] ss:$8 sps:$4 sm:$0xff]   ;;  %v857_v3 = vld [vmem:[%s1174_s2 + $0xf0] ss:$8 sps:$4 sm:$0xff]  }
  0x17   :  { %282 = vmatpush1.bf16.msra.mxu0 %v796_v22  ;;  %v865_v4 = vld [vmem:[%s1174_s2 + $0x104] ss:$8 sps:$4 sm:$0xff]   ;;  %v863_v7 = vld [vmem:[%s1174_s2 + $0x100] ss:$8 sps:$4 sm:$0xff]   ;;  %v868_v8 = vld [vmem:[%s1174_s2 + $0x114] ss:$8 sps:$4 sm:$0xff]  }
  0x18   :  { %574 = vmatpush1.bf16.msra.mxu1 %v797_v23  ;;  %283 = vmatprep.subr.bf16.mxu0 %v798_v24  ;;  %v866_v9 = vld [vmem:[%s1174_s2 + $0x110] ss:$8 sps:$4 sm:$0xff]   ;;  %v871_v11 = vld [vmem:[%s1174_s2 + $0x124] ss:$8 sps:$4 sm:$0xff]   ;;  %v869_v12 = vld [vmem:[%s1174_s2 + $0x120] ss:$8 sps:$4 sm:$0xff]  }
  0x19   :  { %575 = vmatprep.subr.bf16.mxu1 %v800_v25  ;;  %v874_v13 = vld [vmem:[%s1174_s2 + $0x134] ss:$8 sps:$4 sm:$0xff]   ;;  %v872_v14 = vld [vmem:[%s1174_s2 + $0x130] ss:$8 sps:$4 sm:$0xff]   ;;  %v877_v15 = vld [vmem:[%s1174_s2 + $0x144] ss:$8 sps:$4 sm:$0xff]  }
  0x1a   :  { %v875_v16 = vld [vmem:[%s1174_s2 + $0x140] ss:$8 sps:$4 sm:$0xff]   ;;  %v880_v17 = vld [vmem:[%s1174_s2 + $0x154] ss:$8 sps:$4 sm:$0xff]   ;;  %v878_v18 = vld [vmem:[%s1174_s2 + $0x150] ss:$8 sps:$4 sm:$0xff]  }
  0x1b   :  { %284 = vmatpush1.bf16.msra.mxu0 %v802_v26  ;;  %v883_v19 = vld [vmem:[%s1174_s2 + $0x164] ss:$8 sps:$4 sm:$0xff]   ;;  %v881_v20 = vld [vmem:[%s1174_s2 + $0x160] ss:$8 sps:$4 sm:$0xff]   ;;  %v886_v21 = vld [vmem:[%s1174_s2 + $0x174] ss:$8 sps:$4 sm:$0xff]  }
  0x1c   :  { %576 = vmatpush1.bf16.msra.mxu1 %v803_v27  ;;  %285 = vmatprep.subr.bf16.mxu0 %v804_v28  ;;  %v884_v22 = vld [vmem:[%s1174_s2 + $0x170] ss:$8 sps:$4 sm:$0xff]   ;;  %v862_v23 = vld [vmem:[%s1176_s0 + $0x8] ss:$0 sps:$4 sm:$0xff]  }
  0x1d   :  { %577 = vmatprep.subr.bf16.mxu1 %v806_v29 }
  0x1f   :  { %286 = vmatpush1.bf16.msra.mxu0 %v808_v30 }
  0x20   :  { %578 = vmatpush1.bf16.msra.mxu1 %v809_v31  ;;  %287 = vmatprep.subr.bf16.mxu0 %v810_v32 }
  0x21   :  { %579 = vmatprep.subr.bf16.mxu1 %v812_v33 }
  0x23   :  { %288 = vmatpush1.bf16.msra.mxu0 %v814_v34  ;;  %v647_v34 = vlaneseq }
  0x24   :  { %580 = vmatpush1.bf16.msra.mxu1 %v815_v35  ;;  %289 = vmatprep.subr.bf16.mxu0 %v816_v36 }
  0x25   :  { %581 = vmatprep.subr.bf16.mxu1 %v818_v37  ;;  %v648_v35 = vshrl.u32 %v647_v34, 7  ;;  %v645_v37 = vld [vmem:[%s1177_s4] sm:$0x3] }
  0x27   :  { %290 = vmatpush1.bf16.msra.mxu0 %v820_v38  ;;  %v649_v36 = vsub.s32 0, %v648_v35  ;;  %v653_v38 = vsub.s32 1, %v648_v35 }
  0x28   :  { %582 = vmatpush1.bf16.msra.mxu1 %v821_v39  ;;  %291 = vmatprep.subr.bf16.mxu0 %v822_v40 }
  0x29   :  { %583 = vmatprep.subr.bf16.mxu1 %v824_v41  ;;  %v650_v39 = vrot.slane %v645_v37, %v649_v36  ;;  %v654_v41 = vrot.slane %v645_v37, %v653_v38 }
  0x2b   :  { %292 = vmatpush1.bf16.msra.mxu0 %v826_v42 }
  0x2c   :  { %584 = vmatpush1.bf16.msra.mxu1 %v827_v43  ;;  %293 = vmatprep.subr.bf16.mxu0 %v828_v44 }
  0x2d   :  { %585 = vmatprep.subr.bf16.mxu1 %v830_v45 }
  0x2f   :  { %294 = vmatpush1.bf16.msra.mxu0 %v832_v46 }
  0x30   :  { %586 = vmatpush1.bf16.msra.mxu1 %v833_v48  ;;  %295 = vmatprep.subr.bf16.mxu0 %v834_v51 }
  0x31   :  { %587 = vmatprep.subr.bf16.mxu1 %v836_v53 }
  0x33   :  { %296 = vmatpush1.bf16.msra.mxu0 %v838_v54 }
  0x34   :  { %588 = vmatpush1.bf16.msra.mxu1 %v839_v55  ;;  %297 = vmatprep.subr.bf16.mxu0 %v840_v56 }
  0x35   :  { %589 = vmatprep.subr.bf16.mxu1 %v842_v57 }
  0x37   :  { %298 = vmatpush1.bf16.msra.mxu0 %v844_v58 }
  0x38   :  { %590 = vmatpush1.bf16.msra.mxu1 %v845_v59  ;;  %299 = vmatprep.subr.bf16.mxu0 %v846_v60 }
  0x39   :  { %591 = vmatprep.subr.bf16.mxu1 %v848_v61 }
  0x3b   :  { %300 = vmatpush1.bf16.msra.mxu0 %v850_v62 }
  0x3c   :  { %592 = vmatpush1.bf16.msra.mxu1 %v851_v63  ;;  %301 = vmatprep.subr.bf16.mxu0 %v852_v0 }
  0x3d   :  { %593 = vmatprep.subr.bf16.mxu1 %v854_v1 }
  0x3f   :  { %302 = vmatpush1.bf16.msra.mxu0 %v856_v2 }
  0x40   :  { %594 = vmatpush1.bf16.msra.mxu1 %v857_v3  ;;  %604 = vmatprep.subr.bf16.mxu0 %v865_v4 }
  0x42   :  { %304 = vmatmul.mubr.bf16.vlgmr.msra.gmra.mrb[0].mxu0 %v674_v5 }
  0x43   :  { %596 = vmatmul.mubr.bf16.vlgmr.msra.gmra.mrb[0].mxu1 %v708_v6  ;;  %605 = vmatpush1.bf16.msra.mxu0 %v863_v7 }
  0x44   :  { %636 = vmatprep.mubr.bf16.mxu0 %v887_v10  ;;  %606 = vmatprep.subr.bf16.mxu0 %v868_v8 }
  0x47   :  { %607 = vmatpush1.bf16.msra.mxu0 %v866_v9 }
  0x48   :  { %608 = vmatprep.subr.bf16.mxu0 %v871_v11 }
  0x4b   :  { %609 = vmatpush1.bf16.msra.mxu0 %v869_v12 }
  0x4c   :  { %610 = vmatprep.subr.bf16.mxu0 %v874_v13 }
  0x4f   :  { %611 = vmatpush1.bf16.msra.mxu0 %v872_v14 }
  0x50   :  { %612 = vmatprep.subr.bf16.mxu0 %v877_v15 }
  0x53   :  { %613 = vmatpush1.bf16.msra.mxu0 %v875_v16 }
  0x54   :  { %614 = vmatprep.subr.bf16.mxu0 %v880_v17 }
  0x57   :  { %615 = vmatpush1.bf16.msra.mxu0 %v878_v18 }
  0x58   :  { %616 = vmatprep.subr.bf16.mxu0 %v883_v19 }
  0x5b   :  { %617 = vmatpush1.bf16.msra.mxu0 %v881_v20 }
  0x5c   :  { %618 = vmatprep.subr.bf16.mxu0 %v886_v21 }
  0x5f   :  { %619 = vmatpush1.bf16.msra.mxu0 %v884_v22 }
  0x62   :  { %637 = vmatmul.mubr.bf16.vlgmr.msra.gmra.mrb[4].mxu0 %v862_v23 }
 0x115   :  { %v305_v24 = vpop.f32.mrb[0].mxu0 }
 0x116   :  { %v597_v25 = vpop.f32.mrb[0].mxu1  ;;  %v307_v27 = vpop.f32.mrb[1].mxu0 }
 0x117   :  { %v598_v26 = vadd.f32 %v597_v25, %v305_v24  ;;  %v599_v28 = vpop.f32.mrb[1].mxu1  ;;  %v309_v30 = vpop.f32.mrb[2].mxu0 }
 0x118   :  { %v600_v29 = vadd.f32 %v599_v28, %v307_v27  ;;  %v601_v31 = vpop.f32.mrb[2].mxu1  ;;  %v310_v32 = vpop.f32.mrb[3].mxu0 }
 0x119   :  { %v602_v33 = vpop.f32.mrb[3].mxu1 }
 0x135   :  { %v638_v40 = vpop.f32.mrb[4].mxu0 }
 0x136   :  { %v639_v42 = vadd.f32 %v638_v40, %v598_v26  ;;  %v640_v43 = vpop.f32.mrb[5].mxu0 }
 0x137   :  { %v641_v44 = vadd.f32 %v640_v43, %v600_v29  ;;  %v642_v45 = vpop.f32.mrb[6].mxu0 }
 0x138   :  { %v657_v46 = vadd.f32 %v650_v39, %v639_v42  ;;  %v643_v47 = vpop.f32.mrb[7].mxu0 }
 0x139   :  { %v658_v48 = vadd.f32 %v654_v41, %v641_v44 }
 0x13a   :  { %v659_v49 = vmax.f32 %v657_v46, 0.0 }
 0x13b   :  { %v660_v50 = vmax.f32 %v658_v48, 0.0 }
 0x13d   :  { %v760_v51 = vpack.c.bf16 %v660_v50, %v659_v49 }
 0x13f   :  { %669 = vst [vmem:[%s1178_s5] sm:$0xff] %v760_v51 }

// kernel: detector_forward.39
= control target key start
LH: loop header
LB: loop body
LE: loop exit
PB: predicated region body
PF: predicated region fallthrough
CT: control target
= control target key end

     0   :  { %s818_s18 = smov 0   ;;  %s921_s0 = inlined_call_operand.vmem [shape: bf16[32,256], index: 0, kind: input, shape index: {}]   ;;  %s922_s1 = inlined_call_operand.vmem [shape: bf16[32,128], index: 1, kind: input, shape index: {}]   ;;  %s923_s2 = inlined_call_operand.vmem [shape: bf16[256,128], index: 2, kind: input, shape index: {}]   ;;  %s924_s3 = inlined_call_operand.vmem [shape: bf16[128,128], index: 3, kind: input, shape index: {}]   ;;  %s925_s4 = inlined_call_operand.vmem [shape: f32[1,128], index: 4, kind: input, shape index: {}]   ;;  %s926_s5 = inlined_call_operand.vmem [shape: bf16[32,128], index: 5, kind: output, shape index: {}]  }
   0x1 LB: > { %s637_s19 = sadd.s32 4294967295, %s784_s18   ;;  %p641_p0 = scmp.ge.s32.totalorder %s784_s18, 1  ;;  %s784_s18 = sphi %s818_s18, %s15_s18  }
   0x2   : > { %p200_p1 = scmp.lt.s32.totalorder %s784_s18, 3 }
   0x4   : > { %p201_p2 = pnand %p641_p0, %p200_p1 }
   0x5   : > { %v750_v0 = vld [vmem:[%s923_s2 + $0x40] sm:$0xff] (!%p201_p2)   ;;  %v786_v1 = vmov (!%p201_p2), 0.0   ;;  %vm787_vm0 = vmmov (!%p201_p2), 0   ;;  %v753_v4 = vld [vmem:[%s923_s2 + $0x48] sm:$0xff] (!%p201_p2)   ;;  %v756_v7 = vld [vmem:[%s923_s2 + $0x50] sm:$0xff] (!%p201_p2)   ;;  %s642_s13 = sshll.u32 (!%p201_p2), %s637_s19, 1 }
   0x6   : > { %204 = sbr.rel (%p201_p2) target bundleno = 265 (0x109), region = 40  ;;  %720 = vmatprep.subr.bf16.mxu0 (!%p201_p2), %v786_v1  ;;  %v751_v2 = vld [vmem:[%s924_s3] sm:$0xff] (!%p201_p2)   ;;  %698 = vmatprep.subr.bf16.mxu1 (!%p201_p2), %v750_v0  ;;  %v754_v5 = vld [vmem:[%s924_s3 + $0x8] sm:$0xff] (!%p201_p2)   ;;  %v757_v8 = vld [vmem:[%s924_s3 + $0x10] sm:$0xff] (!%p201_p2)   ;;  %p235_p3 = scmp.lt.s32.totalorder (!%p201_p2), %s642_s13, 3 }
   0x7   : > { %v752_v3 = vld [vmem:[%s923_s2] sm:$0xff] (!%p201_p2)   ;;  %736 = vmatprep.mubr.msk.bf16.mxu0 (!%p201_p2), %vm787_vm0, %v786_v1  ;;  %721 = vmatpush3.bf16.msra.mxu0 (!%p201_p2), %v751_v2  ;;  %v755_v6 = vld [vmem:[%s923_s2 + $0x8] sm:$0xff] (!%p201_p2)   ;;  %v758_v9 = vld [vmem:[%s923_s2 + $0x10] sm:$0xff] (!%p201_p2)  }
   0x8   : > { %699 = vmatpush3.bf16.msra.mxu1 (!%p201_p2), %v752_v3  ;;  %722 = vmatprep.subr.bf16.mxu0 (!%p201_p2), %v786_v1  ;;  %v759_v10 = vld [vmem:[%s923_s2 + $0x58] sm:$0xff] (!%p201_p2)   ;;  %v762_v13 = vld [vmem:[%s923_s2 + $0x60] sm:$0xff] (!%p201_p2)   ;;  %v765_v16 = vld [vmem:[%s923_s2 + $0x68] sm:$0xff] (!%p201_p2)  }
   0x9   : > { %700 = vmatprep.subr.bf16.mxu1 (!%p201_p2), %v753_v4  ;;  %v760_v11 = vld [vmem:[%s924_s3 + $0x18] sm:$0xff] (!%p201_p2)   ;;  %v763_v14 = vld [vmem:[%s924_s3 + $0x20] sm:$0xff] (!%p201_p2)   ;;  %v766_v17 = vld [vmem:[%s924_s3 + $0x28] sm:$0xff] (!%p201_p2)  }
   0xa   : > { %v761_v12 = vld [vmem:[%s923_s2 + $0x18] sm:$0xff] (!%p201_p2)   ;;  %v764_v15 = vld [vmem:[%s923_s2 + $0x20] sm:$0xff] (!%p201_p2)   ;;  %v767_v18 = vld [vmem:[%s923_s2 + $0x28] sm:$0xff] (!%p201_p2)  }
   0xb   : > { %723 = vmatpush3.bf16.msra.mxu0 (!%p201_p2), %v754_v5  ;;  %v768_v19 = vld [vmem:[%s923_s2 + $0x70] sm:$0xff] (!%p201_p2)   ;;  %v771_v22 = vld [vmem:[%s923_s2 + $0x78] sm:$0xff] (!%p201_p2)   ;;  %v676_v36 = vld [vmem:[%s925_s4] ss:$0 sm:$0xff] (!%p201_p2) }
   0xc   : > { %701 = vmatpush3.bf16.msra.mxu1 (!%p201_p2), %v755_v6  ;;  %724 = vmatprep.subr.bf16.mxu0 (!%p201_p2), %v786_v1  ;;  %v769_v20 = vld [vmem:[%s924_s3 + $0x30] sm:$0xff] (!%p201_p2)   ;;  %v772_v24 = vld [vmem:[%s924_s3 + $0x38] sm:$0xff] (!%p201_p2)  }
   0xd   : > { %702 = vmatprep.subr.bf16.mxu1 %v756_v7  ;;  %s928_s13 = smov (!%p235_p3, %s642_s13), 3  ;;  %v770_v21 = vld [vmem:[%s923_s2 + $0x30] sm:$0xff]   ;;  %v773_v25 = vld [vmem:[%s923_s2 + $0x38] sm:$0xff]  }
   0xe   : > { %s681_s6 = sshll.u32 %s928_s13, 3  ;;  %s646_s11 = sshll.u32 %s928_s13, 2 }
   0xf   : > { %725 = vmatpush3.bf16.msra.mxu0 %v757_v8  ;;  %s239_s17 = scalar_lea.vmem %s921_s0, %s681_s6  ;;  %s245_s25 = scalar_lea.vmem %s922_s1, %s646_s11 }
  0x10   : > { %703 = vmatpush3.bf16.msra.mxu1 %v758_v9  ;;  %726 = vmatprep.subr.bf16.mxu0 %v786_v1  ;;  %v776_v23 = vld [vmem:[%s239_s17 + $0x4] ss:$8 sps:$4 sm:$0xff]   ;;  %v774_v27 = vld [vmem:[%s239_s17] ss:$8 sps:$4 sm:$0xff]   ;;  %s251_s9 = scalar_lea.vmem %s926_s5, %s646_s11 }
  0x11   : > { %704 = vmatprep.subr.bf16.mxu1 %v759_v10  ;;  %539 = vmatprep.mubr.bf16.mxu1 %v776_v23  ;;  %v777_v26 = vld [vmem:[%s245_s25] sm:$0xff]  }
  0x13   : > { %727 = vmatpush3.bf16.msra.mxu0 %v760_v11 }
  0x14   : > { %705 = vmatpush3.bf16.msra.mxu1 %v761_v12  ;;  %728 = vmatprep.subr.bf16.mxu0 %v786_v1 }
  0x15   : > { %706 = vmatprep.subr.bf16.mxu1 %v762_v13 }
  0x17   : > { %729 = vmatpush3.bf16.msra.mxu0 %v763_v14 }
  0x18   : > { %707 = vmatpush3.bf16.msra.mxu1 %v764_v15  ;;  %730 = vmatprep.subr.bf16.mxu0 %v786_v1 }
  0x19   : > { %708 = vmatprep.subr.bf16.mxu1 %v765_v16 }
  0x1b   : > { %731 = vmatpush3.bf16.msra.mxu0 %v766_v17 }
  0x1c   : > { %709 = vmatpush3.bf16.msra.mxu1 %v767_v18  ;;  %732 = vmatprep.subr.bf16.mxu0 %v786_v1 }
  0x1d   : > { %710 = vmatprep.subr.bf16.mxu1 %v768_v19 }
  0x1f   : > { %733 = vmatpush3.bf16.msra.mxu0 %v769_v20 }
  0x20   : > { %711 = vmatpush3.bf16.msra.mxu1 %v770_v21  ;;  %734 = vmatprep.subr.bf16.mxu0 %v786_v1 }
  0x21   : > { %712 = vmatprep.subr.bf16.mxu1 %v771_v22 }
  0x23   : > { %735 = vmatpush3.bf16.msra.mxu0 %v772_v24 }
  0x24   : > { %713 = vmatpush3.bf16.msra.mxu1 %v773_v25 }
  0x26   : > { %737 = vmatmul.mubr.bf16.vlgmr.msra.gmra.mrb[0].mxu0 %v777_v26 }
  0x27   : > { %540 = vmatmul.mubr.bf16.vlgmr.msra.gmra.mrb[0].mxu1 %v774_v27 }
  0xf9   : > { %v394_v28 = vpop.f32.mrb[0].mxu0 }
  0xfa   : > { %v714_v29 = vpop.f32.mrb[0].mxu1  ;;  %v738_v30 = vpop.f32.mrb[1].mxu0 }
  0xfb   : > { %v715_v31 = vpop.f32.mrb[1].mxu1  ;;  %v397_v32 = vpop.f32.mrb[2].mxu0 }
  0xfc   : > { %v716_v33 = vadd.f32 %v715_v31, %v714_v29  ;;  %v717_v34 = vpop.f32.mrb[2].mxu1  ;;  %v739_v35 = vpop.f32.mrb[3].mxu0 }
  0xfd   : > { %v718_v37 = vpop.f32.mrb[3].mxu1 }
  0xfe   : > { %v542_v38 = vadd.f32 %v716_v33, %v394_v28  ;;  %v719_v39 = vadd.f32 %v718_v37, %v717_v34 }
 0x100   : > { %v555_v40 = vadd.f32 %v676_v36, %v542_v38  ;;  %v545_v41 = vadd.f32 %v719_v39, %v397_v32 }
 0x102   : > { %v556_v42 = vadd.f32 %v676_v36, %v545_v41  ;;  %v557_v43 = vmax.f32 %v555_v40, 0.0 }
 0x104   : > { %v558_v44 = vmax.f32 %v556_v42, 0.0 }
 0x106   : > { %v687_v45 = vpack.c.bf16 %v558_v44, %v557_v43 }
 0x108   : > { %688 = vst [vmem:[%s251_s9] sm:$0xff] %v687_v45  }
 0x109 PF: > { %s15_s18 = sadd.s32 1, %s784_s18  }
 0x10a   : > { %p12_p4 = scmp.ge.s32.totalorder %s15_s18, 4  }
 0x10c   :  { %14 = sbr.rel (!%p12_p4) target bundleno = 1 (0x1), region = 73 }

// kernel: detector_forward.37
= control target key start
LH: loop header
LB: loop body
LE: loop exit
PB: predicated region body
PF: predicated region fallthrough
CT: control target
= control target key end

     0   :  { %v2044_v1 = vmov 0   ;;  %vm2046_vm0 = vmmov 0   ;;  %s2630_s3 = inlined_call_operand.vmem [shape: bf16[384,384], index: 3, kind: input, shape index: {}]   ;;  %s2631_s1 = inlined_call_operand.vmem [shape: bf16[8,384], index: 1, kind: input, shape index: {}]   ;;  %s2632_s2 = inlined_call_operand.vmem [shape: bf16[512,384], index: 2, kind: input, shape index: {}]   ;;  %s2633_s0 = inlined_call_operand.vmem [shape: bf16[8,512], index: 0, kind: input, shape index: {}]   ;;  %s2634_s4 = inlined_call_operand.vmem [shape: f32[1,384], index: 4, kind: input, shape index: {}]   ;;  %s2635_s5 = inlined_call_operand.vmem [shape: bf16[8,384], index: 5, kind: output, shape index: {}]  }
   0x1   :  { %v1813_v0 = vld [vmem:[%s2630_s3 + $0x4] ss:$12 sps:$4 sm:$0xff]   ;;  %717 = vmatprep.mubr.bf16.mxu1 %v2044_v1  ;;  %v1817_v3 = vld [vmem:[%s2630_s3] ss:$12 sps:$4 sm:$0xff]   ;;  %v1819_v5 = vld [vmem:[%s2630_s3 + $0x1c] ss:$12 sps:$4 sm:$0xff]  }
   0x2   :  { %v1815_v2 = vld [vmem:[%s2630_s3 + $0x184] ss:$12 sps:$4 sm:$0xff]   ;;  %644 = vmatprep.subr.bf16.mxu0 %v1813_v0  ;;  %v1818_v4 = vld [vmem:[%s2630_s3 + $0x180] ss:$12 sps:$4 sm:$0xff]   ;;  %v1821_v6 = vld [vmem:[%s2630_s3 + $0x19c] ss:$12 sps:$4 sm:$0xff]  }
   0x3   :  { %685 = vmatprep.subr.bf16.mxu1 %v1815_v2  ;;  %645 = vmatpush1.bf16.msra.mxu0 %v1817_v3  ;;  %v1823_v7 = vld [vmem:[%s2630_s3 + $0x18] ss:$12 sps:$4 sm:$0xff]   ;;  %v1825_v9 = vld [vmem:[%s2630_s3 + $0x34] ss:$12 sps:$4 sm:$0xff]   ;;  %v1829_v11 = vld [vmem:[%s2630_s3 + $0x30] ss:$12 sps:$4 sm:$0xff]  }
   0x4   :  { %686 = vmatpush1.bf16.msra.mxu1 %v1818_v4  ;;  %646 = vmatprep.subr.bf16.mxu0 %v1819_v5  ;;  %v1824_v8 = vld [vmem:[%s2630_s3 + $0x198] ss:$12 sps:$4 sm:$0xff]   ;;  %v1827_v10 = vld [vmem:[%s2630_s3 + $0x1b4] ss:$12 sps:$4 sm:$0xff]   ;;  %v1830_v12 = vld [vmem:[%s2630_s3 + $0x1b0] ss:$12 sps:$4 sm:$0xff]  }
   0x5   :  { %687 = vmatprep.subr.bf16.mxu1 %v1821_v6  ;;  %v1831_v13 = vld [vmem:[%s2630_s3 + $0x4c] ss:$12 sps:$4 sm:$0xff]   ;;  %v1835_v15 = vld [vmem:[%s2630_s3 + $0x48] ss:$12 sps:$4 sm:$0xff]   ;;  %v1837_v17 = vld [vmem:[%s2630_s3 + $0x64] ss:$12 sps:$4 sm:$0xff]  }
   0x6   :  { %v1833_v14 = vld [vmem:[%s2630_s3 + $0x1cc] ss:$12 sps:$4 sm:$0xff]   ;;  %v1836_v16 = vld [vmem:[%s2630_s3 + $0x1c8] ss:$12 sps:$4 sm:$0xff]   ;;  %v1839_v18 = vld [vmem:[%s2630_s3 + $0x1e4] ss:$12 sps:$4 sm:$0xff]  }
   0x7   :  { %647 = vmatpush1.bf16.msra.mxu0 %v1823_v7  ;;  %v1841_v19 = vld [vmem:[%s2630_s3 + $0x60] ss:$12 sps:$4 sm:$0xff]   ;;  %v1843_v21 = vld [vmem:[%s2630_s3 + $0x7c] ss:$12 sps:$4 sm:$0xff]   ;;  %v1847_v23 = vld [vmem:[%s2630_s3 + $0x78] ss:$12 sps:$4 sm:$0xff]  }
   0x8   :  { %688 = vmatpush1.bf16.msra.mxu1 %v1824_v8  ;;  %648 = vmatprep.subr.bf16.mxu0 %v1825_v9  ;;  %v1842_v20 = vld [vmem:[%s2630_s3 + $0x1e0] ss:$12 sps:$4 sm:$0xff]   ;;  %v1845_v22 = vld [vmem:[%s2630_s3 + $0x1fc] ss:$12 sps:$4 sm:$0xff]   ;;  %v1848_v24 = vld [vmem:[%s2630_s3 + $0x1f8] ss:$12 sps:$4 sm:$0xff]  }
   0x9   :  { %689 = vmatprep.subr.bf16.mxu1 %v1827_v10  ;;  %v1849_v25 = vld [vmem:[%s2630_s3 + $0x94] ss:$12 sps:$4 sm:$0xff]   ;;  %v1853_v27 = vld [vmem:[%s2630_s3 + $0x90] ss:$12 sps:$4 sm:$0xff]   ;;  %v1855_v29 = vld [vmem:[%s2630_s3 + $0xac] ss:$12 sps:$4 sm:$0xff]  }
   0xa   :  { %v1851_v26 = vld [vmem:[%s2630_s3 + $0x214] ss:$12 sps:$4 sm:$0xff]   ;;  %v1854_v28 = vld [vmem:[%s2630_s3 + $0x210] ss:$12 sps:$4 sm:$0xff]   ;;  %v1857_v30 = vld [vmem:[%s2630_s3 + $0x22c] ss:$12 sps:$4 sm:$0xff]  }
   0xb   :  { %649 = vmatpush1.bf16.msra.mxu0 %v1829_v11  ;;  %v1859_v31 = vld [vmem:[%s2630_s3 + $0xa8] ss:$12 sps:$4 sm:$0xff]   ;;  %v1861_v33 = vld [vmem:[%s2630_s3 + $0xc4] ss:$12 sps:$4 sm:$0xff]   ;;  %v1864_v35 = vld [vmem:[%s2630_s3 + $0xc0] ss:$12 sps:$4 sm:$0xff]  }
   0xc   :  { %690 = vmatpush1.bf16.msra.mxu1 %v1830_v12  ;;  %650 = vmatprep.subr.bf16.mxu0 %v1831_v13  ;;  %v1860_v32 = vld [vmem:[%s2630_s3 + $0x228] ss:$12 sps:$4 sm:$0xff]   ;;  %v1869_v39 = vld [vmem:[%s2630_s3 + $0xe0] ss:$12 sps:$4 sm:$0xff]   ;;  %v1870_v40 = vld [vmem:[%s2630_s3 + $0xd8] ss:$12 sps:$4 sm:$0xff]  }
   0xd   :  { %691 = vmatprep.subr.bf16.mxu1 %v1833_v14  ;;  %v1863_v34 = vld [vmem:[%s2630_s3 + $0xc8] ss:$12 sps:$4 sm:$0xff]   ;;  %v1871_v41 = vld [vmem:[%s2630_s3 + $0x20] ss:$12 sps:$4 sm:$0xff]   ;;  %v1874_v43 = vld [vmem:[%s2630_s3 + $0xf8] ss:$12 sps:$4 sm:$0xff]  }
   0xe   :  { %v2185_v36 = vld [vmem:[%s2631_s1 + $0x8] ss:$0 sps:$4 sm:$0xff]   ;;  %v1872_v42 = vld [vmem:[%s2630_s3 + $0xf4] ss:$12 sps:$4 sm:$0xff]   ;;  %v1875_v44 = vld [vmem:[%s2630_s3 + $0xf0] ss:$12 sps:$4 sm:$0xff]  }
   0xf   :  { %651 = vmatpush1.bf16.msra.mxu0 %v1835_v15  ;;  %v1866_v37 = vld [vmem:[%s2630_s3 + $0x8] ss:$12 sps:$4 sm:$0xff]   ;;  %v1876_v45 = vld [vmem:[%s2630_s3 + $0x38] ss:$12 sps:$4 sm:$0xff]   ;;  %v1879_v47 = vld [vmem:[%s2630_s3 + $0x110] ss:$12 sps:$4 sm:$0xff]  }
  0x10   :  { %692 = vmatpush1.bf16.msra.mxu1 %v1836_v16  ;;  %652 = vmatprep.subr.bf16.mxu0 %v1837_v17  ;;  %v1867_v38 = vld [vmem:[%s2630_s3 + $0xdc] ss:$12 sps:$4 sm:$0xff]   ;;  %v1877_v46 = vld [vmem:[%s2630_s3 + $0x10c] ss:$12 sps:$4 sm:$0xff]   ;;  %v1882_v50 = vld [vmem:[%s2630_s3 + $0x124] ss:$12 sps:$4 sm:$0xff]  }
  0x11   :  { %693 = vmatprep.subr.bf16.mxu1 %v1839_v18  ;;  %v1880_v48 = vld [vmem:[%s2630_s3 + $0x108] ss:$12 sps:$4 sm:$0xff]   ;;  %v1881_v49 = vld [vmem:[%s2630_s3 + $0x50] ss:$12 sps:$4 sm:$0xff]   ;;  %v1885_v52 = vld [vmem:[%s2630_s3 + $0x120] ss:$12 sps:$4 sm:$0xff]  }
  0x12   :  { %v1884_v51 = vld [vmem:[%s2630_s3 + $0x128] ss:$12 sps:$4 sm:$0xff]   ;;  %v151_v55 = vld [vmem:[%s2631_s1] sm:$0xff]  ;;  %v1895_v62 = vld [vmem:[%s2630_s3 + $0x150] ss:$12 sps:$4 sm:$0xff]   ;;  %v2045_v8 = vmov 0.0  }
  0x13   :  { %653 = vmatpush1.bf16.msra.mxu0 %v1841_v19  ;;  %v1886_v53 = vld [vmem:[%s2630_s3 + $0x68] ss:$12 sps:$4 sm:$0xff]   ;;  %v1889_v56 = vld [vmem:[%s2630_s3 + $0x140] ss:$12 sps:$4 sm:$0xff]   ;;  %v1537_v57 = vcombine.high %v151_v55, %v151_v55  ;;  %v1890_v58 = vld [vmem:[%s2630_s3 + $0x138] ss:$12 sps:$4 sm:$0xff]   ;;  %v1536_v5 = vcombine.low %v151_v55, %v151_v55 }
  0x14   :  { %694 = vmatpush1.bf16.msra.mxu1 %v1842_v20  ;;  %654 = vmatprep.subr.bf16.mxu0 %v1843_v21  ;;  %v1887_v54 = vld [vmem:[%s2630_s3 + $0x13c] ss:$12 sps:$4 sm:$0xff]   ;;  %v1891_v59 = vld [vmem:[%s2630_s3 + $0x80] ss:$12 sps:$4 sm:$0xff]   ;;  %v1894_v61 = vld [vmem:[%s2630_s3 + $0x158] ss:$12 sps:$4 sm:$0xff]  }
  0x15   :  { %695 = vmatprep.subr.bf16.mxu1 %v1845_v22  ;;  %676 = vmatprep.mubr.bf16.mxu0 %v1537_v57  ;;  %v1892_v60 = vld [vmem:[%s2630_s3 + $0x154] ss:$12 sps:$4 sm:$0xff]   ;;  %v1896_v63 = vld [vmem:[%s2630_s3 + $0x98] ss:$12 sps:$4 sm:$0xff]   ;;  %v1899_v1 = vld [vmem:[%s2630_s3 + $0x170] ss:$12 sps:$4 sm:$0xff]  }
  0x16   :  { %v1897_v0 = vld [vmem:[%s2630_s3 + $0x16c] ss:$12 sps:$4 sm:$0xff]   ;;  %v1900_v2 = vld [vmem:[%s2630_s3 + $0x168] ss:$12 sps:$4 sm:$0xff]   ;;  %v1901_v3 = vld [vmem:[%s2630_s3 + $0xb0] ss:$12 sps:$4 sm:$0xff]  }
  0x17   :  { %655 = vmatpush1.bf16.msra.mxu0 %v1847_v23  ;;  %v1906_v4 = vld [vmem:[%s2632_s2 + $0x4] ss:$12 sps:$4 sm:$0xff]   ;;  %v1904_v6 = vld [vmem:[%s2632_s2] ss:$12 sps:$4 sm:$0xff]   ;;  %v1907_v7 = vld [vmem:[%s2630_s3 + $0x188] ss:$12 sps:$4 sm:$0xff]  }
  0x18   :  { %696 = vmatpush1.bf16.msra.mxu1 %v1848_v24  ;;  %656 = vmatprep.subr.bf16.mxu0 %v1849_v25  ;;  %v1910_v9 = vld [vmem:[%s2632_s2 + $0x1c] ss:$12 sps:$4 sm:$0xff]   ;;  %v1908_v10 = vld [vmem:[%s2632_s2 + $0x18] ss:$12 sps:$4 sm:$0xff]   ;;  %v1911_v11 = vld [vmem:[%s2630_s3 + $0x1a0] ss:$12 sps:$4 sm:$0xff]  }
  0x19   :  { %697 = vmatprep.subr.bf16.mxu1 %v1851_v26  ;;  %v1914_v12 = vld [vmem:[%s2632_s2 + $0x34] ss:$12 sps:$4 sm:$0xff]   ;;  %v1912_v13 = vld [vmem:[%s2632_s2 + $0x30] ss:$12 sps:$4 sm:$0xff]   ;;  %v1915_v14 = vld [vmem:[%s2630_s3 + $0x1b8] ss:$12 sps:$4 sm:$0xff]  }
  0x1a   :  { %v1918_v15 = vld [vmem:[%s2632_s2 + $0x4c] ss:$12 sps:$4 sm:$0xff]   ;;  %v1916_v16 = vld [vmem:[%s2632_s2 + $0x48] ss:$12 sps:$4 sm:$0xff]   ;;  %v1919_v17 = vld [vmem:[%s2630_s3 + $0x1d0] ss:$12 sps:$4 sm:$0xff]  }
  0x1b   :  { %657 = vmatpush1.bf16.msra.mxu0 %v1853_v27  ;;  %v1922_v18 = vld [vmem:[%s2632_s2 + $0x64] ss:$12 sps:$4 sm:$0xff]   ;;  %v1920_v19 = vld [vmem:[%s2632_s2 + $0x60] ss:$12 sps:$4 sm:$0xff]   ;;  %v1923_v20 = vld [vmem:[%s2630_s3 + $0x1e8] ss:$12 sps:$4 sm:$0xff]  }
  0x1c   :  { %698 = vmatpush1.bf16.msra.mxu1 %v1854_v28  ;;  %658 = vmatprep.subr.bf16.mxu0 %v1855_v29  ;;  %v1926_v21 = vld [vmem:[%s2632_s2 + $0x7c] ss:$12 sps:$4 sm:$0xff]   ;;  %v1924_v22 = vld [vmem:[%s2632_s2 + $0x78] ss:$12 sps:$4 sm:$0xff]   ;;  %v1927_v23 = vld [vmem:[%s2630_s3 + $0x200] ss:$12 sps:$4 sm:$0xff]  }
  0x1d   :  { %699 = vmatprep.subr.bf16.mxu1 %v1857_v30  ;;  %v1930_v24 = vld [vmem:[%s2632_s2 + $0x94] ss:$12 sps:$4 sm:$0xff]   ;;  %v1928_v25 = vld [vmem:[%s2632_s2 + $0x90] ss:$12 sps:$4 sm:$0xff]   ;;  %v1931_v26 = vld [vmem:[%s2630_s3 + $0x218] ss:$12 sps:$4 sm:$0xff]  }
  0x1e   :  { %v1934_v27 = vld [vmem:[%s2632_s2 + $0xac] ss:$12 sps:$4 sm:$0xff]   ;;  %v2347_v28 = vld [vmem:[%s2633_s0] sm:$0xff]  ;;  %v1932_v30 = vld [vmem:[%s2632_s2 + $0xa8] ss:$12 sps:$4 sm:$0xff]  }
  0x1f   :  { %659 = vmatpush1.bf16.msra.mxu0 %v1859_v31  ;;  %v2351_v29 = vcombine.high %v2347_v28, %v2347_v28  ;;  %v1935_v31 = vld [vmem:[%s2630_s3 + $0x230] ss:$12 sps:$4 sm:$0xff]   ;;  %v1969_v55 = vld [vmem:[%s2632_s2 + $0x1f8] ss:$12 sps:$4 sm:$0xff]  }
  0x20   :  { %700 = vmatpush1.bf16.msra.mxu1 %v1860_v32  ;;  %660 = vmatprep.subr.bf16.mxu0 %v1861_v33  ;;  %v1938_v32 = vld [vmem:[%s2632_s2 + $0xc4] ss:$12 sps:$4 sm:$0xff]  }
  0x21   :  { %1715 = vmatprep.subr.bf16.mxu1 %v1863_v34  ;;  %v1941_v33 = vld [vmem:[%s2632_s2 + $0x184] ss:$12 sps:$4 sm:$0xff]   ;;  %v1936_v34 = vld [vmem:[%s2632_s2 + $0xc0] ss:$12 sps:$4 sm:$0xff]  }
  0x23   :  { %718 = vmatmul.mubr.bf16.vlgmr.msra.gmra.mrb[0].mxu1 %v2185_v36  ;;  %661 = vmatpush1.bf16.msra.mxu0 %v1864_v35  ;;  %v1939_v35 = vld [vmem:[%s2632_s2 + $0x180] ss:$12 sps:$4 sm:$0xff]  }
  0x24   :  { %1716 = vmatpush3.bf16.msra.mxu1 %v1866_v37  ;;  %662 = vmatprep.subr.bf16.mxu0 %v1867_v38  ;;  %v1944_v37 = vld [vmem:[%s2632_s2 + $0xdc] ss:$12 sps:$4 sm:$0xff]  }
  0x25   :  { %1717 = vmatprep.subr.bf16.mxu1 %v1869_v39  ;;  %758 = vmatprep.mubr.bf16.mxu1 %v1537_v57  ;;  %v1947_v38 = vld [vmem:[%s2632_s2 + $0x19c] ss:$12 sps:$4 sm:$0xff]   ;;  %v1942_v39 = vld [vmem:[%s2632_s2 + $0xd8] ss:$12 sps:$4 sm:$0xff]  }
  0x26   :  { %v2439_v57 = vld [vmem:[%s2633_s0 + $0x8] sm:$0xff] }
  0x27   :  { %663 = vmatpush1.bf16.msra.mxu0 %v1870_v40  ;;  %v1945_v40 = vld [vmem:[%s2632_s2 + $0x198] ss:$12 sps:$4 sm:$0xff]  }
  0x28   :  { %1718 = vmatpush3.bf16.msra.mxu1 %v1871_v41  ;;  %664 = vmatprep.subr.bf16.mxu0 %v1872_v42  ;;  %v1950_v41 = vld [vmem:[%s2632_s2 + $0xf4] ss:$12 sps:$4 sm:$0xff]   ;;  %v1948_v42 = vld [vmem:[%s2632_s2 + $0xf0] ss:$12 sps:$4 sm:$0xff]  }
  0x29   :  { %1719 = vmatprep.subr.bf16.mxu1 %v1874_v43  ;;  %v1951_v43 = vld [vmem:[%s2632_s2 + $0x1b0] ss:$12 sps:$4 sm:$0xff]  }
  0x2b   :  { %665 = vmatpush1.bf16.msra.mxu0 %v1875_v44  ;;  %v1956_v44 = vld [vmem:[%s2632_s2 + $0x10c] ss:$12 sps:$4 sm:$0xff]  }
  0x2c   :  { %1720 = vmatpush3.bf16.msra.mxu1 %v1876_v45  ;;  %666 = vmatprep.subr.bf16.mxu0 %v1877_v46  ;;  %v1959_v45 = vld [vmem:[%s2632_s2 + $0x1cc] ss:$12 sps:$4 sm:$0xff]   ;;  %v1954_v46 = vld [vmem:[%s2632_s2 + $0x108] ss:$12 sps:$4 sm:$0xff]  }
  0x2d   :  { %1721 = vmatprep.subr.bf16.mxu1 %v1879_v47  ;;  %v1957_v47 = vld [vmem:[%s2632_s2 + $0x1c8] ss:$12 sps:$4 sm:$0xff]  }
  0x2f   :  { %667 = vmatpush1.bf16.msra.mxu0 %v1880_v48  ;;  %v1962_v48 = vld [vmem:[%s2632_s2 + $0x124] ss:$12 sps:$4 sm:$0xff]  }
  0x30   :  { %1722 = vmatpush3.bf16.msra.mxu1 %v1881_v49  ;;  %668 = vmatprep.subr.bf16.mxu0 %v1882_v50  ;;  %v1965_v49 = vld [vmem:[%s2632_s2 + $0x1e4] ss:$12 sps:$4 sm:$0xff]   ;;  %v1960_v50 = vld [vmem:[%s2632_s2 + $0x120] ss:$12 sps:$4 sm:$0xff]  }
  0x31   :  { %1723 = vmatprep.subr.bf16.mxu1 %v1884_v51  ;;  %v1963_v51 = vld [vmem:[%s2632_s2 + $0x1e0] ss:$12 sps:$4 sm:$0xff]  }
  0x33   :  { %669 = vmatpush1.bf16.msra.mxu0 %v1885_v52  ;;  %v1968_v52 = vld [vmem:[%s2632_s2 + $0x13c] ss:$12 sps:$4 sm:$0xff]  }
  0x34   :  { %1724 = vmatpush3.bf16.msra.mxu1 %v1886_v53  ;;  %670 = vmatprep.subr.bf16.mxu0 %v1887_v54  ;;  %v1971_v53 = vld [vmem:[%s2632_s2 + $0x1fc] ss:$12 sps:$4 sm:$0xff]   ;;  %v1966_v54 = vld [vmem:[%s2632_s2 + $0x138] ss:$12 sps:$4 sm:$0xff]  }
  0x35   :  { %1725 = vmatprep.subr.bf16.mxu1 %v1889_v56  ;;  %v1974_v56 = vld [vmem:[%s2632_s2 + $0x154] ss:$12 sps:$4 sm:$0xff]  }
  0x37   :  { %671 = vmatpush1.bf16.msra.mxu0 %v1890_v58  ;;  %v1977_v58 = vld [vmem:[%s2632_s2 + $0x214] ss:$12 sps:$4 sm:$0xff]  }
  0x38   :  { %1726 = vmatpush3.bf16.msra.mxu1 %v1891_v59  ;;  %672 = vmatprep.subr.bf16.mxu0 %v1892_v60  ;;  %v2446_v59 = vcombine.high %v2439_v57, %v2439_v57  ;;  %v1972_v60 = vld [vmem:[%s2632_s2 + $0x150] ss:$12 sps:$4 sm:$0xff]  }
  0x39   :  { %1727 = vmatprep.subr.bf16.mxu1 %v1894_v61  ;;  %v1975_v61 = vld [vmem:[%s2632_s2 + $0x210] ss:$12 sps:$4 sm:$0xff]  }
  0x3b   :  { %673 = vmatpush1.bf16.msra.mxu0 %v1895_v62  ;;  %v1980_v62 = vld [vmem:[%s2632_s2 + $0x16c] ss:$12 sps:$4 sm:$0xff]  }
  0x3c   :  { %1728 = vmatpush3.bf16.msra.mxu1 %v1896_v63  ;;  %674 = vmatprep.subr.bf16.mxu0 %v1897_v0  ;;  %v1983_v63 = vld [vmem:[%s2632_s2 + $0x22c] ss:$12 sps:$4 sm:$0xff]   ;;  %v1978_v0 = vld [vmem:[%s2632_s2 + $0x168] ss:$12 sps:$4 sm:$0xff]  }
  0x3d   :  { %1729 = vmatprep.subr.bf16.mxu1 %v1899_v1  ;;  %v1981_v1 = vld [vmem:[%s2632_s2 + $0x228] ss:$12 sps:$4 sm:$0xff]  }
  0x3f   :  { %675 = vmatpush1.bf16.msra.mxu0 %v1900_v2  ;;  %v1988_v2 = vld [vmem:[%s2632_s2 + $0x244] ss:$12 sps:$4 sm:$0xff]  }
  0x40   :  { %1730 = vmatpush3.bf16.msra.mxu1 %v1901_v3  ;;  %1790 = vmatprep.subr.bf16.mxu0 %v2045_v8  ;;  %v1989_v3 = vld [vmem:[%s2632_s2 + $0xc8] ss:$12 sps:$4 sm:$0xff]  }
  0x41   :  { %1332 = vmatprep.subr.bf16.mxu1 %v1906_v4  ;;  %v1986_v4 = vld [vmem:[%s2632_s2 + $0x240] ss:$12 sps:$4 sm:$0xff]  }
  0x42   :  { %677 = vmatmul.mubr.bf16.vlgmr.msra.gmra.mrb[0].mxu0 %v1536_v5 }
  0x43   :  { %759 = vmatmul.mubr.bf16.vlgmr.msra.gmra.mrb[4].mxu1 %v1536_v5  ;;  %1791 = vmatpush3.bf16.msra.mxu0 %v1907_v7  ;;  %v2478_v5 = vcombine.low %v2347_v28, %v2347_v28  ;;  %v1993_v7 = vld [vmem:[%s2632_s2 + $0x25c] ss:$12 sps:$4 sm:$0xff]   ;;  %v2019_v28 = vld [vmem:[%s2632_s2 + $0x158] ss:$12 sps:$4 sm:$0xff]  }
  0x44   :  { %1333 = vmatpush1.bf16.msra.mxu1 %v1904_v6  ;;  %1792 = vmatprep.subr.bf16.mxu0 %v2045_v8  ;;  %v1990_v6 = vld [vmem:[%s2632_s2 + $0x8] ss:$12 sps:$4 sm:$0xff]  }
  0x45   :  { %1334 = vmatprep.subr.bf16.mxu1 %v1910_v9  ;;  %1806 = vmatprep.mubr.msk.bf16.mxu0 %vm2046_vm0, %v2045_v8  ;;  %v1991_v9 = vld [vmem:[%s2632_s2 + $0x258] ss:$12 sps:$4 sm:$0xff]  }
  0x46   :  { %1364 = vmatprep.mubr.bf16.mxu1 %v2351_v29 }
  0x47   :  { %1793 = vmatpush3.bf16.msra.mxu0 %v1911_v11  ;;  %v1998_v11 = vld [vmem:[%s2632_s2 + $0x274] ss:$12 sps:$4 sm:$0xff]  }
  0x48   :  { %1335 = vmatpush1.bf16.msra.mxu1 %v1908_v10  ;;  %1794 = vmatprep.subr.bf16.mxu0 %v2045_v8  ;;  %v1995_v10 = vld [vmem:[%s2632_s2 + $0x20] ss:$12 sps:$4 sm:$0xff]  }
  0x49   :  { %1336 = vmatprep.subr.bf16.mxu1 %v1914_v12  ;;  %v1999_v12 = vld [vmem:[%s2632_s2 + $0xf8] ss:$12 sps:$4 sm:$0xff]  }
  0x4b   :  { %1795 = vmatpush3.bf16.msra.mxu0 %v1915_v14  ;;  %v2000_v14 = vld [vmem:[%s2632_s2 + $0x38] ss:$12 sps:$4 sm:$0xff]  }
  0x4c   :  { %1337 = vmatpush1.bf16.msra.mxu1 %v1912_v13  ;;  %1796 = vmatprep.subr.bf16.mxu0 %v2045_v8  ;;  %v1996_v13 = vld [vmem:[%s2632_s2 + $0x270] ss:$12 sps:$4 sm:$0xff]  }
  0x4d   :  { %1338 = vmatprep.subr.bf16.mxu1 %v1918_v15  ;;  %v2003_v15 = vld [vmem:[%s2632_s2 + $0x28c] ss:$12 sps:$4 sm:$0xff]  }
  0x4f   :  { %1797 = vmatpush3.bf16.msra.mxu0 %v1919_v17  ;;  %v2001_v17 = vld [vmem:[%s2632_s2 + $0x288] ss:$12 sps:$4 sm:$0xff]  }
  0x50   :  { %1339 = vmatpush1.bf16.msra.mxu1 %v1916_v16  ;;  %1798 = vmatprep.subr.bf16.mxu0 %v2045_v8  ;;  %v2004_v16 = vld [vmem:[%s2632_s2 + $0x110] ss:$12 sps:$4 sm:$0xff]  }
  0x51   :  { %1340 = vmatprep.subr.bf16.mxu1 %v1922_v18  ;;  %v2005_v18 = vld [vmem:[%s2632_s2 + $0x50] ss:$12 sps:$4 sm:$0xff]  }
  0x53   :  { %1799 = vmatpush3.bf16.msra.mxu0 %v1923_v20  ;;  %v2009_v20 = vld [vmem:[%s2632_s2 + $0x128] ss:$12 sps:$4 sm:$0xff]  }
  0x54   :  { %1341 = vmatpush1.bf16.msra.mxu1 %v1920_v19  ;;  %1800 = vmatprep.subr.bf16.mxu0 %v2045_v8  ;;  %v2008_v19 = vld [vmem:[%s2632_s2 + $0x2a4] ss:$12 sps:$4 sm:$0xff]  }
  0x55   :  { %1342 = vmatprep.subr.bf16.mxu1 %v1926_v21  ;;  %v2006_v21 = vld [vmem:[%s2632_s2 + $0x2a0] ss:$12 sps:$4 sm:$0xff]  }
  0x57   :  { %1801 = vmatpush3.bf16.msra.mxu0 %v1927_v23  ;;  %v2013_v23 = vld [vmem:[%s2632_s2 + $0x2bc] ss:$12 sps:$4 sm:$0xff]  }
  0x58   :  { %1343 = vmatpush1.bf16.msra.mxu1 %v1924_v22  ;;  %1802 = vmatprep.subr.bf16.mxu0 %v2045_v8  ;;  %v2010_v22 = vld [vmem:[%s2632_s2 + $0x68] ss:$12 sps:$4 sm:$0xff]  }
  0x59   :  { %1344 = vmatprep.subr.bf16.mxu1 %v1930_v24  ;;  %v2014_v24 = vld [vmem:[%s2632_s2 + $0x140] ss:$12 sps:$4 sm:$0xff]  }
  0x5b   :  { %1803 = vmatpush3.bf16.msra.mxu0 %v1931_v26  ;;  %v2015_v26 = vld [vmem:[%s2632_s2 + $0x80] ss:$12 sps:$4 sm:$0xff]  }
  0x5c   :  { %1345 = vmatpush1.bf16.msra.mxu1 %v1928_v25  ;;  %1804 = vmatprep.subr.bf16.mxu0 %v2045_v8  ;;  %v1994_v8 = vld [vmem:[%s2632_s2 + $0xe0] ss:$12 sps:$4 sm:$0xff]   ;;  %v2011_v25 = vld [vmem:[%s2632_s2 + $0x2b8] ss:$12 sps:$4 sm:$0xff]  }
  0x5d   :  { %1346 = vmatprep.subr.bf16.mxu1 %v1934_v27  ;;  %v2018_v27 = vld [vmem:[%s2632_s2 + $0x2d4] ss:$12 sps:$4 sm:$0xff]  }
  0x5f   :  { %1805 = vmatpush3.bf16.msra.mxu0 %v1935_v31  ;;  %v2023_v31 = vld [vmem:[%s2632_s2 + $0x2ec] ss:$12 sps:$4 sm:$0xff]  }
  0x60   :  { %1347 = vmatpush1.bf16.msra.mxu1 %v1932_v30  ;;  %1373 = vmatprep.subr.bf16.mxu0 %v1941_v33  ;;  %v2020_v30 = vld [vmem:[%s2632_s2 + $0x98] ss:$12 sps:$4 sm:$0xff]   ;;  %v2021_v33 = vld [vmem:[%s2632_s2 + $0x2e8] ss:$12 sps:$4 sm:$0xff]  }
  0x61   :  { %1348 = vmatprep.subr.bf16.mxu1 %v1938_v32  ;;  %v2024_v32 = vld [vmem:[%s2632_s2 + $0x170] ss:$12 sps:$4 sm:$0xff]  }
  0x62   :  { %1807 = vmatmul.mubr.bf16.vlgmr.msra.gmra.mrb[4].mxu0 %v2185_v36  ;;  %v1953_v36 = vld [vmem:[%s2632_s2 + $0x1b4] ss:$12 sps:$4 sm:$0xff]  }
  0x63   :  { %1374 = vmatpush1.bf16.msra.mxu0 %v1939_v35  ;;  %1405 = vmatprep.mubr.bf16.mxu0 %v2446_v59  ;;  %v2028_v35 = vld [vmem:[%s2632_s2 + $0x248] ss:$12 sps:$4 sm:$0xff]  }
  0x64   :  { %1349 = vmatpush1.bf16.msra.mxu1 %v1936_v34  ;;  %1375 = vmatprep.subr.bf16.mxu0 %v1947_v38  ;;  %v2025_v34 = vld [vmem:[%s2632_s2 + $0xb0] ss:$12 sps:$4 sm:$0xff]   ;;  %v2029_v38 = vld [vmem:[%s2632_s2 + $0x188] ss:$12 sps:$4 sm:$0xff]  }
  0x65   :  { %1350 = vmatprep.subr.bf16.mxu1 %v1944_v37  ;;  %v1613_v37 = vcombine.low %v2439_v57, %v2439_v57 }
  0x67   :  { %1376 = vmatpush1.bf16.msra.mxu0 %v1945_v40  ;;  %v2031_v40 = vld [vmem:[%s2632_s2 + $0x1a0] ss:$12 sps:$4 sm:$0xff]  }
  0x68   :  { %1351 = vmatpush1.bf16.msra.mxu1 %v1942_v39  ;;  %1377 = vmatprep.subr.bf16.mxu0 %v1953_v36  ;;  %v2030_v39 = vld [vmem:[%s2632_s2 + $0x260] ss:$12 sps:$4 sm:$0xff]   ;;  %v2033_v36 = vld [vmem:[%s2632_s2 + $0x1b8] ss:$12 sps:$4 sm:$0xff]  }
  0x69   :  { %1352 = vmatprep.subr.bf16.mxu1 %v1950_v41  ;;  %v2032_v41 = vld [vmem:[%s2632_s2 + $0x278] ss:$12 sps:$4 sm:$0xff]  }
  0x6b   :  { %1378 = vmatpush1.bf16.msra.mxu0 %v1951_v43  ;;  %v2035_v43 = vld [vmem:[%s2632_s2 + $0x1d0] ss:$12 sps:$4 sm:$0xff]  }
  0x6c   :  { %1353 = vmatpush1.bf16.msra.mxu1 %v1948_v42  ;;  %1379 = vmatprep.subr.bf16.mxu0 %v1959_v45  ;;  %v2034_v42 = vld [vmem:[%s2632_s2 + $0x290] ss:$12 sps:$4 sm:$0xff]   ;;  %v2037_v45 = vld [vmem:[%s2632_s2 + $0x1e8] ss:$12 sps:$4 sm:$0xff]  }
  0x6d   :  { %1354 = vmatprep.subr.bf16.mxu1 %v1956_v44  ;;  %v2036_v44 = vld [vmem:[%s2632_s2 + $0x2a8] ss:$12 sps:$4 sm:$0xff]  }
  0x6f   :  { %1380 = vmatpush1.bf16.msra.mxu0 %v1957_v47  ;;  %v2039_v47 = vld [vmem:[%s2632_s2 + $0x200] ss:$12 sps:$4 sm:$0xff]  }
  0x70   :  { %1355 = vmatpush1.bf16.msra.mxu1 %v1954_v46  ;;  %1381 = vmatprep.subr.bf16.mxu0 %v1965_v49  ;;  %v2038_v46 = vld [vmem:[%s2632_s2 + $0x2c0] ss:$12 sps:$4 sm:$0xff]   ;;  %v2041_v49 = vld [vmem:[%s2632_s2 + $0x218] ss:$12 sps:$4 sm:$0xff]  }
  0x71   :  { %1356 = vmatprep.subr.bf16.mxu1 %v1962_v48  ;;  %v2040_v48 = vld [vmem:[%s2632_s2 + $0x2d8] ss:$12 sps:$4 sm:$0xff]  }
  0x73   :  { %1382 = vmatpush1.bf16.msra.mxu0 %v1963_v51  ;;  %v2043_v51 = vld [vmem:[%s2632_s2 + $0x230] ss:$12 sps:$4 sm:$0xff]  }
  0x74   :  { %1357 = vmatpush1.bf16.msra.mxu1 %v1960_v50  ;;  %1383 = vmatprep.subr.bf16.mxu0 %v1971_v53  ;;  %v2042_v50 = vld [vmem:[%s2632_s2 + $0x2f0] ss:$12 sps:$4 sm:$0xff]  }
  0x75   :  { %1358 = vmatprep.subr.bf16.mxu1 %v1968_v52 }
  0x77   :  { %1384 = vmatpush1.bf16.msra.mxu0 %v1969_v55 }
  0x78   :  { %1359 = vmatpush1.bf16.msra.mxu1 %v1966_v54  ;;  %1385 = vmatprep.subr.bf16.mxu0 %v1977_v58 }
  0x79   :  { %1360 = vmatprep.subr.bf16.mxu1 %v1974_v56 }
  0x7b   :  { %1386 = vmatpush1.bf16.msra.mxu0 %v1975_v61 }
  0x7c   :  { %1361 = vmatpush1.bf16.msra.mxu1 %v1972_v60  ;;  %1387 = vmatprep.subr.bf16.mxu0 %v1983_v63 }
  0x7d   :  { %1362 = vmatprep.subr.bf16.mxu1 %v1980_v62 }
  0x7f   :  { %1388 = vmatpush1.bf16.msra.mxu0 %v1981_v1 }
  0x80   :  { %1363 = vmatpush1.bf16.msra.mxu1 %v1978_v0  ;;  %1389 = vmatprep.subr.bf16.mxu0 %v1988_v2 }
  0x81   :  { %1746 = vmatprep.subr.bf16.mxu1 %v1989_v3 }
  0x83   :  { %1365 = vmatmul.mubr.bf16.vlgmr.msra.gmra.mrb[8].mxu1 %v2478_v5  ;;  %1390 = vmatpush1.bf16.msra.mxu0 %v1986_v4 }
  0x84   :  { %1747 = vmatpush3.bf16.msra.mxu1 %v1990_v6  ;;  %1391 = vmatprep.subr.bf16.mxu0 %v1993_v7 }
  0x85   :  { %1748 = vmatprep.subr.bf16.mxu1 %v1994_v8  ;;  %1446 = vmatprep.mubr.bf16.mxu1 %v2351_v29  ;;  %v2016_v29 = vld [vmem:[%s2632_s2 + $0x2d0] ss:$12 sps:$4 sm:$0xff]  }
  0x87   :  { %1392 = vmatpush1.bf16.msra.mxu0 %v1991_v9 }
  0x88   :  { %1749 = vmatpush3.bf16.msra.mxu1 %v1995_v10  ;;  %1393 = vmatprep.subr.bf16.mxu0 %v1998_v11 }
  0x89   :  { %1750 = vmatprep.subr.bf16.mxu1 %v1999_v12 }
  0x8b   :  { %1394 = vmatpush1.bf16.msra.mxu0 %v1996_v13 }
  0x8c   :  { %1751 = vmatpush3.bf16.msra.mxu1 %v2000_v14  ;;  %1395 = vmatprep.subr.bf16.mxu0 %v2003_v15  ;;  %v1496_v14 = vlaneseq }
  0x8d   :  { %1752 = vmatprep.subr.bf16.mxu1 %v2004_v16 }
  0x8e   :  { %v1497_v15 = vshrl.u32 %v1496_v14, 7 }
  0x8f   :  { %1396 = vmatpush1.bf16.msra.mxu0 %v2001_v17  ;;  %v1494_v17 = vld [vmem:[%s2634_s4] sm:$0x7] }
  0x90   :  { %1753 = vmatpush3.bf16.msra.mxu1 %v2005_v18  ;;  %1397 = vmatprep.subr.bf16.mxu0 %v2008_v19  ;;  %v1498_v16 = vsub.s32 0, %v1497_v15  ;;  %v1502_v18 = vsub.s32 1, %v1497_v15 }
  0x91   :  { %1754 = vmatprep.subr.bf16.mxu1 %v2009_v20 }
  0x92   :  { %v1499_v19 = vrot.slane %v1494_v17, %v1498_v16 }
  0x93   :  { %1398 = vmatpush1.bf16.msra.mxu0 %v2006_v21 }
  0x94   :  { %1755 = vmatpush3.bf16.msra.mxu1 %v2010_v22  ;;  %1399 = vmatprep.subr.bf16.mxu0 %v2013_v23  ;;  %v1503_v22 = vrot.slane %v1494_v17, %v1502_v18 }
  0x95   :  { %1756 = vmatprep.subr.bf16.mxu1 %v2014_v24 }
  0x97   :  { %1400 = vmatpush1.bf16.msra.mxu0 %v2011_v25 }
  0x98   :  { %1757 = vmatpush3.bf16.msra.mxu1 %v2015_v26  ;;  %1401 = vmatprep.subr.bf16.mxu0 %v2018_v27 }
  0x99   :  { %1758 = vmatprep.subr.bf16.mxu1 %v2019_v28 }
  0x9b   :  { %1402 = vmatpush1.bf16.msra.mxu0 %v2016_v29 }
  0x9c   :  { %1759 = vmatpush3.bf16.msra.mxu1 %v2020_v30  ;;  %1403 = vmatprep.subr.bf16.mxu0 %v2023_v31 }
  0x9d   :  { %1760 = vmatprep.subr.bf16.mxu1 %v2024_v32 }
  0x9f   :  { %1404 = vmatpush1.bf16.msra.mxu0 %v2021_v33 }
  0xa0   :  { %1761 = vmatpush3.bf16.msra.mxu1 %v2025_v34  ;;  %1768 = vmatprep.subr.bf16.mxu0 %v2028_v35 }
  0xa2   :  { %1406 = vmatmul.mubr.bf16.vlgmr.msra.gmra.mrb[8].mxu0 %v1613_v37 }
  0xa3   :  { %1447 = vmatmul.mubr.bf16.vlgmr.msra.gmra.mrb[12].mxu1 %v2478_v5  ;;  %1769 = vmatpush3.bf16.msra.mxu0 %v2029_v38 }
  0xa4   :  { %1486 = vmatprep.mubr.bf16.mxu0 %v2446_v59  ;;  %1770 = vmatprep.subr.bf16.mxu0 %v2030_v39  ;;  %v1506_v39 = vsub.s32 2, %v1497_v15 }
  0xa7   :  { %1771 = vmatpush3.bf16.msra.mxu0 %v2031_v40 }
  0xa8   :  { %1772 = vmatprep.subr.bf16.mxu0 %v2032_v41 }
  0xab   :  { %1773 = vmatpush3.bf16.msra.mxu0 %v2033_v36 }
  0xac   :  { %1774 = vmatprep.subr.bf16.mxu0 %v2034_v42  ;;  %v1507_v42 = vrot.slane %v1494_v17, %v1506_v39 }
  0xaf   :  { %1775 = vmatpush3.bf16.msra.mxu0 %v2035_v43 }
  0xb0   :  { %1776 = vmatprep.subr.bf16.mxu0 %v2036_v44 }
  0xb3   :  { %1777 = vmatpush3.bf16.msra.mxu0 %v2037_v45 }
  0xb4   :  { %1778 = vmatprep.subr.bf16.mxu0 %v2038_v46 }
  0xb7   :  { %1779 = vmatpush3.bf16.msra.mxu0 %v2039_v47 }
  0xb8   :  { %1780 = vmatprep.subr.bf16.mxu0 %v2040_v48 }
  0xbb   :  { %1781 = vmatpush3.bf16.msra.mxu0 %v2041_v49 }
  0xbc   :  { %1782 = vmatprep.subr.bf16.mxu0 %v2042_v50 }
  0xbf   :  { %1783 = vmatpush3.bf16.msra.mxu0 %v2043_v51 }
  0xc2   :  { %1487 = vmatmul.mubr.bf16.vlgmr.msra.gmra.mrb[12].mxu0 %v1613_v37 }
  0xf6   :  { %v719_v52 = vpop.f32.mrb[0].mxu1 }
  0xf7   :  { %v721_v53 = vpop.f32.mrb[1].mxu1 }
  0xf8   :  { %v723_v54 = vpop.f32.mrb[2].mxu1 }
  0xf9   :  { %v724_v55 = vpop.f32.mrb[3].mxu1 }
 0x115   :  { %v678_v56 = vpop.f32.mrb[0].mxu0 }
 0x116   :  { %v1731_v57 = vpop.f32.mrb[4].mxu1  ;;  %v720_v58 = vadd.f32 %v719_v52, %v678_v56  ;;  %v680_v59 = vpop.f32.mrb[1].mxu0 }
 0x117   :  { %v1732_v60 = vpop.f32.mrb[5].mxu1  ;;  %v722_v61 = vadd.f32 %v721_v53, %v680_v59  ;;  %v682_v62 = vpop.f32.mrb[2].mxu0 }
 0x118   :  { %v1733_v63 = vadd.f32 %v1732_v60, %v1731_v57  ;;  %v1734_v0 = vpop.f32.mrb[6].mxu1  ;;  %v683_v1 = vpop.f32.mrb[3].mxu0 }
 0x119   :  { %v1735_v2 = vpop.f32.mrb[7].mxu1 }
 0x135   :  { %v800_v3 = vpop.f32.mrb[4].mxu0 }
 0x136   :  { %v801_v4 = vadd.f32 %v1733_v63, %v800_v3  ;;  %v1808_v5 = vpop.f32.mrb[5].mxu0 }
 0x137   :  { %v803_v6 = vpop.f32.mrb[6].mxu0 }
 0x138   :  { %v1809_v7 = vpop.f32.mrb[7].mxu0 }
 0x156   :  { %v1366_v8 = vpop.f32.mrb[8].mxu1 }
 0x157   :  { %v1367_v9 = vadd.f32 %v1366_v8, %v720_v58  ;;  %v1368_v10 = vpop.f32.mrb[9].mxu1 }
 0x158   :  { %v1369_v11 = vadd.f32 %v1368_v10, %v722_v61  ;;  %v1370_v12 = vpop.f32.mrb[10].mxu1 }
 0x159   :  { %v1371_v13 = vpop.f32.mrb[11].mxu1 }
 0x175   :  { %v1407_v20 = vpop.f32.mrb[8].mxu0 }
 0x176   :  { %v1762_v21 = vpop.f32.mrb[12].mxu1  ;;  %v1408_v23 = vadd.f32 %v1407_v20, %v1367_v9  ;;  %v1409_v24 = vpop.f32.mrb[9].mxu0 }
 0x177   :  { %v1763_v25 = vpop.f32.mrb[13].mxu1  ;;  %v1410_v26 = vadd.f32 %v1409_v24, %v1369_v11  ;;  %v1411_v28 = vpop.f32.mrb[10].mxu0 }
 0x178   :  { %v1764_v27 = vadd.f32 %v1763_v25, %v1762_v21  ;;  %v1765_v29 = vpop.f32.mrb[14].mxu1  ;;  %v1511_v30 = vadd.f32 %v1499_v19, %v1408_v23  ;;  %v1412_v31 = vpop.f32.mrb[11].mxu0 }
 0x179   :  { %v1766_v32 = vpop.f32.mrb[15].mxu1  ;;  %v1512_v33 = vadd.f32 %v1503_v22, %v1410_v26 }
 0x17a   :  { %v1449_v34 = vadd.f32 %v1764_v27, %v801_v4  ;;  %v1514_v35 = vmax.f32 %v1511_v30, 0.0 }
 0x17b   :  { %v1515_v37 = vmax.f32 %v1512_v33, 0.0 }
 0x17d   :  { %v1713_v38 = vpack.c.bf16 %v1515_v37, %v1514_v35 }
 0x17f   :  { %1530 = vst [vmem:[%s2635_s5] sm:$0xff] %v1713_v38 }
 0x195   :  { %v1784_v40 = vpop.f32.mrb[12].mxu0 }
 0x196   :  { %v1785_v41 = vpop.f32.mrb[13].mxu0 }
 0x197   :  { %v1786_v36 = vadd.f32 %v1785_v41, %v1784_v40  ;;  %v1787_v43 = vpop.f32.mrb[14].mxu0 }
 0x198   :  { %v1788_v44 = vpop.f32.mrb[15].mxu0 }
 0x199   :  { %v1489_v45 = vadd.f32 %v1786_v36, %v1449_v34 }
 0x19b   :  { %v1513_v46 = vadd.f32 %v1507_v42, %v1489_v45 }
 0x19d   :  { %v1516_v47 = vmax.f32 %v1513_v46, 0.0 }
 0x19f   :  { %v1714_v48 = vpack.c.bf16 %v1516_v47, %v1516_v47 }
 0x1a1   :  { %1531 = vst [vmem:[%s2635_s5 + $0x8] sm:$0xf] %v1714_v48 }

// kernel: detector_forward.40
= control target key start
LH: loop header
LB: loop body
LE: loop exit
PB: predicated region body
PF: predicated region fallthrough
CT: control target
= control target key end

     0   :  { %s870_s18 = smov 0   ;;  %s962_s0 = inlined_call_operand.vmem [shape: bf16[128,128], index: 0, kind: input, shape index: {}]   ;;  %s963_s1 = inlined_call_operand.vmem [shape: bf16[128,64], index: 1, kind: input, shape index: {}]   ;;  %s964_s2 = inlined_call_operand.vmem [shape: bf16[128,64], index: 2, kind: input, shape index: {}]   ;;  %s965_s3 = inlined_call_operand.vmem [shape: bf16[64,64], index: 3, kind: input, shape index: {}]   ;;  %s966_s4 = inlined_call_operand.vmem [shape: f32[1,64], index: 4, kind: input, shape index: {}]   ;;  %s967_s5 = inlined_call_operand.vmem [shape: bf16[128,64], index: 5, kind: output, shape index: {}]  }
   0x1 LB: > { %s682_s19 = sadd.s32 4294967295, %s838_s18   ;;  %p686_p0 = scmp.ge.s32.totalorder %s838_s18, 1  ;;  %s838_s18 = sphi %s870_s18, %s15_s18  }
   0x2   : > { %p199_p1 = scmp.lt.s32.totalorder %s838_s18, 3 }
   0x4   : > { %p200_p2 = pnand %p686_p0, %p199_p1 }
   0x5   : > { %v812_v0 = vld [vmem:[%s964_s2] sm:$0xff] (!%p200_p2)   ;;  %s687_s22 = sshll.u32 (!%p200_p2), %s682_s19, 3  ;;  %v813_v1 = vld [vmem:[%s964_s2 + $0x8] sm:$0xff] (!%p200_p2)   ;;  %v814_v2 = vld [vmem:[%s964_s2 + $0x10] sm:$0xff] (!%p200_p2)   ;;  %vm335_vm0 = vcmask (!%p200_p2), 523264   ;;  %vm605_vm1 = vcmask (!%p200_p2), 519168  }
   0x6   : > { %203 = sbr.rel (%p200_p2) target bundleno = 270 (0x10e), region = 40  ;;  %p233_p3 = scmp.lt.s32.totalorder (!%p200_p2), %s687_s22, 15  ;;  %772 = vmatprep.subr.bf16.mxu0 (!%p200_p2), %v812_v0  ;;  %v816_v3 = vld [vmem:[%s965_s3] sm:$0xff] (!%p200_p2)   ;;  %v818_v4 = vld [vmem:[%s965_s3 + $0x8] sm:$0xff] (!%p200_p2)   ;;  %v815_v5 = vld [vmem:[%s964_s2 + $0x18] sm:$0xff] (!%p200_p2)  }
   0x7   : > { %773 = vmatpush3.bf16.msra.mxu0 (!%p200_p2), %v812_v0  ;;  %756 = vmatprep.subr.bf16.mxu1 (!%p200_p2), %v816_v3  ;;  %v820_v6 = vld [vmem:[%s965_s3 + $0x10] sm:$0xff] (!%p200_p2)   ;;  %v817_v7 = vld [vmem:[%s964_s2 + $0x20] sm:$0xff] (!%p200_p2)   ;;  %v822_v9 = vld [vmem:[%s965_s3 + $0x18] sm:$0xff] (!%p200_p2)  }
   0x8   : > { %774 = vmatprep.subr.bf16.mxu0 (!%p200_p2), %v813_v1  ;;  %757 = vmatpush3.bf16.msra.mxu1 (!%p200_p2), %v816_v3  ;;  %v819_v11 = vld [vmem:[%s964_s2 + $0x28] sm:$0xff] (!%p200_p2)   ;;  %v821_v14 = vld [vmem:[%s964_s2 + $0x30] sm:$0xff] (!%p200_p2)   ;;  %v824_v15 = vld [vmem:[%s964_s2 + $0x38] sm:$0xff] (!%p200_p2)  }
   0x9   : > { %758 = vmatprep.subr.bf16.mxu1 (!%p200_p2), %v818_v4  ;;  %v717_v29 = vld [vmem:[%s966_s4] ss:$0 sm:$0xff] (!%p200_p2) }
   0xb   : > { %775 = vmatpush3.bf16.msra.mxu0 (!%p200_p2), %v813_v1 }
   0xc   : > { %776 = vmatprep.subr.bf16.mxu0 (!%p200_p2), %v814_v2  ;;  %759 = vmatpush3.bf16.msra.mxu1 (!%p200_p2), %v818_v4 }
   0xd   : > { %s969_s22 = smov (!%p233_p3, %s687_s22), 15  ;;  %760 = vmatprep.subr.bf16.mxu1 %v820_v6 }
   0xe   : > { %s890_s29 = sshll.u32 %s969_s22, 2 }
   0xf   : > { %s242_s13 = scalar_lea.vmem %s963_s1, %s890_s29  ;;  %777 = vmatpush3.bf16.msra.mxu0 %v814_v2  ;;  %s912_s19 = scalar_lea.vmem %s962_s0, %s890_s29 }
  0x10   : > { %v823_v8 = vld [vmem:[%s242_s13] sm:$0xff]   ;;  %778 = vmatprep.subr.bf16.mxu0 %v815_v5  ;;  %761 = vmatpush3.bf16.msra.mxu1 %v820_v6  ;;  %v825_v12 = vld [vmem:[%s242_s13 + $0x8] sm:$0xff]   ;;  %v828_v13 = vld [vmem:[%s242_s13 + $0x10] sm:$0xff]   ;;  %s941_s8 = scalar_lea.vmem %s967_s5, %s890_s29 }
  0x11   : > { %764 = vmatprep.mubr.msk.bf16.mxu1 %vm335_vm0, %v823_v8  ;;  %v826_v10 = vld [vmem:[%s912_s19] sm:$0xff]   ;;  %762 = vmatprep.subr.bf16.mxu1 %v822_v9  ;;  %v829_v16 = vld [vmem:[%s242_s13 + $0x18] sm:$0xff]   ;;  %v827_v17 = vld [vmem:[%s912_s19 + $0x8] sm:$0xff]  }
  0x12   : > { %788 = vmatprep.mubr.bf16.mxu0 %v826_v10  ;;  %v830_v18 = vld [vmem:[%s912_s19 + $0x10] sm:$0xff]   ;;  %v831_v19 = vld [vmem:[%s912_s19 + $0x18] sm:$0xff]  }
  0x13   : > { %779 = vmatpush3.bf16.msra.mxu0 %v815_v5 }
  0x14   : > { %780 = vmatprep.subr.bf16.mxu0 %v817_v7  ;;  %763 = vmatpush3.bf16.msra.mxu1 %v822_v9 }
  0x17   : > { %781 = vmatpush3.bf16.msra.mxu0 %v817_v7  ;;  %765 = vmatmul.mubr.msk.bf16.vlgmr.msra.gmra.mrb[0].mxu1 %vm335_vm0, %v825_v12 }
  0x18   : > { %782 = vmatprep.subr.bf16.mxu0 %v819_v11  ;;  %768 = vmatprep.mubr.msk.bf16.mxu1 %vm335_vm0, %v828_v13 }
  0x1b   : > { %783 = vmatpush3.bf16.msra.mxu0 %v819_v11 }
  0x1c   : > { %784 = vmatprep.subr.bf16.mxu0 %v821_v14 }
  0x1f   : > { %785 = vmatpush3.bf16.msra.mxu0 %v821_v14  ;;  %769 = vmatmul.mubr.msk.bf16.gmra.mrb[4].mxu1 %vm335_vm0, %v829_v16 }
  0x20   : > { %786 = vmatprep.subr.bf16.mxu0 %v824_v15 }
  0x23   : > { %787 = vmatpush3.bf16.msra.mxu0 %v824_v15 }
  0x26   : > { %789 = vmatmul.mubr.bf16.vlgmr.msra.gmra.mrb[0].mxu0 %v827_v17 }
  0x27   : > { %792 = vmatprep.mubr.bf16.mxu0 %v830_v18 }
  0x2e   : > { %793 = vmatmul.mubr.bf16.gmra.mrb[4].mxu0 %v831_v19 }
  0xea   : > { %v766_v20 = vpop.f32.mrb[0].mxu1 }
  0xeb   : > { %v382_v21 = vpop.f32.mrb[1].mxu1 }
  0xec   : > { %v767_v22 = vpop.f32.mrb[2].mxu1 }
  0xed   : > { %v385_v23 = vpop.f32.mrb[3].mxu1 }
  0xf2   : > { %v770_v24 = vpop.f32.mrb[4].mxu1 }
  0xf3   : > { %v398_v25 = vpop.f32.mrb[5].mxu1 }
  0xf4   : > { %v771_v26 = vpop.f32.mrb[6].mxu1 }
  0xf5   : > { %v401_v27 = vpop.f32.mrb[7].mxu1 }
  0xf9   : > { %v790_v28 = vpop.f32.mrb[0].mxu0 }
  0xfa   : > { %v528_v30 = vadd.f32 %v790_v28, %v766_v20  ;;  %v519_v31 = vpop.f32.mrb[1].mxu0 }
  0xfb   : > { %v520_v32 = vadd.f32 %v519_v31, %v382_v21  ;;  %v791_v33 = vpop.f32.mrb[2].mxu0 }
  0xfc   : > { %v559_v34 = vadd.f32 %v717_v29, %v528_v30  ;;  %v531_v35 = vadd.f32 %v791_v33, %v767_v22  ;;  %v522_v36 = vpop.f32.mrb[3].mxu0 }
  0xfd   : > { %v557_v37 = vadd.f32 %v717_v29, %v520_v32  ;;  %v523_v38 = vadd.f32 %v522_v36, %v385_v23 }
  0xfe   : > { %v567_v39 = vmax.f32 %v559_v34, 0.0  ;;  %v560_v40 = vadd.f32 %v717_v29, %v531_v35 }
  0xff   : > { %v565_v41 = vmax.f32 %v557_v37, 0.0  ;;  %v558_v42 = vadd.f32 %v717_v29, %v523_v38 }
 0x100   : > { %v730_v43 = vpack.c.bf16 %v567_v39, %v567_v39  ;;  %v568_v44 = vmax.f32 %v560_v40, 0.0 }
 0x101   : > { %v728_v45 = vpack.c.bf16 %v565_v41, %v565_v41  ;;  %v566_v46 = vmax.f32 %v558_v42, 0.0  ;;  %v794_v47 = vpop.f32.mrb[4].mxu0 }
 0x102   : > { %608 = vst.msk [vmem:[%s941_s8 + $0x8] sm:$0xf] %vm605_vm1, %v730_v43  ;;  %v731_v48 = vpack.c.bf16 %v568_v44, %v568_v44  ;;  %v544_v49 = vadd.f32 %v794_v47, %v770_v24  ;;  %v535_v50 = vpop.f32.mrb[5].mxu0 }
 0x103   : > { %606 = vst.msk [vmem:[%s941_s8] sm:$0xf] %vm605_vm1, %v728_v45  ;;  %v729_v51 = vpack.c.bf16 %v566_v46, %v566_v46  ;;  %v536_v52 = vadd.f32 %v535_v50, %v398_v25  ;;  %v795_v53 = vpop.f32.mrb[6].mxu0 }
 0x104   : > { %609 = vst.msk [vmem:[%s941_s8 + $0xc] sm:$0xf] %vm605_vm1, %v731_v48  ;;  %v563_v54 = vadd.f32 %v717_v29, %v544_v49  ;;  %v547_v55 = vadd.f32 %v795_v53, %v771_v26  ;;  %v538_v56 = vpop.f32.mrb[7].mxu0 }
 0x105   : > { %607 = vst.msk [vmem:[%s941_s8 + $0x4] sm:$0xf] %vm605_vm1, %v729_v51  ;;  %v561_v57 = vadd.f32 %v717_v29, %v536_v52  ;;  %v539_v58 = vadd.f32 %v538_v56, %v401_v27 }
 0x106   : > { %v571_v59 = vmax.f32 %v563_v54, 0.0  ;;  %v564_v60 = vadd.f32 %v717_v29, %v547_v55 }
 0x107   : > { %v569_v61 = vmax.f32 %v561_v57, 0.0  ;;  %v562_v62 = vadd.f32 %v717_v29, %v539_v58 }
 0x108   : > { %v734_v63 = vpack.c.bf16 %v571_v59, %v571_v59  ;;  %v572_v0 = vmax.f32 %v564_v60, 0.0 }
 0x109   : > { %v732_v1 = vpack.c.bf16 %v569_v61, %v569_v61  ;;  %v570_v2 = vmax.f32 %v562_v62, 0.0 }
 0x10a   : > { %612 = vst.msk [vmem:[%s941_s8 + $0x18] sm:$0xf] %vm605_vm1, %v734_v63  ;;  %v735_v3 = vpack.c.bf16 %v572_v0, %v572_v0 }
 0x10b   : > { %610 = vst.msk [vmem:[%s941_s8 + $0x10] sm:$0xf] %vm605_vm1, %v732_v1  ;;  %v733_v4 = vpack.c.bf16 %v570_v2, %v570_v2 }
 0x10c   : > { %613 = vst.msk [vmem:[%s941_s8 + $0x1c] sm:$0xf] %vm605_vm1, %v735_v3 }
 0x10d   : > { %611 = vst.msk [vmem:[%s941_s8 + $0x14] sm:$0xf] %vm605_vm1, %v733_v4 }
 0x10e PF: > { %s15_s18 = sadd.s32 1, %s838_s18  }
 0x10f   : > { %p12_p4 = scmp.ge.s32.totalorder %s15_s18, 4  }
 0x111   :  { %14 = sbr.rel (!%p12_p4) target bundleno = 1 (0x1), region = 73 }

// kernel: detector_forward.41
= control target key start
LH: loop header
LB: loop body
LE: loop exit
PB: predicated region body
PF: predicated region fallthrough
CT: control target
= control target key end

     0   :  { %s1344_s18 = smov 0   ;;  %s1545_s0 = inlined_call_operand.vmem [shape: bf16[512,16], index: 0, kind: input, shape index: {}]   ;;  %s1546_s1 = inlined_call_operand.vmem [shape: bf16[512,3], index: 1, kind: input, shape index: {}]   ;;  %s1547_s2 = inlined_call_operand.vmem [shape: bf16[16,3], index: 2, kind: input, shape index: {}]   ;;  %s1548_s3 = inlined_call_operand.vmem [shape: bf16[3,3], index: 3, kind: input, shape index: {}]   ;;  %s1549_s4 = inlined_call_operand.vmem [shape: f32[1,3], index: 4, kind: input, shape index: {}]   ;;  %s1550_s5 = inlined_call_operand.vmem [shape: f32[512,3], index: 5, kind: output, shape index: {}]  }
   0x1 LB: > { %s1050_s19 = sadd.s32 4294967295, %s1311_s18   ;;  %p1054_p0 = scmp.ge.s32.totalorder %s1311_s18, 1  ;;  %s1311_s18 = sphi %s1344_s18, %s15_s18  }
   0x2   : > { %p199_p1 = scmp.lt.s32.totalorder %s1311_s18, 3 }
   0x4   : > { %p200_p2 = pnand %p1054_p0, %p199_p1 }
   0x5   : > { %v317_v0 = vld [vmem:[%s1548_s3] sm:$0x3] (!%p200_p2)  ;;  %vm447_vm0 = vcmask (!%p200_p2), 1040384   ;;  %vm448_vm1 = vcmask (!%p200_p2), 1041408   ;;  %v1313_v2 = vmov (!%p200_p2), 65535   ;;  %s1055_s24 = sshll.u32 (!%p200_p2), %s1050_s19, 5 }
   0x6   : > { %203 = sbr.rel (%p200_p2) target bundleno = 295 (0x127), region = 40  ;;  %v1272_v1 = vld [vmem:[%s1547_s2] sm:$0xff] (!%p200_p2)   ;;  %v449_v3 = vsel (!%p200_p2), %vm447_vm0, 4294967295, %v1313_v2  ;;  %p233_p3 = scmp.lt.s32.totalorder (!%p200_p2), %s1055_s24, 63  ;;  %vm398_vm2 = vcmask (!%p200_p2), 23552   ;;  %vm701_vm3 = vcmask (!%p200_p2), 130048  }
   0x7   : > { %v450_v4 = vsel (!%p200_p2), %vm448_vm1, %v449_v3, 0  ;;  %1197 = vmatprep.subr.bf16.mxu0 (!%p200_p2), %v1272_v1  ;;  %v1439_v40 = vld [vmem:[%s1549_s4] ss:$0 sm:$0xff] (!%p200_p2) }
   0x8   : > { %v452_v5 = vand.u32 (!%p200_p2), %v450_v4, %v317_v0  ;;  %1198 = vmatpush3.bf16.msra.mxu0 (!%p200_p2), %v1272_v1 }
   0xa   : > { %1163 = vmatprep.subr.bf16.mxu1 (!%p200_p2), %v452_v5 }
   0xb   : > { %1164 = vmatpush3.bf16.msra.mxu1 (!%p200_p2), %v452_v5 }
   0xd   : > { %s1552_s24 = smov (!%p233_p3, %s1055_s24), 63 }
   0xe   : > { %s1056_s25 = sshll.u32 %s1552_s24, 2  ;;  %s1060_s7 = sshll.u32 %s1552_s24, 3 }
   0xf   : > { %s1364_s28 = scalar_lea.vmem %s1546_s1, %s1056_s25  ;;  %s1369_s6 = scalar_lea.vmem %s1545_s0, %s1056_s25 }
  0x10   : > { %v1273_v6 = vld [vmem:[%s1364_s28] sm:$0xff]   ;;  %v1275_v8 = vld [vmem:[%s1364_s28 + $0x8] sm:$0xff]   ;;  %v1277_v10 = vld [vmem:[%s1364_s28 + $0x10] sm:$0xff]   ;;  %s1444_s12 = scalar_lea.vmem %s1550_s5, %s1060_s7 }
  0x11   : > { %v1274_v7 = vld [vmem:[%s1369_s6] sm:$0xff]   ;;  %1165 = vmatprep.mubr.msk.bf16.mxu1 %vm398_vm2, %v1273_v6  ;;  %v1276_v9 = vld [vmem:[%s1369_s6 + $0x8] sm:$0xff]   ;;  %v1278_v11 = vld [vmem:[%s1369_s6 + $0x10] sm:$0xff]  }
  0x12   : > { %1199 = vmatprep.mubr.msk.bf16.mxu0 %vm701_vm3, %v1274_v7  ;;  %1166 = vmatmul.mubr.msk.bf16.vlgmr.msra.gmra.mrb[0].mxu1 %vm398_vm2, %v1275_v8  ;;  %v1279_v12 = vld [vmem:[%s1364_s28 + $0x18] sm:$0xff]   ;;  %v1281_v14 = vld [vmem:[%s1364_s28 + $0x20] sm:$0xff]   ;;  %v1283_v16 = vld [vmem:[%s1364_s28 + $0x28] sm:$0xff]  }
  0x13   : > { %1200 = vmatmul.mubr.msk.bf16.vlgmr.msra.gmra.mrb[0].mxu0 %vm701_vm3, %v1276_v9  ;;  %1169 = vmatprep.mubr.msk.bf16.mxu1 %vm398_vm2, %v1277_v10  ;;  %v1280_v13 = vld [vmem:[%s1369_s6 + $0x18] sm:$0xff]   ;;  %v1282_v15 = vld [vmem:[%s1369_s6 + $0x20] sm:$0xff]   ;;  %v1284_v17 = vld [vmem:[%s1369_s6 + $0x28] sm:$0xff]  }
  0x14   : > { %1203 = vmatprep.mubr.msk.bf16.mxu0 %vm701_vm3, %v1278_v11  ;;  %v1285_v18 = vld [vmem:[%s1364_s28 + $0x30] sm:$0xff]   ;;  %v1287_v20 = vld [vmem:[%s1364_s28 + $0x38] sm:$0xff]   ;;  %v1289_v22 = vld [vmem:[%s1364_s28 + $0x40] sm:$0xff]  }
  0x15   : > { %v1286_v19 = vld [vmem:[%s1369_s6 + $0x30] sm:$0xff]   ;;  %v1288_v21 = vld [vmem:[%s1369_s6 + $0x38] sm:$0xff]   ;;  %v1290_v23 = vld [vmem:[%s1369_s6 + $0x40] sm:$0xff]  }
  0x16   : > { %v1291_v24 = vld [vmem:[%s1364_s28 + $0x48] sm:$0xff]   ;;  %v1293_v26 = vld [vmem:[%s1364_s28 + $0x50] sm:$0xff]   ;;  %v1295_v28 = vld [vmem:[%s1364_s28 + $0x58] sm:$0xff]  }
  0x17   : > { %v1292_v25 = vld [vmem:[%s1369_s6 + $0x48] sm:$0xff]   ;;  %v1294_v27 = vld [vmem:[%s1369_s6 + $0x50] sm:$0xff]   ;;  %v1296_v29 = vld [vmem:[%s1369_s6 + $0x58] sm:$0xff]  }
  0x18   : > { %v1297_v30 = vld [vmem:[%s1364_s28 + $0x60] sm:$0xff]   ;;  %v1299_v32 = vld [vmem:[%s1364_s28 + $0x68] sm:$0xff]   ;;  %v1301_v34 = vld [vmem:[%s1364_s28 + $0x70] sm:$0xff]  }
  0x19   : > { %v1298_v31 = vld [vmem:[%s1369_s6 + $0x60] sm:$0xff]   ;;  %v1300_v33 = vld [vmem:[%s1369_s6 + $0x68] sm:$0xff]   ;;  %v1302_v35 = vld [vmem:[%s1369_s6 + $0x70] sm:$0xff]  }
  0x1a   : > { %1170 = vmatmul.mubr.msk.bf16.gmra.mrb[4].mxu1 %vm398_vm2, %v1279_v12  ;;  %v1303_v36 = vld [vmem:[%s1364_s28 + $0x78] sm:$0xff]  }
  0x1b   : > { %1204 = vmatmul.mubr.msk.bf16.gmra.mrb[4].mxu0 %vm701_vm3, %v1280_v13  ;;  %1173 = vmatprep.mubr.msk.bf16.mxu1 %vm398_vm2, %v1281_v14  ;;  %v1304_v37 = vld [vmem:[%s1369_s6 + $0x78] sm:$0xff]  }
  0x1c   : > { %1207 = vmatprep.mubr.msk.bf16.mxu0 %vm701_vm3, %v1282_v15 }
  0x22   : > { %1174 = vmatmul.mubr.msk.bf16.gmra.mrb[8].mxu1 %vm398_vm2, %v1283_v16 }
  0x23   : > { %1208 = vmatmul.mubr.msk.bf16.gmra.mrb[8].mxu0 %vm701_vm3, %v1284_v17  ;;  %1177 = vmatprep.mubr.msk.bf16.mxu1 %vm398_vm2, %v1285_v18 }
  0x24   : > { %1211 = vmatprep.mubr.msk.bf16.mxu0 %vm701_vm3, %v1286_v19 }
  0x2a   : > { %1178 = vmatmul.mubr.msk.bf16.gmra.mrb[12].mxu1 %vm398_vm2, %v1287_v20 }
  0x2b   : > { %1212 = vmatmul.mubr.msk.bf16.gmra.mrb[12].mxu0 %vm701_vm3, %v1288_v21  ;;  %1181 = vmatprep.mubr.msk.bf16.mxu1 %vm398_vm2, %v1289_v22 }
  0x2c   : > { %1215 = vmatprep.mubr.msk.bf16.mxu0 %vm701_vm3, %v1290_v23 }
  0x32   : > { %1182 = vmatmul.mubr.msk.bf16.gmra.mrb[16].mxu1 %vm398_vm2, %v1291_v24 }
  0x33   : > { %1216 = vmatmul.mubr.msk.bf16.gmra.mrb[16].mxu0 %vm701_vm3, %v1292_v25  ;;  %1185 = vmatprep.mubr.msk.bf16.mxu1 %vm398_vm2, %v1293_v26 }
  0x34   : > { %1219 = vmatprep.mubr.msk.bf16.mxu0 %vm701_vm3, %v1294_v27 }
  0x3a   : > { %1186 = vmatmul.mubr.msk.bf16.gmra.mrb[20].mxu1 %vm398_vm2, %v1295_v28 }
  0x3b   : > { %1220 = vmatmul.mubr.msk.bf16.gmra.mrb[20].mxu0 %vm701_vm3, %v1296_v29  ;;  %1189 = vmatprep.mubr.msk.bf16.mxu1 %vm398_vm2, %v1297_v30 }
  0x3c   : > { %1223 = vmatprep.mubr.msk.bf16.mxu0 %vm701_vm3, %v1298_v31 }
  0x42   : > { %1190 = vmatmul.mubr.msk.bf16.gmra.mrb[24].mxu1 %vm398_vm2, %v1299_v32 }
  0x43   : > { %1224 = vmatmul.mubr.msk.bf16.gmra.mrb[24].mxu0 %vm701_vm3, %v1300_v33  ;;  %1193 = vmatprep.mubr.msk.bf16.mxu1 %vm398_vm2, %v1301_v34 }
  0x44   : > { %1227 = vmatprep.mubr.msk.bf16.mxu0 %vm701_vm3, %v1302_v35 }
  0x4a   : > { %1194 = vmatmul.mubr.msk.bf16.gmra.mrb[28].mxu1 %vm398_vm2, %v1303_v36 }
  0x4b   : > { %1228 = vmatmul.mubr.msk.bf16.gmra.mrb[28].mxu0 %vm701_vm3, %v1304_v37 }
  0xe5   : > { %v1167_v38 = vpop.f32.mrb[0].mxu1 }
  0xe6   : > { %v1201_v39 = vpop.f32.mrb[0].mxu0  ;;  %v488_v41 = vpop.f32.mrb[1].mxu1 }
  0xe7   : > { %v793_v42 = vadd.f32 %v1201_v39, %v1167_v38  ;;  %v784_v43 = vpop.f32.mrb[1].mxu0  ;;  %v1168_v44 = vpop.f32.mrb[2].mxu1 }
  0xe8   : > { %v785_v45 = vadd.f32 %v784_v43, %v488_v41  ;;  %v1202_v46 = vpop.f32.mrb[2].mxu0  ;;  %v491_v47 = vpop.f32.mrb[3].mxu1 }
  0xe9   : > { %v920_v48 = vadd.f32 %v1439_v40, %v793_v42  ;;  %v796_v49 = vadd.f32 %v1202_v46, %v1168_v44  ;;  %v787_v50 = vpop.f32.mrb[3].mxu0 }
  0xea   : > { %v918_v51 = vadd.f32 %v1439_v40, %v785_v45  ;;  %v788_v52 = vadd.f32 %v787_v50, %v491_v47 }
  0xeb   : > { %952 = vst.msk [vmem:[%s1444_s12 + $0x10] sm:$0xff] %vm398_vm2, %v920_v48  ;;  %v921_v53 = vadd.f32 %v1439_v40, %v796_v49 }
  0xec   : > { %950 = vst.msk [vmem:[%s1444_s12] sm:$0xff] %vm398_vm2, %v918_v51  ;;  %v919_v54 = vadd.f32 %v1439_v40, %v788_v52 }
  0xed   : > { %953 = vst.msk [vmem:[%s1444_s12 + $0x18] sm:$0xff] %vm398_vm2, %v921_v53  ;;  %v1171_v55 = vpop.f32.mrb[4].mxu1 }
  0xee   : > { %951 = vst.msk [vmem:[%s1444_s12 + $0x8] sm:$0xff] %vm398_vm2, %v919_v54  ;;  %v1205_v56 = vpop.f32.mrb[4].mxu0  ;;  %v504_v57 = vpop.f32.mrb[5].mxu1 }
  0xef   : > { %v809_v58 = vadd.f32 %v1205_v56, %v1171_v55  ;;  %v800_v59 = vpop.f32.mrb[5].mxu0  ;;  %v1172_v60 = vpop.f32.mrb[6].mxu1 }
  0xf0   : > { %v801_v61 = vadd.f32 %v800_v59, %v504_v57  ;;  %v1206_v62 = vpop.f32.mrb[6].mxu0  ;;  %v507_v63 = vpop.f32.mrb[7].mxu1 }
  0xf1   : > { %v924_v0 = vadd.f32 %v1439_v40, %v809_v58  ;;  %v812_v1 = vadd.f32 %v1206_v62, %v1172_v60  ;;  %v803_v2 = vpop.f32.mrb[7].mxu0 }
  0xf2   : > { %v922_v3 = vadd.f32 %v1439_v40, %v801_v61  ;;  %v804_v4 = vadd.f32 %v803_v2, %v507_v63 }
  0xf3   : > { %956 = vst.msk [vmem:[%s1444_s12 + $0x30] sm:$0xff] %vm398_vm2, %v924_v0  ;;  %v925_v5 = vadd.f32 %v1439_v40, %v812_v1 }
  0xf4   : > { %954 = vst.msk [vmem:[%s1444_s12 + $0x20] sm:$0xff] %vm398_vm2, %v922_v3  ;;  %v923_v6 = vadd.f32 %v1439_v40, %v804_v4 }
  0xf5   : > { %957 = vst.msk [vmem:[%s1444_s12 + $0x38] sm:$0xff] %vm398_vm2, %v925_v5  ;;  %v1175_v7 = vpop.f32.mrb[8].mxu1 }
  0xf6   : > { %955 = vst.msk [vmem:[%s1444_s12 + $0x28] sm:$0xff] %vm398_vm2, %v923_v6  ;;  %v1209_v8 = vpop.f32.mrb[8].mxu0  ;;  %v520_v9 = vpop.f32.mrb[9].mxu1 }
  0xf7   : > { %v825_v10 = vadd.f32 %v1209_v8, %v1175_v7  ;;  %v816_v11 = vpop.f32.mrb[9].mxu0  ;;  %v1176_v12 = vpop.f32.mrb[10].mxu1 }
  0xf8   : > { %v817_v13 = vadd.f32 %v816_v11, %v520_v9  ;;  %v1210_v14 = vpop.f32.mrb[10].mxu0  ;;  %v523_v15 = vpop.f32.mrb[11].mxu1 }
  0xf9   : > { %v928_v16 = vadd.f32 %v1439_v40, %v825_v10  ;;  %v828_v17 = vadd.f32 %v1210_v14, %v1176_v12  ;;  %v819_v18 = vpop.f32.mrb[11].mxu0 }
  0xfa   : > { %v926_v19 = vadd.f32 %v1439_v40, %v817_v13  ;;  %v820_v20 = vadd.f32 %v819_v18, %v523_v15 }
  0xfb   : > { %960 = vst.msk [vmem:[%s1444_s12 + $0x50] sm:$0xff] %vm398_vm2, %v928_v16  ;;  %v929_v21 = vadd.f32 %v1439_v40, %v828_v17 }
  0xfc   : > { %958 = vst.msk [vmem:[%s1444_s12 + $0x40] sm:$0xff] %vm398_vm2, %v926_v19  ;;  %v927_v22 = vadd.f32 %v1439_v40, %v820_v20 }
  0xfd   : > { %961 = vst.msk [vmem:[%s1444_s12 + $0x58] sm:$0xff] %vm398_vm2, %v929_v21  ;;  %v1179_v23 = vpop.f32.mrb[12].mxu1 }
  0xfe   : > { %959 = vst.msk [vmem:[%s1444_s12 + $0x48] sm:$0xff] %vm398_vm2, %v927_v22  ;;  %v1213_v24 = vpop.f32.mrb[12].mxu0  ;;  %v536_v25 = vpop.f32.mrb[13].mxu1 }
  0xff   : > { %v841_v26 = vadd.f32 %v1213_v24, %v1179_v23  ;;  %v832_v27 = vpop.f32.mrb[13].mxu0  ;;  %v1180_v28 = vpop.f32.mrb[14].mxu1 }
 0x100   : > { %v833_v29 = vadd.f32 %v832_v27, %v536_v25  ;;  %v1214_v30 = vpop.f32.mrb[14].mxu0  ;;  %v539_v31 = vpop.f32.mrb[15].mxu1 }
 0x101   : > { %v932_v32 = vadd.f32 %v1439_v40, %v841_v26  ;;  %v844_v33 = vadd.f32 %v1214_v30, %v1180_v28  ;;  %v835_v34 = vpop.f32.mrb[15].mxu0 }
 0x102   : > { %v930_v35 = vadd.f32 %v1439_v40, %v833_v29  ;;  %v836_v36 = vadd.f32 %v835_v34, %v539_v31 }
 0x103   : > { %964 = vst.msk [vmem:[%s1444_s12 + $0x70] sm:$0xff] %vm398_vm2, %v932_v32  ;;  %v933_v37 = vadd.f32 %v1439_v40, %v844_v33 }
 0x104   : > { %962 = vst.msk [vmem:[%s1444_s12 + $0x60] sm:$0xff] %vm398_vm2, %v930_v35  ;;  %v931_v38 = vadd.f32 %v1439_v40, %v836_v36 }
 0x105   : > { %965 = vst.msk [vmem:[%s1444_s12 + $0x78] sm:$0xff] %vm398_vm2, %v933_v37  ;;  %v1183_v39 = vpop.f32.mrb[16].mxu1 }
 0x106   : > { %963 = vst.msk [vmem:[%s1444_s12 + $0x68] sm:$0xff] %vm398_vm2, %v931_v38  ;;  %v1217_v41 = vpop.f32.mrb[16].mxu0  ;;  %v552_v42 = vpop.f32.mrb[17].mxu1 }
 0x107   : > { %v857_v43 = vadd.f32 %v1217_v41, %v1183_v39  ;;  %v848_v44 = vpop.f32.mrb[17].mxu0  ;;  %v1184_v45 = vpop.f32.mrb[18].mxu1 }
 0x108   : > { %v849_v46 = vadd.f32 %v848_v44, %v552_v42  ;;  %v1218_v47 = vpop.f32.mrb[18].mxu0  ;;  %v555_v48 = vpop.f32.mrb[19].mxu1 }
 0x109   : > { %v936_v49 = vadd.f32 %v1439_v40, %v857_v43  ;;  %v860_v50 = vadd.f32 %v1218_v47, %v1184_v45  ;;  %v851_v51 = vpop.f32.mrb[19].mxu0 }
 0x10a   : > { %v934_v52 = vadd.f32 %v1439_v40, %v849_v46  ;;  %v852_v53 = vadd.f32 %v851_v51, %v555_v48 }
 0x10b   : > { %968 = vst.msk [vmem:[%s1444_s12 + $0x90] sm:$0xff] %vm398_vm2, %v936_v49  ;;  %v937_v54 = vadd.f32 %v1439_v40, %v860_v50 }
 0x10c   : > { %966 = vst.msk [vmem:[%s1444_s12 + $0x80] sm:$0xff] %vm398_vm2, %v934_v52  ;;  %v935_v55 = vadd.f32 %v1439_v40, %v852_v53 }
 0x10d   : > { %969 = vst.msk [vmem:[%s1444_s12 + $0x98] sm:$0xff] %vm398_vm2, %v937_v54  ;;  %v1187_v56 = vpop.f32.mrb[20].mxu1 }
 0x10e   : > { %967 = vst.msk [vmem:[%s1444_s12 + $0x88] sm:$0xff] %vm398_vm2, %v935_v55  ;;  %v1221_v57 = vpop.f32.mrb[20].mxu0  ;;  %v568_v58 = vpop.f32.mrb[21].mxu1 }
 0x10f   : > { %v873_v59 = vadd.f32 %v1221_v57, %v1187_v56  ;;  %v864_v60 = vpop.f32.mrb[21].mxu0  ;;  %v1188_v61 = vpop.f32.mrb[22].mxu1 }
 0x110   : > { %v865_v62 = vadd.f32 %v864_v60, %v568_v58  ;;  %v1222_v63 = vpop.f32.mrb[22].mxu0  ;;  %v571_v0 = vpop.f32.mrb[23].mxu1 }
 0x111   : > { %v940_v1 = vadd.f32 %v1439_v40, %v873_v59  ;;  %v876_v2 = vadd.f32 %v1222_v63, %v1188_v61  ;;  %v867_v3 = vpop.f32.mrb[23].mxu0 }
 0x112   : > { %v938_v4 = vadd.f32 %v1439_v40, %v865_v62  ;;  %v868_v5 = vadd.f32 %v867_v3, %v571_v0 }
 0x113   : > { %972 = vst.msk [vmem:[%s1444_s12 + $0xb0] sm:$0xff] %vm398_vm2, %v940_v1  ;;  %v941_v6 = vadd.f32 %v1439_v40, %v876_v2 }
 0x114   : > { %970 = vst.msk [vmem:[%s1444_s12 + $0xa0] sm:$0xff] %vm398_vm2, %v938_v4  ;;  %v939_v7 = vadd.f32 %v1439_v40, %v868_v5 }
 0x115   : > { %973 = vst.msk [vmem:[%s1444_s12 + $0xb8] sm:$0xff] %vm398_vm2, %v941_v6  ;;  %v1191_v8 = vpop.f32.mrb[24].mxu1 }
 0x116   : > { %971 = vst.msk [vmem:[%s1444_s12 + $0xa8] sm:$0xff] %vm398_vm2, %v939_v7  ;;  %v1225_v9 = vpop.f32.mrb[24].mxu0  ;;  %v584_v10 = vpop.f32.mrb[25].mxu1 }
 0x117   : > { %v889_v11 = vadd.f32 %v1225_v9, %v1191_v8  ;;  %v880_v12 = vpop.f32.mrb[25].mxu0  ;;  %v1192_v13 = vpop.f32.mrb[26].mxu1 }
 0x118   : > { %v881_v14 = vadd.f32 %v880_v12, %v584_v10  ;;  %v1226_v15 = vpop.f32.mrb[26].mxu0  ;;  %v587_v16 = vpop.f32.mrb[27].mxu1 }
 0x119   : > { %v944_v17 = vadd.f32 %v1439_v40, %v889_v11  ;;  %v892_v18 = vadd.f32 %v1226_v15, %v1192_v13  ;;  %v883_v19 = vpop.f32.mrb[27].mxu0 }
 0x11a   : > { %v942_v20 = vadd.f32 %v1439_v40, %v881_v14  ;;  %v884_v21 = vadd.f32 %v883_v19, %v587_v16 }
 0x11b   : > { %976 = vst.msk [vmem:[%s1444_s12 + $0xd0] sm:$0xff] %vm398_vm2, %v944_v17  ;;  %v945_v22 = vadd.f32 %v1439_v40, %v892_v18 }
 0x11c   : > { %974 = vst.msk [vmem:[%s1444_s12 + $0xc0] sm:$0xff] %vm398_vm2, %v942_v20  ;;  %v943_v23 = vadd.f32 %v1439_v40, %v884_v21 }
 0x11d   : > { %977 = vst.msk [vmem:[%s1444_s12 + $0xd8] sm:$0xff] %vm398_vm2, %v945_v22  ;;  %v1195_v24 = vpop.f32.mrb[28].mxu1 }
 0x11e   : > { %975 = vst.msk [vmem:[%s1444_s12 + $0xc8] sm:$0xff] %vm398_vm2, %v943_v23  ;;  %v1229_v25 = vpop.f32.mrb[28].mxu0  ;;  %v600_v26 = vpop.f32.mrb[29].mxu1 }
 0x11f   : > { %v905_v27 = vadd.f32 %v1229_v25, %v1195_v24  ;;  %v896_v28 = vpop.f32.mrb[29].mxu0  ;;  %v1196_v29 = vpop.f32.mrb[30].mxu1 }
 0x120   : > { %v897_v30 = vadd.f32 %v896_v28, %v600_v26  ;;  %v1230_v31 = vpop.f32.mrb[30].mxu0  ;;  %v603_v32 = vpop.f32.mrb[31].mxu1 }
 0x121   : > { %v948_v33 = vadd.f32 %v1439_v40, %v905_v27  ;;  %v908_v34 = vadd.f32 %v1230_v31, %v1196_v29  ;;  %v899_v35 = vpop.f32.mrb[31].mxu0 }
 0x122   : > { %v946_v36 = vadd.f32 %v1439_v40, %v897_v30  ;;  %v900_v37 = vadd.f32 %v899_v35, %v603_v32 }
 0x123   : > { %980 = vst.msk [vmem:[%s1444_s12 + $0xf0] sm:$0xff] %vm398_vm2, %v948_v33  ;;  %v949_v38 = vadd.f32 %v1439_v40, %v908_v34 }
 0x124   : > { %978 = vst.msk [vmem:[%s1444_s12 + $0xe0] sm:$0xff] %vm398_vm2, %v946_v36  ;;  %v947_v39 = vadd.f32 %v1439_v40, %v900_v37 }
 0x125   : > { %981 = vst.msk [vmem:[%s1444_s12 + $0xf8] sm:$0xff] %vm398_vm2, %v949_v38 }
 0x126   : > { %979 = vst.msk [vmem:[%s1444_s12 + $0xe8] sm:$0xff] %vm398_vm2, %v947_v39 }
 0x127 PF: > { %s15_s18 = sadd.s32 1, %s1311_s18  }
 0x128   : > { %p12_p4 = scmp.ge.s32.totalorder %s15_s18, 4  }
 0x12a   :  { %14 = sbr.rel (!%p12_p4) target bundleno = 1 (0x1), region = 73 }

</bundles_post_ra>
